<compile_context>
chip_gen: v7x
topology: tpu7x:2x2x1
jax: 0.10.0
libtpu: 0.0.40
codegen_flags: <defaults>
</compile_context>

<pallas_src>
import jax
import jax.numpy as jnp
from jax import lax
from jax.experimental import pallas as pl
from jax.experimental.pallas import tpu as pltpu
import numpy as np

C1, C2, C3 = 256, 128, 64       # conv1/2/3 output channels
PAD = 128                       # lane halo on each side of staged activations


# ------------------------------ fused head -----------------------------------
def genre_conv_head(x_nchw, params):
    x = x_nchw.astype(jnp.float32)
    N, Cin, H, W = x.shape
    P = H * W
    assert P % 128 == 0 and (W + 1) <= PAD
    L = PAD + P + PAD                       # lanes of each staging scratch
    G = params["wfc"].shape[-1]
    K1 = max(128, ((9 * Cin + 127) // 128) * 128)   # aligned conv1 K

    # ---- weight prep (layout glue, traced once under jit) -------------------
    # conv1: HWIO (3,3,Cin,C1) -> (C1, 9*Cin) with column order (dy, dx, cin),
    # zero-padded to K1 lanes.
    w1 = params["w1"].transpose(3, 0, 1, 2).reshape(C1, 9 * Cin)
    w1 = jnp.pad(w1, ((0, 0), (0, K1 - 9 * Cin))).astype(jnp.bfloat16)
    # conv2/3: per-tap transposed weights (9, Cout, Cin).
    w2 = params["w2"].transpose(0, 1, 3, 2).reshape(9, C2, C1).astype(jnp.bfloat16)
    w3 = params["w3"].transpose(0, 1, 3, 2).reshape(9, C3, C2).astype(jnp.bfloat16)
    b1 = params["b1"].reshape(C1, 1).astype(jnp.float32)
    b2 = params["b2"].reshape(C2, 1).astype(jnp.float32)
    b3 = params["b3"].reshape(C3, 1).astype(jnp.float32)
    wfc = params["wfc"].T.astype(jnp.float32)           # (G, C3)
    bfc = params["bfc"].reshape(G, 1).astype(jnp.float32)

    # conv1 im2col in the wrapper: tiny (N, K1, H*W) with (dy, dx, cin) rows.
    xp = jnp.pad(x, ((0, 0), (0, 0), (1, 1), (1, 1)))
    cols = [xp[:, :, dy:dy + H, dx:dx + W].reshape(N, Cin, P)
            for dy in range(3) for dx in range(3)]
    x_col = jnp.concatenate(cols, axis=1)                # (N, 9*Cin, P)
    x_col = jnp.pad(x_col, ((0, 0), (0, K1 - 9 * Cin), (0, 0))).astype(jnp.bfloat16)

    def conv_taps(s_ref, w_ref, b_ref, mask_l, mask_r):
        """9 accumulating taps (Cout,Cin)@(Cin,P) from the lane-padded staging
        scratch; y-edges via the zero halo, x-edges via lane masks."""
        Cout = w_ref.shape[1]
        acc = jnp.zeros((Cout, P), jnp.float32)
        for dy in range(3):
            for dx in range(3):
                off = (dy - 1) * W + (dx - 1)
                part = jnp.dot(w_ref[dy * 3 + dx],
                               s_ref[:, PAD + off:PAD + off + P],
                               preferred_element_type=jnp.float32)
                if dx == 0:
                    part = jnp.where(mask_l, part, 0.0)
                elif dx == 2:
                    part = jnp.where(mask_r, part, 0.0)
                acc = acc + part
        return jnp.maximum(acc + b_ref[...], 0.0)

    def stage(s_ref, act_f32):
        """Stage an (C, P) activation into the bf16 scratch; re-zero only the
        two aligned halo bands (interior is fully overwritten every step)."""
        C = act_f32.shape[0]
        s_ref[:, 0:PAD] = jnp.zeros((C, PAD), jnp.bfloat16)
        s_ref[:, PAD + P:L] = jnp.zeros((C, L - PAD - P), jnp.bfloat16)
        s_ref[:, PAD:PAD + P] = act_f32.astype(jnp.bfloat16)

    def kernel(xcol_ref, w1_ref, b1_ref, w2_ref, b2_ref, w3_ref, b3_ref,
               wfc_ref, bfc_ref, o_ref, s1, s2):
        px = lax.broadcasted_iota(jnp.int32, (1, P), 1) % W
        mask_l = px >= 1            # dx=0 tap (x-1) valid
        mask_r = px < (W - 1)       # dx=2 tap (x+1) valid

        # ---- conv1: one tile-aligned im2col matmul + bias + ReLU ------------
        a1 = jnp.dot(w1_ref[...], xcol_ref[0],
                     preferred_element_type=jnp.float32)
        a1 = jnp.maximum(a1 + b1_ref[...], 0.0)                   # (C1, P)

        # ---- conv2 / conv3: 9-tap accumulating matmuls ----------------------
        stage(s1, a1)
        a2 = conv_taps(s1, w2_ref, b2_ref, mask_l, mask_r)        # (C2, P)
        stage(s2, a2)
        a3 = conv_taps(s2, w3_ref, b3_ref, mask_l, mask_r)        # (C3, P)

        # ---- global average pool + fc (fc is linear -> apply per-pixel,
        #      then pool; identical to pool-then-fc). -------------------------
        # TODO(synk): dropout(p=0.5) is identity in eval mode; training-mode
        # RNG masking is not implemented here.
        per_px = jnp.dot(wfc_ref[...], a3,
                         preferred_element_type=jnp.float32)       # (G, P)
        logits = jnp.sum(per_px, axis=1, keepdims=True) * (1.0 / P) + bfc_ref[...]
        o_ref[0] = logits                                           # (G, 1)

    out = pl.pallas_call(
        kernel,
        out_shape=jax.ShapeDtypeStruct((N, G, 1), jnp.float32),
        grid_spec=pltpu.PrefetchScalarGridSpec(
            num_scalar_prefetch=0,
            grid=(N,),
            in_specs=[
                pl.BlockSpec((1, K1, P), lambda n: (n, 0, 0)),      # x_col
                pl.BlockSpec((C1, K1), lambda n: (0, 0)),           # w1
                pl.BlockSpec((C1, 1), lambda n: (0, 0)),            # b1
                pl.BlockSpec((9, C2, C1), lambda n: (0, 0, 0)),     # w2 (per tap)
                pl.BlockSpec((C2, 1), lambda n: (0, 0)),            # b2
                pl.BlockSpec((9, C3, C2), lambda n: (0, 0, 0)),     # w3 (per tap)
                pl.BlockSpec((C3, 1), lambda n: (0, 0)),            # b3
                pl.BlockSpec((G, C3), lambda n: (0, 0)),            # fc weight^T
                pl.BlockSpec((G, 1), lambda n: (0, 0)),             # fc bias
            ],
            out_specs=pl.BlockSpec((1, G, 1), lambda n: (n, 0, 0)),
            scratch_shapes=[
                pltpu.VMEM((C1, L), jnp.bfloat16),   # staged conv1 output
                pltpu.VMEM((C2, L), jnp.bfloat16),   # staged conv2 output
            ],
        ),
        compiler_params=pltpu.CompilerParams(
            dimension_semantics=("parallel",)),      # v7x: 2nd TC gets image 1
    )(x_col, w1, b1, w2, b2, w3, b3, wfc, bfc)
    return out.reshape(N, G)


# ------------------------------ params ---------------------------------------
def init_params(key, cin, num_genres):
    # NOTE: weights are created directly in HWIO; real PyTorch checkpoints
    # (OIHW) would need a permute to (3,3,Cin,Cout) before use.
    def conv_init(k, ci, co):
        kw, kb = jax.random.split(k)
        bound = 1.0 / np.sqrt(ci * 9)
        w = jax.random.uniform(kw, (3, 3, ci, co), jnp.float32, -bound, bound)
        b = jax.random.uniform(kb, (co,), jnp.float32, -bound, bound)
        return w, b

    k1, k2, k3, k4 = jax.random.split(key, 4)
    w1, b1 = conv_init(k1, cin, C1)
    w2, b2 = conv_init(k2, C1, C2)
    w3, b3 = conv_init(k3, C2, C3)
    kw, kb = jax.random.split(k4)
    bound = 1.0 / np.sqrt(C3)
    wfc = jax.random.uniform(kw, (C3, num_genres), jnp.float32, -bound, bound)
    bfc = jax.random.uniform(kb, (num_genres,), jnp.float32, -bound, bound)
    return dict(w1=w1, b1=b1, w2=w2, b2=b2, w3=w3, b3=b3, wfc=wfc, bfc=bfc)


# ----------------------------- pure-JAX reference ----------------------------
def reference(x_nchw, p):
    x = jnp.transpose(x_nchw, (0, 2, 3, 1)).astype(jnp.float32)

    def conv(x, w, b):
        y = lax.conv_general_dilated(
            x, w, window_strides=(1, 1), padding="SAME",
            dimension_numbers=("NHWC", "HWIO", "NHWC"))
        return jax.nn.relu(y + b[None, None, None, :])

    x = conv(x, p["w1"], p["b1"])
    x = conv(x, p["w2"], p["b2"])
    x = conv(x, p["w3"], p["b3"])
    pooled = jnp.mean(x, axis=(1, 2))
    return pooled @ p["wfc"] + p["bfc"][None, :]


if __name__ == "__main__":
    key = jax.random.PRNGKey(0)
    kx, kp = jax.random.split(key)

    N, C_IN, H, W = 2, 4, 16, 16          # backbone_out_feats_dims = 4
    NUM_GENRES = 10

    x = jax.random.normal(kx, (N, C_IN, H, W), jnp.float32)   # NCHW like PyTorch
    params = init_params(kp, C_IN, NUM_GENRES)

    fwd = jax.jit(genre_conv_head)
    out = jax.block_until_ready(fwd(x, params))

    ref = jax.block_until_ready(reference(x, params))
    assert out.shape == (N, NUM_GENRES)
    # bf16 matmul operands -> relaxed tolerance (per perf review).
    np.testing.assert_allclose(np.asarray(out), np.asarray(ref),
                               rtol=2e-2, atol=2e-2)

    print("KERNEL_OK")
</pallas_src>

<mosaic_0001>
module attributes {stable_mosaic.version = 11 : i64} {
  func.func @kernel(%arg0: i32, %arg1: memref<1x128x256xbf16, #tpu.memory_space<vmem>>, %arg2: memref<256x128xbf16, #tpu.memory_space<vmem>>, %arg3: memref<256x1xf32, #tpu.memory_space<vmem>>, %arg4: memref<9x128x256xbf16, #tpu.memory_space<vmem>>, %arg5: memref<128x1xf32, #tpu.memory_space<vmem>>, %arg6: memref<9x64x128xbf16, #tpu.memory_space<vmem>>, %arg7: memref<64x1xf32, #tpu.memory_space<vmem>>, %arg8: memref<10x64xf32, #tpu.memory_space<vmem>>, %arg9: memref<10x1xf32, #tpu.memory_space<vmem>>, %arg10: memref<1x10x1xf32, #tpu.memory_space<vmem>>, %arg11: memref<256x512xbf16, #tpu.memory_space<vmem>>, %arg12: memref<128x512xbf16, #tpu.memory_space<vmem>>) attributes {dimension_semantics = [#tpu.dimension_semantics<parallel>], iteration_bounds = array<i64: 2>, scalar_prefetch = 0 : i64, scratch_operands = 2 : i64, tpu.core_type = #tpu.core_type<tc>, window_params = [{transform_indices = @transform_0, window_bounds = array<i64: 1, 128, 256>}, {pipeline_mode = #tpu.pipeline_mode<synchronous>, transform_indices = @transform_1, window_bounds = array<i64: 256, 128>}, {pipeline_mode = #tpu.pipeline_mode<synchronous>, transform_indices = @transform_2, window_bounds = array<i64: 256, 1>}, {pipeline_mode = #tpu.pipeline_mode<synchronous>, transform_indices = @transform_3, window_bounds = array<i64: 9, 128, 256>}, {pipeline_mode = #tpu.pipeline_mode<synchronous>, transform_indices = @transform_4, window_bounds = array<i64: 128, 1>}, {pipeline_mode = #tpu.pipeline_mode<synchronous>, transform_indices = @transform_5, window_bounds = array<i64: 9, 64, 128>}, {pipeline_mode = #tpu.pipeline_mode<synchronous>, transform_indices = @transform_6, window_bounds = array<i64: 64, 1>}, {pipeline_mode = #tpu.pipeline_mode<synchronous>, transform_indices = @transform_7, window_bounds = array<i64: 10, 64>}, {pipeline_mode = #tpu.pipeline_mode<synchronous>, transform_indices = @transform_8, window_bounds = array<i64: 10, 1>}, {transform_indices = @transform_9, window_bounds = array<i64: 1, 10, 1>}]} {
    %0 = tpu.iota {dimensions = array<i32: 1>} : vector<1x256xi32>
    %c16_i32 = arith.constant 16 : i32
    %c0_i32 = arith.constant 0 : i32
    %1 = arith.cmpi eq, %c16_i32, %c0_i32 : i32
    %c1_i32 = arith.constant 1 : i32
    %2 = arith.select %1, %c1_i32, %c16_i32 : i32
    %3 = vector.broadcast %2 : i32 to vector<1x256xi32>
    %4 = arith.remsi %0, %3 : vector<1x256xi32>
    %c0_i32_0 = arith.constant 0 : i32
    %5 = vector.broadcast %c0_i32_0 : i32 to vector<1x256xi32>
    %6 = arith.cmpi ne, %4, %5 : vector<1x256xi32>
    %c0_i32_1 = arith.constant 0 : i32
    %7 = vector.broadcast %c0_i32_1 : i32 to vector<1x256xi32>
    %8 = arith.cmpi slt, %4, %7 : vector<1x256xi32>
    %c0_i32_2 = arith.constant 0 : i32
    %9 = arith.cmpi slt, %2, %c0_i32_2 : i32
    %10 = vector.broadcast %9 : i1 to vector<1x256xi1>
    %11 = vector.broadcast %10 : vector<1x256xi1> to vector<1x256xi1>
    %12 = arith.xori %8, %11 : vector<1x256xi1>
    %13 = arith.andi %12, %6 : vector<1x256xi1>
    %14 = vector.broadcast %2 : i32 to vector<1x256xi32>
    %15 = arith.addi %4, %14 : vector<1x256xi32>
    %16 = arith.select %13, %15, %4 : vector<1x256xi1>, vector<1x256xi32>
    %c1_i32_3 = arith.constant 1 : i32
    %17 = vector.broadcast %c1_i32_3 : i32 to vector<1x256xi32>
    %18 = arith.cmpi sge, %16, %17 : vector<1x256xi32>
    %c15_i32 = arith.constant 15 : i32
    %19 = vector.broadcast %c15_i32 : i32 to vector<1x256xi32>
    %20 = arith.cmpi slt, %16, %19 : vector<1x256xi32>
    %c0 = arith.constant 0 : index
    %c0_4 = arith.constant 0 : index
    %21 = vector.load %arg2[%c0, %c0_4] : memref<256x128xbf16, #tpu.memory_space<vmem>>, vector<256x128xbf16>
    %c0_5 = arith.constant 0 : index
    %c0_6 = arith.constant 0 : index
    %c0_7 = arith.constant 0 : index
    %22 = vector.load %arg1[%c0_5, %c0_6, %c0_7] : memref<1x128x256xbf16, #tpu.memory_space<vmem>>, vector<1x128x256xbf16>
    %23 = vector.shape_cast %22 : vector<1x128x256xbf16> to vector<128x256xbf16>
    %cst = arith.constant dense<0.000000e+00> : vector<256x256xf32>
    %24 = tpu.matmul %21, %23, %cst {dimension_numbers = #tpu.dot_dimension_numbers<[1], [0], [0], [1], [0, 0, 1, 1], [], []>} : vector<256x128xbf16>, vector<128x256xbf16>, vector<256x256xf32> -> vector<256x256xf32>
    %c0_8 = arith.constant 0 : index
    %c0_9 = arith.constant 0 : index
    %25 = vector.load %arg3[%c0_8, %c0_9] : memref<256x1xf32, #tpu.memory_space<vmem>>, vector<256x1xf32>
    %26 = vector.broadcast %25 : vector<256x1xf32> to vector<256x256xf32>
    %27 = arith.addf %24, %26 : vector<256x256xf32>
    %cst_10 = arith.constant 0.000000e+00 : f32
    %28 = vector.broadcast %cst_10 : f32 to vector<256x256xf32>
    %29 = arith.maximumf %27, %28 : vector<256x256xf32>
    %cst_11 = arith.constant 0.000000e+00 : bf16
    %30 = vector.broadcast %cst_11 : bf16 to vector<256x128xbf16>
    %c0_12 = arith.constant 0 : index
    %c0_13 = arith.constant 0 : index
    %31 = vector.load %arg11[%c0_12, %c0_13] : memref<256x512xbf16, #tpu.memory_space<vmem>>, vector<256x128xbf16>
    tpu.vector_store %arg11[%c0_12, %c0_13], %30 {strides = array<i32>} : memref<256x512xbf16, #tpu.memory_space<vmem>>, vector<256x128xbf16>,
    %cst_14 = arith.constant 0.000000e+00 : bf16
    %32 = vector.broadcast %cst_14 : bf16 to vector<256x128xbf16>
    %c0_15 = arith.constant 0 : index
    %c384 = arith.constant 384 : index
    %33 = vector.load %arg11[%c0_15, %c384] : memref<256x512xbf16, #tpu.memory_space<vmem>>, vector<256x128xbf16>
    tpu.vector_store %arg11[%c0_15, %c384], %32 {strides = array<i32>} : memref<256x512xbf16, #tpu.memory_space<vmem>>, vector<256x128xbf16>,
    %34 = arith.truncf %29 : vector<256x256xf32> to vector<256x256xbf16>
    %c0_16 = arith.constant 0 : index
    %c128 = arith.constant 128 : index
    %35 = vector.load %arg11[%c0_16, %c128] : memref<256x512xbf16, #tpu.memory_space<vmem>>, vector<256x256xbf16>
    tpu.vector_store %arg11[%c0_16, %c128], %34 {strides = array<i32>} : memref<256x512xbf16, #tpu.memory_space<vmem>>, vector<256x256xbf16>,
    %cst_17 = arith.constant 0.000000e+00 : f32
    %36 = vector.broadcast %cst_17 : f32 to vector<128x256xf32>
    %c0_18 = arith.constant 0 : index
    %c0_19 = arith.constant 0 : index
    %c0_20 = arith.constant 0 : index
    %37 = vector.load %arg4[%c0_18, %c0_19, %c0_20] : memref<9x128x256xbf16, #tpu.memory_space<vmem>>, vector<1x128x256xbf16>
    %38 = vector.shape_cast %37 : vector<1x128x256xbf16> to vector<128x256xbf16>
    %c0_21 = arith.constant 0 : index
    %c111 = arith.constant 111 : index
    %39 = vector.load %arg11[%c0_21, %c111] : memref<256x512xbf16, #tpu.memory_space<vmem>>, vector<256x256xbf16>
    %cst_22 = arith.constant dense<0.000000e+00> : vector<128x256xf32>
    %40 = tpu.matmul %38, %39, %cst_22 {dimension_numbers = #tpu.dot_dimension_numbers<[1], [0], [0], [1], [0, 0, 1, 1], [], []>} : vector<128x256xbf16>, vector<256x256xbf16>, vector<128x256xf32> -> vector<128x256xf32>
    %cst_23 = arith.constant 0.000000e+00 : f32
    %41 = vector.shape_cast %18 : vector<1x256xi1> to vector<1x256xi1>
    %42 = vector.broadcast %41 : vector<1x256xi1> to vector<128x256xi1>
    %43 = vector.broadcast %cst_23 : f32 to vector<128x256xf32>
    %44 = arith.select %42, %40, %43 : vector<128x256xi1>, vector<128x256xf32>
    %45 = arith.addf %36, %44 : vector<128x256xf32>
    %c1 = arith.constant 1 : index
    %c0_24 = arith.constant 0 : index
    %c0_25 = arith.constant 0 : index
    %46 = vector.load %arg4[%c1, %c0_24, %c0_25] : memref<9x128x256xbf16, #tpu.memory_space<vmem>>, vector<1x128x256xbf16>
    %47 = vector.shape_cast %46 : vector<1x128x256xbf16> to vector<128x256xbf16>
    %c0_26 = arith.constant 0 : index
    %c112 = arith.constant 112 : index
    %48 = vector.load %arg11[%c0_26, %c112] : memref<256x512xbf16, #tpu.memory_space<vmem>>, vector<256x256xbf16>
    %cst_27 = arith.constant dense<0.000000e+00> : vector<128x256xf32>
    %49 = tpu.matmul %47, %48, %cst_27 {dimension_numbers = #tpu.dot_dimension_numbers<[1], [0], [0], [1], [0, 0, 1, 1], [], []>} : vector<128x256xbf16>, vector<256x256xbf16>, vector<128x256xf32> -> vector<128x256xf32>
    %50 = arith.addf %45, %49 : vector<128x256xf32>
    %c2 = arith.constant 2 : index
    %c0_28 = arith.constant 0 : index
    %c0_29 = arith.constant 0 : index
    %51 = vector.load %arg4[%c2, %c0_28, %c0_29] : memref<9x128x256xbf16, #tpu.memory_space<vmem>>, vector<1x128x256xbf16>
    %52 = vector.shape_cast %51 : vector<1x128x256xbf16> to vector<128x256xbf16>
    %c0_30 = arith.constant 0 : index
    %c113 = arith.constant 113 : index
    %53 = vector.load %arg11[%c0_30, %c113] : memref<256x512xbf16, #tpu.memory_space<vmem>>, vector<256x256xbf16>
    %cst_31 = arith.constant dense<0.000000e+00> : vector<128x256xf32>
    %54 = tpu.matmul %52, %53, %cst_31 {dimension_numbers = #tpu.dot_dimension_numbers<[1], [0], [0], [1], [0, 0, 1, 1], [], []>} : vector<128x256xbf16>, vector<256x256xbf16>, vector<128x256xf32> -> vector<128x256xf32>
    %cst_32 = arith.constant 0.000000e+00 : f32
    %55 = vector.shape_cast %20 : vector<1x256xi1> to vector<1x256xi1>
    %56 = vector.broadcast %55 : vector<1x256xi1> to vector<128x256xi1>
    %57 = vector.broadcast %cst_32 : f32 to vector<128x256xf32>
    %58 = arith.select %56, %54, %57 : vector<128x256xi1>, vector<128x256xf32>
    %59 = arith.addf %50, %58 : vector<128x256xf32>
    %c3 = arith.constant 3 : index
    %c0_33 = arith.constant 0 : index
    %c0_34 = arith.constant 0 : index
    %60 = vector.load %arg4[%c3, %c0_33, %c0_34] : memref<9x128x256xbf16, #tpu.memory_space<vmem>>, vector<1x128x256xbf16>
    %61 = vector.shape_cast %60 : vector<1x128x256xbf16> to vector<128x256xbf16>
    %c0_35 = arith.constant 0 : index
    %c127 = arith.constant 127 : index
    %62 = vector.load %arg11[%c0_35, %c127] : memref<256x512xbf16, #tpu.memory_space<vmem>>, vector<256x256xbf16>
    %cst_36 = arith.constant dense<0.000000e+00> : vector<128x256xf32>
    %63 = tpu.matmul %61, %62, %cst_36 {dimension_numbers = #tpu.dot_dimension_numbers<[1], [0], [0], [1], [0, 0, 1, 1], [], []>} : vector<128x256xbf16>, vector<256x256xbf16>, vector<128x256xf32> -> vector<128x256xf32>
    %cst_37 = arith.constant 0.000000e+00 : f32
    %64 = vector.shape_cast %18 : vector<1x256xi1> to vector<1x256xi1>
    %65 = vector.broadcast %64 : vector<1x256xi1> to vector<128x256xi1>
    %66 = vector.broadcast %cst_37 : f32 to vector<128x256xf32>
    %67 = arith.select %65, %63, %66 : vector<128x256xi1>, vector<128x256xf32>
    %68 = arith.addf %59, %67 : vector<128x256xf32>
    %c4 = arith.constant 4 : index
    %c0_38 = arith.constant 0 : index
    %c0_39 = arith.constant 0 : index
    %69 = vector.load %arg4[%c4, %c0_38, %c0_39] : memref<9x128x256xbf16, #tpu.memory_space<vmem>>, vector<1x128x256xbf16>
    %70 = vector.shape_cast %69 : vector<1x128x256xbf16> to vector<128x256xbf16>
    %c0_40 = arith.constant 0 : index
    %c128_41 = arith.constant 128 : index
    %71 = vector.load %arg11[%c0_40, %c128_41] : memref<256x512xbf16, #tpu.memory_space<vmem>>, vector<256x256xbf16>
    %cst_42 = arith.constant dense<0.000000e+00> : vector<128x256xf32>
    %72 = tpu.matmul %70, %71, %cst_42 {dimension_numbers = #tpu.dot_dimension_numbers<[1], [0], [0], [1], [0, 0, 1, 1], [], []>} : vector<128x256xbf16>, vector<256x256xbf16>, vector<128x256xf32> -> vector<128x256xf32>
    %73 = arith.addf %68, %72 : vector<128x256xf32>
    %c5 = arith.constant 5 : index
    %c0_43 = arith.constant 0 : index
    %c0_44 = arith.constant 0 : index
    %74 = vector.load %arg4[%c5, %c0_43, %c0_44] : memref<9x128x256xbf16, #tpu.memory_space<vmem>>, vector<1x128x256xbf16>
    %75 = vector.shape_cast %74 : vector<1x128x256xbf16> to vector<128x256xbf16>
    %c0_45 = arith.constant 0 : index
    %c129 = arith.constant 129 : index
    %76 = vector.load %arg11[%c0_45, %c129] : memref<256x512xbf16, #tpu.memory_space<vmem>>, vector<256x256xbf16>
    %cst_46 = arith.constant dense<0.000000e+00> : vector<128x256xf32>
    %77 = tpu.matmul %75, %76, %cst_46 {dimension_numbers = #tpu.dot_dimension_numbers<[1], [0], [0], [1], [0, 0, 1, 1], [], []>} : vector<128x256xbf16>, vector<256x256xbf16>, vector<128x256xf32> -> vector<128x256xf32>
    %cst_47 = arith.constant 0.000000e+00 : f32
    %78 = vector.shape_cast %20 : vector<1x256xi1> to vector<1x256xi1>
    %79 = vector.broadcast %78 : vector<1x256xi1> to vector<128x256xi1>
    %80 = vector.broadcast %cst_47 : f32 to vector<128x256xf32>
    %81 = arith.select %79, %77, %80 : vector<128x256xi1>, vector<128x256xf32>
    %82 = arith.addf %73, %81 : vector<128x256xf32>
    %c6 = arith.constant 6 : index
    %c0_48 = arith.constant 0 : index
    %c0_49 = arith.constant 0 : index
    %83 = vector.load %arg4[%c6, %c0_48, %c0_49] : memref<9x128x256xbf16, #tpu.memory_space<vmem>>, vector<1x128x256xbf16>
    %84 = vector.shape_cast %83 : vector<1x128x256xbf16> to vector<128x256xbf16>
    %c0_50 = arith.constant 0 : index
    %c143 = arith.constant 143 : index
    %85 = vector.load %arg11[%c0_50, %c143] : memref<256x512xbf16, #tpu.memory_space<vmem>>, vector<256x256xbf16>
    %cst_51 = arith.constant dense<0.000000e+00> : vector<128x256xf32>
    %86 = tpu.matmul %84, %85, %cst_51 {dimension_numbers = #tpu.dot_dimension_numbers<[1], [0], [0], [1], [0, 0, 1, 1], [], []>} : vector<128x256xbf16>, vector<256x256xbf16>, vector<128x256xf32> -> vector<128x256xf32>
    %cst_52 = arith.constant 0.000000e+00 : f32
    %87 = vector.shape_cast %18 : vector<1x256xi1> to vector<1x256xi1>
    %88 = vector.broadcast %87 : vector<1x256xi1> to vector<128x256xi1>
    %89 = vector.broadcast %cst_52 : f32 to vector<128x256xf32>
    %90 = arith.select %88, %86, %89 : vector<128x256xi1>, vector<128x256xf32>
    %91 = arith.addf %82, %90 : vector<128x256xf32>
    %c7 = arith.constant 7 : index
    %c0_53 = arith.constant 0 : index
    %c0_54 = arith.constant 0 : index
    %92 = vector.load %arg4[%c7, %c0_53, %c0_54] : memref<9x128x256xbf16, #tpu.memory_space<vmem>>, vector<1x128x256xbf16>
    %93 = vector.shape_cast %92 : vector<1x128x256xbf16> to vector<128x256xbf16>
    %c0_55 = arith.constant 0 : index
    %c144 = arith.constant 144 : index
    %94 = vector.load %arg11[%c0_55, %c144] : memref<256x512xbf16, #tpu.memory_space<vmem>>, vector<256x256xbf16>
    %cst_56 = arith.constant dense<0.000000e+00> : vector<128x256xf32>
    %95 = tpu.matmul %93, %94, %cst_56 {dimension_numbers = #tpu.dot_dimension_numbers<[1], [0], [0], [1], [0, 0, 1, 1], [], []>} : vector<128x256xbf16>, vector<256x256xbf16>, vector<128x256xf32> -> vector<128x256xf32>
    %96 = arith.addf %91, %95 : vector<128x256xf32>
    %c8 = arith.constant 8 : index
    %c0_57 = arith.constant 0 : index
    %c0_58 = arith.constant 0 : index
    %97 = vector.load %arg4[%c8, %c0_57, %c0_58] : memref<9x128x256xbf16, #tpu.memory_space<vmem>>, vector<1x128x256xbf16>
    %98 = vector.shape_cast %97 : vector<1x128x256xbf16> to vector<128x256xbf16>
    %c0_59 = arith.constant 0 : index
    %c145 = arith.constant 145 : index
    %99 = vector.load %arg11[%c0_59, %c145] : memref<256x512xbf16, #tpu.memory_space<vmem>>, vector<256x256xbf16>
    %cst_60 = arith.constant dense<0.000000e+00> : vector<128x256xf32>
    %100 = tpu.matmul %98, %99, %cst_60 {dimension_numbers = #tpu.dot_dimension_numbers<[1], [0], [0], [1], [0, 0, 1, 1], [], []>} : vector<128x256xbf16>, vector<256x256xbf16>, vector<128x256xf32> -> vector<128x256xf32>
    %cst_61 = arith.constant 0.000000e+00 : f32
    %101 = vector.shape_cast %20 : vector<1x256xi1> to vector<1x256xi1>
    %102 = vector.broadcast %101 : vector<1x256xi1> to vector<128x256xi1>
    %103 = vector.broadcast %cst_61 : f32 to vector<128x256xf32>
    %104 = arith.select %102, %100, %103 : vector<128x256xi1>, vector<128x256xf32>
    %105 = arith.addf %96, %104 : vector<128x256xf32>
    %c0_62 = arith.constant 0 : index
    %c0_63 = arith.constant 0 : index
    %106 = vector.load %arg5[%c0_62, %c0_63] : memref<128x1xf32, #tpu.memory_space<vmem>>, vector<128x1xf32>
    %107 = vector.broadcast %106 : vector<128x1xf32> to vector<128x256xf32>
    %108 = arith.addf %105, %107 : vector<128x256xf32>
    %cst_64 = arith.constant 0.000000e+00 : f32
    %109 = vector.broadcast %cst_64 : f32 to vector<128x256xf32>
    %110 = arith.maximumf %108, %109 : vector<128x256xf32>
    %cst_65 = arith.constant 0.000000e+00 : bf16
    %111 = vector.broadcast %cst_65 : bf16 to vector<128x128xbf16>
    %c0_66 = arith.constant 0 : index
    %c0_67 = arith.constant 0 : index
    %112 = vector.load %arg12[%c0_66, %c0_67] : memref<128x512xbf16, #tpu.memory_space<vmem>>, vector<128x128xbf16>
    tpu.vector_store %arg12[%c0_66, %c0_67], %111 {strides = array<i32>} : memref<128x512xbf16, #tpu.memory_space<vmem>>, vector<128x128xbf16>,
    %cst_68 = arith.constant 0.000000e+00 : bf16
    %113 = vector.broadcast %cst_68 : bf16 to vector<128x128xbf16>
    %c0_69 = arith.constant 0 : index
    %c384_70 = arith.constant 384 : index
    %114 = vector.load %arg12[%c0_69, %c384_70] : memref<128x512xbf16, #tpu.memory_space<vmem>>, vector<128x128xbf16>
    tpu.vector_store %arg12[%c0_69, %c384_70], %113 {strides = array<i32>} : memref<128x512xbf16, #tpu.memory_space<vmem>>, vector<128x128xbf16>,
    %115 = arith.truncf %110 : vector<128x256xf32> to vector<128x256xbf16>
    %c0_71 = arith.constant 0 : index
    %c128_72 = arith.constant 128 : index
    %116 = vector.load %arg12[%c0_71, %c128_72] : memref<128x512xbf16, #tpu.memory_space<vmem>>, vector<128x256xbf16>
    tpu.vector_store %arg12[%c0_71, %c128_72], %115 {strides = array<i32>} : memref<128x512xbf16, #tpu.memory_space<vmem>>, vector<128x256xbf16>,
    %cst_73 = arith.constant 0.000000e+00 : f32
    %117 = vector.broadcast %cst_73 : f32 to vector<64x256xf32>
    %c0_74 = arith.constant 0 : index
    %c0_75 = arith.constant 0 : index
    %c0_76 = arith.constant 0 : index
    %118 = vector.load %arg6[%c0_74, %c0_75, %c0_76] : memref<9x64x128xbf16, #tpu.memory_space<vmem>>, vector<1x64x128xbf16>
    %119 = vector.shape_cast %118 : vector<1x64x128xbf16> to vector<64x128xbf16>
    %c0_77 = arith.constant 0 : index
    %c111_78 = arith.constant 111 : index
    %120 = vector.load %arg12[%c0_77, %c111_78] : memref<128x512xbf16, #tpu.memory_space<vmem>>, vector<128x256xbf16>
    %cst_79 = arith.constant dense<0.000000e+00> : vector<64x256xf32>
    %121 = tpu.matmul %119, %120, %cst_79 {dimension_numbers = #tpu.dot_dimension_numbers<[1], [0], [0], [1], [0, 0, 1, 1], [], []>} : vector<64x128xbf16>, vector<128x256xbf16>, vector<64x256xf32> -> vector<64x256xf32>
    %cst_80 = arith.constant 0.000000e+00 : f32
    %122 = vector.shape_cast %18 : vector<1x256xi1> to vector<1x256xi1>
    %123 = vector.broadcast %122 : vector<1x256xi1> to vector<64x256xi1>
    %124 = vector.broadcast %cst_80 : f32 to vector<64x256xf32>
    %125 = arith.select %123, %121, %124 : vector<64x256xi1>, vector<64x256xf32>
    %126 = arith.addf %117, %125 : vector<64x256xf32>
    %c1_81 = arith.constant 1 : index
    %c0_82 = arith.constant 0 : index
    %c0_83 = arith.constant 0 : index
    %127 = vector.load %arg6[%c1_81, %c0_82, %c0_83] : memref<9x64x128xbf16, #tpu.memory_space<vmem>>, vector<1x64x128xbf16>
    %128 = vector.shape_cast %127 : vector<1x64x128xbf16> to vector<64x128xbf16>
    %c0_84 = arith.constant 0 : index
    %c112_85 = arith.constant 112 : index
    %129 = vector.load %arg12[%c0_84, %c112_85] : memref<128x512xbf16, #tpu.memory_space<vmem>>, vector<128x256xbf16>
    %cst_86 = arith.constant dense<0.000000e+00> : vector<64x256xf32>
    %130 = tpu.matmul %128, %129, %cst_86 {dimension_numbers = #tpu.dot_dimension_numbers<[1], [0], [0], [1], [0, 0, 1, 1], [], []>} : vector<64x128xbf16>, vector<128x256xbf16>, vector<64x256xf32> -> vector<64x256xf32>
    %131 = arith.addf %126, %130 : vector<64x256xf32>
    %c2_87 = arith.constant 2 : index
    %c0_88 = arith.constant 0 : index
    %c0_89 = arith.constant 0 : index
    %132 = vector.load %arg6[%c2_87, %c0_88, %c0_89] : memref<9x64x128xbf16, #tpu.memory_space<vmem>>, vector<1x64x128xbf16>
    %133 = vector.shape_cast %132 : vector<1x64x128xbf16> to vector<64x128xbf16>
    %c0_90 = arith.constant 0 : index
    %c113_91 = arith.constant 113 : index
    %134 = vector.load %arg12[%c0_90, %c113_91] : memref<128x512xbf16, #tpu.memory_space<vmem>>, vector<128x256xbf16>
    %cst_92 = arith.constant dense<0.000000e+00> : vector<64x256xf32>
    %135 = tpu.matmul %133, %134, %cst_92 {dimension_numbers = #tpu.dot_dimension_numbers<[1], [0], [0], [1], [0, 0, 1, 1], [], []>} : vector<64x128xbf16>, vector<128x256xbf16>, vector<64x256xf32> -> vector<64x256xf32>
    %cst_93 = arith.constant 0.000000e+00 : f32
    %136 = vector.shape_cast %20 : vector<1x256xi1> to vector<1x256xi1>
    %137 = vector.broadcast %136 : vector<1x256xi1> to vector<64x256xi1>
    %138 = vector.broadcast %cst_93 : f32 to vector<64x256xf32>
    %139 = arith.select %137, %135, %138 : vector<64x256xi1>, vector<64x256xf32>
    %140 = arith.addf %131, %139 : vector<64x256xf32>
    %c3_94 = arith.constant 3 : index
    %c0_95 = arith.constant 0 : index
    %c0_96 = arith.constant 0 : index
    %141 = vector.load %arg6[%c3_94, %c0_95, %c0_96] : memref<9x64x128xbf16, #tpu.memory_space<vmem>>, vector<1x64x128xbf16>
    %142 = vector.shape_cast %141 : vector<1x64x128xbf16> to vector<64x128xbf16>
    %c0_97 = arith.constant 0 : index
    %c127_98 = arith.constant 127 : index
    %143 = vector.load %arg12[%c0_97, %c127_98] : memref<128x512xbf16, #tpu.memory_space<vmem>>, vector<128x256xbf16>
    %cst_99 = arith.constant dense<0.000000e+00> : vector<64x256xf32>
    %144 = tpu.matmul %142, %143, %cst_99 {dimension_numbers = #tpu.dot_dimension_numbers<[1], [0], [0], [1], [0, 0, 1, 1], [], []>} : vector<64x128xbf16>, vector<128x256xbf16>, vector<64x256xf32> -> vector<64x256xf32>
    %cst_100 = arith.constant 0.000000e+00 : f32
    %145 = vector.shape_cast %18 : vector<1x256xi1> to vector<1x256xi1>
    %146 = vector.broadcast %145 : vector<1x256xi1> to vector<64x256xi1>
    %147 = vector.broadcast %cst_100 : f32 to vector<64x256xf32>
    %148 = arith.select %146, %144, %147 : vector<64x256xi1>, vector<64x256xf32>
    %149 = arith.addf %140, %148 : vector<64x256xf32>
    %c4_101 = arith.constant 4 : index
    %c0_102 = arith.constant 0 : index
    %c0_103 = arith.constant 0 : index
    %150 = vector.load %arg6[%c4_101, %c0_102, %c0_103] : memref<9x64x128xbf16, #tpu.memory_space<vmem>>, vector<1x64x128xbf16>
    %151 = vector.shape_cast %150 : vector<1x64x128xbf16> to vector<64x128xbf16>
    %c0_104 = arith.constant 0 : index
    %c128_105 = arith.constant 128 : index
    %152 = vector.load %arg12[%c0_104, %c128_105] : memref<128x512xbf16, #tpu.memory_space<vmem>>, vector<128x256xbf16>
    %cst_106 = arith.constant dense<0.000000e+00> : vector<64x256xf32>
    %153 = tpu.matmul %151, %152, %cst_106 {dimension_numbers = #tpu.dot_dimension_numbers<[1], [0], [0], [1], [0, 0, 1, 1], [], []>} : vector<64x128xbf16>, vector<128x256xbf16>, vector<64x256xf32> -> vector<64x256xf32>
    %154 = arith.addf %149, %153 : vector<64x256xf32>
    %c5_107 = arith.constant 5 : index
    %c0_108 = arith.constant 0 : index
    %c0_109 = arith.constant 0 : index
    %155 = vector.load %arg6[%c5_107, %c0_108, %c0_109] : memref<9x64x128xbf16, #tpu.memory_space<vmem>>, vector<1x64x128xbf16>
    %156 = vector.shape_cast %155 : vector<1x64x128xbf16> to vector<64x128xbf16>
    %c0_110 = arith.constant 0 : index
    %c129_111 = arith.constant 129 : index
    %157 = vector.load %arg12[%c0_110, %c129_111] : memref<128x512xbf16, #tpu.memory_space<vmem>>, vector<128x256xbf16>
    %cst_112 = arith.constant dense<0.000000e+00> : vector<64x256xf32>
    %158 = tpu.matmul %156, %157, %cst_112 {dimension_numbers = #tpu.dot_dimension_numbers<[1], [0], [0], [1], [0, 0, 1, 1], [], []>} : vector<64x128xbf16>, vector<128x256xbf16>, vector<64x256xf32> -> vector<64x256xf32>
    %cst_113 = arith.constant 0.000000e+00 : f32
    %159 = vector.shape_cast %20 : vector<1x256xi1> to vector<1x256xi1>
    %160 = vector.broadcast %159 : vector<1x256xi1> to vector<64x256xi1>
    %161 = vector.broadcast %cst_113 : f32 to vector<64x256xf32>
    %162 = arith.select %160, %158, %161 : vector<64x256xi1>, vector<64x256xf32>
    %163 = arith.addf %154, %162 : vector<64x256xf32>
    %c6_114 = arith.constant 6 : index
    %c0_115 = arith.constant 0 : index
    %c0_116 = arith.constant 0 : index
    %164 = vector.load %arg6[%c6_114, %c0_115, %c0_116] : memref<9x64x128xbf16, #tpu.memory_space<vmem>>, vector<1x64x128xbf16>
    %165 = vector.shape_cast %164 : vector<1x64x128xbf16> to vector<64x128xbf16>
    %c0_117 = arith.constant 0 : index
    %c143_118 = arith.constant 143 : index
    %166 = vector.load %arg12[%c0_117, %c143_118] : memref<128x512xbf16, #tpu.memory_space<vmem>>, vector<128x256xbf16>
    %cst_119 = arith.constant dense<0.000000e+00> : vector<64x256xf32>
    %167 = tpu.matmul %165, %166, %cst_119 {dimension_numbers = #tpu.dot_dimension_numbers<[1], [0], [0], [1], [0, 0, 1, 1], [], []>} : vector<64x128xbf16>, vector<128x256xbf16>, vector<64x256xf32> -> vector<64x256xf32>
    %cst_120 = arith.constant 0.000000e+00 : f32
    %168 = vector.shape_cast %18 : vector<1x256xi1> to vector<1x256xi1>
    %169 = vector.broadcast %168 : vector<1x256xi1> to vector<64x256xi1>
    %170 = vector.broadcast %cst_120 : f32 to vector<64x256xf32>
    %171 = arith.select %169, %167, %170 : vector<64x256xi1>, vector<64x256xf32>
    %172 = arith.addf %163, %171 : vector<64x256xf32>
    %c7_121 = arith.constant 7 : index
    %c0_122 = arith.constant 0 : index
    %c0_123 = arith.constant 0 : index
    %173 = vector.load %arg6[%c7_121, %c0_122, %c0_123] : memref<9x64x128xbf16, #tpu.memory_space<vmem>>, vector<1x64x128xbf16>
    %174 = vector.shape_cast %173 : vector<1x64x128xbf16> to vector<64x128xbf16>
    %c0_124 = arith.constant 0 : index
    %c144_125 = arith.constant 144 : index
    %175 = vector.load %arg12[%c0_124, %c144_125] : memref<128x512xbf16, #tpu.memory_space<vmem>>, vector<128x256xbf16>
    %cst_126 = arith.constant dense<0.000000e+00> : vector<64x256xf32>
    %176 = tpu.matmul %174, %175, %cst_126 {dimension_numbers = #tpu.dot_dimension_numbers<[1], [0], [0], [1], [0, 0, 1, 1], [], []>} : vector<64x128xbf16>, vector<128x256xbf16>, vector<64x256xf32> -> vector<64x256xf32>
    %177 = arith.addf %172, %176 : vector<64x256xf32>
    %c8_127 = arith.constant 8 : index
    %c0_128 = arith.constant 0 : index
    %c0_129 = arith.constant 0 : index
    %178 = vector.load %arg6[%c8_127, %c0_128, %c0_129] : memref<9x64x128xbf16, #tpu.memory_space<vmem>>, vector<1x64x128xbf16>
    %179 = vector.shape_cast %178 : vector<1x64x128xbf16> to vector<64x128xbf16>
    %c0_130 = arith.constant 0 : index
    %c145_131 = arith.constant 145 : index
    %180 = vector.load %arg12[%c0_130, %c145_131] : memref<128x512xbf16, #tpu.memory_space<vmem>>, vector<128x256xbf16>
    %cst_132 = arith.constant dense<0.000000e+00> : vector<64x256xf32>
    %181 = tpu.matmul %179, %180, %cst_132 {dimension_numbers = #tpu.dot_dimension_numbers<[1], [0], [0], [1], [0, 0, 1, 1], [], []>} : vector<64x128xbf16>, vector<128x256xbf16>, vector<64x256xf32> -> vector<64x256xf32>
    %cst_133 = arith.constant 0.000000e+00 : f32
    %182 = vector.shape_cast %20 : vector<1x256xi1> to vector<1x256xi1>
    %183 = vector.broadcast %182 : vector<1x256xi1> to vector<64x256xi1>
    %184 = vector.broadcast %cst_133 : f32 to vector<64x256xf32>
    %185 = arith.select %183, %181, %184 : vector<64x256xi1>, vector<64x256xf32>
    %186 = arith.addf %177, %185 : vector<64x256xf32>
    %c0_134 = arith.constant 0 : index
    %c0_135 = arith.constant 0 : index
    %187 = vector.load %arg7[%c0_134, %c0_135] : memref<64x1xf32, #tpu.memory_space<vmem>>, vector<64x1xf32>
    %188 = vector.broadcast %187 : vector<64x1xf32> to vector<64x256xf32>
    %189 = arith.addf %186, %188 : vector<64x256xf32>
    %cst_136 = arith.constant 0.000000e+00 : f32
    %190 = vector.broadcast %cst_136 : f32 to vector<64x256xf32>
    %191 = arith.maximumf %189, %190 : vector<64x256xf32>
    %c0_137 = arith.constant 0 : index
    %c0_138 = arith.constant 0 : index
    %192 = vector.load %arg8[%c0_137, %c0_138] : memref<10x64xf32, #tpu.memory_space<vmem>>, vector<10x64xf32>
    %cst_139 = arith.constant dense<0.000000e+00> : vector<10x256xf32>
    %193 = tpu.matmul %192, %191, %cst_139 {dimension_numbers = #tpu.dot_dimension_numbers<[1], [0], [0], [1], [0, 0, 1, 1], [], []>} : vector<10x64xf32>, vector<64x256xf32>, vector<10x256xf32> -> vector<10x256xf32>
    %cst_140 = arith.constant dense<0.000000e+00> : vector<10xf32>
    %194 = vector.multi_reduction <add>, %193, %cst_140 [1] : vector<10x256xf32> to vector<10xf32>
    %195 = vector.shape_cast %194 : vector<10xf32> to vector<10x1xf32>
    %cst_141 = arith.constant 3.906250e-03 : f32
    %196 = vector.broadcast %cst_141 : f32 to vector<10x1xf32>
    %197 = arith.mulf %195, %196 : vector<10x1xf32>
    %c0_142 = arith.constant 0 : index
    %c0_143 = arith.constant 0 : index
    %198 = vector.load %arg9[%c0_142, %c0_143] : memref<10x1xf32, #tpu.memory_space<vmem>>, vector<10x1xf32>
    %199 = arith.addf %197, %198 : vector<10x1xf32>
    %c0_144 = arith.constant 0 : index
    %c0_145 = arith.constant 0 : index
    %c0_146 = arith.constant 0 : index
    %200 = vector.load %arg10[%c0_144, %c0_145, %c0_146] : memref<1x10x1xf32, #tpu.memory_space<vmem>>, vector<1x10x1xf32>
    %201 = vector.shape_cast %200 : vector<1x10x1xf32> to vector<10x1xf32>
    %202 = vector.shape_cast %199 : vector<10x1xf32> to vector<1x10x1xf32>
    tpu.vector_store %arg10[%c0_144, %c0_145, %c0_146], %202 {strides = array<i32>} : memref<1x10x1xf32, #tpu.memory_space<vmem>>, vector<1x10x1xf32>,
    return
  }
  func.func @transform_0(%arg0: i32) -> (i32, i32, i32) {
    %c0_i32 = arith.constant 0 : i32
    %c0_i32_0 = arith.constant 0 : i32
    %c0_i32_1 = arith.constant 0 : i32
    return %arg0, %c0_i32, %c0_i32_0 : i32, i32, i32
  }
  func.func @transform_1(%arg0: i32) -> (i32, i32) {
    %c0_i32 = arith.constant 0 : i32
    %c0_i32_0 = arith.constant 0 : i32
    %c0_i32_1 = arith.constant 0 : i32
    return %c0_i32, %c0_i32_0 : i32, i32
  }
  func.func @transform_2(%arg0: i32) -> (i32, i32) {
    %c0_i32 = arith.constant 0 : i32
    %c0_i32_0 = arith.constant 0 : i32
    %c0_i32_1 = arith.constant 0 : i32
    return %c0_i32, %c0_i32_0 : i32, i32
  }
  func.func @transform_3(%arg0: i32) -> (i32, i32, i32) {
    %c0_i32 = arith.constant 0 : i32
    %c0_i32_0 = arith.constant 0 : i32
    %c0_i32_1 = arith.constant 0 : i32
    %c0_i32_2 = arith.constant 0 : i32
    return %c0_i32, %c0_i32_0, %c0_i32_1 : i32, i32, i32
  }
  func.func @transform_4(%arg0: i32) -> (i32, i32) {
    %c0_i32 = arith.constant 0 : i32
    %c0_i32_0 = arith.constant 0 : i32
    %c0_i32_1 = arith.constant 0 : i32
    return %c0_i32, %c0_i32_0 : i32, i32
  }
  func.func @transform_5(%arg0: i32) -> (i32, i32, i32) {
    %c0_i32 = arith.constant 0 : i32
    %c0_i32_0 = arith.constant 0 : i32
    %c0_i32_1 = arith.constant 0 : i32
    %c0_i32_2 = arith.constant 0 : i32
    return %c0_i32, %c0_i32_0, %c0_i32_1 : i32, i32, i32
  }
  func.func @transform_6(%arg0: i32) -> (i32, i32) {
    %c0_i32 = arith.constant 0 : i32
    %c0_i32_0 = arith.constant 0 : i32
    %c0_i32_1 = arith.constant 0 : i32
    return %c0_i32, %c0_i32_0 : i32, i32
  }
  func.func @transform_7(%arg0: i32) -> (i32, i32) {
    %c0_i32 = arith.constant 0 : i32
    %c0_i32_0 = arith.constant 0 : i32
    %c0_i32_1 = arith.constant 0 : i32
    return %c0_i32, %c0_i32_0 : i32, i32
  }
  func.func @transform_8(%arg0: i32) -> (i32, i32) {
    %c0_i32 = arith.constant 0 : i32
    %c0_i32_0 = arith.constant 0 : i32
    %c0_i32_1 = arith.constant 0 : i32
    return %c0_i32, %c0_i32_0 : i32, i32
  }
  func.func @transform_9(%arg0: i32) -> (i32, i32, i32) {
    %c0_i32 = arith.constant 0 : i32
    %c0_i32_0 = arith.constant 0 : i32
    %c0_i32_1 = arith.constant 0 : i32
    return %arg0, %c0_i32, %c0_i32_0 : i32, i32, i32
  }
}

</mosaic_0001>

<bundles_post_ra>
// kernel: genre_conv_head.1
= control target key start
LH: loop header
LB: loop body
LE: loop exit
PB: predicated region body
PF: predicated region fallthrough
CT: control target
= control target key end

     0   :  { %s8997_s30 = smov 0   ;;  %s13695_s0 = inlined_call_operand.vmem [shape: bf16[2,128,256], index: 0, kind: input, shape index: {}]   ;;  %s13696_s1 = inlined_call_operand.vmem [shape: bf16[256,128], index: 1, kind: input, shape index: {}]   ;;  %s13697_s2 = inlined_call_operand.vmem [shape: f32[256,1], index: 2, kind: input, shape index: {}]   ;;  %s13698_s3 = inlined_call_operand.vmem [shape: bf16[9,128,256], index: 3, kind: input, shape index: {}]   ;;  %s13699_s4 = inlined_call_operand.vmem [shape: f32[128,1], index: 4, kind: input, shape index: {}]   ;;  %s13700_s5 = inlined_call_operand.vmem [shape: bf16[9,64,128], index: 5, kind: input, shape index: {}]   ;;  %s13701_s6 = inlined_call_operand.vmem [shape: f32[64,1], index: 6, kind: input, shape index: {}]   ;;  %s13702_s7 = inlined_call_operand.vmem [shape: f32[10,64], index: 7, kind: input, shape index: {}]   ;;  %s13703_s8 = inlined_call_operand.vmem [shape: f32[10,1], index: 8, kind: input, shape index: {}]   ;;  %s13704_s9 = inlined_call_operand.vmem [shape: f32[2,10,1], index: 9, kind: output, shape index: {}]  }
   0x1 LB: > { %s7368_s10 = sadd.s32 4294967295, %s8935_s30   ;;  %p7372_p0 = scmp.ge.s32.totalorder %s8935_s30, 1  ;;  %s8935_s30 = sphi %s8997_s30, %s19_s30  }
   0x2   : > { %p287_p1 = scmp.lt.s32.totalorder %s8935_s30, 3 }
   0x4   : > { %p288_p2 = pnand %p7372_p0, %p287_p1 }
   0x6   : > { %291 = sbr.rel (%p288_p2) target bundleno = 2226 (0x8b2), region = 56 }
   0xd   : > { %p323_p3 = scmp.lt.s32.totalorder %s7368_s10, 1  ;;  %v13705_v0 = vmov 0   ;;  %v413_v1 = vld [vmem:[%s13697_s2] sm:$0xff]  ;;  %v414_v2 = vld [vmem:[%s13697_s2 + $0x8] sm:$0xff]  ;;  %v419_v12 = vld [vmem:[%s13697_s2 + $0x30] sm:$0xff]  ;;  %s8939_s19 = smov 16  }
   0xe   : > { %813 = vmatprep.mubr.bf16.mxu0 %v13705_v0  ;;  %8165 = vset.pattern.permute.xlu0 %v13705_v0  ;;  %v417_v7 = vld [vmem:[%s13697_s2 + $0x20] sm:$0xff]  ;;  %v415_v13 = vld [vmem:[%s13697_s2 + $0x10] sm:$0xff]  ;;  %v416_v16 = vld [vmem:[%s13697_s2 + $0x18] sm:$0xff]  ;;  %s8940_s24 = smov 15   ;;  %s8941_s29 = smov 1   ;;  %vm1422_vm0 = vcmask 138240  }
   0xf   : > { %s14044_s10 = smov (!%p323_p3, %s7368_s10), 1  ;;  %8166 = vset.pattern.permute.xlu1 %v13705_v0  ;;  %447 = vperm.xlu0 %8165, %v413_v1   ;;  %v421_v15 = vld [vmem:[%s13697_s2 + $0x40] sm:$0xff]  ;;  %v423_v19 = vld [vmem:[%s13697_s2 + $0x50] sm:$0xff]  ;;  %v418_v20 = vld [vmem:[%s13697_s2 + $0x28] sm:$0xff]  ;;  %s8942_s11 = smov 127   ;;  %vm2264_vm1 = vcmask 121856  }
  0x10   : > { %s7785_s13 = sshll.u32 %s14044_s10, 7  ;;  %457 = vperm.xlu1 %8166, %v415_v13   ;;  %v425_v23 = vld [vmem:[%s13697_s2 + $0x60] sm:$0xff]  ;;  %v420_v24 = vld [vmem:[%s13697_s2 + $0x38] sm:$0xff]  ;;  %v427_v27 = vld [vmem:[%s13697_s2 + $0x70] sm:$0xff]  ;;  %s8943_s12 = smov 113   ;;  %vm1861_vm2 = vcmask 130048  }
  0x11   : > { %s9017_s16 = scalar_lea.vmem %s13695_s0, %s7785_s13  ;;  %v422_v28 = vld [vmem:[%s13697_s2 + $0x48] sm:$0xff]  ;;  %v8661_v30 = vld [vmem:[%s13696_s1] sm:$0xff]   ;;  %v424_v32 = vld [vmem:[%s13697_s2 + $0x58] sm:$0xff]  ;;  %vm3476_vm3 = vcmask 1039360   ;;  %s8944_s22 = smov 112   ;;  %vm2703_vm4 = vcmask 7168  }
  0x12   : > { %v8637_v3 = vld [vmem:[%s9017_s16 + $0x4] ss:$8 sps:$4 sm:$0xff]   ;;  %v8639_v4 = vld [vmem:[%s9017_s16] ss:$8 sps:$4 sm:$0xff]   ;;  %v8640_v5 = vld [vmem:[%s9017_s16 + $0x14] ss:$8 sps:$4 sm:$0xff]  }
  0x13   : > { %781 = vmatprep.subr.bf16.mxu0 %v8637_v3  ;;  %452 = vperm.xlu0 %8165, %v414_v2   ;;  %v8642_v6 = vld [vmem:[%s9017_s16 + $0x10] ss:$8 sps:$4 sm:$0xff]   ;;  %v8643_v8 = vld [vmem:[%s9017_s16 + $0x24] ss:$8 sps:$4 sm:$0xff]   ;;  %v8645_v9 = vld [vmem:[%s9017_s16 + $0x20] ss:$8 sps:$4 sm:$0xff]  }
  0x14   : > { %782 = vmatpush1.bf16.msra.mxu0 %v8639_v4  ;;  %v8646_v10 = vld [vmem:[%s9017_s16 + $0x34] ss:$8 sps:$4 sm:$0xff]   ;;  %v8648_v11 = vld [vmem:[%s9017_s16 + $0x30] ss:$8 sps:$4 sm:$0xff]   ;;  %v8649_v14 = vld [vmem:[%s9017_s16 + $0x44] ss:$8 sps:$4 sm:$0xff]   ;;  %462 = vperm.xlu1 %8166, %v416_v16  }
  0x15   : > { %783 = vmatprep.subr.bf16.mxu0 %v8640_v5  ;;  %v8651_v17 = vld [vmem:[%s9017_s16 + $0x40] ss:$8 sps:$4 sm:$0xff]   ;;  %v8652_v18 = vld [vmem:[%s9017_s16 + $0x54] ss:$8 sps:$4 sm:$0xff]   ;;  %v8654_v21 = vld [vmem:[%s9017_s16 + $0x50] ss:$8 sps:$4 sm:$0xff]  }
  0x16   : > { %v8655_v22 = vld [vmem:[%s9017_s16 + $0x64] ss:$8 sps:$4 sm:$0xff]   ;;  %v8657_v25 = vld [vmem:[%s9017_s16 + $0x60] ss:$8 sps:$4 sm:$0xff]   ;;  %v8658_v26 = vld [vmem:[%s9017_s16 + $0x74] ss:$8 sps:$4 sm:$0xff]  }
  0x17   : > { %467 = vperm.xlu0 %8165, %v417_v7   ;;  %v8660_v29 = vld [vmem:[%s9017_s16 + $0x70] ss:$8 sps:$4 sm:$0xff]   ;;  %v429_v31 = vld [vmem:[%s13697_s2 + $0x80] sm:$0xff]  ;;  %v426_v34 = vld [vmem:[%s13697_s2 + $0x68] sm:$0xff]  ;;  %s8938_s16 = smov 17   ;;  %s8945_s17 = smov 111  }
  0x18   : > { %784 = vmatpush1.bf16.msra.mxu0 %v8642_v6  ;;  %472 = vperm.xlu1 %8166, %v418_v20   ;;  %v431_v33 = vld [vmem:[%s13697_s2 + $0x90] sm:$0xff]  ;;  %v433_v35 = vld [vmem:[%s13697_s2 + $0xa0] sm:$0xff]  ;;  %v8662_v36 = vld [vmem:[%s13696_s1 + $0x8] sm:$0xff]   ;;  %vm3911_vm5 = vcmask 924672   ;;  %vm4749_vm6 = vcmask 908288   ;;  %vm4346_vm7 = vcmask 916480  }
  0x19   : > { %785 = vmatprep.subr.bf16.mxu0 %v8643_v8  ;;  %v428_v37 = vld [vmem:[%s13697_s2 + $0x78] sm:$0xff]  ;;  %v435_v38 = vld [vmem:[%s13697_s2 + $0xb0] sm:$0xff]  ;;  %v430_v39 = vld [vmem:[%s13697_s2 + $0x88] sm:$0xff]  ;;  %vm7210_vm12 = vcmask 523264   ;;  %vm7297_vm13 = vcmask 1041408   ;;  %s7786_s15 = sshll.u32 %s14044_s10, 4 }
  0x1a   : > { %v437_v40 = vld [vmem:[%s13697_s2 + $0xc0] sm:$0xff]  ;;  %v8663_v41 = vld [vmem:[%s13696_s1 + $0x10] sm:$0xff]   ;;  %v432_v42 = vld [vmem:[%s13697_s2 + $0x98] sm:$0xff]  ;;  %vm7311_vm14 = vcmask 1024  }
  0x1b   : > { %477 = vperm.xlu0 %8165, %v419_v12   ;;  %v439_v43 = vld [vmem:[%s13697_s2 + $0xd0] sm:$0xff]  ;;  %v434_v44 = vld [vmem:[%s13697_s2 + $0xa8] sm:$0xff]  ;;  %v441_v45 = vld [vmem:[%s13697_s2 + $0xe0] sm:$0xff] }
  0x1c   : > { %786 = vmatpush1.bf16.msra.mxu0 %v8645_v9  ;;  %482 = vperm.xlu1 %8166, %v420_v24   ;;  %v8664_v46 = vld [vmem:[%s13696_s1 + $0x18] sm:$0xff]   ;;  %v443_v48 = vld [vmem:[%s13697_s2 + $0xf0] sm:$0xff]  ;;  %v438_v49 = vld [vmem:[%s13697_s2 + $0xc8] sm:$0xff] }
  0x1d   : > { %787 = vmatprep.subr.bf16.mxu0 %v8646_v10  ;;  %v436_v47 = vld [vmem:[%s13697_s2 + $0xb8] sm:$0xff]  ;;  %v8665_v50 = vld [vmem:[%s13696_s1 + $0x20] sm:$0xff]   ;;  %v442_v52 = vld [vmem:[%s13697_s2 + $0xe8] sm:$0xff] }
  0x1e   : > { %v440_v51 = vld [vmem:[%s13697_s2 + $0xd8] sm:$0xff]  ;;  %v8666_v53 = vld [vmem:[%s13696_s1 + $0x28] sm:$0xff]   ;;  %v8667_v55 = vld [vmem:[%s13696_s1 + $0x30] sm:$0xff]  }
  0x1f   : > { %487 = vperm.xlu0 %8165, %v421_v15   ;;  %v444_v54 = vld [vmem:[%s13697_s2 + $0xf8] sm:$0xff]  ;;  %v8669_v57 = vld [vmem:[%s13696_s1 + $0x40] sm:$0xff]   ;;  %v8670_v58 = vld [vmem:[%s13696_s1 + $0x48] sm:$0xff]  }
  0x20   : > { %788 = vmatpush1.bf16.msra.mxu0 %v8648_v11  ;;  %492 = vperm.xlu1 %8166, %v422_v28   ;;  %v8668_v56 = vld [vmem:[%s13696_s1 + $0x38] sm:$0xff]   ;;  %v8671_v59 = vld [vmem:[%s13696_s1 + $0x50] sm:$0xff]   ;;  %v8673_v61 = vld [vmem:[%s13696_s1 + $0x60] sm:$0xff]  }
  0x21   : > { %789 = vmatprep.subr.bf16.mxu0 %v8649_v14  ;;  %v8672_v60 = vld [vmem:[%s13696_s1 + $0x58] sm:$0xff]   ;;  %v8674_v62 = vld [vmem:[%s13696_s1 + $0x68] sm:$0xff]   ;;  %v8675_v63 = vld [vmem:[%s13696_s1 + $0x70] sm:$0xff]  }
  0x22   : > { %v8676_v1 = vld [vmem:[%s13696_s1 + $0x78] sm:$0xff]  }
  0x23   : > { %497 = vperm.xlu0 %8165, %v423_v19  }
  0x24   : > { %790 = vmatpush1.bf16.msra.mxu0 %v8651_v17  ;;  %502 = vperm.xlu1 %8166, %v424_v32  }
  0x25   : > { %791 = vmatprep.subr.bf16.mxu0 %v8652_v18 }
  0x27   : > { %507 = vperm.xlu0 %8165, %v425_v23  }
  0x28   : > { %792 = vmatpush1.bf16.msra.mxu0 %v8654_v21  ;;  %512 = vperm.xlu1 %8166, %v426_v34  }
  0x29   : > { %793 = vmatprep.subr.bf16.mxu0 %v8655_v22 }
  0x2b   : > { %517 = vperm.xlu0 %8165, %v427_v27  }
  0x2c   : > { %794 = vmatpush1.bf16.msra.mxu0 %v8657_v25  ;;  %522 = vperm.xlu1 %8166, %v428_v37  }
  0x2d   : > { %795 = vmatprep.subr.bf16.mxu0 %v8658_v26 }
  0x2f   : > { %527 = vperm.xlu0 %8165, %v429_v31  }
  0x30   : > { %796 = vmatpush1.bf16.msra.mxu0 %v8660_v29  ;;  %532 = vperm.xlu1 %8166, %v430_v39  }
  0x33   : > { %814 = vmatmul.mubr.bf16.vlgmr.msra.gmra.mrb[0].mxu0 %v8661_v30  ;;  %537 = vperm.xlu0 %8165, %v431_v33  }
  0x34   : > { %823 = vmatprep.mubr.bf16.mxu0 %v13705_v0  ;;  %542 = vperm.xlu1 %8166, %v432_v42  }
  0x37   : > { %547 = vperm.xlu0 %8165, %v433_v35  }
  0x38   : > { %552 = vperm.xlu1 %8166, %v434_v44  }
  0x3b   : > { %824 = vmatmul.mubr.bf16.gmra.mrb[4].mxu0 %v8662_v36  ;;  %557 = vperm.xlu0 %8165, %v435_v38  }
  0x3c   : > { %833 = vmatprep.mubr.bf16.mxu0 %v13705_v0  ;;  %562 = vperm.xlu1 %8166, %v436_v47  }
  0x3f   : > { %567 = vperm.xlu0 %8165, %v437_v40  }
  0x40   : > { %572 = vperm.xlu1 %8166, %v438_v49  }
  0x43   : > { %834 = vmatmul.mubr.bf16.gmra.mrb[8].mxu0 %v8663_v41  ;;  %577 = vperm.xlu0 %8165, %v439_v43  }
  0x44   : > { %843 = vmatprep.mubr.bf16.mxu0 %v13705_v0  ;;  %582 = vperm.xlu1 %8166, %v440_v51  }
  0x47   : > { %587 = vperm.xlu0 %8165, %v441_v45  }
  0x48   : > { %592 = vperm.xlu1 %8166, %v442_v52  }
  0x4b   : > { %844 = vmatmul.mubr.bf16.gmra.mrb[12].mxu0 %v8664_v46  ;;  %597 = vperm.xlu0 %8165, %v443_v48  }
  0x4c   : > { %853 = vmatprep.mubr.bf16.mxu0 %v13705_v0  ;;  %602 = vperm.xlu1 %8166, %v444_v54  }
  0x4f   : > { %8168 = vrot.lane.b32.xlu0 %v13705_v0, %s8938_s16 }
  0x50   : > { %8173 = vrot.lane.b32.xlu1 %v13705_v0, %s8938_s16 }
  0x53   : > { %854 = vmatmul.mubr.bf16.gmra.mrb[16].mxu0 %v8665_v50  ;;  %8178 = vrot.lane.b32.xlu0 %v13705_v0, %s8938_s16 }
  0x54   : > { %863 = vmatprep.mubr.bf16.mxu0 %v13705_v0  ;;  %8183 = vrot.lane.b32.xlu1 %v13705_v0, %s8938_s16 }
  0x57   : > { %8188 = vrot.lane.b32.xlu0 %v13705_v0, %s8938_s16 }
  0x58   : > { %8193 = vrot.lane.b32.xlu1 %v13705_v0, %s8938_s16 }
  0x5b   : > { %864 = vmatmul.mubr.bf16.gmra.mrb[20].mxu0 %v8666_v53  ;;  %8198 = vrot.lane.b32.xlu0 %v13705_v0, %s8938_s16 }
  0x5c   : > { %873 = vmatprep.mubr.bf16.mxu0 %v13705_v0  ;;  %8203 = vrot.lane.b32.xlu1 %v13705_v0, %s8938_s16 }
  0x5f   : > { %8208 = vrot.lane.b32.xlu0 %v13705_v0, %s8939_s19 }
  0x60   : > { %8213 = vrot.lane.b32.xlu1 %v13705_v0, %s8940_s24 }
  0x63   : > { %874 = vmatmul.mubr.bf16.gmra.mrb[24].mxu0 %v8667_v55  ;;  %8218 = vrot.lane.b32.xlu0 %v13705_v0, %s8939_s19 }
  0x64   : > { %883 = vmatprep.mubr.bf16.mxu0 %v13705_v0  ;;  %8223 = vrot.lane.b32.xlu1 %v13705_v0, %s8940_s24 }
  0x67   : > { %8228 = vrot.lane.b32.xlu0 %v13705_v0, %s8939_s19 }
  0x68   : > { %8233 = vrot.lane.b32.xlu1 %v13705_v0, %s8940_s24 }
  0x6b   : > { %884 = vmatmul.mubr.bf16.gmra.mrb[28].mxu0 %v8668_v56  ;;  %8238 = vrot.lane.b32.xlu0 %v13705_v0, %s8939_s19 }
  0x6c   : > { %893 = vmatprep.mubr.bf16.mxu0 %v13705_v0  ;;  %8243 = vrot.lane.b32.xlu1 %v13705_v0, %s8940_s24 }
  0x6f   : > { %8248 = vrot.lane.b32.xlu0 %v13705_v0, %s8939_s19 }
  0x70   : > { %8253 = vrot.lane.b32.xlu1 %v13705_v0, %s8940_s24 }
  0x73   : > { %894 = vmatmul.mubr.bf16.gmra.mrb[32].mxu0 %v8669_v57  ;;  %8258 = vrot.lane.b32.xlu0 %v13705_v0, %s8939_s19 }
  0x74   : > { %903 = vmatprep.mubr.bf16.mxu0 %v13705_v0  ;;  %8263 = vrot.lane.b32.xlu1 %v13705_v0, %s8940_s24 }
  0x77   : > { %8268 = vrot.lane.b32.xlu0 %v13705_v0, %s8939_s19 }
  0x78   : > { %8273 = vrot.lane.b32.xlu1 %v13705_v0, %s8940_s24 }
  0x7b   : > { %904 = vmatmul.mubr.bf16.gmra.mrb[36].mxu0 %v8670_v58  ;;  %8278 = vrot.lane.b32.xlu0 %v13705_v0, %s8939_s19 }
  0x7c   : > { %913 = vmatprep.mubr.bf16.mxu0 %v13705_v0  ;;  %8283 = vrot.lane.b32.xlu1 %v13705_v0, %s8940_s24 }
  0x7f   : > { %8288 = vrot.lane.b32.xlu0 %v13705_v0, %s8941_s29 }
  0x83   : > { %914 = vmatmul.mubr.bf16.gmra.mrb[40].mxu0 %v8671_v59  ;;  %8293 = vrot.lane.b32.xlu0 %v13705_v0, %s8942_s11 }
  0x84   : > { %923 = vmatprep.mubr.bf16.mxu0 %v13705_v0 }
  0x87   : > { %8298 = vrot.lane.b32.xlu0 %v13705_v0, %s8941_s29 }
  0x8b   : > { %924 = vmatmul.mubr.bf16.gmra.mrb[44].mxu0 %v8672_v60  ;;  %8303 = vrot.lane.b32.xlu0 %v13705_v0, %s8942_s11 }
  0x8c   : > { %933 = vmatprep.mubr.bf16.mxu0 %v13705_v0 }
  0x8e   : > { %v448_v2 = vpop.permute.xlu0 %447 }
  0x8f   : > { %8308 = vrot.lane.b32.xlu0 %v13705_v0, %s8941_s29  ;;  %v458_v10 = vpop.permute.xlu1 %457 }
  0x92   : > { %v453_v3 = vpop.permute.xlu0 %452 }
  0x93   : > { %934 = vmatmul.mubr.bf16.gmra.mrb[48].mxu0 %v8673_v61  ;;  %8313 = vrot.lane.b32.xlu0 %v13705_v0, %s8942_s11  ;;  %v463_v12 = vpop.permute.xlu1 %462 }
  0x94   : > { %943 = vmatprep.mubr.bf16.mxu0 %v13705_v0 }
  0x96   : > { %v9255_v4 = vpop.permute.xlu0 %467 }
  0x97   : > { %8318 = vrot.lane.b32.xlu0 %v13705_v0, %s8941_s29  ;;  %v473_v14 = vpop.permute.xlu1 %472 }
  0x9a   : > { %v9257_v5 = vpop.permute.xlu0 %477 }
  0x9b   : > { %944 = vmatmul.mubr.bf16.gmra.mrb[52].mxu0 %v8674_v62  ;;  %8323 = vrot.lane.b32.xlu0 %v13705_v0, %s8942_s11  ;;  %v9273_v16 = vpop.permute.xlu1 %482 }
  0x9c   : > { %953 = vmatprep.mubr.bf16.mxu0 %v13705_v0 }
  0x9e   : > { %v9259_v6 = vpop.permute.xlu0 %487 }
  0x9f   : > { %v9277_v18 = vpop.permute.xlu1 %492 }
  0xa2   : > { %v9261_v7 = vpop.permute.xlu0 %497 }
  0xa3   : > { %954 = vmatmul.mubr.bf16.gmra.mrb[56].mxu0 %v8675_v63  ;;  %v9281_v20 = vpop.permute.xlu1 %502 }
  0xa4   : > { %963 = vmatprep.mubr.bf16.mxu0 %v13705_v0 }
  0xa6   : > { %v9263_v8 = vpop.permute.xlu0 %507 }
  0xa7   : > { %v9285_v22 = vpop.permute.xlu1 %512 }
  0xaa   : > { %v9265_v9 = vpop.permute.xlu0 %517 }
  0xab   : > { %964 = vmatmul.mubr.bf16.gmra.mrb[60].mxu0 %v8676_v1  ;;  %v9289_v24 = vpop.permute.xlu1 %522 }
  0xae   : > { %v9267_v11 = vpop.permute.xlu0 %527 }
  0xaf   : > { %v9295_v35 = vpop.permute.xlu1 %532 }
  0xb2   : > { %v9269_v13 = vpop.permute.xlu0 %537 }
  0xb3   : > { %v9307_v48 = vpop.permute.xlu1 %542 }
  0xb6   : > { %v9271_v15 = vpop.permute.xlu0 %547 }
  0xb7   : > { %v9319_v60 = vpop.permute.xlu1 %552 }
  0xba   : > { %v9275_v17 = vpop.permute.xlu0 %557 }
  0xbe   : > { %v9279_v19 = vpop.permute.xlu0 %567 }
  0xc2   : > { %v9283_v21 = vpop.permute.xlu0 %577 }
  0xc6   : > { %v9287_v23 = vpop.permute.xlu0 %587 }
  0xca   : > { %v9291_v25 = vpop.permute.xlu0 %597 }
  0xce   : > { %v9293_v34 = vpop.permute.xlu0 %8168 }
  0xd2   : > { %v9305_v47 = vpop.permute.xlu0 %8178 }
  0xd6   : > { %v9317_v59 = vpop.permute.xlu0 %8188 }
 0x106   : > { %v815_v26 = vpop.f32.mrb[0].mxu0 }
 0x107   : > { %v816_v27 = vadd.f32 %v815_v26, %v448_v2  ;;  %v817_v28 = vpop.f32.mrb[1].mxu0 }
 0x108   : > { %v818_v29 = vadd.f32 %v817_v28, %v448_v2  ;;  %v819_v30 = vpop.f32.mrb[2].mxu0 }
 0x109   : > { %v820_v31 = vadd.f32 %v819_v30, %v453_v3  ;;  %v821_v32 = vpop.f32.mrb[3].mxu0  ;;  %v974_v36 = vmax.f32 %v816_v27, 0.0  ;;  %v9333_v30 = vpop.permute.xlu1 %562 }
 0x10a   : > { %v822_v33 = vadd.f32 %v821_v32, %v453_v3  ;;  %v975_v38 = vmax.f32 %v818_v29, 0.0  ;;  %v9331_v29 = vpop.permute.xlu0 %8198 }
 0x10b   : > { %v976_v37 = vmax.f32 %v820_v31, 0.0 }
 0x10c   : > { %v977_v39 = vmax.f32 %v822_v33, 0.0 }
 0x10d   : > { %v9297_v40 = vpack.c.bf16 %v976_v37, %v974_v36 }
 0x10e   : > { %v9299_v41 = vpack.c.bf16 %v977_v39, %v975_v38  ;;  %v825_v42 = vpop.f32.mrb[4].mxu0 }
 0x10f   : > { %v826_v43 = vadd.f32 %v825_v42, %v458_v10  ;;  %v827_v44 = vpop.f32.mrb[5].mxu0  ;;  %2170 = vrot.lane.b32.xlu1 %v9297_v40, %s8940_s24  ;;  %1328 = vrot.lane.b32.xlu0 %v9297_v40, %s8938_s16 }
 0x110   : > { %v828_v45 = vadd.f32 %v827_v44, %v458_v10  ;;  %v829_v46 = vpop.f32.mrb[6].mxu0  ;;  %v9349_v44 = vpop.permute.xlu1 %572 }
 0x111   : > { %v978_v49 = vmax.f32 %v826_v43, 0.0  ;;  %v830_v50 = vadd.f32 %v829_v46, %v463_v12  ;;  %v831_v51 = vpop.f32.mrb[7].mxu0  ;;  %v9347_v43 = vpop.permute.xlu0 %8208 }
 0x112   : > { %v979_v52 = vmax.f32 %v828_v45, 0.0  ;;  %v832_v53 = vadd.f32 %v831_v51, %v463_v12 }
 0x113   : > { %v980_v54 = vmax.f32 %v830_v50, 0.0  ;;  %3380 = vrot.lane.b32.xlu1 %v9297_v40, %s8942_s11  ;;  %1767 = vrot.lane.b32.xlu0 %v9297_v40, %s8939_s19 }
 0x114   : > { %v981_v55 = vmax.f32 %v832_v53, 0.0 }
 0x115   : > { %v9313_v56 = vpack.c.bf16 %v980_v54, %v978_v49 }
 0x116   : > { %v9315_v57 = vpack.c.bf16 %v981_v55, %v979_v52  ;;  %v835_v58 = vpop.f32.mrb[8].mxu0 }
 0x117   : > { %13805 = vst [vmem:[#allocation4_spill] sm:$0xff] %v9313_v56  ;;  %v836_v61 = vadd.f32 %v835_v58, %v9255_v4  ;;  %v837_v62 = vpop.f32.mrb[9].mxu0  ;;  %1330 = vrot.lane.b32.xlu1 %v9299_v41, %s8938_s16  ;;  %2609 = vrot.lane.b32.xlu0 %v9297_v40, %s8941_s29  ;;  %v9365_v58 = vpop.permute.xlu0 %8218 }
 0x118   : > { %v838_v63 = vadd.f32 %v837_v62, %v9255_v4  ;;  %v839_v1 = vpop.f32.mrb[10].mxu0  ;;  %13806 = vst [vmem:[#allocation5_spill] sm:$0xff] %v9365_v58 }
 0x119   : > { %v840_v2 = vadd.f32 %v839_v1, %v473_v14  ;;  %v841_v3 = vpop.f32.mrb[11].mxu0  ;;  %v982_v12 = vmax.f32 %v836_v61, 0.0  ;;  %v9367_v61 = vpop.permute.xlu1 %582 }
 0x11a   : > { %v842_v10 = vadd.f32 %v841_v3, %v473_v14  ;;  %v983_v27 = vmax.f32 %v838_v63, 0.0 }
 0x11b   : > { %v984_v26 = vmax.f32 %v840_v2, 0.0  ;;  %1769 = vrot.lane.b32.xlu1 %v9299_v41, %s8939_s19  ;;  %2172 = vrot.lane.b32.xlu0 %v9299_v41, %s8940_s24 }
 0x11c   : > { %v985_v28 = vmax.f32 %v842_v10, 0.0 }
 0x11d   : > { %v9335_v31 = vpack.c.bf16 %v984_v26, %v982_v12 }
 0x11e   : > { %v9337_v4 = vpack.c.bf16 %v985_v28, %v983_v27  ;;  %v845_v32 = vpop.f32.mrb[12].mxu0  ;;  %v9379_v28 = vpop.permute.xlu0 %8228 }
 0x11f   : > { %v846_v14 = vadd.f32 %v845_v32, %v9257_v5  ;;  %v847_v33 = vpop.f32.mrb[13].mxu0  ;;  %2611 = vrot.lane.b32.xlu1 %v9299_v41, %s8941_s29  ;;  %1773 = vrot.lane.b32.xlu0 %v9313_v56, %s8939_s19  ;;  %13807 = vst [vmem:[#allocation6_spill] sm:$0xff] %v9379_v28  ;;  %v9381_v32 = vpop.permute.xlu1 %592 }
 0x120   : > { %v848_v36 = vadd.f32 %v847_v33, %v9257_v5  ;;  %v849_v37 = vpop.f32.mrb[14].mxu0 }
 0x121   : > { %v850_v38 = vadd.f32 %v849_v37, %v9273_v16  ;;  %v851_v39 = vpop.f32.mrb[15].mxu0  ;;  %v986_v45 = vmax.f32 %v846_v14, 0.0 }
 0x122   : > { %v852_v42 = vadd.f32 %v851_v39, %v9273_v16  ;;  %v987_v49 = vmax.f32 %v848_v36, 0.0 }
 0x123   : > { %v988_v46 = vmax.f32 %v850_v38, 0.0  ;;  %3382 = vrot.lane.b32.xlu1 %v9299_v41, %s8942_s11  ;;  %2176 = vrot.lane.b32.xlu0 %v9313_v56, %s8940_s24 }
 0x124   : > { %v989_v5 = vmax.f32 %v852_v42, 0.0 }
 0x125   : > { %v9355_v50 = vpack.c.bf16 %v988_v46, %v986_v45 }
 0x126   : > { %v9357_v51 = vpack.c.bf16 %v989_v5, %v987_v49  ;;  %v855_v52 = vpop.f32.mrb[16].mxu0  ;;  %v9395_v5 = vpop.permute.xlu0 %8238 }
 0x127   : > { %v856_v16 = vadd.f32 %v855_v52, %v9259_v6  ;;  %v857_v53 = vpop.f32.mrb[17].mxu0  ;;  %1334 = vrot.lane.b32.xlu1 %v9313_v56, %s8938_s16  ;;  %2615 = vrot.lane.b32.xlu0 %v9313_v56, %s8941_s29  ;;  %13808 = vst [vmem:[#allocation7_spill] sm:$0xff] %v9395_v5  ;;  %v9397_v52 = vpop.permute.xlu1 %602 }
 0x128   : > { %v858_v54 = vadd.f32 %v857_v53, %v9259_v6  ;;  %v859_v55 = vpop.f32.mrb[18].mxu0 }
 0x129   : > { %v860_v62 = vadd.f32 %v859_v55, %v9277_v18  ;;  %v861_v63 = vpop.f32.mrb[19].mxu0  ;;  %v990_v2 = vmax.f32 %v856_v16, 0.0 }
 0x12a   : > { %v862_v1 = vadd.f32 %v861_v63, %v9277_v18  ;;  %v991_v10 = vmax.f32 %v858_v54, 0.0 }
 0x12b   : > { %v992_v3 = vmax.f32 %v860_v62, 0.0  ;;  %3386 = vrot.lane.b32.xlu1 %v9313_v56, %s8942_s11  ;;  %1336 = vrot.lane.b32.xlu0 %v9315_v57, %s8938_s16 }
 0x12c   : > { %v993_v6 = vmax.f32 %v862_v1, 0.0 }
 0x12d   : > { %v9375_v12 = vpack.c.bf16 %v992_v3, %v990_v2  ;;  %v9410_v2 = vpop.permute.xlu1 %8173 }
 0x12e   : > { %v9377_v26 = vpack.c.bf16 %v993_v6, %v991_v10  ;;  %v865_v27 = vpop.f32.mrb[20].mxu0  ;;  %v9413_v10 = vpop.permute.xlu0 %8248 }
 0x12f   : > { %v866_v18 = vadd.f32 %v865_v27, %v9261_v7  ;;  %v867_v14 = vpop.f32.mrb[21].mxu0  ;;  %1775 = vrot.lane.b32.xlu1 %v9315_v57, %s8939_s19  ;;  %3388 = vrot.lane.b32.xlu0 %v9315_v57, %s8942_s11  ;;  %13810 = vst [vmem:[#allocation9_spill] sm:$0xff] %v9413_v10 }
 0x130   : > { %v868_v33 = vadd.f32 %v867_v14, %v9261_v7  ;;  %v869_v36 = vpop.f32.mrb[22].mxu0 }
 0x131   : > { %v870_v37 = vadd.f32 %v869_v36, %v9281_v20  ;;  %v871_v38 = vpop.f32.mrb[23].mxu0  ;;  %v994_v42 = vmax.f32 %v866_v18, 0.0 }
 0x132   : > { %v872_v39 = vadd.f32 %v871_v38, %v9281_v20  ;;  %v995_v46 = vmax.f32 %v868_v33, 0.0  ;;  %v9428_v38 = vpop.permute.xlu1 %8183 }
 0x133   : > { %v996_v45 = vmax.f32 %v870_v37, 0.0  ;;  %2178 = vrot.lane.b32.xlu1 %v9315_v57, %s8940_s24  ;;  %1779 = vrot.lane.b32.xlu0 %v9335_v31, %s8939_s19 }
 0x134   : > { %v997_v49 = vmax.f32 %v872_v39, 0.0 }
 0x135   : > { %v9399_v7 = vpack.c.bf16 %v996_v45, %v994_v42  ;;  %v9431_v45 = vpop.permute.xlu0 %8258 }
 0x136   : > { %v9401_v16 = vpack.c.bf16 %v997_v49, %v995_v46  ;;  %v875_v53 = vpop.f32.mrb[24].mxu0  ;;  %13811 = vst [vmem:[#allocation10_spill] sm:$0xff] %v9431_v45 }
 0x137   : > { %13809 = vst [vmem:[#allocation8_spill] sm:$0xff] %v9399_v7  ;;  %v876_v20 = vadd.f32 %v875_v53, %v9263_v8  ;;  %v877_v54 = vpop.f32.mrb[25].mxu0  ;;  %2617 = vrot.lane.b32.xlu1 %v9315_v57, %s8941_s29  ;;  %2621 = vrot.lane.b32.xlu0 %v9335_v31, %s8941_s29 }
 0x138   : > { %v878_v55 = vadd.f32 %v877_v54, %v9263_v8  ;;  %v879_v62 = vpop.f32.mrb[26].mxu0 }
 0x139   : > { %v880_v63 = vadd.f32 %v879_v62, %v9285_v22  ;;  %v881_v1 = vpop.f32.mrb[27].mxu0  ;;  %v998_v6 = vmax.f32 %v876_v20, 0.0 }
 0x13a   : > { %v882_v3 = vadd.f32 %v881_v1, %v9285_v22  ;;  %v999_v18 = vmax.f32 %v878_v55, 0.0 }
 0x13b   : > { %v1000_v27 = vmax.f32 %v880_v63, 0.0  ;;  %1340 = vrot.lane.b32.xlu1 %v9335_v31, %s8938_s16  ;;  %1342 = vrot.lane.b32.xlu0 %v9337_v4, %s8938_s16 }
 0x13c   : > { %v1001_v8 = vmax.f32 %v882_v3, 0.0 }
 0x13d   : > { %v9419_v14 = vpack.c.bf16 %v1000_v27, %v998_v6  ;;  %v9445_v6 = vpop.permute.xlu0 %8268 }
 0x13e   : > { %v9421_v33 = vpack.c.bf16 %v1001_v8, %v999_v18  ;;  %v885_v36 = vpop.f32.mrb[28].mxu0  ;;  %13813 = vst [vmem:[#allocation12_spill] sm:$0xff] %v9445_v6 }
 0x13f   : > { %v886_v37 = vadd.f32 %v885_v36, %v9265_v9  ;;  %v887_v22 = vpop.f32.mrb[29].mxu0  ;;  %2182 = vrot.lane.b32.xlu1 %v9335_v31, %s8940_s24  ;;  %2184 = vrot.lane.b32.xlu0 %v9337_v4, %s8940_s24 }
 0x140   : > { %v888_v39 = vadd.f32 %v887_v22, %v9265_v9  ;;  %v889_v42 = vpop.f32.mrb[30].mxu0  ;;  %v9441_v9 = vpop.permute.xlu1 %8193 }
 0x141   : > { %v890_v46 = vadd.f32 %v889_v42, %v9289_v24  ;;  %v891_v49 = vpop.f32.mrb[31].mxu0  ;;  %v1002_v20 = vmax.f32 %v886_v37, 0.0 }
 0x142   : > { %v892_v53 = vadd.f32 %v891_v49, %v9289_v24  ;;  %v1003_v55 = vmax.f32 %v888_v39, 0.0 }
 0x143   : > { %v1004_v54 = vmax.f32 %v890_v46, 0.0  ;;  %3392 = vrot.lane.b32.xlu1 %v9335_v31, %s8942_s11  ;;  %1346 = vrot.lane.b32.xlu0 %v9355_v50, %s8938_s16 }
 0x144   : > { %v1005_v62 = vmax.f32 %v892_v53, 0.0  ;;  %v9459_v46 = vpop.permute.xlu1 %8203 }
 0x145   : > { %v9439_v63 = vpack.c.bf16 %v1004_v54, %v1002_v20  ;;  %v9461_v20 = vpop.permute.xlu0 %8278 }
 0x146   : > { %v9443_v1 = vpack.c.bf16 %v1005_v62, %v1003_v55  ;;  %v895_v3 = vpop.f32.mrb[32].mxu0  ;;  %13814 = vst [vmem:[#allocation13_spill] sm:$0xff] %v9461_v20 }
 0x147   : > { %13812 = vst [vmem:[#allocation11_spill] sm:$0xff] %v9439_v63  ;;  %v896_v24 = vadd.f32 %v895_v3, %v9267_v11  ;;  %v897_v27 = vpop.f32.mrb[33].mxu0  ;;  %1781 = vrot.lane.b32.xlu1 %v9337_v4, %s8939_s19  ;;  %1785 = vrot.lane.b32.xlu0 %v9355_v50, %s8939_s19 }
 0x148   : > { %v898_v18 = vadd.f32 %v897_v27, %v9267_v11  ;;  %v899_v8 = vpop.f32.mrb[34].mxu0 }
 0x149   : > { %v900_v36 = vadd.f32 %v899_v8, %v9295_v35  ;;  %v901_v37 = vpop.f32.mrb[35].mxu0  ;;  %v1006_v39 = vmax.f32 %v896_v24, 0.0  ;;  %v9474_v8 = vpop.permute.xlu1 %8213 }
 0x14a   : > { %v902_v22 = vadd.f32 %v901_v37, %v9295_v35  ;;  %v1007_v49 = vmax.f32 %v898_v18, 0.0  ;;  %v9477_v37 = vpop.permute.xlu0 %8288 }
 0x14b   : > { %v1008_v42 = vmax.f32 %v900_v36, 0.0  ;;  %2623 = vrot.lane.b32.xlu1 %v9337_v4, %s8941_s29  ;;  %2188 = vrot.lane.b32.xlu0 %v9355_v50, %s8940_s24  ;;  %13815 = vst [vmem:[#allocation14_spill] sm:$0xff] %v9477_v37 }
 0x14c   : > { %v1009_v53 = vmax.f32 %v902_v22, 0.0 }
 0x14d   : > { %v9463_v11 = vpack.c.bf16 %v1008_v42, %v1006_v39 }
 0x14e   : > { %v9465_v54 = vpack.c.bf16 %v1009_v53, %v1007_v49  ;;  %v905_v55 = vpop.f32.mrb[36].mxu0 }
 0x14f   : > { %v906_v35 = vadd.f32 %v905_v55, %v9269_v13  ;;  %v907_v62 = vpop.f32.mrb[37].mxu0  ;;  %3394 = vrot.lane.b32.xlu1 %v9337_v4, %s8942_s11  ;;  %2627 = vrot.lane.b32.xlu0 %v9355_v50, %s8941_s29 }
 0x150   : > { %v908_v3 = vadd.f32 %v907_v62, %v9269_v13  ;;  %v909_v24 = vpop.f32.mrb[38].mxu0 }
 0x151   : > { %v910_v27 = vadd.f32 %v909_v24, %v9307_v48  ;;  %v911_v18 = vpop.f32.mrb[39].mxu0  ;;  %v1010_v22 = vmax.f32 %v906_v35, 0.0  ;;  %v9492_v35 = vpop.permute.xlu1 %8223 }
 0x152   : > { %v912_v36 = vadd.f32 %v911_v18, %v9307_v48  ;;  %v1011_v42 = vmax.f32 %v908_v3, 0.0 }
 0x153   : > { %v1012_v39 = vmax.f32 %v910_v27, 0.0  ;;  %3398 = vrot.lane.b32.xlu1 %v9355_v50, %s8942_s11  ;;  %3400 = vrot.lane.b32.xlu0 %v9357_v51, %s8942_s11  ;;  %v9495_v27 = vpop.permute.xlu0 %8293 }
 0x154   : > { %v1013_v13 = vmax.f32 %v912_v36, 0.0 }
 0x155   : > { %v9483_v49 = vpack.c.bf16 %v1012_v39, %v1010_v22 }
 0x156   : > { %v9485_v53 = vpack.c.bf16 %v1013_v13, %v1011_v42  ;;  %v915_v55 = vpop.f32.mrb[40].mxu0 }
 0x157   : > { %13816 = vst [vmem:[#allocation15_spill] sm:$0xff] %v9483_v49  ;;  %v916_v62 = vadd.f32 %v915_v55, %v9271_v15  ;;  %v917_v48 = vpop.f32.mrb[41].mxu0  ;;  %1348 = vrot.lane.b32.xlu1 %v9357_v51, %s8938_s16  ;;  %1352 = vrot.lane.b32.xlu0 %v9375_v12, %s8938_s16  ;;  %v9509_v37 = vpop.permute.xlu0 %8298 }
 0x158   : > { %13817 = vst [vmem:[#allocation16_spill] sm:$0xff] %v9485_v53  ;;  %v918_v24 = vadd.f32 %v917_v48, %v9271_v15  ;;  %v919_v3 = vpop.f32.mrb[42].mxu0  ;;  %v9505_v15 = vpop.permute.xlu1 %8233  ;;  %13820 = vst [vmem:[#allocation19_spill] sm:$0xff] %v9509_v37 }
 0x159   : > { %v920_v18 = vadd.f32 %v919_v3, %v9319_v60  ;;  %v921_v36 = vpop.f32.mrb[43].mxu0  ;;  %v1014_v39 = vmax.f32 %v916_v62, 0.0 }
 0x15a   : > { %v922_v22 = vadd.f32 %v921_v36, %v9319_v60  ;;  %v1015_v13 = vmax.f32 %v918_v24, 0.0 }
 0x15b   : > { %v1016_v42 = vmax.f32 %v920_v18, 0.0  ;;  %1787 = vrot.lane.b32.xlu1 %v9357_v51, %s8939_s19  ;;  %1791 = vrot.lane.b32.xlu0 %v9375_v12, %s8939_s19  ;;  %v9525_v20 = vpop.permute.xlu0 %8303 }
 0x15c   : > { %v1017_v55 = vmax.f32 %v922_v22, 0.0  ;;  %13821 = vst [vmem:[#allocation20_spill] sm:$0xff] %v9525_v20 }
 0x15d   : > { %v9503_v0 = vpack.c.bf16 %v1016_v42, %v1014_v39 }
 0x15e   : > { %v9507_v48 = vpack.c.bf16 %v1017_v55, %v1015_v13  ;;  %v925_v3 = vpop.f32.mrb[44].mxu0  ;;  %v9523_v55 = vpop.permute.xlu1 %8243 }
 0x15f   : > { %13818 = vst [vmem:[#allocation17_spill] sm:$0xff] %v9503_v0  ;;  %v926_v60 = vadd.f32 %v925_v3, %v9275_v17  ;;  %v927_v62 = vpop.f32.mrb[45].mxu0  ;;  %2190 = vrot.lane.b32.xlu1 %v9357_v51, %s8940_s24  ;;  %2633 = vrot.lane.b32.xlu0 %v9375_v12, %s8941_s29 }
 0x160   : > { %13819 = vst [vmem:[#allocation18_spill] sm:$0xff] %v9507_v48  ;;  %v928_v24 = vadd.f32 %v927_v62, %v9275_v17  ;;  %v929_v18 = vpop.f32.mrb[46].mxu0 }
 0x161   : > { %v930_v36 = vadd.f32 %v929_v18, %v9333_v30  ;;  %v931_v22 = vpop.f32.mrb[47].mxu0  ;;  %v1018_v42 = vmax.f32 %v926_v60, 0.0 }
 0x162   : > { %v932_v39 = vadd.f32 %v931_v22, %v9333_v30  ;;  %v1019_v3 = vmax.f32 %v928_v24, 0.0 }
 0x163   : > { %v1020_v13 = vmax.f32 %v930_v36, 0.0  ;;  %2629 = vrot.lane.b32.xlu1 %v9357_v51, %s8941_s29  ;;  %2196 = vrot.lane.b32.xlu0 %v9377_v26, %s8940_s24 }
 0x164   : > { %v1021_v37 = vmax.f32 %v932_v39, 0.0 }
 0x165   : > { %v9527_v17 = vpack.c.bf16 %v1020_v13, %v1018_v42  ;;  %v9538_v42 = vpop.permute.xlu1 %8253  ;;  %v9541_v13 = vpop.permute.xlu0 %8308 }
 0x166   : > { %v9529_v62 = vpack.c.bf16 %v1021_v37, %v1019_v3  ;;  %v935_v18 = vpop.f32.mrb[48].mxu0  ;;  %13824 = vst [vmem:[#allocation23_spill] sm:$0xff] %v9541_v13 }
 0x167   : > { %13822 = vst [vmem:[#allocation21_spill] sm:$0xff] %v9527_v17  ;;  %v936_v30 = vadd.f32 %v935_v18, %v9279_v19  ;;  %v937_v60 = vpop.f32.mrb[49].mxu0  ;;  %2194 = vrot.lane.b32.xlu1 %v9375_v12, %s8940_s24  ;;  %1797 = vrot.lane.b32.xlu0 %v9399_v7, %s8939_s19 }
 0x168   : > { %13823 = vst [vmem:[#allocation22_spill] sm:$0xff] %v9529_v62  ;;  %v938_v36 = vadd.f32 %v937_v60, %v9279_v19  ;;  %v939_v24 = vpop.f32.mrb[50].mxu0 }
 0x169   : > { %v940_v22 = vadd.f32 %v939_v24, %v9349_v44  ;;  %v941_v39 = vpop.f32.mrb[51].mxu0  ;;  %v1022_v3 = vmax.f32 %v936_v30, 0.0  ;;  %v9556_v30 = vpop.permute.xlu1 %8263 }
 0x16a   : > { %v942_v37 = vadd.f32 %v941_v39, %v9349_v44  ;;  %v1023_v6 = vmax.f32 %v938_v36, 0.0  ;;  %v9559_v39 = vpop.permute.xlu0 %8313 }
 0x16b   : > { %v1024_v18 = vmax.f32 %v940_v22, 0.0  ;;  %3404 = vrot.lane.b32.xlu1 %v9375_v12, %s8942_s11  ;;  %2200 = vrot.lane.b32.xlu0 %v9399_v7, %s8940_s24  ;;  %13827 = vst [vmem:[#allocation26_spill] sm:$0xff] %v9559_v39 }
 0x16c   : > { %v1025_v19 = vmax.f32 %v942_v37, 0.0 }
 0x16d   : > { %v9547_v60 = vpack.c.bf16 %v1024_v18, %v1022_v3 }
 0x16e   : > { %v9549_v24 = vpack.c.bf16 %v1025_v19, %v1023_v6  ;;  %v945_v45 = vpop.f32.mrb[52].mxu0  ;;  %v9573_v39 = vpop.permute.xlu0 %8318 }
 0x16f   : > { %13825 = vst [vmem:[#allocation24_spill] sm:$0xff] %v9547_v60  ;;  %v946_v10 = vadd.f32 %v945_v45, %v9283_v21  ;;  %v947_v44 = vpop.f32.mrb[53].mxu0  ;;  %1354 = vrot.lane.b32.xlu1 %v9377_v26, %s8938_s16  ;;  %2639 = vrot.lane.b32.xlu0 %v9399_v7, %s8941_s29  ;;  %13829 = vst [vmem:[#allocation28_spill] sm:$0xff] %v9573_v39 }
 0x170   : > { %13826 = vst [vmem:[#allocation25_spill] sm:$0xff] %v9549_v24  ;;  %v948_v22 = vadd.f32 %v947_v44, %v9283_v21  ;;  %v949_v36 = vpop.f32.mrb[54].mxu0  ;;  %v9569_v21 = vpop.permute.xlu1 %8273 }
 0x171   : > { %v950_v6 = vadd.f32 %v949_v36, %v9367_v61  ;;  %v951_v37 = vpop.f32.mrb[55].mxu0  ;;  %v1026_v45 = vmax.f32 %v946_v10, 0.0 }
 0x172   : > { %v952_v3 = vadd.f32 %v951_v37, %v9367_v61  ;;  %v1027_v19 = vmax.f32 %v948_v22, 0.0  ;;  %v9589_v28 = vpop.permute.xlu0 %8323 }
 0x173   : > { %v1028_v18 = vmax.f32 %v950_v6, 0.0  ;;  %1793 = vrot.lane.b32.xlu1 %v9377_v26, %s8939_s19  ;;  %1360 = vrot.lane.b32.xlu0 %v9401_v16, %s8938_s16  ;;  %13830 = vst [vmem:[#allocation29_spill] sm:$0xff] %v9589_v28 }
 0x174   : > { %v1029_v13 = vmax.f32 %v952_v3, 0.0 }
 0x175   : > { %v9567_v5 = vpack.c.bf16 %v1028_v18, %v1026_v45 }
 0x176   : > { %v9571_v44 = vpack.c.bf16 %v1029_v13, %v1027_v19  ;;  %v955_v36 = vpop.f32.mrb[56].mxu0  ;;  %v9587_v19 = vpop.permute.xlu1 %8283 }
 0x177   : > { %13828 = vst [vmem:[#allocation27_spill] sm:$0xff] %v9567_v5  ;;  %v956_v61 = vadd.f32 %v955_v36, %v9287_v23  ;;  %v957_v10 = vpop.f32.mrb[57].mxu0  ;;  %2635 = vrot.lane.b32.xlu1 %v9377_v26, %s8941_s29  ;;  %3412 = vrot.lane.b32.xlu0 %v9401_v16, %s8942_s11 }
 0x178   : > { %v958_v22 = vadd.f32 %v957_v10, %v9287_v23  ;;  %v959_v6 = vpop.f32.mrb[58].mxu0 }
 0x179   : > { %v960_v37 = vadd.f32 %v959_v6, %v9381_v32  ;;  %v961_v3 = vpop.f32.mrb[59].mxu0  ;;  %v1030_v45 = vmax.f32 %v956_v61, 0.0 }
 0x17a   : > { %v962_v13 = vadd.f32 %v961_v3, %v9381_v32  ;;  %v1031_v36 = vmax.f32 %v958_v22, 0.0 }
 0x17b   : > { %v1032_v18 = vmax.f32 %v960_v37, 0.0  ;;  %3406 = vrot.lane.b32.xlu1 %v9377_v26, %s8942_s11  ;;  %1803 = vrot.lane.b32.xlu0 %v9419_v14, %s8939_s19 }
 0x17c   : > { %v1033_v39 = vmax.f32 %v962_v13, 0.0 }
 0x17d   : > { %v9591_v23 = vpack.c.bf16 %v1032_v18, %v1030_v45 }
 0x17e   : > { %v9593_v10 = vpack.c.bf16 %v1033_v39, %v1031_v36  ;;  %v965_v6 = vpop.f32.mrb[60].mxu0 }
 0x17f   : > { %v966_v32 = vadd.f32 %v965_v6, %v9291_v25  ;;  %v967_v61 = vpop.f32.mrb[61].mxu0  ;;  %1358 = vrot.lane.b32.xlu1 %v9399_v7, %s8938_s16  ;;  %2645 = vrot.lane.b32.xlu0 %v9419_v14, %s8941_s29 }
 0x180   : > { %v968_v37 = vadd.f32 %v967_v61, %v9291_v25  ;;  %v969_v22 = vpop.f32.mrb[62].mxu0 }
 0x181   : > { %v970_v3 = vadd.f32 %v969_v22, %v9397_v52  ;;  %v971_v13 = vpop.f32.mrb[63].mxu0  ;;  %v2171_v45 = vpop.permute.xlu1 %2170  ;;  %v1034_v36 = vmax.f32 %v966_v32, 0.0  ;;  %v8170_v32 = vunpack.i.l.bf16 %v9293_v34 }
 0x182   : > { %v972_v39 = vadd.f32 %v971_v13, %v9397_v52  ;;  %v1329_v18 = vpop.permute.xlu0 %1328  ;;  %v1035_v6 = vmax.f32 %v968_v37, 0.0  ;;  %v8215_v13 = vunpack.i.l.bf16 %v9474_v8 }
 0x183   : > { %v1036_v28 = vmax.f32 %v970_v3, 0.0  ;;  %3410 = vrot.lane.b32.xlu1 %v9399_v7, %s8942_s11  ;;  %1366 = vrot.lane.b32.xlu0 %v9421_v33, %s8938_s16 }
 0x184   : > { %v1037_v20 = vmax.f32 %v972_v39, 0.0 }
 0x185   : > { %v9607_v58 = vpack.c.bf16 %v1036_v28, %v1034_v36  ;;  %v9609_v25 = vpop.permute.xlu1 %3380 }
 0x186   : > { %13831 = vst [vmem:[#allocation30_spill] sm:$0xff] %v9609_v25  ;;  %v9611_v61 = vpack.c.bf16 %v1037_v20, %v1035_v6  ;;  %v9613_v22 = vpop.permute.xlu0 %1767  ;;  %v1423_v20 = vsel %vm1422_vm0, %v8170_v32, %v1329_v18  ;;  %v2265_v6 = vsel %vm2264_vm1, %v8215_v13, %v2171_v45 }
 0x187   : > { %1799 = vrot.lane.b32.xlu1 %v9401_v16, %s8939_s19  ;;  %2208 = vrot.lane.b32.xlu0 %v9421_v33, %s8940_s24 }
 0x188   : > { %13832 = vst [vmem:[#allocation31_spill] sm:$0xff] %v9611_v61 }
 0x189   : > { %v1331_v52 = vpop.permute.xlu1 %1330 }
 0x18a   : > { %v9620_v37 = vpop.permute.xlu0 %2609  ;;  %v1424_v28 = vsel %vm1422_vm0, %v1329_v18, %v1331_v52 }
 0x18b   : > { %13833 = vst [vmem:[#allocation32_spill] sm:$0xff] %v9620_v37  ;;  %2202 = vrot.lane.b32.xlu1 %v9401_v16, %s8940_s24  ;;  %1370 = vrot.lane.b32.xlu0 %v9439_v63, %s8938_s16 }
 0x18c   : > { %1487 = vmatprep.subr.bf16.mxu1 %v1424_v28 }
 0x18d   : > { %1488 = vmatpush1.bf16.msra.mxu1 %v1423_v20  ;;  %v9628_v3 = vpop.permute.xlu1 %1769 }
 0x18e   : > { %v2173_v39 = vpop.permute.xlu0 %2172 }
 0x18f   : > { %2641 = vrot.lane.b32.xlu1 %v9401_v16, %s8941_s29  ;;  %1809 = vrot.lane.b32.xlu0 %v9439_v63, %s8939_s19  ;;  %v2266_v36 = vsel %vm2264_vm1, %v2171_v45, %v2173_v39  ;;  %v8171_v39 = vunpack.i.h.bf16 %v9293_v34 }
 0x190   : > { %2329 = vmatprep.subr.bf16.mxu0 %v2266_v36 }
 0x191   : > { %2330 = vmatpush1.bf16.msra.mxu0 %v2265_v6  ;;  %v9637_v18 = vpop.permute.xlu1 %2611 }
 0x192   : > { %13834 = vst [vmem:[#allocation33_spill] sm:$0xff] %v9637_v18  ;;  %v9639_v52 = vpop.permute.xlu0 %1773 }
 0x193   : > { %1364 = vrot.lane.b32.xlu1 %v9419_v14, %s8938_s16  ;;  %2212 = vrot.lane.b32.xlu0 %v9439_v63, %s8940_s24 }
 0x195   : > { %v9645_v32 = vpop.permute.xlu1 %3382 }
 0x196   : > { %v2177_v28 = vpop.permute.xlu0 %2176 }
 0x197   : > { %2206 = vrot.lane.b32.xlu1 %v9419_v14, %s8940_s24  ;;  %2651 = vrot.lane.b32.xlu0 %v9439_v63, %s8941_s29 }
 0x199   : > { %v1335_v45 = vpop.permute.xlu1 %1334 }
 0x19a   : > { %v9651_v20 = vpop.permute.xlu0 %2615 }
 0x19b   : > { %13835 = vst [vmem:[#allocation34_spill] sm:$0xff] %v9651_v20  ;;  %3416 = vrot.lane.b32.xlu1 %v9419_v14, %s8942_s11  ;;  %3424 = vrot.lane.b32.xlu0 %v9443_v1, %s8942_s11  ;;  %v1425_v20 = vsel %vm1422_vm0, %v8171_v39, %v1335_v45 }
 0x19d   : > { %v9657_v13 = vpop.permute.xlu1 %3386 }
 0x19e   : > { %13836 = vst [vmem:[#allocation35_spill] sm:$0xff] %v9657_v13  ;;  %v1337_v36 = vpop.permute.xlu0 %1336  ;;  %v8216_v13 = vunpack.i.h.bf16 %v9474_v8  ;;  %v8175_v8 = vunpack.i.l.bf16 %v9410_v2 }
 0x19f   : > { %1805 = vrot.lane.b32.xlu1 %v9421_v33, %s8939_s19  ;;  %1376 = vrot.lane.b32.xlu0 %v9463_v11, %s8938_s16  ;;  %v1426_v6 = vsel %vm1422_vm0, %v1335_v45, %v1337_v36 }
 0x1a0   : > { %1489 = vmatprep.subr.bf16.mxu1 %v1426_v6  ;;  %v2267_v45 = vsel %vm2264_vm1, %v8216_v13, %v2177_v28  ;;  %v8225_v13 = vunpack.i.l.bf16 %v9492_v35 }
 0x1a1   : > { %1490 = vmatpush1.bf16.msra.mxu1 %v1425_v20  ;;  %v9666_v37 = vpop.permute.xlu1 %1775 }
 0x1a2   : > { %v9668_v18 = vpop.permute.xlu0 %3388 }
 0x1a3   : > { %13837 = vst [vmem:[#allocation36_spill] sm:$0xff] %v9668_v18  ;;  %2647 = vrot.lane.b32.xlu1 %v9421_v33, %s8941_s29  ;;  %1815 = vrot.lane.b32.xlu0 %v9463_v11, %s8939_s19 }
 0x1a5   : > { %v2179_v34 = vpop.permute.xlu1 %2178 }
 0x1a6   : > { %v9675_v25 = vpop.permute.xlu0 %1779  ;;  %v2268_v36 = vsel %vm2264_vm1, %v2177_v28, %v2179_v34 }
 0x1a7   : > { %3418 = vrot.lane.b32.xlu1 %v9421_v33, %s8942_s11  ;;  %2220 = vrot.lane.b32.xlu0 %v9465_v54, %s8940_s24 }
 0x1a8   : > { %2331 = vmatprep.subr.bf16.mxu0 %v2268_v36 }
 0x1a9   : > { %2332 = vmatpush1.bf16.msra.mxu0 %v2267_v45  ;;  %v9683_v20 = vpop.permute.xlu1 %2617 }
 0x1aa   : > { %13838 = vst [vmem:[#allocation37_spill] sm:$0xff] %v9683_v20  ;;  %v9685_v39 = vpop.permute.xlu0 %2621 }
 0x1ab   : > { %13839 = vst [vmem:[#allocation38_spill] sm:$0xff] %v9685_v39  ;;  %3422 = vrot.lane.b32.xlu1 %v9439_v63, %s8942_s11  ;;  %1821 = vrot.lane.b32.xlu0 %v9483_v49, %s8939_s19 }
 0x1ad   : > { %v1341_v6 = vpop.permute.xlu1 %1340 }
 0x1ae   : > { %v1343_v34 = vpop.permute.xlu0 %1342  ;;  %v1427_v18 = vsel %vm1422_vm0, %v8175_v8, %v1341_v6 }
 0x1af   : > { %1372 = vrot.lane.b32.xlu1 %v9443_v1, %s8938_s16  ;;  %2224 = vrot.lane.b32.xlu0 %v9483_v49, %s8940_s24  ;;  %v1428_v28 = vsel %vm1422_vm0, %v1341_v6, %v1343_v34 }
 0x1b0   : > { %1491 = vmatprep.subr.bf16.mxu1 %v1428_v28 }
 0x1b1   : > { %1492 = vmatpush1.bf16.msra.mxu1 %v1427_v18  ;;  %v2183_v36 = vpop.permute.xlu1 %2182 }
 0x1b2   : > { %v2185_v45 = vpop.permute.xlu0 %2184  ;;  %v2269_v39 = vsel %vm2264_vm1, %v8225_v13, %v2183_v36 }
 0x1b3   : > { %1811 = vrot.lane.b32.xlu1 %v9443_v1, %s8939_s19  ;;  %1384 = vrot.lane.b32.xlu0 %v9485_v53, %s8938_s16  ;;  %v2270_v8 = vsel %vm2264_vm1, %v2183_v36, %v2185_v45 }
 0x1b4   : > { %2333 = vmatprep.subr.bf16.mxu0 %v2270_v8 }
 0x1b5   : > { %2334 = vmatpush1.bf16.msra.mxu0 %v2269_v39  ;;  %v9705_v20 = vpop.permute.xlu1 %3392 }
 0x1b6   : > { %13840 = vst [vmem:[#allocation39_spill] sm:$0xff] %v9705_v20  ;;  %v1347_v6 = vpop.permute.xlu0 %1346  ;;  %v8176_v20 = vunpack.i.h.bf16 %v9410_v2 }
 0x1b7   : > { %2214 = vrot.lane.b32.xlu1 %v9443_v1, %s8940_s24  ;;  %1827 = vrot.lane.b32.xlu0 %v9503_v0, %s8939_s19 }
 0x1b9   : > { %v9711_v18 = vpop.permute.xlu1 %1781 }
 0x1ba   : > { %v9713_v34 = vpop.permute.xlu0 %1785 }
 0x1bb   : > { %13841 = vst [vmem:[#allocation40_spill] sm:$0xff] %v9713_v34  ;;  %2653 = vrot.lane.b32.xlu1 %v9443_v1, %s8941_s29  ;;  %1390 = vrot.lane.b32.xlu0 %v9507_v48, %s8938_s16 }
 0x1bd   : > { %v9719_v39 = vpop.permute.xlu1 %2623 }
 0x1be   : > { %13842 = vst [vmem:[#allocation41_spill] sm:$0xff] %v9719_v39  ;;  %v2189_v28 = vpop.permute.xlu0 %2188 }
 0x1bf   : > { %2218 = vrot.lane.b32.xlu1 %v9463_v11, %s8940_s24  ;;  %2232 = vrot.lane.b32.xlu0 %v9507_v48, %s8940_s24 }
 0x1c1   : > { %v9725_v13 = vpop.permute.xlu1 %3394 }
 0x1c2   : > { %13843 = vst [vmem:[#allocation42_spill] sm:$0xff] %v9725_v13  ;;  %v9727_v36 = vpop.permute.xlu0 %2627 }
 0x1c3   : > { %13844 = vst [vmem:[#allocation43_spill] sm:$0xff] %v9727_v36  ;;  %1378 = vrot.lane.b32.xlu1 %v9465_v54, %s8938_s16  ;;  %1394 = vrot.lane.b32.xlu0 %v9527_v17, %s8938_s16 }
 0x1c5   : > { %v9733_v45 = vpop.permute.xlu1 %3398 }
 0x1c6   : > { %13845 = vst [vmem:[#allocation44_spill] sm:$0xff] %v9733_v45  ;;  %v9735_v8 = vpop.permute.xlu0 %3400  ;;  %v1429_v45 = vsel %vm1422_vm0, %v8176_v20, %v1347_v6 }
 0x1c7   : > { %13846 = vst [vmem:[#allocation45_spill] sm:$0xff] %v9735_v8  ;;  %1817 = vrot.lane.b32.xlu1 %v9465_v54, %s8939_s19  ;;  %1833 = vrot.lane.b32.xlu0 %v9527_v17, %s8939_s19 }
 0x1c9   : > { %v1349_v39 = vpop.permute.xlu1 %1348 }
 0x1ca   : > { %v1353_v36 = vpop.permute.xlu0 %1352  ;;  %v1430_v13 = vsel %vm1422_vm0, %v1347_v6, %v1349_v39  ;;  %v8226_v39 = vunpack.i.h.bf16 %v9492_v35  ;;  %v8235_v35 = vunpack.i.l.bf16 %v9505_v15 }
 0x1cb   : > { %1382 = vrot.lane.b32.xlu1 %v9483_v49, %s8938_s16  ;;  %2236 = vrot.lane.b32.xlu0 %v9527_v17, %s8940_s24 }
 0x1cc   : > { %1493 = vmatprep.subr.bf16.mxu1 %v1430_v13  ;;  %v2271_v20 = vsel %vm2264_vm1, %v8226_v39, %v2189_v28 }
 0x1cd   : > { %1494 = vmatpush1.bf16.msra.mxu1 %v1429_v45  ;;  %v9748_v8 = vpop.permute.xlu1 %1787 }
 0x1ce   : > { %13847 = vst [vmem:[#allocation46_spill] sm:$0xff] %v9748_v8  ;;  %v9750_v34 = vpop.permute.xlu0 %1791 }
 0x1cf   : > { %13848 = vst [vmem:[#allocation47_spill] sm:$0xff] %v9750_v34  ;;  %1823 = vrot.lane.b32.xlu1 %v9485_v53, %s8939_s19  ;;  %1400 = vrot.lane.b32.xlu0 %v9547_v60, %s8938_s16 }
 0x1d1   : > { %v2191_v2 = vpop.permute.xlu1 %2190 }
 0x1d2   : > { %v9757_v63 = vpop.permute.xlu0 %2633  ;;  %v2272_v13 = vsel %vm2264_vm1, %v2189_v28, %v2191_v2 }
 0x1d3   : > { %13849 = vst [vmem:[#allocation48_spill] sm:$0xff] %v9757_v63  ;;  %2226 = vrot.lane.b32.xlu1 %v9485_v53, %s8940_s24  ;;  %1839 = vrot.lane.b32.xlu0 %v9547_v60, %s8939_s19 }
 0x1d4   : > { %2335 = vmatprep.subr.bf16.mxu0 %v2272_v13 }
 0x1d5   : > { %2336 = vmatpush1.bf16.msra.mxu0 %v2271_v20  ;;  %v9765_v6 = vpop.permute.xlu1 %2629 }
 0x1d6   : > { %13850 = vst [vmem:[#allocation49_spill] sm:$0xff] %v9765_v6  ;;  %v2197_v45 = vpop.permute.xlu0 %2196 }
 0x1d7   : > { %1388 = vrot.lane.b32.xlu1 %v9503_v0, %s8938_s16  ;;  %2244 = vrot.lane.b32.xlu0 %v9549_v24, %s8940_s24 }
 0x1d9   : > { %v2195_v2 = vpop.permute.xlu1 %2194 }
 0x1da   : > { %v9772_v63 = vpop.permute.xlu0 %1797  ;;  %v2274_v34 = vsel %vm2264_vm1, %v2195_v2, %v2197_v45  ;;  %v2273_v13 = vsel %vm2264_vm1, %v8235_v35, %v2195_v2  ;;  %v8180_v45 = vunpack.i.l.bf16 %v9305_v47 }
 0x1db   : > { %13851 = vst [vmem:[#allocation50_spill] sm:$0xff] %v9772_v63  ;;  %2230 = vrot.lane.b32.xlu1 %v9503_v0, %s8940_s24  ;;  %1845 = vrot.lane.b32.xlu0 %v9567_v5, %s8939_s19 }
 0x1dc   : > { %2337 = vmatprep.subr.bf16.mxu0 %v2274_v34  ;;  %v1431_v34 = vsel %vm1422_vm0, %v8180_v45, %v1353_v36 }
 0x1dd   : > { %2338 = vmatpush1.bf16.msra.mxu0 %v2273_v13  ;;  %v9780_v28 = vpop.permute.xlu1 %3404 }
 0x1de   : > { %13852 = vst [vmem:[#allocation51_spill] sm:$0xff] %v9780_v28  ;;  %v2201_v39 = vpop.permute.xlu0 %2200 }
 0x1df   : > { %1829 = vrot.lane.b32.xlu1 %v9507_v48, %s8939_s19  ;;  %2248 = vrot.lane.b32.xlu0 %v9567_v5, %s8940_s24 }
 0x1e1   : > { %v1355_v20 = vpop.permute.xlu1 %1354 }
 0x1e2   : > { %v9787_v35 = vpop.permute.xlu0 %2639  ;;  %v1432_v2 = vsel %vm1422_vm0, %v1353_v36, %v1355_v20 }
 0x1e3   : > { %13853 = vst [vmem:[#allocation52_spill] sm:$0xff] %v9787_v35  ;;  %1396 = vrot.lane.b32.xlu1 %v9529_v62, %s8938_s16  ;;  %1408 = vrot.lane.b32.xlu0 %v9571_v44, %s8938_s16 }
 0x1e4   : > { %1495 = vmatprep.subr.bf16.mxu1 %v1432_v2  ;;  %v8181_v2 = vunpack.i.h.bf16 %v9305_v47 }
 0x1e5   : > { %1496 = vmatpush1.bf16.msra.mxu1 %v1431_v34  ;;  %v9795_v13 = vpop.permute.xlu1 %1793 }
 0x1e6   : > { %13854 = vst [vmem:[#allocation53_spill] sm:$0xff] %v9795_v13  ;;  %v1361_v6 = vpop.permute.xlu0 %1360 }
 0x1e7   : > { %1835 = vrot.lane.b32.xlu1 %v9529_v62, %s8939_s19  ;;  %1851 = vrot.lane.b32.xlu0 %v9591_v23, %s8939_s19 }
 0x1e9   : > { %v9801_v20 = vpop.permute.xlu1 %2635 }
 0x1ea   : > { %13855 = vst [vmem:[#allocation54_spill] sm:$0xff] %v9801_v20  ;;  %v9803_v35 = vpop.permute.xlu0 %3412 }
 0x1eb   : > { %13856 = vst [vmem:[#allocation55_spill] sm:$0xff] %v9803_v35  ;;  %2238 = vrot.lane.b32.xlu1 %v9529_v62, %s8940_s24  ;;  %1414 = vrot.lane.b32.xlu0 %v9593_v10, %s8938_s16 }
 0x1ed   : > { %v9809_v36 = vpop.permute.xlu1 %3406 }
 0x1ee   : > { %13857 = vst [vmem:[#allocation56_spill] sm:$0xff] %v9809_v36  ;;  %v9811_v45 = vpop.permute.xlu0 %1803 }
 0x1ef   : > { %13858 = vst [vmem:[#allocation57_spill] sm:$0xff] %v9811_v45  ;;  %2242 = vrot.lane.b32.xlu1 %v9547_v60, %s8940_s24  ;;  %2256 = vrot.lane.b32.xlu0 %v9593_v10, %s8940_s24 }
 0x1f1   : > { %v1359_v34 = vpop.permute.xlu1 %1358 }
 0x1f2   : > { %v9818_v20 = vpop.permute.xlu0 %2645  ;;  %v1434_v35 = vsel %vm1422_vm0, %v1359_v34, %v1361_v6  ;;  %v1433_v28 = vsel %vm1422_vm0, %v8181_v2, %v1359_v34 }
 0x1f3   : > { %13859 = vst [vmem:[#allocation58_spill] sm:$0xff] %v9818_v20  ;;  %1402 = vrot.lane.b32.xlu1 %v9549_v24, %s8938_s16  ;;  %1418 = vrot.lane.b32.xlu0 %v9607_v58, %s8938_s16 }
 0x1f4   : > { %1497 = vmatprep.subr.bf16.mxu1 %v1434_v35 }
 0x1f5   : > { %1498 = vmatpush1.bf16.msra.mxu1 %v1433_v28  ;;  %v9826_v36 = vpop.permute.xlu1 %3410  ;;  %v8236_v28 = vunpack.i.h.bf16 %v9505_v15  ;;  %v13864_v15 = vmov 0  }
 0x1f6   : > { %13860 = vst [vmem:[#allocation59_spill] sm:$0xff] %v9826_v36  ;;  %v1367_v45 = vpop.permute.xlu0 %1366 }
 0x1f7   : > { %1841 = vrot.lane.b32.xlu1 %v9549_v24, %s8939_s19  ;;  %1857 = vrot.lane.b32.xlu0 %v9607_v58, %s8939_s19  ;;  %v2275_v20 = vsel %vm2264_vm1, %v8236_v28, %v2201_v39  ;;  %v8679_v28 = vld [vmem:[%s13698_s3 + $0x4] ss:$8 sps:$4 sm:$0xff]  }
 0x1f8   : > { %1519 = vmatprep.mubr.bf16.mxu1 %v8679_v28 }
 0x1f9   : > { %v9832_v47 = vpop.permute.xlu1 %1799 }
 0x1fa   : > { %13861 = vst [vmem:[#allocation60_spill] sm:$0xff] %v9832_v47  ;;  %v2209_v6 = vpop.permute.xlu0 %2208 }
 0x1fb   : > { %1406 = vrot.lane.b32.xlu1 %v9567_v5, %s8938_s16  ;;  %2260 = vrot.lane.b32.xlu0 %v9607_v58, %s8940_s24 }
 0x1fd   : > { %v2203_v35 = vpop.permute.xlu1 %2202 }
 0x1fe   : > { %v1371_v2 = vpop.permute.xlu0 %1370  ;;  %v2276_v34 = vsel %vm2264_vm1, %v2201_v39, %v2203_v35  ;;  %v8185_v35 = vunpack.i.l.bf16 %v9428_v38  ;;  %v8245_v39 = vunpack.i.l.bf16 %v9523_v55 }
 0x1ff   : > { %1847 = vrot.lane.b32.xlu1 %v9571_v44, %s8939_s19  ;;  %2657 = vrot.lane.b32.xlu0 %v9463_v11, %s8941_s29 }
 0x200   : > { %2339 = vmatprep.subr.bf16.mxu0 %v2276_v34 }
 0x201   : > { %2340 = vmatpush1.bf16.msra.mxu0 %v2275_v20  ;;  %v9845_v36 = vpop.permute.xlu1 %2641 }
 0x202   : > { %13862 = vst [vmem:[#allocation61_spill] sm:$0xff] %v9845_v36  ;;  %v9847_v63 = vpop.permute.xlu0 %1809 }
 0x203   : > { %13863 = vst [vmem:[#allocation62_spill] sm:$0xff] %v9847_v63  ;;  %2250 = vrot.lane.b32.xlu1 %v9571_v44, %s8940_s24  ;;  %8328 = vrot.lane.b32.xlu0 %v13864_v15, %s8941_s29 }
 0x205   : > { %v1365_v47 = vpop.permute.xlu1 %1364 }
 0x206   : > { %v2213_v13 = vpop.permute.xlu0 %2212  ;;  %v1436_v8 = vsel %vm1422_vm0, %v1365_v47, %v1367_v45  ;;  %v1435_v34 = vsel %vm1422_vm0, %v8185_v35, %v1365_v47 }
 0x207   : > { %1412 = vrot.lane.b32.xlu1 %v9591_v23, %s8938_s16  ;;  %8333 = vrot.lane.b32.xlu0 %v13864_v15, %s8942_s11 }
 0x208   : > { %1499 = vmatprep.subr.bf16.mxu1 %v1436_v8 }
 0x209   : > { %1500 = vmatpush1.bf16.msra.mxu1 %v1435_v34  ;;  %v2207_v20 = vpop.permute.xlu1 %2206 }
 0x20a   : > { %v9864_v36 = vpop.permute.xlu0 %2651  ;;  %v2278_v45 = vsel %vm2264_vm1, %v2207_v20, %v2209_v6  ;;  %v2277_v47 = vsel %vm2264_vm1, %v8245_v39, %v2207_v20  ;;  %v8684_v39 = vld [vmem:[%s13698_s3 + $0x104] ss:$8 sps:$4 sm:$0xff]  }
 0x20b   : > { %13865 = vst [vmem:[#allocation63_spill] sm:$0xff] %v9864_v36  ;;  %2254 = vrot.lane.b32.xlu1 %v9591_v23, %s8940_s24  ;;  %2663 = vrot.lane.b32.xlu0 %v9483_v49, %s8941_s29 }
 0x20c   : > { %2341 = vmatprep.subr.bf16.mxu0 %v2278_v45  ;;  %2361 = vmatprep.mubr.bf16.mxu0 %v8684_v39 }
 0x20d   : > { %2342 = vmatpush1.bf16.msra.mxu0 %v2277_v47  ;;  %v9872_v8 = vpop.permute.xlu1 %3416 }
 0x20e   : > { %13866 = vst [vmem:[#allocation64_spill] sm:$0xff] %v9872_v8  ;;  %v9874_v35 = vpop.permute.xlu0 %3424 }
 0x20f   : > { %13867 = vst [vmem:[#allocation65_spill] sm:$0xff] %v9874_v35  ;;  %1853 = vrot.lane.b32.xlu1 %v9593_v10, %s8939_s19  ;;  %3436 = vrot.lane.b32.xlu0 %v9485_v53, %s8942_s11  ;;  %v8186_v35 = vunpack.i.h.bf16 %v9428_v38 }
 0x211   : > { %v9880_v6 = vpop.permute.xlu1 %1805 }
 0x212   : > { %13868 = vst [vmem:[#allocation66_spill] sm:$0xff] %v9880_v6  ;;  %v1377_v34 = vpop.permute.xlu0 %1376 }
 0x213   : > { %1420 = vrot.lane.b32.xlu1 %v9611_v61, %s8938_s16  ;;  %2669 = vrot.lane.b32.xlu0 %v9503_v0, %s8941_s29 }
 0x215   : > { %v9889_v20 = vpop.permute.xlu1 %2647 }
 0x216   : > { %13869 = vst [vmem:[#allocation67_spill] sm:$0xff] %v9889_v20  ;;  %v9891_v28 = vpop.permute.xlu0 %1815 }
 0x217   : > { %13870 = vst [vmem:[#allocation68_spill] sm:$0xff] %v9891_v28  ;;  %1859 = vrot.lane.b32.xlu1 %v9611_v61, %s8939_s19  ;;  %8338 = vrot.lane.b32.xlu0 %v13864_v15, %s8941_s29 }
 0x219   : > { %v9897_v45 = vpop.permute.xlu1 %3418 }
 0x21a   : > { %13871 = vst [vmem:[#allocation69_spill] sm:$0xff] %v9897_v45  ;;  %v2221_v47 = vpop.permute.xlu0 %2220 }
 0x21b   : > { %2262 = vrot.lane.b32.xlu1 %v9611_v61, %s8940_s24  ;;  %8343 = vrot.lane.b32.xlu0 %v13864_v15, %s8942_s11 }
 0x21d   : > { %v9903_v39 = vpop.permute.xlu1 %3422 }
 0x21e   : > { %13872 = vst [vmem:[#allocation70_spill] sm:$0xff] %v9903_v39  ;;  %v9905_v36 = vpop.permute.xlu0 %1821  ;;  %v1437_v39 = vsel %vm1422_vm0, %v8186_v35, %v1371_v2 }
 0x21f   : > { %13873 = vst [vmem:[#allocation71_spill] sm:$0xff] %v9905_v36  ;;  %2659 = vrot.lane.b32.xlu1 %v9465_v54, %s8941_s29  ;;  %2675 = vrot.lane.b32.xlu0 %v9527_v17, %s8941_s29 }
 0x221   : > { %v1373_v20 = vpop.permute.xlu1 %1372 }
 0x222   : > { %v9912_v8 = vpop.permute.xlu0 %2224  ;;  %v1438_v45 = vsel %vm1422_vm0, %v1371_v2, %v1373_v20  ;;  %v8246_v20 = vunpack.i.h.bf16 %v9523_v55  ;;  %v8255_v55 = vunpack.i.l.bf16 %v9538_v42 }
 0x223   : > { %3430 = vrot.lane.b32.xlu1 %v9465_v54, %s8942_s11  ;;  %3448 = vrot.lane.b32.xlu0 %v9529_v62, %s8942_s11 }
 0x224   : > { %1501 = vmatprep.subr.bf16.mxu1 %v1438_v45  ;;  %v2279_v2 = vsel %vm2264_vm1, %v8246_v20, %v2213_v13  ;;  %v8190_v20 = vunpack.i.l.bf16 %v9317_v59 }
 0x225   : > { %1502 = vmatpush1.bf16.msra.mxu1 %v1437_v39  ;;  %v9920_v36 = vpop.permute.xlu1 %1811 }
 0x226   : > { %v1385_v28 = vpop.permute.xlu0 %1384 }
 0x227   : > { %3428 = vrot.lane.b32.xlu1 %v9463_v11, %s8942_s11  ;;  %2681 = vrot.lane.b32.xlu0 %v9547_v60, %s8941_s29 }
 0x229   : > { %v2215_v38 = vpop.permute.xlu1 %2214 }
 0x22a   : > { %v9927_v63 = vpop.permute.xlu0 %1827  ;;  %v2280_v6 = vsel %vm2264_vm1, %v2213_v13, %v2215_v38 }
 0x22b   : > { %13874 = vst [vmem:[#allocation72_spill] sm:$0xff] %v9927_v63  ;;  %2665 = vrot.lane.b32.xlu1 %v9485_v53, %s8941_s29  ;;  %8348 = vrot.lane.b32.xlu0 %v13864_v15, %s8941_s29 }
 0x22c   : > { %2343 = vmatprep.subr.bf16.mxu0 %v2280_v6 }
 0x22d   : > { %2344 = vmatpush1.bf16.msra.mxu0 %v2279_v2  ;;  %v9935_v35 = vpop.permute.xlu1 %2653 }
 0x22e   : > { %13875 = vst [vmem:[#allocation73_spill] sm:$0xff] %v9935_v35  ;;  %v1391_v45 = vpop.permute.xlu0 %1390 }
 0x22f   : > { %3434 = vrot.lane.b32.xlu1 %v9483_v49, %s8942_s11  ;;  %8353 = vrot.lane.b32.xlu0 %v13864_v15, %s8942_s11 }
 0x231   : > { %v2219_v39 = vpop.permute.xlu1 %2218 }
 0x232   : > { %v2233_v38 = vpop.permute.xlu0 %2232  ;;  %v2282_v63 = vsel %vm2264_vm1, %v2219_v39, %v2221_v47  ;;  %v2281_v6 = vsel %vm2264_vm1, %v8255_v55, %v2219_v39  ;;  %v1439_v47 = vsel %vm1422_vm0, %v8190_v20, %v1377_v34  ;;  %v8191_v39 = vunpack.i.h.bf16 %v9317_v59 }
 0x233   : > { %2671 = vrot.lane.b32.xlu1 %v9507_v48, %s8941_s29  ;;  %2687 = vrot.lane.b32.xlu0 %v9567_v5, %s8941_s29 }
 0x234   : > { %2345 = vmatprep.subr.bf16.mxu0 %v2282_v63 }
 0x235   : > { %2346 = vmatpush1.bf16.msra.mxu0 %v2281_v6  ;;  %v1379_v13 = vpop.permute.xlu1 %1378 }
 0x236   : > { %v9949_v2 = vpop.permute.xlu0 %1394  ;;  %v1440_v35 = vsel %vm1422_vm0, %v1377_v34, %v1379_v13 }
 0x237   : > { %3442 = vrot.lane.b32.xlu1 %v9507_v48, %s8942_s11  ;;  %3460 = vrot.lane.b32.xlu0 %v9571_v44, %s8942_s11 }
 0x238   : > { %1503 = vmatprep.subr.bf16.mxu1 %v1440_v35 }
 0x239   : > { %1504 = vmatpush1.bf16.msra.mxu1 %v1439_v47  ;;  %v9957_v55 = vpop.permute.xlu1 %1817 }
 0x23a   : > { %13876 = vst [vmem:[#allocation74_spill] sm:$0xff] %v9957_v55  ;;  %v9959_v63 = vpop.permute.xlu0 %1833 }
 0x23b   : > { %13877 = vst [vmem:[#allocation75_spill] sm:$0xff] %v9959_v63  ;;  %3440 = vrot.lane.b32.xlu1 %v9503_v0, %s8942_s11  ;;  %2693 = vrot.lane.b32.xlu0 %v9591_v23, %s8941_s29 }
 0x23d   : > { %v1383_v6 = vpop.permute.xlu1 %1382 }
 0x23e   : > { %v9966_v13 = vpop.permute.xlu0 %2236  ;;  %v1442_v35 = vsel %vm1422_vm0, %v1383_v6, %v1385_v28  ;;  %v1441_v34 = vsel %vm1422_vm0, %v8191_v39, %v1383_v6  ;;  %v8256_v28 = vunpack.i.h.bf16 %v9538_v42 }
 0x23f   : > { %2677 = vrot.lane.b32.xlu1 %v9529_v62, %s8941_s29  ;;  %8358 = vrot.lane.b32.xlu0 %v13864_v15, %s8941_s29 }
 0x240   : > { %1505 = vmatprep.subr.bf16.mxu1 %v1442_v35  ;;  %v8195_v35 = vunpack.i.l.bf16 %v9441_v9 }
 0x241   : > { %1506 = vmatpush1.bf16.msra.mxu1 %v1441_v34  ;;  %v9974_v20 = vpop.permute.xlu1 %1823  ;;  %v2283_v34 = vsel %vm2264_vm1, %v8256_v28, %v9912_v8 }
 0x242   : > { %13878 = vst [vmem:[#allocation76_spill] sm:$0xff] %v9974_v20  ;;  %v9976_v47 = vpop.permute.xlu0 %1400 }
 0x243   : > { %3446 = vrot.lane.b32.xlu1 %v9527_v17, %s8942_s11  ;;  %8363 = vrot.lane.b32.xlu0 %v13864_v15, %s8942_s11 }
 0x245   : > { %v2227_v59 = vpop.permute.xlu1 %2226 }
 0x246   : > { %v9983_v39 = vpop.permute.xlu0 %1839  ;;  %v2284_v6 = vsel %vm2264_vm1, %v9912_v8, %v2227_v59  ;;  %v8265_v59 = vunpack.i.l.bf16 %v9556_v30 }
 0x247   : > { %13879 = vst [vmem:[#allocation77_spill] sm:$0xff] %v9983_v39  ;;  %2683 = vrot.lane.b32.xlu1 %v9549_v24, %s8941_s29  ;;  %2699 = vrot.lane.b32.xlu0 %v9607_v58, %s8941_s29 }
 0x248   : > { %2347 = vmatprep.subr.bf16.mxu0 %v2284_v6 }
 0x249   : > { %2348 = vmatpush1.bf16.msra.mxu0 %v2283_v34  ;;  %v1389_v63 = vpop.permute.xlu1 %1388 }
 0x24a   : > { %v2245_v42 = vpop.permute.xlu0 %2244  ;;  %v1444_v39 = vsel %vm1422_vm0, %v1389_v63, %v1391_v45  ;;  %v1443_v20 = vsel %vm1422_vm0, %v8195_v35, %v1389_v63 }
 0x24b   : > { %3454 = vrot.lane.b32.xlu1 %v9549_v24, %s8942_s11  ;;  %3472 = vrot.lane.b32.xlu0 %v9611_v61, %s8942_s11 }
 0x24c   : > { %1507 = vmatprep.subr.bf16.mxu1 %v1444_v39 }
 0x24d   : > { %1508 = vmatpush1.bf16.msra.mxu1 %v1443_v20  ;;  %v2231_v6 = vpop.permute.xlu1 %2230  ;;  %v8196_v20 = vunpack.i.h.bf16 %v9441_v9 }
 0x24e   : > { %v10001_v55 = vpop.permute.xlu0 %1845  ;;  %v2286_v8 = vsel %vm2264_vm1, %v2231_v6, %v2233_v38  ;;  %v2285_v28 = vsel %vm2264_vm1, %v8265_v59, %v2231_v6 }
 0x24f   : > { %3452 = vrot.lane.b32.xlu1 %v9547_v60, %s8942_s11  ;;  %3817 = vrot.lane.b32.xlu0 %v9299_v41, %s8943_s12  ;;  %v1445_v34 = vsel %vm1422_vm0, %v8196_v20, %v9949_v2 }
 0x250   : > { %2349 = vmatprep.subr.bf16.mxu0 %v2286_v8  ;;  %v8266_v8 = vunpack.i.h.bf16 %v9556_v30 }
 0x251   : > { %2350 = vmatpush1.bf16.msra.mxu0 %v2285_v28  ;;  %v10009_v45 = vpop.permute.xlu1 %1829 }
 0x252   : > { %v10011_v63 = vpop.permute.xlu0 %2248  ;;  %v2287_v20 = vsel %vm2264_vm1, %v8266_v8, %v9966_v13 }
 0x253   : > { %2689 = vrot.lane.b32.xlu1 %v9571_v44, %s8941_s29  ;;  %3815 = vrot.lane.b32.xlu0 %v9297_v40, %s8943_s12 }
 0x255   : > { %v1397_v38 = vpop.permute.xlu1 %1396 }
 0x256   : > { %v1409_v39 = vpop.permute.xlu0 %1408  ;;  %v1446_v35 = vsel %vm1422_vm0, %v9949_v2, %v1397_v38  ;;  %v8275_v2 = vunpack.i.l.bf16 %v9569_v21 }
 0x257   : > { %3458 = vrot.lane.b32.xlu1 %v9567_v5, %s8942_s11  ;;  %3821 = vrot.lane.b32.xlu0 %v9313_v56, %s8943_s12 }
 0x258   : > { %1509 = vmatprep.subr.bf16.mxu1 %v1446_v35 }
 0x259   : > { %1510 = vmatpush1.bf16.msra.mxu1 %v1445_v34  ;;  %v10026_v59 = vpop.permute.xlu1 %1835 }
 0x25a   : > { %v10028_v6 = vpop.permute.xlu0 %1851 }
 0x25b   : > { %13880 = vst [vmem:[#allocation78_spill] sm:$0xff] %v10028_v6  ;;  %2695 = vrot.lane.b32.xlu1 %v9593_v10, %s8941_s29  ;;  %8373 = vrot.lane.b32.xlu0 %v13864_v15, %s8943_s12 }
 0x25d   : > { %v2239_v9 = vpop.permute.xlu1 %2238 }
 0x25e   : > { %v1415_v28 = vpop.permute.xlu0 %1414  ;;  %v2288_v38 = vsel %vm2264_vm1, %v9966_v13, %v2239_v9 }
 0x25f   : > { %3466 = vrot.lane.b32.xlu1 %v9593_v10, %s8942_s11  ;;  %3835 = vrot.lane.b32.xlu0 %v9357_v51, %s8943_s12 }
 0x260   : > { %2351 = vmatprep.subr.bf16.mxu0 %v2288_v38  ;;  %v8200_v38 = vunpack.i.l.bf16 %v9331_v29 }
 0x261   : > { %2352 = vmatpush1.bf16.msra.mxu0 %v2287_v20  ;;  %v2243_v35 = vpop.permute.xlu1 %2242 }
 0x262   : > { %v2257_v34 = vpop.permute.xlu0 %2256  ;;  %v2290_v30 = vsel %vm2264_vm1, %v2243_v35, %v2245_v42  ;;  %v2289_v56 = vsel %vm2264_vm1, %v8275_v2, %v2243_v35  ;;  %v1447_v42 = vsel %vm1422_vm0, %v8200_v38, %v9976_v47  ;;  %v8201_v2 = vunpack.i.h.bf16 %v9331_v29 }
 0x263   : > { %3464 = vrot.lane.b32.xlu1 %v9591_v23, %s8942_s11  ;;  %3841 = vrot.lane.b32.xlu0 %v9377_v26, %s8943_s12 }
 0x264   : > { %2353 = vmatprep.subr.bf16.mxu0 %v2290_v30 }
 0x265   : > { %2354 = vmatpush1.bf16.msra.mxu0 %v2289_v56  ;;  %v1403_v9 = vpop.permute.xlu1 %1402 }
 0x266   : > { %v10051_v6 = vpop.permute.xlu0 %1418  ;;  %v1448_v13 = vsel %vm1422_vm0, %v9976_v47, %v1403_v9 }
 0x267   : > { %2701 = vrot.lane.b32.xlu1 %v9611_v61, %s8941_s29  ;;  %3839 = vrot.lane.b32.xlu0 %v9375_v12, %s8943_s12 }
 0x268   : > { %1511 = vmatprep.subr.bf16.mxu1 %v1448_v13 }
 0x269   : > { %1512 = vmatpush1.bf16.msra.mxu1 %v1447_v42  ;;  %v10061_v56 = vpop.permute.xlu1 %1841 }
 0x26a   : > { %v10063_v8 = vpop.permute.xlu0 %1857 }
 0x26b   : > { %3470 = vrot.lane.b32.xlu1 %v9607_v58, %s8942_s11  ;;  %3845 = vrot.lane.b32.xlu0 %v9399_v7, %s8943_s12  ;;  %v8285_v7 = vunpack.i.l.bf16 %v9587_v19 }
 0x26d   : > { %v1407_v20 = vpop.permute.xlu1 %1406 }
 0x26e   : > { %v10070_v35 = vpop.permute.xlu0 %2260  ;;  %v1450_v30 = vsel %vm1422_vm0, %v1407_v20, %v1409_v39  ;;  %v1449_v47 = vsel %vm1422_vm0, %v8201_v2, %v1407_v20  ;;  %v8276_v39 = vunpack.i.h.bf16 %v9569_v21  ;;  %v8205_v2 = vunpack.i.l.bf16 %v9459_v46 }
 0x26f   : > { %8368 = vrot.lane.b32.xlu1 %v13864_v15, %s8943_s12  ;;  %8383 = vrot.lane.b32.xlu0 %v13864_v15, %s8943_s12 }
 0x270   : > { %1513 = vmatprep.subr.bf16.mxu1 %v1450_v30  ;;  %v2291_v20 = vsel %vm2264_vm1, %v8276_v39, %v10011_v63 }
 0x271   : > { %1514 = vmatpush1.bf16.msra.mxu1 %v1449_v47  ;;  %v10078_v9 = vpop.permute.xlu1 %1847 }
 0x272   : > { %v10080_v38 = vpop.permute.xlu0 %2657 }
 0x273   : > { %3823 = vrot.lane.b32.xlu1 %v9315_v57, %s8943_s12  ;;  %3859 = vrot.lane.b32.xlu0 %v9443_v1, %s8943_s12 }
 0x275   : > { %v2251_v29 = vpop.permute.xlu1 %2250 }
 0x276   : > { %v10087_v13 = vpop.permute.xlu0 %8328  ;;  %v2292_v42 = vsel %vm2264_vm1, %v10011_v63, %v2251_v29 }
 0x277   : > { %3829 = vrot.lane.b32.xlu1 %v9337_v4, %s8943_s12  ;;  %3865 = vrot.lane.b32.xlu0 %v9465_v54, %s8943_s12 }
 0x278   : > { %2355 = vmatprep.subr.bf16.mxu0 %v2292_v42 }
 0x279   : > { %2356 = vmatpush1.bf16.msra.mxu0 %v2291_v20  ;;  %v1413_v30 = vpop.permute.xlu1 %1412 }
 0x27a   : > { %v10098_v21 = vpop.permute.xlu0 %8333  ;;  %v1452_v47 = vsel %vm1422_vm0, %v1413_v30, %v1415_v28  ;;  %v1451_v29 = vsel %vm1422_vm0, %v8205_v2, %v1413_v30 }
 0x27b   : > { %3827 = vrot.lane.b32.xlu1 %v9335_v31, %s8943_s12  ;;  %3863 = vrot.lane.b32.xlu0 %v9463_v11, %s8943_s12 }
 0x27c   : > { %1515 = vmatprep.subr.bf16.mxu1 %v1452_v47 }
 0x27d   : > { %1516 = vmatpush1.bf16.msra.mxu1 %v1451_v29  ;;  %v2255_v42 = vpop.permute.xlu1 %2254 }
 0x27e   : > { %v10107_v63 = vpop.permute.xlu0 %2663  ;;  %v2294_v39 = vsel %vm2264_vm1, %v2255_v42, %v2257_v34  ;;  %v2293_v20 = vsel %vm2264_vm1, %v8285_v7, %v2255_v42  ;;  %v8206_v7 = vunpack.i.h.bf16 %v9459_v46  ;;  %v8677_v46 = vld [vmem:[%s13698_s3] ss:$8 sps:$4 sm:$0xff]  }
 0x27f   : > { %3833 = vrot.lane.b32.xlu1 %v9355_v50, %s8943_s12  ;;  %3869 = vrot.lane.b32.xlu0 %v9483_v49, %s8943_s12 }
 0x280   : > { %2357 = vmatprep.subr.bf16.mxu0 %v2294_v39  ;;  %v1453_v29 = vsel %vm1422_vm0, %v8206_v7, %v10051_v6  ;;  %v1863_v39 = vsel %vm1861_vm2, %v9613_v22, %v9628_v3 }
 0x281   : > { %2358 = vmatpush1.bf16.msra.mxu0 %v2293_v20  ;;  %v10115_v28 = vpop.permute.xlu1 %1853  ;;  %v8680_v20 = vld [vmem:[%s13698_s3 + $0x14] ss:$8 sps:$4 sm:$0xff]  }
 0x282   : > { %v10117_v2 = vpop.permute.xlu0 %3436 }
 0x283   : > { %8378 = vrot.lane.b32.xlu1 %v13864_v15, %s8943_s12  ;;  %8393 = vrot.lane.b32.xlu0 %v13864_v15, %s8943_s12 }
 0x285   : > { %v1421_v34 = vpop.permute.xlu1 %1420 }
 0x286   : > { %v10124_v30 = vpop.permute.xlu0 %2669  ;;  %v1454_v47 = vsel %vm1422_vm0, %v10051_v6, %v1421_v34  ;;  %v8210_v34 = vunpack.i.l.bf16 %v9347_v43 }
 0x287   : > { %3847 = vrot.lane.b32.xlu1 %v9401_v16, %s8943_s12  ;;  %3883 = vrot.lane.b32.xlu0 %v9529_v62, %s8943_s12 }
 0x288   : > { %1517 = vmatprep.subr.bf16.mxu1 %v1454_v47  ;;  %v1862_v7 = vsel %vm1861_vm2, %v8210_v34, %v9613_v22  ;;  %v1865_v47 = vsel %vm1861_vm2, %v9639_v52, %v9666_v37  ;;  %v8295_v22 = vunpack.i.l.bf16 %v9495_v27  ;;  %v8682_v37 = vld [vmem:[%s13698_s3 + $0x100] ss:$8 sps:$4 sm:$0xff]  }
 0x289   : > { %1518 = vmatpush1.bf16.msra.mxu1 %v1453_v29  ;;  %v10137_v42 = vpop.permute.xlu1 %1859  ;;  %v8211_v29 = vunpack.i.h.bf16 %v9347_v43 }
 0x28a   : > { %1926 = vmatprep.subr.bf16.mxu1 %v1863_v39  ;;  %v10146_v6 = vpop.permute.xlu0 %8338  ;;  %v8286_v39 = vunpack.i.h.bf16 %v9587_v19 }
 0x28b   : > { %3853 = vrot.lane.b32.xlu1 %v9421_v33, %s8943_s12  ;;  %3889 = vrot.lane.b32.xlu0 %v9549_v24, %s8943_s12  ;;  %v1864_v43 = vsel %vm1861_vm2, %v8211_v29, %v9639_v52  ;;  %v3478_v52 = vsel %vm3476_vm3, %v9645_v32, %v8295_v22  ;;  %v8296_v29 = vunpack.i.h.bf16 %v9495_v27  ;;  %v8695_v27 = vld [vmem:[%s13698_s3 + $0x114] ss:$8 sps:$4 sm:$0xff]  }
 0x28c   : > { %1520 = vmatmul.mubr.bf16.vlgmr.msra.gmra.mrb[0].mxu1 %v8677_v46  ;;  %v2295_v19 = vsel %vm2264_vm1, %v8286_v39, %v10070_v35  ;;  %v13882_v39 = vld [vmem:[#allocation11_spill] sm:$0xff] }
 0x28d   : > { %1927 = vmatpush1.bf16.msra.mxu1 %v1862_v7  ;;  %v2263_v3 = vpop.permute.xlu1 %2262  ;;  %1529 = vmatprep.mubr.bf16.mxu1 %v8680_v20  ;;  %v8685_v20 = vld [vmem:[%s13698_s3 + $0x10] ss:$8 sps:$4 sm:$0xff]   ;;  %v1867_v7 = vsel %vm1861_vm2, %v9675_v25, %v9711_v18 }
 0x28e   : > { %1928 = vmatprep.subr.bf16.mxu1 %v1865_v47  ;;  %v10159_v49 = vpop.permute.xlu0 %8343  ;;  %v2296_v46 = vsel %vm2264_vm1, %v10070_v35, %v2263_v3  ;;  %v13881_v35 = vld [vmem:[#allocation5_spill] sm:$0xff] }
 0x28f   : > { %3851 = vrot.lane.b32.xlu1 %v9419_v14, %s8943_s12  ;;  %3887 = vrot.lane.b32.xlu0 %v9547_v60, %s8943_s12  ;;  %v8220_v3 = vunpack.i.l.bf16 %v13881_v35  ;;  %v13891_v60 = vld [vmem:[#allocation42_spill] sm:$0xff] }
 0x290   : > { %2359 = vmatprep.subr.bf16.mxu0 %v2296_v46  ;;  %v13883_v46 = vld [vmem:[#allocation30_spill] sm:$0xff] }
 0x291   : > { %1929 = vmatpush1.bf16.msra.mxu1 %v1864_v43  ;;  %2360 = vmatpush1.bf16.msra.mxu0 %v2295_v19  ;;  %v10178_v34 = vpop.permute.xlu1 %2659  ;;  %v1866_v18 = vsel %vm1861_vm2, %v8220_v3, %v9675_v25  ;;  %v3477_v22 = vsel %vm3476_vm3, %v13883_v46, %v9645_v32  ;;  %v8686_v43 = vld [vmem:[%s13698_s3 + $0x24] ss:$8 sps:$4 sm:$0xff]   ;;  %v8221_v32 = vunpack.i.h.bf16 %v13881_v35  ;;  %v8688_v35 = vld [vmem:[%s13698_s3 + $0x20] ss:$8 sps:$4 sm:$0xff]  }
 0x292   : > { %1930 = vmatprep.subr.bf16.mxu1 %v1867_v7  ;;  %3541 = vmatprep.subr.bf16.mxu0 %v3478_v52  ;;  %v10186_v47 = vpop.permute.xlu0 %2675  ;;  %v13885_v7 = vld [vmem:[#allocation40_spill] sm:$0xff] }
 0x293   : > { %3857 = vrot.lane.b32.xlu1 %v13882_v39, %s8943_s12  ;;  %3893 = vrot.lane.b32.xlu0 %v9567_v5, %s8943_s12  ;;  %v13887_v46 = vld [vmem:[#allocation20_spill] sm:$0xff] }
 0x294   : > { %1530 = vmatmul.mubr.bf16.gmra.mrb[4].mxu1 %v8685_v20  ;;  %2362 = vmatmul.mubr.bf16.vlgmr.msra.gmra.mrb[64].mxu0 %v8682_v37  ;;  %v13884_v20 = vld [vmem:[#allocation46_spill] sm:$0xff]  ;;  %v13886_v37 = vld [vmem:[#allocation36_spill] sm:$0xff]  ;;  %v8305_v5 = vunpack.i.l.bf16 %v13887_v46  ;;  %v8306_v24 = vunpack.i.h.bf16 %v13887_v46 }
 0x295   : > { %1931 = vmatpush1.bf16.msra.mxu1 %v1866_v18  ;;  %3542 = vmatpush1.bf16.msra.mxu0 %v3477_v22  ;;  %v10204_v19 = vpop.permute.xlu1 %3430  ;;  %v1869_v25 = vsel %vm1861_vm2, %v13885_v7, %v13884_v20  ;;  %v3480_v52 = vsel %vm3476_vm3, %v13886_v37, %v8296_v29  ;;  %v1868_v18 = vsel %vm1861_vm2, %v8221_v32, %v13885_v7  ;;  %v13888_v22 = vld [vmem:[#allocation35_spill] sm:$0xff]  ;;  %v8701_v46 = vld [vmem:[%s13698_s3 + $0x124] ss:$8 sps:$4 sm:$0xff]  }
 0x296   : > { %1932 = vmatprep.subr.bf16.mxu1 %v1869_v25  ;;  %3543 = vmatprep.subr.bf16.mxu0 %v3480_v52  ;;  %v10212_v3 = vpop.permute.xlu0 %3448  ;;  %v3479_v29 = vsel %vm3476_vm3, %v13888_v22, %v13886_v37  ;;  %v8697_v20 = vld [vmem:[%s13698_s3 + $0x110] ss:$8 sps:$4 sm:$0xff]   ;;  %v13889_v52 = vld [vmem:[#allocation53_spill] sm:$0xff]  ;;  %v13901_v39 = vld [vmem:[#allocation56_spill] sm:$0xff] }
 0x297   : > { %8388 = vrot.lane.b32.xlu1 %v13864_v15, %s8943_s12  ;;  %8403 = vrot.lane.b32.xlu0 %v13864_v15, %s8943_s12  ;;  %v13890_v7 = vld [vmem:[#allocation47_spill] sm:$0xff]  ;;  %v13892_v37 = vld [vmem:[#allocation6_spill] sm:$0xff] }
 0x298   : > { %1539 = vmatprep.mubr.bf16.mxu1 %v8686_v43  ;;  %2371 = vmatprep.mubr.bf16.mxu0 %v8695_v27  ;;  %v1871_v32 = vsel %vm1861_vm2, %v13890_v7, %v13889_v52  ;;  %v3482_v43 = vsel %vm3476_vm3, %v13891_v60, %v8305_v5  ;;  %v8230_v22 = vunpack.i.l.bf16 %v13892_v37  ;;  %v13893_v5 = vld [vmem:[#allocation39_spill] sm:$0xff] }
 0x299   : > { %1933 = vmatpush1.bf16.msra.mxu1 %v1868_v18  ;;  %3544 = vmatpush1.bf16.msra.mxu0 %v3479_v29  ;;  %v10230_v25 = vpop.permute.xlu1 %3428  ;;  %v3481_v29 = vsel %vm3476_vm3, %v13893_v5, %v13891_v60  ;;  %v8689_v52 = vld [vmem:[%s13698_s3 + $0x34] ss:$8 sps:$4 sm:$0xff]   ;;  %v8231_v5 = vunpack.i.h.bf16 %v13892_v37 }
 0x29a   : > { %1934 = vmatprep.subr.bf16.mxu1 %v1871_v32  ;;  %3545 = vmatprep.subr.bf16.mxu0 %v3482_v43  ;;  %v10238_v27 = vpop.permute.xlu0 %2681  ;;  %v1870_v18 = vsel %vm1861_vm2, %v8230_v22, %v13890_v7  ;;  %v13895_v43 = vld [vmem:[#allocation50_spill] sm:$0xff]  ;;  %v13896_v22 = vld [vmem:[#allocation45_spill] sm:$0xff] }
 0x29b   : > { %3871 = vrot.lane.b32.xlu1 %v9485_v53, %s8943_s12  ;;  %3907 = vrot.lane.b32.xlu0 %v9611_v61, %s8943_s12  ;;  %v3484_v60 = vsel %vm3476_vm3, %v13896_v22, %v8306_v24  ;;  %v13897_v61 = vld [vmem:[#allocation26_spill] sm:$0xff]  ;;  %v13898_v24 = vld [vmem:[#allocation44_spill] sm:$0xff] }
 0x29c   : > { %1540 = vmatmul.mubr.bf16.gmra.mrb[8].mxu1 %v8688_v35  ;;  %2372 = vmatmul.mubr.bf16.gmra.mrb[68].mxu0 %v8697_v20  ;;  %v13894_v35 = vld [vmem:[#allocation60_spill] sm:$0xff]  ;;  %v8315_v62 = vunpack.i.l.bf16 %v13897_v61  ;;  %v3483_v37 = vsel %vm3476_vm3, %v13898_v24, %v13896_v22  ;;  %v13902_v22 = vld [vmem:[#allocation7_spill] sm:$0xff] }
 0x29d   : > { %1935 = vmatpush1.bf16.msra.mxu1 %v1870_v18  ;;  %3546 = vmatpush1.bf16.msra.mxu0 %v3481_v29  ;;  %v10256_v32 = vpop.permute.xlu1 %2665  ;;  %v1873_v7 = vsel %vm1861_vm2, %v13895_v43, %v13894_v35  ;;  %v1872_v18 = vsel %vm1861_vm2, %v8231_v5, %v13895_v43  ;;  %v8691_v29 = vld [vmem:[%s13698_s3 + $0x30] ss:$8 sps:$4 sm:$0xff]   ;;  %v8703_v35 = vld [vmem:[%s13698_s3 + $0x120] ss:$8 sps:$4 sm:$0xff]   ;;  %v8240_v24 = vunpack.i.l.bf16 %v13902_v22 }
 0x29e   : > { %1936 = vmatprep.subr.bf16.mxu1 %v1873_v7  ;;  %3547 = vmatprep.subr.bf16.mxu0 %v3484_v60  ;;  %v10264_v20 = vpop.permute.xlu0 %8348  ;;  %v13899_v60 = vld [vmem:[#allocation66_spill] sm:$0xff]  ;;  %v13900_v43 = vld [vmem:[#allocation57_spill] sm:$0xff] }
 0x29f   : > { %3877 = vrot.lane.b32.xlu1 %v9507_v48, %s8943_s12  ;;  %4252 = vrot.lane.b32.xlu0 %v9299_v41, %s8944_s22  ;;  %v1875_v5 = vsel %vm1861_vm2, %v13900_v43, %v13899_v60  ;;  %v8316_v48 = vunpack.i.h.bf16 %v13897_v61  ;;  %v8692_v60 = vld [vmem:[%s13698_s3 + $0x44] ss:$8 sps:$4 sm:$0xff]   ;;  %v8707_v61 = vld [vmem:[%s13698_s3 + $0x134] ss:$8 sps:$4 sm:$0xff]  }
 0x2a0   : > { %1549 = vmatprep.mubr.bf16.mxu1 %v8689_v52  ;;  %2381 = vmatprep.mubr.bf16.mxu0 %v8701_v46  ;;  %v3486_v52 = vsel %vm3476_vm3, %v13901_v39, %v8315_v62  ;;  %v13903_v62 = vld [vmem:[#allocation51_spill] sm:$0xff] }
 0x2a1   : > { %1937 = vmatpush1.bf16.msra.mxu1 %v1872_v18  ;;  %3548 = vmatpush1.bf16.msra.mxu0 %v3483_v37  ;;  %v10282_v7 = vpop.permute.xlu1 %3434  ;;  %v1874_v18 = vsel %vm1861_vm2, %v8240_v24, %v13900_v43  ;;  %v3485_v37 = vsel %vm3476_vm3, %v13903_v62, %v13901_v39  ;;  %v8241_v24 = vunpack.i.h.bf16 %v13902_v22  ;;  %v13907_v62 = vld [vmem:[#allocation29_spill] sm:$0xff] }
 0x2a2   : > { %1938 = vmatprep.subr.bf16.mxu1 %v1875_v5  ;;  %3549 = vmatprep.subr.bf16.mxu0 %v3486_v52  ;;  %v10290_v46 = vpop.permute.xlu0 %8353  ;;  %v13905_v52 = vld [vmem:[#allocation55_spill] sm:$0xff]  ;;  %v8694_v22 = vld [vmem:[%s13698_s3 + $0x40] ss:$8 sps:$4 sm:$0xff]  }
 0x2a3   : > { %3875 = vrot.lane.b32.xlu1 %v9503_v0, %s8943_s12  ;;  %4250 = vrot.lane.b32.xlu0 %v9297_v40, %s8944_s22  ;;  %v3488_v39 = vsel %vm3476_vm3, %v13905_v52, %v8316_v48  ;;  %v8325_v0 = vunpack.i.l.bf16 %v13907_v62 }
 0x2a4   : > { %1550 = vmatmul.mubr.bf16.gmra.mrb[12].mxu1 %v8691_v29  ;;  %2382 = vmatmul.mubr.bf16.gmra.mrb[72].mxu0 %v8703_v35  ;;  %v13904_v29 = vld [vmem:[#allocation62_spill] sm:$0xff] }
 0x2a5   : > { %1939 = vmatpush1.bf16.msra.mxu1 %v1874_v18  ;;  %3550 = vmatpush1.bf16.msra.mxu0 %v3485_v37  ;;  %v10308_v5 = vpop.permute.xlu1 %2671  ;;  %v1877_v43 = vsel %vm1861_vm2, %v13904_v29, %v9920_v36  ;;  %v13908_v36 = vld [vmem:[#allocation59_spill] sm:$0xff]  ;;  %v1876_v48 = vsel %vm1861_vm2, %v8241_v24, %v13904_v29  ;;  %v13912_v29 = vld [vmem:[#allocation9_spill] sm:$0xff] }
 0x2a6   : > { %1940 = vmatprep.subr.bf16.mxu1 %v1877_v43  ;;  %3551 = vmatprep.subr.bf16.mxu0 %v3488_v39  ;;  %v10316_v35 = vpop.permute.xlu0 %2687  ;;  %v3487_v18 = vsel %vm3476_vm3, %v13908_v36, %v13905_v52  ;;  %v8709_v37 = vld [vmem:[%s13698_s3 + $0x130] ss:$8 sps:$4 sm:$0xff]   ;;  %v13911_v36 = vld [vmem:[#allocation69_spill] sm:$0xff]  ;;  %v8250_v24 = vunpack.i.l.bf16 %v13912_v29  ;;  %v8251_v53 = vunpack.i.h.bf16 %v13912_v29 }
 0x2a7   : > { %13906 = vst [vmem:[#allocation5_spill] sm:$0xff] %v10316_v35  ;;  %3881 = vrot.lane.b32.xlu1 %v9527_v17, %s8943_s12  ;;  %8413 = vrot.lane.b32.xlu0 %v13864_v15, %s8945_s17  ;;  %v13909_v39 = vld [vmem:[#allocation74_spill] sm:$0xff]  ;;  %v13910_v17 = vld [vmem:[#allocation68_spill] sm:$0xff]  ;;  %v8326_v35 = vunpack.i.h.bf16 %v13907_v62 }
 0x2a8   : > { %1559 = vmatprep.mubr.bf16.mxu1 %v8692_v60  ;;  %2391 = vmatprep.mubr.bf16.mxu0 %v8707_v61  ;;  %v1879_v52 = vsel %vm1861_vm2, %v13910_v17, %v13909_v39  ;;  %v3490_v60 = vsel %vm3476_vm3, %v13911_v36, %v8325_v0  ;;  %v13913_v0 = vld [vmem:[#allocation64_spill] sm:$0xff]  ;;  %v8698_v39 = vld [vmem:[%s13698_s3 + $0x54] ss:$8 sps:$4 sm:$0xff]  }
 0x2a9   : > { %1941 = vmatpush1.bf16.msra.mxu1 %v1876_v48  ;;  %3552 = vmatpush1.bf16.msra.mxu0 %v3487_v18  ;;  %v10334_v43 = vpop.permute.xlu1 %3442  ;;  %v1878_v18 = vsel %vm1861_vm2, %v8250_v24, %v13910_v17  ;;  %v3489_v48 = vsel %vm3476_vm3, %v13913_v0, %v13911_v36  ;;  %v8713_v62 = vld [vmem:[%s13698_s3 + $0x144] ss:$8 sps:$4 sm:$0xff]   ;;  %v8715_v29 = vld [vmem:[%s13698_s3 + $0x140] ss:$8 sps:$4 sm:$0xff]  }
 0x2aa   : > { %1942 = vmatprep.subr.bf16.mxu1 %v1879_v52  ;;  %3553 = vmatprep.subr.bf16.mxu0 %v3490_v60  ;;  %v10342_v61 = vpop.permute.xlu0 %3460  ;;  %v8335_v52 = vunpack.i.l.bf16 %v10098_v21  ;;  %v13914_v17 = vld [vmem:[#allocation76_spill] sm:$0xff]  ;;  %v13915_v60 = vld [vmem:[#allocation71_spill] sm:$0xff]  ;;  %v13916_v36 = vld [vmem:[#allocation65_spill] sm:$0xff] }
 0x2ab   : > { %8398 = vrot.lane.b32.xlu1 %v13864_v15, %s8943_s12  ;;  %4258 = vrot.lane.b32.xlu0 %v9315_v57, %s8944_s22  ;;  %v1881_v24 = vsel %vm1861_vm2, %v13915_v60, %v13914_v17  ;;  %v3492_v0 = vsel %vm3476_vm3, %v13916_v36, %v8326_v35  ;;  %v1880_v17 = vsel %vm1861_vm2, %v8251_v53, %v13915_v60  ;;  %v8700_v35 = vld [vmem:[%s13698_s3 + $0x50] ss:$8 sps:$4 sm:$0xff]  }
 0x2ac   : > { %1560 = vmatmul.mubr.bf16.gmra.mrb[16].mxu1 %v8694_v22  ;;  %2392 = vmatmul.mubr.bf16.gmra.mrb[76].mxu0 %v8709_v37  ;;  %v13919_v60 = vld [vmem:[#allocation10_spill] sm:$0xff] }
 0x2ad   : > { %1943 = vmatpush1.bf16.msra.mxu1 %v1878_v18  ;;  %3554 = vmatpush1.bf16.msra.mxu0 %v3489_v48  ;;  %v10361_v22 = vpop.permute.xlu1 %3440  ;;  %v13917_v18 = vld [vmem:[#allocation70_spill] sm:$0xff] }
 0x2ae   : > { %1944 = vmatprep.subr.bf16.mxu1 %v1881_v24  ;;  %3555 = vmatprep.subr.bf16.mxu0 %v3492_v0  ;;  %v10369_v37 = vpop.permute.xlu0 %2693  ;;  %v3491_v48 = vsel %vm3476_vm3, %v13917_v18, %v13916_v36  ;;  %v8336_v24 = vunpack.i.h.bf16 %v10098_v21  ;;  %v13918_v36 = vld [vmem:[#allocation72_spill] sm:$0xff]  ;;  %v8260_v18 = vunpack.i.l.bf16 %v13919_v60  ;;  %v3493_v21 = vsel %vm3476_vm3, %v10230_v25, %v10204_v19 }
 0x2af   : > { %3895 = vrot.lane.b32.xlu1 %v9571_v44, %s8943_s12  ;;  %4661 = vrot.lane.b32.xlu0 %v9315_v57, %s8945_s17  ;;  %v1883_v53 = vsel %vm1861_vm2, %v13918_v36, %v10009_v45 }
 0x2b0   : > { %1569 = vmatprep.mubr.bf16.mxu1 %v8698_v39  ;;  %2401 = vmatprep.mubr.bf16.mxu0 %v8713_v62  ;;  %v3494_v39 = vsel %vm3476_vm3, %v10204_v19, %v8335_v52  ;;  %v1882_v45 = vsel %vm1861_vm2, %v8260_v18, %v13918_v36  ;;  %v8704_v52 = vld [vmem:[%s13698_s3 + $0x64] ss:$8 sps:$4 sm:$0xff]   ;;  %v13920_v19 = vld [vmem:[#allocation75_spill] sm:$0xff]  ;;  %v8261_v36 = vunpack.i.h.bf16 %v13919_v60  ;;  %v8346_v18 = vunpack.i.h.bf16 %v10159_v49 }
 0x2b1   : > { %1945 = vmatpush1.bf16.msra.mxu1 %v1880_v17  ;;  %3556 = vmatpush1.bf16.msra.mxu0 %v3491_v48  ;;  %v10387_v0 = vpop.permute.xlu1 %2677  ;;  %v8719_v48 = vld [vmem:[%s13698_s3 + $0x154] ss:$8 sps:$4 sm:$0xff]   ;;  %v8345_v17 = vunpack.i.l.bf16 %v10159_v49  ;;  %v1885_v25 = vsel %vm1861_vm2, %v13920_v19, %v10026_v59  ;;  %v8721_v60 = vld [vmem:[%s13698_s3 + $0x150] ss:$8 sps:$4 sm:$0xff]   ;;  %v3497_v49 = vsel %vm3476_vm3, %v10361_v22, %v10334_v43 }
 0x2b2   : > { %1946 = vmatprep.subr.bf16.mxu1 %v1883_v53  ;;  %v10395_v62 = vpop.permute.xlu0 %8358  ;;  %3557 = vmatprep.subr.bf16.mxu0 %v3494_v39  ;;  %v3495_v39 = vsel %vm3476_vm3, %v10282_v7, %v10117_v2  ;;  %v1884_v59 = vsel %vm1861_vm2, %v8261_v36, %v13920_v19  ;;  %v3500_v22 = vsel %vm3476_vm3, %v10212_v3, %v8346_v18  ;;  %v8727_v18 = vld [vmem:[%s13698_s3 + $0x160] ss:$8 sps:$4 sm:$0xff]  }
 0x2b3   : > { %3901 = vrot.lane.b32.xlu1 %v9593_v10, %s8943_s12  ;;  %4264 = vrot.lane.b32.xlu0 %v9337_v4, %s8944_s22 }
 0x2b4   : > { %1570 = vmatmul.mubr.bf16.gmra.mrb[20].mxu1 %v8700_v35  ;;  %2402 = vmatmul.mubr.bf16.gmra.mrb[80].mxu0 %v8715_v29  ;;  %v3496_v35 = vsel %vm3476_vm3, %v10117_v2, %v8336_v24  ;;  %v8706_v24 = vld [vmem:[%s13698_s3 + $0x60] ss:$8 sps:$4 sm:$0xff]  }
 0x2b5   : > { %1947 = vmatpush1.bf16.msra.mxu1 %v1882_v45  ;;  %3558 = vmatpush1.bf16.msra.mxu0 %v3493_v21  ;;  %v3447_v53 = vpop.permute.xlu1 %3446  ;;  %v13921_v2 = vld [vmem:[#allocation77_spill] sm:$0xff]  ;;  %v3498_v45 = vsel %vm3476_vm3, %v10334_v43, %v8345_v17  ;;  %v8710_v17 = vld [vmem:[%s13698_s3 + $0x74] ss:$8 sps:$4 sm:$0xff]   ;;  %v1889_v43 = vsel %vm1861_vm2, %v10001_v55, %v10078_v9 }
 0x2b6   : > { %1948 = vmatprep.subr.bf16.mxu1 %v1885_v25  ;;  %v10419_v29 = vpop.permute.xlu0 %8363  ;;  %3559 = vmatprep.subr.bf16.mxu0 %v3496_v35  ;;  %v1887_v7 = vsel %vm1861_vm2, %v13921_v2, %v10061_v56  ;;  %v8725_v25 = vld [vmem:[%s13698_s3 + $0x164] ss:$8 sps:$4 sm:$0xff]   ;;  %v8355_v35 = vunpack.i.l.bf16 %v10290_v46 }
 0x2b7   : > { %3899 = vrot.lane.b32.xlu1 %v9591_v23, %s8943_s12  ;;  %4262 = vrot.lane.b32.xlu0 %v9335_v31, %s8944_s22 }
 0x2b8   : > { %1579 = vmatprep.mubr.bf16.mxu1 %v8704_v52  ;;  %2411 = vmatprep.mubr.bf16.mxu0 %v8719_v48  ;;  %v13922_v52 = vld [vmem:[#allocation12_spill] sm:$0xff] }
 0x2b9   : > { %1949 = vmatpush1.bf16.msra.mxu1 %v1884_v59  ;;  %3560 = vmatpush1.bf16.msra.mxu0 %v3495_v39  ;;  %v10437_v21 = vpop.permute.xlu1 %2683  ;;  %v8270_v19 = vunpack.i.l.bf16 %v13922_v52  ;;  %v8271_v39 = vunpack.i.h.bf16 %v13922_v52 }
 0x2ba   : > { %1950 = vmatprep.subr.bf16.mxu1 %v1887_v7  ;;  %v10445_v48 = vpop.permute.xlu0 %2699  ;;  %3561 = vmatprep.subr.bf16.mxu0 %v3498_v45  ;;  %v13924_v45 = vld [vmem:[#allocation13_spill] sm:$0xff] }
 0x2bb   : > { %3905 = vrot.lane.b32.xlu1 %v9607_v58, %s8943_s12  ;;  %8423 = vrot.lane.b32.xlu0 %v13864_v15, %s8945_s17  ;;  %v1886_v56 = vsel %vm1861_vm2, %v8270_v19, %v13921_v2  ;;  %v1888_v9 = vsel %vm1861_vm2, %v8271_v39, %v10001_v55  ;;  %v8356_v2 = vunpack.i.h.bf16 %v10290_v46  ;;  %v8280_v52 = vunpack.i.l.bf16 %v13924_v45  ;;  %v8718_v46 = vld [vmem:[%s13698_s3 + $0x84] ss:$8 sps:$4 sm:$0xff]  }
 0x2bc   : > { %1580 = vmatmul.mubr.bf16.gmra.mrb[24].mxu1 %v8706_v24  ;;  %2412 = vmatmul.mubr.bf16.gmra.mrb[84].mxu0 %v8721_v60  ;;  %v3499_v24 = vsel %vm3476_vm3, %v3447_v53, %v10212_v3  ;;  %v8712_v60 = vld [vmem:[%s13698_s3 + $0x70] ss:$8 sps:$4 sm:$0xff]  }
 0x2bd   : > { %1951 = vmatpush1.bf16.msra.mxu1 %v1886_v56  ;;  %3562 = vmatpush1.bf16.msra.mxu0 %v3497_v49  ;;  %v3455_v36 = vpop.permute.xlu1 %3454  ;;  %v13923_v3 = vld [vmem:[#allocation78_spill] sm:$0xff] }
 0x2be   : > { %1952 = vmatprep.subr.bf16.mxu1 %v1889_v43  ;;  %v10469_v59 = vpop.permute.xlu0 %3472  ;;  %3563 = vmatprep.subr.bf16.mxu0 %v3500_v22  ;;  %v1891_v53 = vsel %vm1861_vm2, %v13923_v3, %v10115_v28  ;;  %v3502_v55 = vsel %vm3476_vm3, %v3455_v36, %v8355_v35  ;;  %v1890_v28 = vsel %vm1861_vm2, %v8280_v52, %v13923_v3  ;;  %v8731_v56 = vld [vmem:[%s13698_s3 + $0x174] ss:$8 sps:$4 sm:$0xff]  }
 0x2bf   : > { %8408 = vrot.lane.b32.xlu1 %v13864_v15, %s8944_s22  ;;  %4270 = vrot.lane.b32.xlu0 %v9357_v51, %s8944_s22  ;;  %v3504_v35 = vsel %vm3476_vm3, %v10342_v61, %v8356_v2  ;;  %v13927_v2 = vld [vmem:[#allocation14_spill] sm:$0xff] }
 0x2c0   : > { %1589 = vmatprep.mubr.bf16.mxu1 %v8710_v17  ;;  %2421 = vmatprep.mubr.bf16.mxu0 %v8725_v25  ;;  %v1893_v25 = vsel %vm1861_vm2, %v10063_v8, %v10137_v42  ;;  %v8716_v42 = vld [vmem:[%s13698_s3 + $0x80] ss:$8 sps:$4 sm:$0xff]  }
 0x2c1   : > { %1953 = vmatpush1.bf16.msra.mxu1 %v1888_v9  ;;  %3564 = vmatpush1.bf16.msra.mxu0 %v3499_v24  ;;  %v3453_v7 = vpop.permute.xlu1 %3452  ;;  %v13925_v24 = vld [vmem:[#allocation33_spill] sm:$0xff]  ;;  %v13926_v9 = vld [vmem:[#allocation32_spill] sm:$0xff] }
 0x2c2   : > { %v3501_v19 = vsel %vm3476_vm3, %v3453_v7, %v3455_v36  ;;  %1954 = vmatprep.subr.bf16.mxu1 %v1891_v53  ;;  %v10492_v49 = vpop.permute.xlu0 %3817  ;;  %3565 = vmatprep.subr.bf16.mxu0 %v3502_v55  ;;  %v8281_v36 = vunpack.i.h.bf16 %v13924_v45  ;;  %v8290_v7 = vunpack.i.l.bf16 %v13927_v2  ;;  %v8733_v53 = vld [vmem:[%s13698_s3 + $0x170] ss:$8 sps:$4 sm:$0xff]   ;;  %v13928_v55 = vld [vmem:[#allocation4_spill] sm:$0xff] }
 0x2c3   : > { %4655 = vrot.lane.b32.xlu1 %v9299_v41, %s8945_s17  ;;  %4673 = vrot.lane.b32.xlu0 %v9357_v51, %s8945_s17 }
 0x2c4   : > { %1590 = vmatmul.mubr.bf16.gmra.mrb[28].mxu1 %v8712_v60  ;;  %2422 = vmatmul.mubr.bf16.gmra.mrb[88].mxu0 %v8727_v18  ;;  %v1892_v22 = vsel %vm1861_vm2, %v8281_v36, %v10063_v8  ;;  %v2705_v60 = vsel %vm2703_vm4, %v13926_v9, %v13925_v24  ;;  %v8722_v18 = vld [vmem:[%s13698_s3 + $0x94] ss:$8 sps:$4 sm:$0xff]   ;;  %v2704_v45 = vsel %vm2703_vm4, %v8290_v7, %v13926_v9 }
 0x2c5   : > { %1955 = vmatpush1.bf16.msra.mxu1 %v1890_v28  ;;  %3566 = vmatpush1.bf16.msra.mxu0 %v3501_v19  ;;  %v10506_v17 = vpop.permute.xlu1 %2689  ;;  %v13929_v19 = vld [vmem:[#allocation37_spill] sm:$0xff]  ;;  %v13930_v28 = vld [vmem:[#allocation34_spill] sm:$0xff] }
 0x2c6   : > { %1956 = vmatprep.subr.bf16.mxu1 %v1893_v25  ;;  %v10514_v43 = vpop.permute.xlu0 %3815  ;;  %3567 = vmatprep.subr.bf16.mxu0 %v3504_v35  ;;  %v8365_v25 = vunpack.i.l.bf16 %v10419_v29  ;;  %v13932_v24 = vld [vmem:[#allocation38_spill] sm:$0xff] }
 0x2c7   : > { %4653 = vrot.lane.b32.xlu1 %v9297_v40, %s8945_s17  ;;  %4276 = vrot.lane.b32.xlu0 %v9377_v26, %s8944_s22 }
 0x2c8   : > { %1958 = vmatprep.mubr.bf16.mxu1 %v8718_v46  ;;  %2431 = vmatprep.mubr.bf16.mxu0 %v8731_v56  ;;  %v2707_v46 = vsel %vm2703_vm4, %v13930_v28, %v13929_v19  ;;  %v8291_v56 = vunpack.i.h.bf16 %v13927_v2  ;;  %v13934_v19 = vld [vmem:[#allocation49_spill] sm:$0xff] }
 0x2c9   : > { %1957 = vmatpush1.bf16.msra.mxu1 %v1892_v22  ;;  %v3459_v39 = vpop.permute.xlu1 %3458  ;;  %v8724_v22 = vld [vmem:[%s13698_s3 + $0x90] ss:$8 sps:$4 sm:$0xff]  }
 0x2ca   : > { %v3503_v8 = vsel %vm3476_vm3, %v3459_v39, %v10342_v61  ;;  %2768 = vmatprep.subr.bf16.mxu1 %v2705_v60  ;;  %v10534_v3 = vpop.permute.xlu0 %3821  ;;  %v8739_v61 = vld [vmem:[%s13698_s3 + $0x284] ss:$8 sps:$4 sm:$0xff]   ;;  %v2706_v36 = vsel %vm2703_vm4, %v8291_v56, %v13930_v28  ;;  %v13935_v28 = vld [vmem:[#allocation43_spill] sm:$0xff] }
 0x2cb   : > { %4256 = vrot.lane.b32.xlu1 %v13928_v55, %s8944_s22  ;;  %4274 = vrot.lane.b32.xlu0 %v9375_v12, %s8944_s22  ;;  %v13931_v39 = vld [vmem:[#allocation41_spill] sm:$0xff] }
 0x2cc   : > { %1959 = vmatmul.mubr.bf16.vlgmr.msra.gmra.mrb[32].mxu1 %v8716_v42  ;;  %3568 = vmatpush1.bf16.msra.mxu0 %v3503_v8  ;;  %v2709_v9 = vsel %vm2703_vm4, %v13932_v24, %v13931_v39  ;;  %v8728_v60 = vld [vmem:[%s13698_s3 + $0xa4] ss:$8 sps:$4 sm:$0xff]  }
 0x2cd   : > { %2769 = vmatpush1.bf16.msra.mxu1 %v2704_v45  ;;  %v10548_v52 = vpop.permute.xlu1 %2695  ;;  %1968 = vmatprep.mubr.bf16.mxu1 %v8722_v18  ;;  %v13933_v18 = vld [vmem:[#allocation19_spill] sm:$0xff] }
 0x2ce   : > { %2770 = vmatprep.subr.bf16.mxu1 %v2707_v46  ;;  %v10555_v35 = vpop.permute.xlu0 %8373  ;;  %2432 = vmatmul.mubr.bf16.gmra.mrb[92].mxu0 %v8733_v53  ;;  %v8300_v2 = vunpack.i.l.bf16 %v13933_v18  ;;  %v8366_v53 = vunpack.i.h.bf16 %v10419_v29  ;;  %v2711_v46 = vsel %vm2703_vm4, %v13935_v28, %v13934_v19  ;;  %v8301_v56 = vunpack.i.h.bf16 %v13933_v18  ;;  %v8734_v18 = vld [vmem:[%s13698_s3 + $0xb4] ss:$8 sps:$4 sm:$0xff]   ;;  %v13939_v19 = vld [vmem:[#allocation61_spill] sm:$0xff] }
 0x2cf   : > { %4659 = vrot.lane.b32.xlu1 %v13928_v55, %s8945_s17  ;;  %8433 = vrot.lane.b32.xlu0 %v13864_v15, %s8945_s17 }
 0x2d0   : > { %3573 = vmatprep.mubr.bf16.mxu0 %v8739_v61  ;;  %v2708_v45 = vsel %vm2703_vm4, %v8300_v2, %v13932_v24  ;;  %v2710_v29 = vsel %vm2703_vm4, %v8301_v56, %v13935_v28  ;;  %v13936_v24 = vld [vmem:[#allocation54_spill] sm:$0xff]  ;;  %v13938_v2 = vld [vmem:[#allocation23_spill] sm:$0xff]  ;;  %v13940_v28 = vld [vmem:[#allocation52_spill] sm:$0xff] }
 0x2d1   : > { %2771 = vmatpush1.bf16.msra.mxu1 %v2706_v36  ;;  %v3467_v42 = vpop.permute.xlu1 %3466  ;;  %v8311_v56 = vunpack.i.h.bf16 %v13938_v2 }
 0x2d2   : > { %2772 = vmatprep.subr.bf16.mxu1 %v2709_v9  ;;  %v10573_v7 = vpop.permute.xlu0 %3835  ;;  %v3506_v8 = vsel %vm3476_vm3, %v3467_v42, %v8365_v25  ;;  %v13937_v9 = vld [vmem:[#allocation48_spill] sm:$0xff] }
 0x2d3   : > { %8418 = vrot.lane.b32.xlu1 %v13864_v15, %s8944_s22  ;;  %4282 = vrot.lane.b32.xlu0 %v9401_v16, %s8944_s22 }
 0x2d4   : > { %1969 = vmatmul.mubr.bf16.gmra.mrb[36].mxu1 %v8724_v22  ;;  %3569 = vmatprep.subr.bf16.mxu0 %v3506_v8  ;;  %v3508_v22 = vsel %vm3476_vm3, %v10469_v59, %v8366_v53  ;;  %v8310_v8 = vunpack.i.l.bf16 %v13938_v2  ;;  %v13943_v2 = vld [vmem:[#allocation28_spill] sm:$0xff] }
 0x2d5   : > { %2773 = vmatpush1.bf16.msra.mxu1 %v2708_v45  ;;  %v3465_v61 = vpop.permute.xlu1 %3464  ;;  %1978 = vmatprep.mubr.bf16.mxu1 %v8728_v60  ;;  %v2713_v60 = vsel %vm2703_vm4, %v13937_v9, %v13936_v24 }
 0x2d6   : > { %v3505_v25 = vsel %vm3476_vm3, %v3465_v61, %v3467_v42  ;;  %2774 = vmatprep.subr.bf16.mxu1 %v2711_v46  ;;  %v10588_v36 = vpop.permute.xlu0 %3841  ;;  %v8730_v42 = vld [vmem:[%s13698_s3 + $0xa0] ss:$8 sps:$4 sm:$0xff]   ;;  %v2712_v45 = vsel %vm2703_vm4, %v8310_v8, %v13937_v9  ;;  %v2715_v46 = vsel %vm2703_vm4, %v13940_v28, %v13939_v19  ;;  %v13941_v9 = vld [vmem:[#allocation67_spill] sm:$0xff]  ;;  %v8320_v8 = vunpack.i.l.bf16 %v13943_v2 }
 0x2d7   : > { %4667 = vrot.lane.b32.xlu1 %v9337_v4, %s8945_s17  ;;  %4685 = vrot.lane.b32.xlu0 %v9401_v16, %s8945_s17 }
 0x2d8   : > { %3570 = vmatpush1.bf16.msra.mxu0 %v3505_v25 }
 0x2d9   : > { %2775 = vmatpush1.bf16.msra.mxu1 %v2710_v29  ;;  %3571 = vmatprep.subr.bf16.mxu0 %v3508_v22  ;;  %v10601_v39 = vpop.permute.xlu1 %2701  ;;  %v2714_v22 = vsel %vm2703_vm4, %v8311_v56, %v13940_v28  ;;  %v8740_v56 = vld [vmem:[%s13698_s3 + $0xc4] ss:$8 sps:$4 sm:$0xff]  }
 0x2da   : > { %2776 = vmatprep.subr.bf16.mxu1 %v2713_v60  ;;  %v10610_v53 = vpop.permute.xlu0 %3839  ;;  %v13942_v60 = vld [vmem:[#allocation58_spill] sm:$0xff] }
 0x2db   : > { %4665 = vrot.lane.b32.xlu1 %v9335_v31, %s8945_s17  ;;  %4288 = vrot.lane.b32.xlu0 %v9421_v33, %s8944_s22  ;;  %v2716_v28 = vsel %vm2703_vm4, %v8320_v8, %v13942_v60 }
 0x2dc   : > { %1979 = vmatmul.mubr.bf16.gmra.mrb[40].mxu1 %v8730_v42  ;;  %v8736_v42 = vld [vmem:[%s13698_s3 + $0xb0] ss:$8 sps:$4 sm:$0xff]  }
 0x2dd   : > { %2777 = vmatpush1.bf16.msra.mxu1 %v2712_v45  ;;  %v3471_v61 = vpop.permute.xlu1 %3470  ;;  %1988 = vmatprep.mubr.bf16.mxu1 %v8734_v18  ;;  %v2717_v18 = vsel %vm2703_vm4, %v13942_v60, %v13941_v9  ;;  %v13944_v9 = vld [vmem:[#allocation73_spill] sm:$0xff]  ;;  %v8746_v60 = vld [vmem:[%s13698_s3 + $0x294] ss:$8 sps:$4 sm:$0xff]  }
 0x2de   : > { %v3507_v25 = vsel %vm3476_vm3, %v3471_v61, %v10469_v59  ;;  %2778 = vmatprep.subr.bf16.mxu1 %v2715_v46  ;;  %v10624_v29 = vpop.permute.xlu0 %3845  ;;  %v8737_v59 = vld [vmem:[%s13698_s3 + $0x280] ss:$8 sps:$4 sm:$0xff]  }
 0x2df   : > { %4268 = vrot.lane.b32.xlu1 %v9355_v50, %s8944_s22  ;;  %4286 = vrot.lane.b32.xlu0 %v9419_v14, %s8944_s22 }
 0x2e0   : > { %3572 = vmatpush1.bf16.msra.mxu0 %v3507_v25  ;;  %v3912_v25 = vsel %vm3911_vm5, %v10514_v43, %v10492_v49  ;;  %v8330_v43 = vunpack.i.l.bf16 %v10087_v13 }
 0x2e1   : > { %2779 = vmatpush1.bf16.msra.mxu1 %v2714_v22  ;;  %v8369_v24 = vpop.permute.xlu1 %8368 }
 0x2e2   : > { %v8370_v45 = vunpack.i.l.bf16 %v8369_v24  ;;  %2780 = vmatprep.subr.bf16.mxu1 %v2717_v18  ;;  %v10642_v61 = vpop.permute.xlu0 %8383  ;;  %v8371_v19 = vunpack.i.h.bf16 %v8369_v24  ;;  %v13945_v24 = vld [vmem:[#allocation63_spill] sm:$0xff]  ;;  %v8375_v18 = vunpack.i.l.bf16 %v10555_v35 }
 0x2e3   : > { %4671 = vrot.lane.b32.xlu1 %v9355_v50, %s8945_s17  ;;  %8443 = vrot.lane.b32.xlu0 %v13864_v15, %s8945_s17 }
 0x2e4   : > { %1989 = vmatmul.mubr.bf16.gmra.mrb[44].mxu1 %v8736_v42  ;;  %v3913_v46 = vsel %vm3911_vm5, %v10492_v49, %v8370_v45  ;;  %3574 = vmatmul.mubr.bf16.vlgmr.msra.gmra.mrb[96].mxu0 %v8737_v59  ;;  %v2719_v42 = vsel %vm2703_vm4, %v13945_v24, %v13944_v9  ;;  %v8321_v59 = vunpack.i.h.bf16 %v13943_v2  ;;  %v8742_v45 = vld [vmem:[%s13698_s3 + $0xc0] ss:$8 sps:$4 sm:$0xff]  }
 0x2e5   : > { %2781 = vmatpush1.bf16.msra.mxu1 %v2716_v28  ;;  %v3824_v22 = vpop.permute.xlu1 %3823  ;;  %3976 = vmatprep.subr.bf16.mxu0 %v3913_v46 }
 0x2e6   : > { %2782 = vmatprep.subr.bf16.mxu1 %v2719_v42  ;;  %v10666_v8 = vpop.permute.xlu0 %3859  ;;  %3977 = vmatpush1.bf16.msra.mxu0 %v3912_v25  ;;  %v3915_v49 = vsel %vm3911_vm5, %v3824_v22, %v8371_v19  ;;  %v2718_v2 = vsel %vm2703_vm4, %v8321_v59, %v13945_v24  ;;  %v2721_v19 = vsel %vm2703_vm4, %v10080_v38, %v10178_v34  ;;  %v8743_v25 = vld [vmem:[%s13698_s3 + $0xd4] ss:$8 sps:$4 sm:$0xff]   ;;  %v8750_v24 = vld [vmem:[%s13698_s3 + $0x290] ss:$8 sps:$4 sm:$0xff]   ;;  %v8331_v34 = vunpack.i.h.bf16 %v10087_v13  ;;  %v8752_v42 = vld [vmem:[%s13698_s3 + $0x2a4] ss:$8 sps:$4 sm:$0xff]  }
 0x2e7   : > { %8428 = vrot.lane.b32.xlu1 %v13864_v15, %s8944_s22  ;;  %4294 = vrot.lane.b32.xlu0 %v9443_v1, %s8944_s22  ;;  %v3914_v46 = vsel %vm3911_vm5, %v10534_v3, %v3824_v22  ;;  %v8376_v3 = vunpack.i.h.bf16 %v10555_v35  ;;  %v2720_v22 = vsel %vm2703_vm4, %v8330_v43, %v10080_v38  ;;  %v2723_v59 = vsel %vm2703_vm4, %v10107_v63, %v10256_v32 }
 0x2e8   : > { %3978 = vmatprep.subr.bf16.mxu0 %v3915_v49  ;;  %1998 = vmatprep.mubr.bf16.mxu1 %v8740_v56  ;;  %v8340_v38 = vunpack.i.l.bf16 %v10146_v6  ;;  %v2722_v35 = vsel %vm2703_vm4, %v8331_v34, %v10107_v63  ;;  %v8745_v49 = vld [vmem:[%s13698_s3 + $0xd0] ss:$8 sps:$4 sm:$0xff]  }
 0x2e9   : > { %2783 = vmatpush1.bf16.msra.mxu1 %v2718_v2  ;;  %v3830_v28 = vpop.permute.xlu1 %3829  ;;  %3583 = vmatprep.mubr.bf16.mxu0 %v8746_v60  ;;  %v3919_v32 = vsel %vm3911_vm5, %v10573_v7, %v8376_v3  ;;  %v2725_v2 = vsel %vm2703_vm4, %v10124_v30, %v10308_v5  ;;  %v8341_v5 = vunpack.i.h.bf16 %v10146_v6 }
 0x2ea   : > { %2784 = vmatprep.subr.bf16.mxu1 %v2721_v19  ;;  %v10687_v56 = vpop.permute.xlu0 %3865  ;;  %3979 = vmatpush1.bf16.msra.mxu0 %v3914_v46  ;;  %v3917_v9 = vsel %vm3911_vm5, %v3830_v28, %v8375_v18  ;;  %v8756_v19 = vld [vmem:[%s13698_s3 + $0x2a0] ss:$8 sps:$4 sm:$0xff]  }
 0x2eb   : > { %4679 = vrot.lane.b32.xlu1 %v9377_v26, %s8945_s17  ;;  %4697 = vrot.lane.b32.xlu0 %v9443_v1, %s8945_s17  ;;  %v13946_v46 = vld [vmem:[#allocation8_spill] sm:$0xff] }
 0x2ec   : > { %1999 = vmatmul.mubr.bf16.gmra.mrb[48].mxu1 %v8742_v45  ;;  %3980 = vmatprep.subr.bf16.mxu0 %v3917_v9  ;;  %v8748_v45 = vld [vmem:[%s13698_s3 + $0xe4] ss:$8 sps:$4 sm:$0xff]  }
 0x2ed   : > { %2785 = vmatpush1.bf16.msra.mxu1 %v2720_v22  ;;  %v3828_v60 = vpop.permute.xlu1 %3827  ;;  %2008 = vmatprep.mubr.bf16.mxu1 %v8743_v25  ;;  %v8758_v25 = vld [vmem:[%s13698_s3 + $0x2b4] ss:$8 sps:$4 sm:$0xff]   ;;  %v2726_v22 = vsel %vm2703_vm4, %v8341_v5, %v10186_v47 }
 0x2ee   : > { %v3916_v13 = vsel %vm3911_vm5, %v3828_v60, %v3830_v28  ;;  %v10708_v18 = vpop.permute.xlu0 %3863  ;;  %2786 = vmatprep.subr.bf16.mxu1 %v2723_v59  ;;  %3584 = vmatmul.mubr.bf16.gmra.mrb[100].mxu0 %v8750_v24  ;;  %v2727_v24 = vsel %vm2703_vm4, %v10186_v47, %v10387_v0  ;;  %v3920_v60 = vsel %vm3911_vm5, %v10610_v53, %v10588_v36  ;;  %v8754_v47 = vld [vmem:[%s13698_s3 + $0xf4] ss:$8 sps:$4 sm:$0xff]  }
 0x2ef   : > { %4677 = vrot.lane.b32.xlu1 %v9375_v12, %s8945_s17  ;;  %4300 = vrot.lane.b32.xlu0 %v9465_v54, %s8944_s22 }
 0x2f0   : > { %3981 = vmatpush1.bf16.msra.mxu0 %v3916_v13  ;;  %3593 = vmatprep.mubr.bf16.mxu0 %v8752_v42  ;;  %v8751_v42 = vld [vmem:[%s13698_s3 + $0xe0] ss:$8 sps:$4 sm:$0xff]   ;;  %v2729_v13 = vsel %vm2703_vm4, %v10238_v27, %v10437_v21  ;;  %v8351_v21 = vunpack.i.h.bf16 %v10264_v20 }
 0x2f1   : > { %2787 = vmatpush1.bf16.msra.mxu1 %v2722_v35  ;;  %3982 = vmatprep.subr.bf16.mxu0 %v3919_v32  ;;  %v3834_v43 = vpop.permute.xlu1 %3833 }
 0x2f2   : > { %v3918_v63 = vsel %vm3911_vm5, %v3834_v43, %v10573_v7  ;;  %v10730_v28 = vpop.permute.xlu0 %3869  ;;  %2788 = vmatprep.subr.bf16.mxu1 %v2725_v2  ;;  %v2724_v7 = vsel %vm2703_vm4, %v8340_v38, %v10124_v30  ;;  %v8350_v30 = vunpack.i.l.bf16 %v10264_v20  ;;  %v8385_v38 = vunpack.i.l.bf16 %v10642_v61  ;;  %v13948_v2 = vld [vmem:[#allocation5_spill] sm:$0xff] }
 0x2f3   : > { %4280 = vrot.lane.b32.xlu1 %v13946_v46, %s8944_s22  ;;  %4298 = vrot.lane.b32.xlu0 %v9463_v11, %s8944_s22  ;;  %v8764_v20 = vld [vmem:[%s13698_s3 + $0x2c4] ss:$8 sps:$4 sm:$0xff]   ;;  %v2730_v5 = vsel %vm2703_vm4, %v8351_v21, %v13948_v2 }
 0x2f4   : > { %2009 = vmatmul.mubr.bf16.gmra.mrb[52].mxu1 %v8745_v49  ;;  %3983 = vmatpush1.bf16.msra.mxu0 %v3918_v63  ;;  %v2728_v53 = vsel %vm2703_vm4, %v8350_v30, %v10238_v27  ;;  %v8763_v49 = vld [vmem:[%s13698_s3 + $0x2b0] ss:$8 sps:$4 sm:$0xff]  }
 0x2f5   : > { %2789 = vmatpush1.bf16.msra.mxu1 %v2724_v7  ;;  %v8379_v9 = vpop.permute.xlu1 %8378  ;;  %2018 = vmatprep.mubr.bf16.mxu1 %v8748_v45  ;;  %v2731_v45 = vsel %vm2703_vm4, %v13948_v2, %v10506_v17  ;;  %v8360_v17 = vunpack.i.l.bf16 %v10395_v62  ;;  %v8757_v7 = vld [vmem:[%s13698_s3 + $0xf0] ss:$8 sps:$4 sm:$0xff]  }
 0x2f6   : > { %v8380_v34 = vunpack.i.l.bf16 %v8379_v9  ;;  %v10748_v3 = vpop.permute.xlu0 %8393  ;;  %2790 = vmatprep.subr.bf16.mxu1 %v2727_v24  ;;  %3594 = vmatmul.mubr.bf16.gmra.mrb[104].mxu0 %v8756_v19  ;;  %v8381_v6 = vunpack.i.h.bf16 %v8379_v9  ;;  %v2733_v9 = vsel %vm2703_vm4, %v10369_v37, %v10548_v52  ;;  %v13949_v30 = vld [vmem:[#allocation18_spill] sm:$0xff] }
 0x2f7   : > { %4683 = vrot.lane.b32.xlu1 %v13946_v46, %s8945_s17  ;;  %8453 = vrot.lane.b32.xlu0 %v13864_v15, %s8945_s17  ;;  %v2732_v52 = vsel %vm2703_vm4, %v8360_v17, %v10369_v37  ;;  %v8770_v37 = vld [vmem:[%s13698_s3 + $0x2d4] ss:$8 sps:$4 sm:$0xff]   ;;  %v8774_v2 = vld [vmem:[%s13698_s3 + $0x2d0] ss:$8 sps:$4 sm:$0xff]  }
 0x2f8   : > { %v3921_v0 = vsel %vm3911_vm5, %v10588_v36, %v8380_v34  ;;  %3603 = vmatprep.mubr.bf16.mxu0 %v8758_v25  ;;  %v13947_v36 = vld [vmem:[#allocation16_spill] sm:$0xff] }
 0x2f9   : > { %2791 = vmatpush1.bf16.msra.mxu1 %v2726_v22  ;;  %v3848_v59 = vpop.permute.xlu1 %3847  ;;  %3984 = vmatprep.subr.bf16.mxu0 %v3921_v0 }
 0x2fa   : > { %v10772_v35 = vpop.permute.xlu0 %3883  ;;  %2792 = vmatprep.subr.bf16.mxu1 %v2729_v13  ;;  %3985 = vmatpush1.bf16.msra.mxu0 %v3920_v60  ;;  %v3923_v32 = vsel %vm3911_vm5, %v3848_v59, %v8381_v6  ;;  %v3922_v63 = vsel %vm3911_vm5, %v10624_v29, %v3848_v59  ;;  %v8386_v29 = vunpack.i.h.bf16 %v10642_v61  ;;  %v8762_v61 = vld [vmem:[%s13698_s3 + $0x184] ss:$8 sps:$4 sm:$0xff]   ;;  %v8361_v6 = vunpack.i.h.bf16 %v10395_v62  ;;  %v8768_v60 = vld [vmem:[%s13698_s3 + $0x2c0] ss:$8 sps:$4 sm:$0xff]   ;;  %v13950_v13 = vld [vmem:[#allocation11_spill] sm:$0xff] }
 0x2fb   : > { %8438 = vrot.lane.b32.xlu1 %v13864_v15, %s8944_s22  ;;  %4306 = vrot.lane.b32.xlu0 %v13947_v36, %s8944_s22 }
 0x2fc   : > { %2019 = vmatmul.mubr.bf16.gmra.mrb[56].mxu1 %v8751_v42  ;;  %3986 = vmatprep.subr.bf16.mxu0 %v3923_v32  ;;  %v3927_v22 = vsel %vm3911_vm5, %v10666_v8, %v8386_v29  ;;  %v2735_v42 = vsel %vm2703_vm4, %v10445_v48, %v10601_v39  ;;  %v13951_v39 = vld [vmem:[#allocation17_spill] sm:$0xff] }
 0x2fd   : > { %2793 = vmatpush1.bf16.msra.mxu1 %v2728_v53  ;;  %v3854_v43 = vpop.permute.xlu1 %3853  ;;  %2028 = vmatprep.mubr.bf16.mxu1 %v8754_v47  ;;  %v2734_v47 = vsel %vm2703_vm4, %v8361_v6, %v10445_v48 }
 0x2fe   : > { %v10793_v19 = vpop.permute.xlu0 %3889  ;;  %2794 = vmatprep.subr.bf16.mxu1 %v2731_v45  ;;  %3987 = vmatpush1.bf16.msra.mxu0 %v3922_v63  ;;  %v3925_v27 = vsel %vm3911_vm5, %v3854_v43, %v8385_v38  ;;  %v8395_v45 = vunpack.i.l.bf16 %v10748_v3 }
 0x2ff   : > { %4691 = vrot.lane.b32.xlu1 %v9421_v33, %s8945_s17  ;;  %4709 = vrot.lane.b32.xlu0 %v13947_v36, %s8945_s17 }
 0x300   : > { %3988 = vmatprep.subr.bf16.mxu0 %v3925_v27  ;;  %3604 = vmatmul.mubr.bf16.gmra.mrb[108].mxu0 %v8763_v49  ;;  %v8766_v49 = vld [vmem:[%s13698_s3 + $0x194] ss:$8 sps:$4 sm:$0xff]   ;;  %v8772_v27 = vld [vmem:[%s13698_s3 + $0x1a4] ss:$8 sps:$4 sm:$0xff]  }
 0x301   : > { %2795 = vmatpush1.bf16.msra.mxu1 %v2730_v5  ;;  %v3852_v25 = vpop.permute.xlu1 %3851  ;;  %3613 = vmatprep.mubr.bf16.mxu0 %v8764_v20 }
 0x302   : > { %v3924_v24 = vsel %vm3911_vm5, %v3852_v25, %v3854_v43  ;;  %v10811_v34 = vpop.permute.xlu0 %3887  ;;  %2796 = vmatprep.subr.bf16.mxu1 %v2733_v9  ;;  %v8780_v25 = vld [vmem:[%s13698_s3 + $0x2e0] ss:$8 sps:$4 sm:$0xff]  }
 0x303   : > { %4689 = vrot.lane.b32.xlu1 %v9419_v14, %s8945_s17  ;;  %4312 = vrot.lane.b32.xlu0 %v13949_v30, %s8944_s22  ;;  %v8775_v9 = vld [vmem:[%s13698_s3 + $0x1a0] ss:$8 sps:$4 sm:$0xff]  }
 0x304   : > { %2029 = vmatmul.mubr.bf16.gmra.mrb[60].mxu1 %v8757_v7  ;;  %3989 = vmatpush1.bf16.msra.mxu0 %v3924_v24  ;;  %v8778_v24 = vld [vmem:[%s13698_s3 + $0x1b4] ss:$8 sps:$4 sm:$0xff]  }
 0x305   : > { %2797 = vmatpush1.bf16.msra.mxu1 %v2732_v52  ;;  %3990 = vmatprep.subr.bf16.mxu0 %v3927_v22  ;;  %v3858_v0 = vpop.permute.xlu1 %3857  ;;  %v8782_v52 = vld [vmem:[%s13698_s3 + $0x2f4] ss:$8 sps:$4 sm:$0xff]   ;;  %v13955_v22 = vld [vmem:[#allocation24_spill] sm:$0xff] }
 0x306   : > { %v3926_v62 = vsel %vm3911_vm5, %v3858_v0, %v10666_v8  ;;  %v10833_v59 = vpop.permute.xlu0 %3893  ;;  %2798 = vmatprep.subr.bf16.mxu1 %v2735_v42  ;;  %2800 = vmatprep.mubr.bf16.mxu1 %v8762_v61  ;;  %v8760_v8 = vld [vmem:[%s13698_s3 + $0x180] ss:$8 sps:$4 sm:$0xff]  }
 0x307   : > { %4292 = vrot.lane.b32.xlu1 %v13950_v13, %s8944_s22  ;;  %4310 = vrot.lane.b32.xlu0 %v13951_v39, %s8944_s22 }
 0x308   : > { %3991 = vmatpush1.bf16.msra.mxu0 %v3926_v62  ;;  %v3936_v62 = vsel %vm3911_vm5, %v10811_v34, %v10793_v19  ;;  %v8790_v34 = vld [vmem:[%s13698_s3 + $0x304] ss:$8 sps:$4 sm:$0xff]  }
 0x309   : > { %2799 = vmatpush1.bf16.msra.mxu1 %v2734_v47  ;;  %v8389_v38 = vpop.permute.xlu1 %8388  ;;  %3614 = vmatmul.mubr.bf16.gmra.mrb[112].mxu0 %v8768_v60 }
 0x30a   : > { %v8390_v32 = vunpack.i.l.bf16 %v8389_v38  ;;  %v10847_v21 = vpop.permute.xlu0 %8403  ;;  %3042 = vmatprep.subr.bf16.mxu1 %v9299_v41  ;;  %3623 = vmatprep.mubr.bf16.mxu0 %v8770_v37  ;;  %v8391_v48 = vunpack.i.h.bf16 %v8389_v38  ;;  %v3928_v41 = vsel %vm3911_vm5, %v10708_v18, %v10687_v56  ;;  %v8784_v37 = vld [vmem:[%s13698_s3 + $0x1c4] ss:$8 sps:$4 sm:$0xff]  }
 0x30b   : > { %4695 = vrot.lane.b32.xlu1 %v13950_v13, %s8945_s17  ;;  %8463 = vrot.lane.b32.xlu0 %v13864_v15, %s8945_s17  ;;  %v8405_v47 = vunpack.i.l.bf16 %v10847_v21 }
 0x30c   : > { %2801 = vmatmul.mubr.bf16.vlgmr.msra.gmra.mrb[64].mxu1 %v8760_v8  ;;  %v3929_v53 = vsel %vm3911_vm5, %v10687_v56, %v8390_v32  ;;  %v8769_v56 = vld [vmem:[%s13698_s3 + $0x190] ss:$8 sps:$4 sm:$0xff]  }
 0x30d   : > { %3043 = vmatpush1.bf16.msra.mxu1 %v9297_v40  ;;  %v3872_v43 = vpop.permute.xlu1 %3871  ;;  %3992 = vmatprep.subr.bf16.mxu0 %v3929_v53  ;;  %v13952_v40 = vld [vmem:[#allocation22_spill] sm:$0xff] }
 0x30e   : > { %v10867_v63 = vpop.permute.xlu0 %3907  ;;  %3044 = vmatprep.subr.bf16.mxu1 %v9315_v57  ;;  %3993 = vmatpush1.bf16.msra.mxu0 %v3928_v41  ;;  %v3931_v20 = vsel %vm3911_vm5, %v3872_v43, %v8391_v48  ;;  %v3930_v57 = vsel %vm3911_vm5, %v10730_v28, %v3872_v43  ;;  %v8396_v28 = vunpack.i.h.bf16 %v10748_v3  ;;  %v13953_v3 = vld [vmem:[#allocation25_spill] sm:$0xff] }
 0x30f   : > { %8448 = vrot.lane.b32.xlu1 %v13864_v15, %s8944_s22  ;;  %4318 = vrot.lane.b32.xlu0 %v13952_v40, %s8944_s22 }
 0x310   : > { %3994 = vmatprep.subr.bf16.mxu0 %v3931_v20  ;;  %2810 = vmatprep.mubr.bf16.mxu1 %v8766_v49 }
 0x311   : > { %3045 = vmatpush1.bf16.msra.mxu1 %v13928_v55  ;;  %v3878_v18 = vpop.permute.xlu1 %3877  ;;  %3624 = vmatmul.mubr.bf16.gmra.mrb[116].mxu0 %v8774_v2  ;;  %v8776_v55 = vld [vmem:[%s13698_s3 + $0x2e4] ss:$8 sps:$4 sm:$0xff]  }
 0x312   : > { %v10884_v17 = vpop.permute.xlu0 %4252  ;;  %3046 = vmatprep.subr.bf16.mxu1 %v9337_v4  ;;  %3995 = vmatpush1.bf16.msra.mxu0 %v3930_v57  ;;  %v3933_v29 = vsel %vm3911_vm5, %v3878_v18, %v8395_v45  ;;  %v13956_v2 = vld [vmem:[#allocation21_spill] sm:$0xff]  ;;  %v8793_v45 = vld [vmem:[%s13698_s3 + $0x1d0] ss:$8 sps:$4 sm:$0xff]  }
 0x313   : > { %4703 = vrot.lane.b32.xlu1 %v9465_v54, %s8945_s17  ;;  %4721 = vrot.lane.b32.xlu0 %v13952_v40, %s8945_s17 }
 0x314   : > { %2811 = vmatmul.mubr.bf16.gmra.mrb[68].mxu1 %v8769_v56  ;;  %3996 = vmatprep.subr.bf16.mxu0 %v3933_v29  ;;  %v8798_v29 = vld [vmem:[%s13698_s3 + $0x310] ss:$8 sps:$4 sm:$0xff]  }
 0x315   : > { %3047 = vmatpush1.bf16.msra.mxu1 %v9335_v31  ;;  %v3876_v4 = vpop.permute.xlu1 %3875  ;;  %2820 = vmatprep.mubr.bf16.mxu1 %v8772_v27  ;;  %v3935_v31 = vsel %vm3911_vm5, %v10772_v35, %v8396_v28 }
 0x316   : > { %v3932_v5 = vsel %vm3911_vm5, %v3876_v4, %v3878_v18  ;;  %v10898_v7 = vpop.permute.xlu0 %4250  ;;  %3048 = vmatprep.subr.bf16.mxu1 %v9357_v51  ;;  %3633 = vmatprep.mubr.bf16.mxu0 %v8776_v55  ;;  %v8796_v18 = vld [vmem:[%s13698_s3 + $0x1e4] ss:$8 sps:$4 sm:$0xff]   ;;  %v8799_v55 = vld [vmem:[%s13698_s3 + $0x1e0] ss:$8 sps:$4 sm:$0xff]  }
 0x317   : > { %4701 = vrot.lane.b32.xlu1 %v9463_v11, %s8945_s17  ;;  %4324 = vrot.lane.b32.xlu0 %v13953_v3, %s8944_s22 }
 0x318   : > { %3997 = vmatpush1.bf16.msra.mxu0 %v3932_v5 }
 0x319   : > { %3049 = vmatpush1.bf16.msra.mxu1 %v9355_v50  ;;  %3998 = vmatprep.subr.bf16.mxu0 %v3935_v31  ;;  %v3882_v51 = vpop.permute.xlu1 %3881  ;;  %v13954_v50 = vld [vmem:[#allocation15_spill] sm:$0xff] }
 0x31a   : > { %v3934_v61 = vsel %vm3911_vm5, %v3882_v51, %v10772_v35  ;;  %v10919_v6 = vpop.permute.xlu0 %8413  ;;  %3050 = vmatprep.subr.bf16.mxu1 %v9377_v26  ;;  %3634 = vmatmul.mubr.bf16.gmra.mrb[120].mxu0 %v8780_v25  ;;  %v8800_v25 = vld [vmem:[%s13698_s3 + $0x324] ss:$8 sps:$4 sm:$0xff]   ;;  %v8802_v31 = vld [vmem:[%s13698_s3 + $0x1f4] ss:$8 sps:$4 sm:$0xff]  }
 0x31b   : > { %4304 = vrot.lane.b32.xlu1 %v13954_v50, %s8944_s22  ;;  %4322 = vrot.lane.b32.xlu0 %v13955_v22, %s8944_s22  ;;  %v8415_v20 = vunpack.i.l.bf16 %v10919_v6 }
 0x31c   : > { %2821 = vmatmul.mubr.bf16.gmra.mrb[72].mxu1 %v8775_v9  ;;  %3999 = vmatpush1.bf16.msra.mxu0 %v3934_v61  ;;  %v8805_v61 = vld [vmem:[%s13698_s3 + $0x1f0] ss:$8 sps:$4 sm:$0xff]  }
 0x31d   : > { %3051 = vmatpush1.bf16.msra.mxu1 %v9375_v12  ;;  %v8399_v35 = vpop.permute.xlu1 %8398  ;;  %2830 = vmatprep.mubr.bf16.mxu1 %v8778_v24  ;;  %v8781_v12 = vld [vmem:[%s13698_s3 + $0x1b0] ss:$8 sps:$4 sm:$0xff]   ;;  %v8804_v24 = vld [vmem:[%s13698_s3 + $0x320] ss:$8 sps:$4 sm:$0xff]  }
 0x31e   : > { %v8400_v0 = vunpack.i.l.bf16 %v8399_v35  ;;  %v10930_v42 = vpop.permute.xlu0 %4258  ;;  %3052 = vmatprep.subr.bf16.mxu1 %v9401_v16  ;;  %3643 = vmatprep.mubr.bf16.mxu0 %v8782_v52  ;;  %v8401_v26 = vunpack.i.h.bf16 %v8399_v35  ;;  %v8806_v35 = vld [vmem:[%s13698_s3 + $0x334] ss:$8 sps:$4 sm:$0xff]  }
 0x31f   : > { %4707 = vrot.lane.b32.xlu1 %v13954_v50, %s8945_s17  ;;  %8473 = vrot.lane.b32.xlu0 %v13864_v15, %s8945_s17 }
 0x320   : > { %v3937_v60 = vsel %vm3911_vm5, %v10793_v19, %v8400_v0  ;;  %v8811_v0 = vld [vmem:[%s13698_s3 + $0x204] ss:$8 sps:$4 sm:$0xff]  }
 0x321   : > { %3053 = vmatpush1.bf16.msra.mxu1 %v13946_v46  ;;  %v3896_v16 = vpop.permute.xlu1 %3895  ;;  %4000 = vmatprep.subr.bf16.mxu0 %v3937_v60  ;;  %v8786_v46 = vld [vmem:[%s13698_s3 + $0x2f0] ss:$8 sps:$4 sm:$0xff]  }
 0x322   : > { %v10950_v8 = vpop.permute.xlu0 %4661  ;;  %3054 = vmatprep.subr.bf16.mxu1 %v9421_v33  ;;  %4001 = vmatpush1.bf16.msra.mxu0 %v3936_v62  ;;  %v3939_v38 = vsel %vm3911_vm5, %v3896_v16, %v8401_v26  ;;  %v3938_v33 = vsel %vm3911_vm5, %v10833_v59, %v3896_v16  ;;  %v8787_v59 = vld [vmem:[%s13698_s3 + $0x1c0] ss:$8 sps:$4 sm:$0xff]  }
 0x323   : > { %8458 = vrot.lane.b32.xlu1 %v13864_v15, %s8944_s22  ;;  %4330 = vrot.lane.b32.xlu0 %v9571_v44, %s8944_s22 }
 0x324   : > { %2831 = vmatmul.mubr.bf16.gmra.mrb[76].mxu1 %v8781_v12  ;;  %4002 = vmatprep.subr.bf16.mxu0 %v3939_v38  ;;  %v4994_v12 = vld [vmem:[%s13699_s4 + $0x18] sm:$0xff]  ;;  %v4996_v38 = vld [vmem:[%s13699_s4 + $0x28] sm:$0xff] }
 0x325   : > { %3055 = vmatpush1.bf16.msra.mxu1 %v9419_v14  ;;  %v3902_v19 = vpop.permute.xlu1 %3901  ;;  %2840 = vmatprep.mubr.bf16.mxu1 %v8784_v37  ;;  %v8406_v14 = vunpack.i.h.bf16 %v10847_v21  ;;  %v8791_v21 = vld [vmem:[%s13698_s3 + $0x1d4] ss:$8 sps:$4 sm:$0xff]   ;;  %v8808_v37 = vld [vmem:[%s13698_s3 + $0x330] ss:$8 sps:$4 sm:$0xff]  }
 0x326   : > { %v10967_v32 = vpop.permute.xlu0 %4264  ;;  %3056 = vmatprep.subr.bf16.mxu1 %v9443_v1  ;;  %4003 = vmatpush1.bf16.msra.mxu0 %v3938_v33  ;;  %v3941_v48 = vsel %vm3911_vm5, %v3902_v19, %v8405_v47 }
 0x327   : > { %4715 = vrot.lane.b32.xlu1 %v13949_v30, %s8945_s17  ;;  %4733 = vrot.lane.b32.xlu0 %v9571_v44, %s8945_s17 }
 0x328   : > { %4004 = vmatprep.subr.bf16.mxu0 %v3941_v48  ;;  %3644 = vmatmul.mubr.bf16.gmra.mrb[124].mxu0 %v8786_v46  ;;  %v8809_v46 = vld [vmem:[%s13698_s3 + $0x200] ss:$8 sps:$4 sm:$0xff]  }
 0x329   : > { %3057 = vmatpush1.bf16.msra.mxu1 %v13950_v13  ;;  %v3900_v1 = vpop.permute.xlu1 %3899  ;;  %4008 = vmatprep.mubr.bf16.mxu0 %v8790_v34  ;;  %v3943_v13 = vsel %vm3911_vm5, %v10867_v63, %v8406_v14  ;;  %v8824_v14 = vld [vmem:[%s13698_s3 + $0x214] ss:$8 sps:$4 sm:$0xff]  }
 0x32a   : > { %v3940_v53 = vsel %vm3911_vm5, %v3900_v1, %v3902_v19  ;;  %v10981_v49 = vpop.permute.xlu0 %4262  ;;  %3058 = vmatprep.subr.bf16.mxu1 %v9465_v54  ;;  %v8812_v19 = vld [vmem:[%s13698_s3 + $0x344] ss:$8 sps:$4 sm:$0xff]   ;;  %v4347_v1 = vsel %vm4346_vm7, %v10898_v7, %v10884_v17 }
 0x32b   : > { %4713 = vrot.lane.b32.xlu1 %v13951_v39, %s8945_s17  ;;  %4336 = vrot.lane.b32.xlu0 %v9593_v10, %s8944_s22 }
 0x32c   : > { %2841 = vmatmul.mubr.bf16.gmra.mrb[80].mxu1 %v8787_v59  ;;  %4005 = vmatpush1.bf16.msra.mxu0 %v3940_v53 }
 0x32d   : > { %3059 = vmatpush1.bf16.msra.mxu1 %v9463_v11  ;;  %4006 = vmatprep.subr.bf16.mxu0 %v3943_v13  ;;  %v3906_v41 = vpop.permute.xlu1 %3905  ;;  %v8788_v11 = vld [vmem:[%s13698_s3 + $0x300] ss:$8 sps:$4 sm:$0xff]  }
 0x32e   : > { %v3942_v54 = vsel %vm3911_vm5, %v3906_v41, %v10867_v63  ;;  %v10996_v43 = vpop.permute.xlu0 %8423  ;;  %3060 = vmatprep.subr.bf16.mxu1 %v13947_v36  ;;  %2850 = vmatprep.mubr.bf16.mxu1 %v8791_v21  ;;  %v8794_v36 = vld [vmem:[%s13698_s3 + $0x314] ss:$8 sps:$4 sm:$0xff]  }
 0x32f   : > { %4316 = vrot.lane.b32.xlu1 %v13956_v2, %s8944_s22  ;;  %4334 = vrot.lane.b32.xlu0 %v9591_v23, %s8944_s22  ;;  %v8425_v62 = vunpack.i.l.bf16 %v10996_v43  ;;  %v8426_v59 = vunpack.i.h.bf16 %v10996_v43  ;;  %v4998_v21 = vld [vmem:[%s13699_s4 + $0x38] sm:$0xff] }
 0x330   : > { %4007 = vmatpush1.bf16.msra.mxu0 %v3942_v54 }
 0x331   : > { %3061 = vmatpush1.bf16.msra.mxu1 %v13954_v50  ;;  %v11010_v63 = vpop.permute.xlu1 %8408 }
 0x332   : > { %v11016_v56 = vpop.permute.xlu0 %4270  ;;  %3062 = vmatprep.subr.bf16.mxu1 %v13949_v30  ;;  %v8410_v26 = vunpack.i.l.bf16 %v11010_v63  ;;  %v8411_v33 = vunpack.i.h.bf16 %v11010_v63  ;;  %v8826_v63 = vld [vmem:[%s13698_s3 + $0x210] ss:$8 sps:$4 sm:$0xff]  }
 0x333   : > { %4009 = vmatmul.mubr.bf16.vlgmr.msra.gmra.mrb[128].mxu0 %v8788_v11  ;;  %4719 = vrot.lane.b32.xlu1 %v13956_v2, %s8945_s17 }
 0x334   : > { %4741 = vrot.lane.b32.xlu0 %v13864_v15, %s8945_s17  ;;  %2851 = vmatmul.mubr.bf16.gmra.mrb[84].mxu1 %v8793_v45  ;;  %v4350_v43 = vsel %vm4346_vm7, %v10930_v42, %v8411_v33  ;;  %v5000_v45 = vld [vmem:[%s13699_s4 + $0x48] sm:$0xff] }
 0x335   : > { %3063 = vmatpush1.bf16.msra.mxu1 %v13951_v39  ;;  %v4656_v57 = vpop.permute.xlu1 %4655  ;;  %4018 = vmatprep.mubr.bf16.mxu0 %v8794_v36  ;;  %v13957_v39 = vld [vmem:[#allocation31_spill] sm:$0xff] }
 0x336   : > { %v11027_v27 = vpop.permute.xlu0 %4673  ;;  %3064 = vmatprep.subr.bf16.mxu1 %v13952_v40  ;;  %v4751_v30 = vsel %vm4749_vm6, %v4656_v57, %v8415_v20  ;;  %2860 = vmatprep.mubr.bf16.mxu1 %v8796_v18  ;;  %v8416_v40 = vunpack.i.h.bf16 %v10919_v6  ;;  %v13958_v6 = vld [vmem:[#allocation27_spill] sm:$0xff]  ;;  %v8827_v18 = vld [vmem:[%s13698_s3 + $0x224] ss:$8 sps:$4 sm:$0xff]  }
 0x337   : > { %8468 = vrot.lane.b32.xlu1 %v13864_v15, %s8944_s22  ;;  %4814 = vmatprep.subr.bf16.mxu0 %v4751_v30  ;;  %v4757_v7 = vsel %vm4749_vm6, %v11027_v27, %v8426_v59  ;;  %v4351_v30 = vsel %vm4346_vm7, %v10981_v49, %v10967_v32 }
 0x338   : > { %4342 = vrot.lane.b32.xlu0 %v13957_v39, %s8944_s22  ;;  %v4753_v9 = vsel %vm4749_vm6, %v10950_v8, %v8416_v40 }
 0x339   : > { %3065 = vmatpush1.bf16.msra.mxu1 %v13956_v2  ;;  %v4654_v28 = vpop.permute.xlu1 %4653 }
 0x33a   : > { %v4750_v4 = vsel %vm4749_vm6, %v4654_v28, %v4656_v57  ;;  %v11044_v5 = vpop.permute.xlu0 %4276  ;;  %3066 = vmatprep.subr.bf16.mxu1 %v13953_v3  ;;  %v334_v57 = vlaneseq }
 0x33b   : > { %4019 = vmatmul.mubr.bf16.gmra.mrb[132].mxu0 %v8798_v29  ;;  %4727 = vrot.lane.b32.xlu1 %v13953_v3, %s8945_s17 }
 0x33c   : > { %4745 = vrot.lane.b32.xlu0 %v13957_v39, %s8945_s17  ;;  %2861 = vmatmul.mubr.bf16.gmra.mrb[88].mxu1 %v8799_v55  ;;  %v335_v49 = vand.u32 127, %v334_v57 }
 0x33d   : > { %4815 = vmatpush1.bf16.msra.mxu0 %v4750_v4  ;;  %3067 = vmatpush1.bf16.msra.mxu1 %v13955_v22  ;;  %v11060_v51 = vpop.permute.xlu1 %4256  ;;  %v5004_v4 = vld [vmem:[%s13699_s4 + $0x68] sm:$0xff] }
 0x33e   : > { %4816 = vmatprep.subr.bf16.mxu0 %v4753_v9  ;;  %v11062_v3 = vpop.permute.xlu0 %4274  ;;  %3068 = vmatprep.subr.bf16.mxu1 %v9571_v44  ;;  %v4992_v44 = vld [vmem:[%s13699_s4 + $0x8] sm:$0xff]  ;;  %v4349_v2 = vsel %vm4346_vm7, %v11060_v51, %v10930_v42 }
 0x33f   : > { %4725 = vrot.lane.b32.xlu1 %v13955_v22, %s8945_s17  ;;  %4028 = vmatprep.mubr.bf16.mxu0 %v8800_v25  ;;  %v8818_v25 = vld [vmem:[%s13698_s3 + $0x364] ss:$8 sps:$4 sm:$0xff]  }
 0x340   : > { %4743 = vrot.lane.b32.xlu0 %v9607_v58, %s8945_s17  ;;  %2870 = vmatprep.mubr.bf16.mxu1 %v8802_v31 }
 0x341   : > { %3069 = vmatpush1.bf16.msra.mxu1 %v13958_v6  ;;  %v4660_v52 = vpop.permute.xlu1 %4659 }
 0x342   : > { %v4752_v50 = vsel %vm4749_vm6, %v4660_v52, %v10950_v8  ;;  %v11081_v22 = vpop.permute.xlu0 %8433  ;;  %3070 = vmatprep.subr.bf16.mxu1 %v9593_v10  ;;  %v4348_v8 = vsel %vm4346_vm7, %v10884_v17, %v8410_v26  ;;  %v8814_v17 = vld [vmem:[%s13698_s3 + $0x340] ss:$8 sps:$4 sm:$0xff]  }
 0x343   : > { %4029 = vmatmul.mubr.bf16.gmra.mrb[136].mxu0 %v8804_v24  ;;  %4328 = vrot.lane.b32.xlu1 %v13958_v6, %s8944_s22  ;;  %v8435_v31 = vunpack.i.l.bf16 %v11081_v22  ;;  %v336_v24 = vadd.s32 128, %v335_v49  ;;  %v4991_v52 = vld [vmem:[%s13699_s4] sm:$0xff] }
 0x344   : > { %5014 = vperm.xlu0 %8165, %v4992_v44   ;;  %2871 = vmatmul.mubr.bf16.gmra.mrb[92].mxu1 %v8805_v61  ;;  %v4355_v61 = vsel %vm4346_vm7, %v11062_v3, %v11044_v5  ;;  %v5006_v44 = vld [vmem:[%s13699_s4 + $0x78] sm:$0xff]  ;;  %v8820_v26 = vld [vmem:[%s13698_s3 + $0x360] ss:$8 sps:$4 sm:$0xff]  }
 0x345   : > { %4817 = vmatpush1.bf16.msra.mxu0 %v4752_v50  ;;  %3071 = vmatpush1.bf16.msra.mxu1 %v9591_v23  ;;  %v11094_v60 = vpop.permute.xlu1 %8418  ;;  %v8829_v50 = vld [vmem:[%s13698_s3 + $0x220] ss:$8 sps:$4 sm:$0xff]  }
 0x346   : > { %v11100_v16 = vpop.permute.xlu0 %4282  ;;  %3072 = vmatprep.subr.bf16.mxu1 %v13957_v39  ;;  %4038 = vmatprep.mubr.bf16.mxu0 %v8806_v35  ;;  %v8420_v13 = vunpack.i.l.bf16 %v11094_v60  ;;  %v8421_v36 = vunpack.i.h.bf16 %v11094_v60  ;;  %v5002_v39 = vld [vmem:[%s13699_s4 + $0x58] sm:$0xff]  ;;  %v341_v60 = vand.u32 15, %v335_v49  ;;  %v8850_v49 = vld [vmem:[%s13698_s3 + $0x404] ss:$8 sps:$4 sm:$0xff]  }
 0x347   : > { %4731 = vrot.lane.b32.xlu1 %v13958_v6, %s8945_s17  ;;  %3074 = vmatprep.mubr.bf16.mxu1 %v8811_v0  ;;  %v8830_v0 = vld [vmem:[%s13698_s3 + $0x234] ss:$8 sps:$4 sm:$0xff]  }
 0x348   : > { %5024 = vperm.xlu0 %8165, %v4994_v12   ;;  %v4352_v42 = vsel %vm4346_vm7, %v10967_v32, %v8420_v13  ;;  %v8817_v32 = vld [vmem:[%s13698_s3 + $0x350] ss:$8 sps:$4 sm:$0xff]   ;;  %vm11236_vm8 = vcmp.ge.s32.totalorder %v341_v60, 1  ;;  %vm11249_vm10 = vcmp.lt.s32.totalorder %v341_v60, 15  ;;  %v13965_v13 = vmov 0 }
 0x349   : > { %3073 = vmatpush1.bf16.msra.mxu1 %v9607_v58  ;;  %v4668_v47 = vpop.permute.xlu1 %4667  ;;  %v13966_v13 = vsel %vm11249_vm10, 4294967295, %v13965_v13 }
 0x34a   : > { %v11121_v34 = vpop.permute.xlu0 %4685  ;;  %4411 = vmatprep.subr.bf16.mxu1 %v4348_v8  ;;  %v4755_v48 = vsel %vm4749_vm6, %v4668_v47, %v8425_v62  ;;  %v8436_v62 = vunpack.i.h.bf16 %v11081_v22  ;;  %13967 = vst [vmem:[#allocation40_spill] sm:$0xff] %v13966_v13 }
 0x34b   : > { %4039 = vmatmul.mubr.bf16.gmra.mrb[140].mxu0 %v8808_v37  ;;  %8478 = vrot.lane.b32.xlu1 %v13864_v15, %s8944_s22  ;;  %v348_v37 = vand.u32 15, %v336_v24 }
 0x34c   : > { %5034 = vperm.xlu0 %8165, %v4996_v38   ;;  %4818 = vmatprep.subr.bf16.mxu0 %v4755_v48  ;;  %v4993_v38 = vld [vmem:[%s13699_s4 + $0x10] sm:$0xff]  ;;  %v4761_v59 = vsel %vm4749_vm6, %v11121_v34, %v8436_v62 }
 0x34d   : > { %3075 = vmatmul.mubr.bf16.vlgmr.msra.gmra.mrb[32].mxu1 %v8809_v46  ;;  %v4666_v53 = vpop.permute.xlu1 %4665  ;;  %4048 = vmatprep.mubr.bf16.mxu0 %v8812_v19  ;;  %v8821_v46 = vld [vmem:[%s13698_s3 + $0x374] ss:$8 sps:$4 sm:$0xff]   ;;  %vm11242_vm9 = vcmp.ge.s32.totalorder %v348_v37, 1  ;;  %vm11262_vm11 = vcmp.lt.s32.totalorder %v348_v37, 15 }
 0x34e   : > { %4412 = vmatpush1.bf16.msra.mxu1 %v4347_v1  ;;  %v4754_v41 = vsel %vm4749_vm6, %v4666_v53, %v4668_v47  ;;  %v11138_v54 = vpop.permute.xlu0 %4288  ;;  %3084 = vmatprep.mubr.bf16.mxu1 %v8824_v14  ;;  %v13959_v14 = vmov 0  ;;  %v13962_v1 = vmov 0 }
 0x34f   : > { %4413 = vmatprep.subr.bf16.mxu1 %v4350_v43  ;;  %4739 = vrot.lane.b32.xlu1 %v9593_v10, %s8945_s17  ;;  %v8815_v10 = vld [vmem:[%s13698_s3 + $0x354] ss:$8 sps:$4 sm:$0xff]   ;;  %v13960_v14 = vsel %vm11236_vm8, 4294967295, %v13959_v14  ;;  %v13963_v1 = vsel %vm11242_vm9, 4294967295, %v13962_v1 }
 0x350   : > { %5044 = vperm.xlu0 %8165, %v4998_v21   ;;  %4819 = vmatpush1.bf16.msra.mxu0 %v4754_v41  ;;  %13961 = vst [vmem:[#allocation30_spill] sm:$0xff] %v13960_v14  ;;  %13964 = vst [vmem:[#allocation46_spill] sm:$0xff] %v13963_v1  ;;  %v4995_v21 = vld [vmem:[%s13699_s4 + $0x20] sm:$0xff]  ;;  %v8832_v41 = vld [vmem:[%s13698_s3 + $0x230] ss:$8 sps:$4 sm:$0xff]  }
 0x351   : > { %4820 = vmatprep.subr.bf16.mxu0 %v4757_v7  ;;  %v4269_v11 = vpop.permute.xlu1 %4268 }
 0x352   : > { %4414 = vmatpush1.bf16.msra.mxu1 %v4349_v2  ;;  %v11162_v20 = vpop.permute.xlu0 %4286  ;;  %v13968_v2 = vmov 0 }
 0x353   : > { %4415 = vmatprep.subr.bf16.mxu1 %v4352_v42  ;;  %4049 = vmatmul.mubr.bf16.gmra.mrb[144].mxu0 %v8814_v17  ;;  %v13969_v2 = vsel %vm11262_vm11, 4294967295, %v13968_v2 }
 0x354   : > { %4737 = vrot.lane.b32.xlu1 %v9591_v23, %s8945_s17  ;;  %5054 = vperm.xlu0 %8165, %v5000_v45   ;;  %v4354_v23 = vsel %vm4346_vm7, %v11016_v56, %v8421_v36  ;;  %13970 = vst [vmem:[#allocation36_spill] sm:$0xff] %v13969_v2  ;;  %v8823_v45 = vld [vmem:[%s13698_s3 + $0x370] ss:$8 sps:$4 sm:$0xff]  }
 0x355   : > { %v4672_v29 = vpop.permute.xlu1 %4671  ;;  %4058 = vmatprep.mubr.bf16.mxu0 %v8815_v10  ;;  %3085 = vmatmul.mubr.bf16.gmra.mrb[36].mxu1 %v8826_v63 }
 0x356   : > { %4416 = vmatpush1.bf16.msra.mxu1 %v4351_v30  ;;  %v4756_v55 = vsel %vm4749_vm6, %v4672_v29, %v11027_v27  ;;  %v11179_v40 = vpop.permute.xlu0 %8443  ;;  %3094 = vmatprep.mubr.bf16.mxu1 %v8827_v18  ;;  %v4353_v27 = vsel %vm4346_vm7, %v4269_v11, %v11016_v56  ;;  %v8833_v11 = vld [vmem:[%s13698_s3 + $0x244] ss:$8 sps:$4 sm:$0xff]   ;;  %v4997_v29 = vld [vmem:[%s13699_s4 + $0x30] sm:$0xff] }
 0x357   : > { %4417 = vmatprep.subr.bf16.mxu1 %v4354_v23  ;;  %4821 = vmatpush1.bf16.msra.mxu0 %v4756_v55 }
 0x358   : > { %4340 = vrot.lane.b32.xlu1 %v9607_v58, %s8944_s22  ;;  %5064 = vperm.xlu0 %8165, %v5002_v39  }
 0x359   : > { %v8429_v28 = vpop.permute.xlu1 %8428 }
 0x35a   : > { %4418 = vmatpush1.bf16.msra.mxu1 %v4353_v27  ;;  %v8431_v9 = vunpack.i.h.bf16 %v8429_v28  ;;  %v8430_v51 = vunpack.i.l.bf16 %v8429_v28  ;;  %v11197_v58 = vpop.permute.xlu0 %4294 }
 0x35b   : > { %4059 = vmatmul.mubr.bf16.gmra.mrb[148].mxu0 %v8817_v32 }
 0x35c   : > { %4747 = vrot.lane.b32.xlu1 %v13864_v15, %s8945_s17  ;;  %5074 = vperm.xlu0 %8165, %v5004_v4   ;;  %v4356_v56 = vsel %vm4346_vm7, %v11044_v5, %v8430_v51  ;;  %v4358_v5 = vsel %vm4346_vm7, %v11100_v16, %v8431_v9 }
 0x35d   : > { %v4680_v6 = vpop.permute.xlu1 %4679  ;;  %4419 = vmatprep.subr.bf16.mxu1 %v4356_v56  ;;  %4068 = vmatprep.mubr.bf16.mxu0 %v8818_v25 }
 0x35e   : > { %v11215_v35 = vpop.permute.xlu0 %4697  ;;  %4420 = vmatpush1.bf16.msra.mxu1 %v4355_v61  ;;  %v4759_v3 = vsel %vm4749_vm6, %v4680_v6, %v8435_v31 }
 0x35f   : > { %4421 = vmatprep.subr.bf16.mxu1 %v4358_v5  ;;  %4822 = vmatprep.subr.bf16.mxu0 %v4759_v3  ;;  %v1521_v12 = vpop.f32.mrb[0].mxu1 }
 0x360   : > { %5009 = vperm.xlu1 %8166, %v4991_v52   ;;  %5084 = vperm.xlu0 %8165, %v5006_v44   ;;  %v1523_v47 = vpop.f32.mrb[1].mxu1  ;;  %v1604_v7 = vsel %vm11236_vm8, %v1521_v12, 0.0  ;;  %v8835_v52 = vld [vmem:[%s13698_s3 + $0x240] ss:$8 sps:$4 sm:$0xff]   ;;  %v8445_v44 = vunpack.i.l.bf16 %v11179_v40 }
 0x361   : > { %v4678_v8 = vpop.permute.xlu1 %4677  ;;  %3095 = vmatmul.mubr.bf16.gmra.mrb[40].mxu1 %v8829_v50  ;;  %v1525_v19 = vpop.f32.mrb[2].mxu1 }
 0x362   : > { %v4758_v33 = vsel %vm4749_vm6, %v4678_v8, %v4680_v6  ;;  %v11234_v48 = vpop.permute.xlu0 %4300  ;;  %v1527_v22 = vpop.f32.mrb[3].mxu1  ;;  %3104 = vmatprep.mubr.bf16.mxu1 %v8830_v0  ;;  %v1606_v18 = vsel %vm11236_vm8, %v1525_v19, 0.0  ;;  %v4999_v6 = vld [vmem:[%s13699_s4 + $0x40] sm:$0xff]  ;;  %v4359_v19 = vsel %vm4346_vm7, %v11162_v20, %v11138_v54 }
 0x363   : > { %4069 = vmatmul.mubr.bf16.gmra.mrb[152].mxu0 %v8820_v26  ;;  %v1607_v32 = vsel %vm11242_vm9, %v1527_v22, 0.0  ;;  %v8836_v26 = vld [vmem:[%s13698_s3 + $0x254] ss:$8 sps:$4 sm:$0xff]  }
 0x364   : > { %5019 = vperm.xlu1 %8166, %v4993_v38   ;;  %4823 = vmatpush1.bf16.msra.mxu0 %v4758_v33  ;;  %v5001_v22 = vld [vmem:[%s13699_s4 + $0x50] sm:$0xff] }
 0x365   : > { %4824 = vmatprep.subr.bf16.mxu0 %v4761_v59  ;;  %v4281_v53 = vpop.permute.xlu1 %4280  ;;  %4078 = vmatprep.mubr.bf16.mxu0 %v8821_v46 }
 0x366   : > { %v4357_v43 = vsel %vm4346_vm7, %v4281_v53, %v11100_v16  ;;  %v11258_v17 = vpop.permute.xlu0 %4298  ;;  %v1605_v16 = vsel %vm11242_vm9, %v1523_v47, 0.0  ;;  %8488 = vrot.lane.b32.xlu0 %v13864_v15, %s8938_s16 }
 0x367   : > { %4422 = vmatpush1.bf16.msra.mxu1 %v4357_v43  ;;  %v2363_v10 = vpop.f32.mrb[64].mxu0  ;;  %v1531_v63 = vpop.f32.mrb[4].mxu1 }
 0x368   : > { %5029 = vperm.xlu1 %8166, %v4995_v21   ;;  %v2446_v36 = vsel %vm11249_vm10, %v2363_v10, 0.0  ;;  %v2365_v42 = vpop.f32.mrb[65].mxu0  ;;  %v1533_v57 = vpop.f32.mrb[5].mxu1  ;;  %v1608_v0 = vsel %vm11236_vm8, %v1531_v63, 0.0  ;;  %v8446_v10 = vunpack.i.h.bf16 %v11179_v40  ;;  %v8838_v40 = vld [vmem:[%s13698_s3 + $0x250] ss:$8 sps:$4 sm:$0xff]  }
 0x369   : > { %v4684_v30 = vpop.permute.xlu1 %4683  ;;  %v11281_v39 = vadd.f32 %v2446_v36, %v1604_v7  ;;  %v2447_v55 = vsel %vm11262_vm11, %v2365_v42, 0.0  ;;  %v2367_v23 = vpop.f32.mrb[66].mxu0  ;;  %3105 = vmatmul.mubr.bf16.gmra.mrb[44].mxu1 %v8832_v41  ;;  %v1609_v12 = vsel %vm11242_vm9, %v1533_v57, 0.0 }
 0x36a   : > { %v4760_v27 = vsel %vm4749_vm6, %v4684_v30, %v11121_v34  ;;  %v11292_v28 = vpop.permute.xlu0 %8453  ;;  %v11294_v4 = vadd.f32 %v2447_v55, %v1605_v16  ;;  %v2448_v25 = vsel %vm11249_vm10, %v2367_v23, 0.0  ;;  %v2369_v31 = vpop.f32.mrb[67].mxu0  ;;  %3114 = vmatprep.mubr.bf16.mxu1 %v8833_v11  ;;  %v5003_v30 = vld [vmem:[%s13699_s4 + $0x60] sm:$0xff]  ;;  %8498 = vrot.lane.b32.xlu0 %v13864_v15, %s8938_s16 }
 0x36b   : > { %4079 = vmatmul.mubr.bf16.gmra.mrb[156].mxu0 %v8823_v45  ;;  %v11298_v9 = vadd.f32 %v2448_v25, %v1606_v18  ;;  %v2449_v51 = vsel %vm11262_vm11, %v2369_v31, 0.0  ;;  %v1535_v56 = vpop.f32.mrb[6].mxu1 }
 0x36c   : > { %5039 = vperm.xlu1 %8166, %v4997_v29   ;;  %4825 = vmatpush1.bf16.msra.mxu0 %v4760_v27  ;;  %v11302_v24 = vadd.f32 %v2449_v51, %v1607_v32  ;;  %v1537_v34 = vpop.f32.mrb[7].mxu1  ;;  %v1610_v38 = vsel %vm11236_vm8, %v1535_v56, 0.0  ;;  %v8839_v32 = vld [vmem:[%s13698_s3 + $0x264] ss:$8 sps:$4 sm:$0xff]  }
 0x36d   : > { %v8439_v61 = vpop.permute.xlu1 %8438  ;;  %4846 = vmatprep.mubr.bf16.mxu0 %v8850_v49  ;;  %v1611_v41 = vsel %vm11242_vm9, %v1537_v34, 0.0  ;;  %v4765_v49 = vsel %vm4749_vm6, %v11215_v35, %v8446_v10 }
 0x36e   : > { %v8441_v50 = vunpack.i.h.bf16 %v8439_v61  ;;  %v8440_v5 = vunpack.i.l.bf16 %v8439_v61  ;;  %v11311_v3 = vpop.permute.xlu0 %4306  ;;  %8508 = vrot.lane.b32.xlu0 %v13864_v15, %s8940_s24 }
 0x36f   : > { %v2373_v60 = vpop.f32.mrb[68].mxu0  ;;  %v1541_v62 = vpop.f32.mrb[8].mxu1 }
 0x370   : > { %5049 = vperm.xlu1 %8166, %v4999_v6   ;;  %v4360_v37 = vsel %vm4346_vm7, %v11138_v54, %v8440_v5  ;;  %v2450_v47 = vsel %vm11249_vm10, %v2373_v60, 0.0  ;;  %v2375_v8 = vpop.f32.mrb[69].mxu0  ;;  %v1543_v46 = vpop.f32.mrb[9].mxu1  ;;  %v4362_v54 = vsel %vm4346_vm7, %v11197_v58, %v8441_v50  ;;  %v1612_v23 = vsel %vm11236_vm8, %v1541_v62, 0.0 }
 0x371   : > { %v4692_v33 = vpop.permute.xlu1 %4691  ;;  %4423 = vmatprep.subr.bf16.mxu1 %v4360_v37  ;;  %v11332_v59 = vadd.f32 %v2450_v47, %v1608_v0  ;;  %v2451_v53 = vsel %vm11262_vm11, %v2375_v8, 0.0  ;;  %v2377_v21 = vpop.f32.mrb[70].mxu0  ;;  %3115 = vmatmul.mubr.bf16.gmra.mrb[48].mxu1 %v8835_v52  ;;  %v1613_v25 = vsel %vm11242_vm9, %v1543_v46, 0.0  ;;  %v5005_v52 = vld [vmem:[%s13699_s4 + $0x70] sm:$0xff] }
 0x372   : > { %v11338_v43 = vpop.permute.xlu0 %4709  ;;  %4424 = vmatpush1.bf16.msra.mxu1 %v4359_v19  ;;  %v4763_v20 = vsel %vm4749_vm6, %v4692_v33, %v8445_v44  ;;  %v11343_v7 = vadd.f32 %v2451_v53, %v1609_v12  ;;  %v2452_v11 = vsel %vm11249_vm10, %v2377_v21, 0.0  ;;  %v2379_v45 = vpop.f32.mrb[71].mxu0  ;;  %3124 = vmatprep.mubr.bf16.mxu1 %v8836_v26 }
 0x373   : > { %4425 = vmatprep.subr.bf16.mxu1 %v4362_v54  ;;  %4826 = vmatprep.subr.bf16.mxu0 %v4763_v20  ;;  %v11348_v16 = vadd.f32 %v2452_v11, %v1610_v38  ;;  %v2453_v63 = vsel %vm11262_vm11, %v2379_v45, 0.0  ;;  %v1545_v36 = vpop.f32.mrb[10].mxu1 }
 0x374   : > { %5059 = vperm.xlu1 %8166, %v5001_v22   ;;  %v11352_v42 = vadd.f32 %v2453_v63, %v1611_v41  ;;  %v1547_v18 = vpop.f32.mrb[11].mxu1  ;;  %v1614_v34 = vsel %vm11236_vm8, %v1545_v36, 0.0  ;;  %v8842_v41 = vld [vmem:[%s13698_s3 + $0x274] ss:$8 sps:$4 sm:$0xff]   ;;  %v8455_v36 = vunpack.i.l.bf16 %v11292_v28  ;;  %8518 = vrot.lane.b32.xlu0 %v13864_v15, %s8940_s24 }
 0x375   : > { %v4690_v57 = vpop.permute.xlu1 %4689  ;;  %v1615_v0 = vsel %vm11242_vm9, %v1547_v18, 0.0 }
 0x376   : > { %v4762_v29 = vsel %vm4749_vm6, %v4690_v57, %v4692_v33  ;;  %v11361_v55 = vpop.permute.xlu0 %4312  ;;  %v8841_v33 = vld [vmem:[%s13698_s3 + $0x260] ss:$8 sps:$4 sm:$0xff]  }
 0x377   : > { %4827 = vmatpush1.bf16.msra.mxu0 %v4762_v29  ;;  %v2383_v27 = vpop.f32.mrb[72].mxu0  ;;  %v1551_v31 = vpop.f32.mrb[12].mxu1 }
 0x378   : > { %5069 = vperm.xlu1 %8166, %v5003_v30   ;;  %4828 = vmatprep.subr.bf16.mxu0 %v4765_v49  ;;  %v2454_v51 = vsel %vm11249_vm10, %v2383_v27, 0.0  ;;  %v2385_v56 = vpop.f32.mrb[73].mxu0  ;;  %v1553_v61 = vpop.f32.mrb[13].mxu1  ;;  %v1616_v21 = vsel %vm11236_vm8, %v1551_v31, 0.0 }
 0x379   : > { %v4293_v6 = vpop.permute.xlu1 %4292  ;;  %v11379_v44 = vadd.f32 %v2454_v51, %v1612_v23  ;;  %v2455_v50 = vsel %vm11262_vm11, %v2385_v56, 0.0  ;;  %v2387_v5 = vpop.f32.mrb[74].mxu0  ;;  %3125 = vmatmul.mubr.bf16.gmra.mrb[52].mxu1 %v8838_v40  ;;  %v1617_v20 = vsel %vm11242_vm9, %v1553_v61, 0.0  ;;  %8528 = vrot.lane.b32.xlu0 %v13864_v15, %s8940_s24 }
 0x37a   : > { %v4361_v26 = vsel %vm4346_vm7, %v4293_v6, %v11197_v58  ;;  %v11387_v60 = vpop.permute.xlu0 %4310  ;;  %v11389_v12 = vadd.f32 %v2455_v50, %v1613_v25  ;;  %v2456_v62 = vsel %vm11249_vm10, %v2387_v5, 0.0  ;;  %v2389_v37 = vpop.f32.mrb[75].mxu0  ;;  %3134 = vmatprep.mubr.bf16.mxu1 %v8839_v32  ;;  %v4363_v50 = vsel %vm4346_vm7, %v11258_v17, %v11234_v48 }
 0x37b   : > { %4426 = vmatpush1.bf16.msra.mxu1 %v4361_v26  ;;  %v11393_v47 = vadd.f32 %v2456_v62, %v1614_v34  ;;  %v2457_v8 = vsel %vm11262_vm11, %v2389_v37, 0.0  ;;  %v1555_v38 = vpop.f32.mrb[14].mxu1  ;;  %v8456_v17 = vunpack.i.h.bf16 %v11292_v28 }
 0x37c   : > { %5079 = vperm.xlu1 %8166, %v5005_v52   ;;  %v11397_v46 = vadd.f32 %v2457_v8, %v1615_v0  ;;  %v1557_v58 = vpop.f32.mrb[15].mxu1  ;;  %v8844_v0 = vld [vmem:[%s13698_s3 + $0x270] ss:$8 sps:$4 sm:$0xff]  }
 0x37d   : > { %v4696_v19 = vpop.permute.xlu1 %4695  ;;  %v1619_v29 = vsel %vm11242_vm9, %v1557_v58, 0.0  ;;  %8538 = vrot.lane.b32.xlu0 %v13864_v15, %s8940_s24 }
 0x37e   : > { %v4764_v22 = vsel %vm4749_vm6, %v4696_v19, %v11215_v35  ;;  %v11404_v53 = vpop.permute.xlu0 %8463  ;;  %v1618_v35 = vsel %vm11236_vm8, %v1555_v38, 0.0 }
 0x37f   : > { %4829 = vmatpush1.bf16.msra.mxu0 %v4764_v22  ;;  %v2393_v54 = vpop.f32.mrb[76].mxu0  ;;  %v1561_v11 = vpop.f32.mrb[16].mxu1 }
 0x380   : > { %v2458_v45 = vsel %vm11249_vm10, %v2393_v54, 0.0  ;;  %v2395_v10 = vpop.f32.mrb[77].mxu0  ;;  %v1563_v63 = vpop.f32.mrb[17].mxu1  ;;  %v1620_v8 = vsel %vm11236_vm8, %v1561_v11, 0.0  ;;  %8483 = vrot.lane.b32.xlu1 %v13864_v15, %s8938_s16 }
 0x381   : > { %v8449_v18 = vpop.permute.xlu1 %8448  ;;  %v11418_v57 = vadd.f32 %v2458_v45, %v1616_v21  ;;  %v2459_v30 = vsel %vm11262_vm11, %v2395_v10, 0.0  ;;  %v2397_v40 = vpop.f32.mrb[78].mxu0  ;;  %3135 = vmatmul.mubr.bf16.gmra.mrb[56].mxu1 %v8841_v33  ;;  %v1621_v58 = vsel %vm11242_vm9, %v1563_v63, 0.0  ;;  %8583 = vrot.lane.b32.xlu0 %v13864_v15, %s8943_s12 }
 0x382   : > { %v8451_v23 = vunpack.i.h.bf16 %v8449_v18  ;;  %v8450_v32 = vunpack.i.l.bf16 %v8449_v18  ;;  %v11424_v49 = vpop.permute.xlu0 %4318  ;;  %v11426_v27 = vadd.f32 %v2459_v30, %v1617_v20  ;;  %v2460_v25 = vsel %vm11249_vm10, %v2397_v40, 0.0  ;;  %v2399_v31 = vpop.f32.mrb[79].mxu0  ;;  %3144 = vmatprep.mubr.bf16.mxu1 %v8842_v41 }
 0x383   : > { %v11430_v51 = vadd.f32 %v2460_v25, %v1618_v35  ;;  %v2461_v56 = vsel %vm11262_vm11, %v2399_v31, 0.0  ;;  %v1565_v34 = vpop.f32.mrb[18].mxu1  ;;  %v4769_v18 = vsel %vm4749_vm6, %v11338_v43, %v8456_v17 }
 0x384   : > { %v4364_v61 = vsel %vm4346_vm7, %v11234_v48, %v8450_v32  ;;  %v11436_v6 = vadd.f32 %v2461_v56, %v1619_v29  ;;  %v1567_v52 = vpop.f32.mrb[19].mxu1  ;;  %v4366_v62 = vsel %vm4346_vm7, %v11311_v3, %v8451_v23  ;;  %v8847_v48 = vld [vmem:[%s13698_s3 + $0x384] ss:$8 sps:$4 sm:$0xff]   ;;  %v1622_v21 = vsel %vm11236_vm8, %v1565_v34, 0.0  ;;  %8493 = vrot.lane.b32.xlu1 %v13864_v15, %s8938_s16 }
 0x385   : > { %v4704_v5 = vpop.permute.xlu1 %4703  ;;  %4427 = vmatprep.subr.bf16.mxu1 %v4364_v61  ;;  %v1623_v45 = vsel %vm11242_vm9, %v1567_v52, 0.0 }
 0x386   : > { %v11444_v26 = vpop.permute.xlu0 %4721  ;;  %4428 = vmatpush1.bf16.msra.mxu1 %v4363_v50  ;;  %v4767_v37 = vsel %vm4749_vm6, %v4704_v5, %v8455_v36 }
 0x387   : > { %4429 = vmatprep.subr.bf16.mxu1 %v4366_v62  ;;  %4830 = vmatprep.subr.bf16.mxu0 %v4767_v37  ;;  %v2403_v38 = vpop.f32.mrb[80].mxu0  ;;  %v1571_v19 = vpop.f32.mrb[20].mxu1 }
 0x388   : > { %v2462_v33 = vsel %vm11249_vm10, %v2403_v38, 0.0  ;;  %v2405_v22 = vpop.f32.mrb[81].mxu0  ;;  %v1573_v41 = vpop.f32.mrb[21].mxu1  ;;  %v1624_v34 = vsel %vm11236_vm8, %v1571_v19, 0.0  ;;  %8503 = vrot.lane.b32.xlu1 %v13864_v15, %s8939_s19 }
 0x389   : > { %v4702_v54 = vpop.permute.xlu1 %4701  ;;  %v11461_v20 = vadd.f32 %v2462_v33, %v1620_v8  ;;  %v2463_v28 = vsel %vm11262_vm11, %v2405_v22, 0.0  ;;  %v2407_v11 = vpop.f32.mrb[82].mxu0  ;;  %3145 = vmatmul.mubr.bf16.gmra.mrb[60].mxu1 %v8844_v0  ;;  %v1625_v52 = vsel %vm11242_vm9, %v1573_v41, 0.0 }
 0x38a   : > { %v4766_v10 = vsel %vm4749_vm6, %v4702_v54, %v4704_v5  ;;  %v11468_v35 = vadd.f32 %v2463_v28, %v1621_v58  ;;  %v2464_v63 = vsel %vm11249_vm10, %v2407_v11, 0.0  ;;  %v2409_v36 = vpop.f32.mrb[83].mxu0  ;;  %4443 = vmatprep.mubr.bf16.mxu1 %v8847_v48  ;;  %v1575_v29 = vpop.f32.mrb[22].mxu1 }
 0x38b   : > { %4831 = vmatpush1.bf16.msra.mxu0 %v4766_v10  ;;  %v11474_v30 = vadd.f32 %v2464_v63, %v1622_v21  ;;  %v2465_v40 = vsel %vm11262_vm11, %v2409_v36, 0.0  ;;  %v1577_v32 = vpop.f32.mrb[23].mxu1  ;;  %v11480_v31 = vpop.permute.xlu0 %4324  ;;  %v1626_v62 = vsel %vm11236_vm8, %v1575_v29, 0.0  ;;  %v8465_v10 = vunpack.i.l.bf16 %v11404_v53 }
 0x38c   : > { %4832 = vmatprep.subr.bf16.mxu0 %v4769_v18  ;;  %v11478_v23 = vadd.f32 %v2465_v40, %v1623_v45  ;;  %v1627_v38 = vsel %vm11242_vm9, %v1577_v32, 0.0  ;;  %8513 = vrot.lane.b32.xlu1 %v13864_v15, %s8939_s19 }
 0x38d   : > { %v4305_v25 = vpop.permute.xlu1 %4304 }
 0x38e   : > { %v4365_v56 = vsel %vm4346_vm7, %v4305_v25, %v11311_v3 }
 0x38f   : > { %4430 = vmatpush1.bf16.msra.mxu1 %v4365_v56  ;;  %v2413_v61 = vpop.f32.mrb[84].mxu0  ;;  %v1581_v50 = vpop.f32.mrb[24].mxu1 }
 0x390   : > { %v2466_v5 = vsel %vm11249_vm10, %v2413_v61, 0.0  ;;  %v2415_v0 = vpop.f32.mrb[85].mxu0  ;;  %v1583_v37 = vpop.f32.mrb[25].mxu1  ;;  %v1628_v18 = vsel %vm11236_vm8, %v1581_v50, 0.0  ;;  %v4367_v50 = vsel %vm4346_vm7, %v11387_v60, %v11361_v55  ;;  %8523 = vrot.lane.b32.xlu1 %v13864_v15, %s8939_s19 }
 0x391   : > { %v4708_v8 = vpop.permute.xlu1 %4707  ;;  %v11492_v48 = vadd.f32 %v2466_v5, %v1624_v34  ;;  %v2467_v3 = vsel %vm11262_vm11, %v2415_v0, 0.0  ;;  %v2417_v17 = vpop.f32.mrb[86].mxu0  ;;  %v1629_v29 = vsel %vm11242_vm9, %v1583_v37, 0.0 }
 0x392   : > { %v4768_v58 = vsel %vm4749_vm6, %v4708_v8, %v11338_v43  ;;  %v11500_v19 = vadd.f32 %v2467_v3, %v1625_v52  ;;  %v2468_v33 = vsel %vm11249_vm10, %v2417_v17, 0.0  ;;  %v2419_v22 = vpop.f32.mrb[87].mxu0  ;;  %v1585_v54 = vpop.f32.mrb[26].mxu1 }
 0x393   : > { %4833 = vmatpush1.bf16.msra.mxu0 %v4768_v58  ;;  %v11504_v21 = vadd.f32 %v2468_v33, %v1626_v62  ;;  %v2469_v41 = vsel %vm11262_vm11, %v2419_v22, 0.0  ;;  %v1587_v11 = vpop.f32.mrb[27].mxu1  ;;  %v11511_v43 = vpop.permute.xlu0 %4322  ;;  %v1630_v61 = vsel %vm11236_vm8, %v1585_v54, 0.0  ;;  %v8466_v58 = vunpack.i.h.bf16 %v11404_v53 }
 0x394   : > { %v11508_v28 = vadd.f32 %v2469_v41, %v1627_v38  ;;  %v1631_v8 = vsel %vm11242_vm9, %v1587_v11, 0.0  ;;  %8533 = vrot.lane.b32.xlu1 %v13864_v15, %s8939_s19 }
 0x395   : > { %v8459_v45 = vpop.permute.xlu1 %8458 }
 0x396   : > { %v8461_v63 = vunpack.i.h.bf16 %v8459_v45  ;;  %v8460_v36 = vunpack.i.l.bf16 %v8459_v45 }
 0x397   : > { %v2423_v40 = vpop.f32.mrb[88].mxu0  ;;  %v1591_v32 = vpop.f32.mrb[28].mxu1 }
 0x398   : > { %v4368_v25 = vsel %vm4346_vm7, %v11361_v55, %v8460_v36  ;;  %v2470_v56 = vsel %vm11249_vm10, %v2423_v40, 0.0  ;;  %v2425_v34 = vpop.f32.mrb[89].mxu0  ;;  %v1593_v52 = vpop.f32.mrb[29].mxu1  ;;  %v4370_v3 = vsel %vm4346_vm7, %v11424_v49, %v8461_v63  ;;  %v4773_v36 = vsel %vm4749_vm6, %v11444_v26, %v8466_v58  ;;  %8543 = vrot.lane.b32.xlu1 %v13864_v15, %s8941_s29 }
 0x399   : > { %v4716_v5 = vpop.permute.xlu1 %4715  ;;  %4431 = vmatprep.subr.bf16.mxu1 %v4368_v25  ;;  %v11526_v0 = vadd.f32 %v2470_v56, %v1628_v18  ;;  %v2471_v62 = vsel %vm11262_vm11, %v2425_v34, 0.0  ;;  %v2427_v37 = vpop.f32.mrb[90].mxu0  ;;  %v1632_v53 = vsel %vm11236_vm8, %v1591_v32, 0.0 }
 0x39a   : > { %4432 = vmatpush1.bf16.msra.mxu1 %v4367_v50  ;;  %v4771_v17 = vsel %vm4749_vm6, %v4716_v5, %v8465_v10  ;;  %v11535_v38 = vadd.f32 %v2471_v62, %v1629_v29  ;;  %v2472_v55 = vsel %vm11249_vm10, %v2427_v37, 0.0  ;;  %v2429_v60 = vpop.f32.mrb[91].mxu0  ;;  %v1595_v41 = vpop.f32.mrb[30].mxu1  ;;  %v1633_v29 = vsel %vm11242_vm9, %v1593_v52, 0.0 }
 0x39b   : > { %4433 = vmatprep.subr.bf16.mxu1 %v4370_v3  ;;  %4834 = vmatprep.subr.bf16.mxu0 %v4771_v17  ;;  %v11540_v33 = vadd.f32 %v2472_v55, %v1630_v61  ;;  %v2473_v22 = vsel %vm11262_vm11, %v2429_v60, 0.0  ;;  %v8474_v54 = vpop.permute.xlu0 %8473  ;;  %v1597_v45 = vpop.f32.mrb[31].mxu1  ;;  %v1634_v50 = vsel %vm11236_vm8, %v1595_v41, 0.0 }
 0x39c   : > { %v11544_v11 = vadd.f32 %v2473_v22, %v1631_v8  ;;  %v1635_v52 = vsel %vm11242_vm9, %v1597_v45, 0.0  ;;  %v8475_v45 = vunpack.i.l.bf16 %v8474_v54  ;;  %8548 = vrot.lane.b32.xlu1 %v13864_v15, %s8942_s11 }
 0x39d   : > { %13971 = vst [vmem:[#allocation20_spill] sm:$0xff] %v11540_v33  ;;  %v4714_v10 = vpop.permute.xlu1 %4713 }
 0x39e   : > { %13972 = vst [vmem:[#allocation35_spill] sm:$0xff] %v11544_v11  ;;  %v4770_v63 = vsel %vm4749_vm6, %v4714_v10, %v4716_v5 }
 0x39f   : > { %4835 = vmatpush1.bf16.msra.mxu0 %v4770_v63  ;;  %v4331_v25 = vpop.permute.xlu0 %4330 }
 0x3a0   : > { %4836 = vmatprep.subr.bf16.mxu0 %v4773_v36  ;;  %8553 = vrot.lane.b32.xlu1 %v13864_v15, %s8941_s29 }
 0x3a1   : > { %v4317_v18 = vpop.permute.xlu1 %4316  ;;  %v2433_v40 = vpop.f32.mrb[92].mxu0 }
 0x3a2   : > { %v4369_v56 = vsel %vm4346_vm7, %v4317_v18, %v11424_v49  ;;  %v2474_v34 = vsel %vm11249_vm10, %v2433_v40, 0.0  ;;  %v2435_v61 = vpop.f32.mrb[93].mxu0 }
 0x3a3   : > { %4434 = vmatpush1.bf16.msra.mxu1 %v4369_v56  ;;  %v11559_v5 = vadd.f32 %v2474_v34, %v1632_v53  ;;  %v2475_v32 = vsel %vm11262_vm11, %v2435_v61, 0.0  ;;  %v2437_v62 = vpop.f32.mrb[94].mxu0  ;;  %v4734_v22 = vpop.permute.xlu0 %4733  ;;  %v4371_v53 = vsel %vm4346_vm7, %v11511_v43, %v11480_v31  ;;  %v8476_v56 = vunpack.i.h.bf16 %v8474_v54 }
 0x3a4   : > { %v11565_v37 = vadd.f32 %v2475_v32, %v1633_v29  ;;  %v2476_v49 = vsel %vm11249_vm10, %v2437_v62, 0.0  ;;  %v2439_v8 = vpop.f32.mrb[95].mxu0  ;;  %8558 = vrot.lane.b32.xlu1 %v13864_v15, %s8942_s11 }
 0x3a5   : > { %13973 = vst [vmem:[#allocation53_spill] sm:$0xff] %v11559_v5  ;;  %v4720_v3 = vpop.permute.xlu1 %4719  ;;  %v11569_v17 = vadd.f32 %v2476_v49, %v1634_v50  ;;  %v2477_v55 = vsel %vm11262_vm11, %v2439_v8, 0.0  ;;  %v4777_v50 = vsel %vm4749_vm6, %v4734_v22, %v8476_v56 }
 0x3a6   : > { %13974 = vst [vmem:[#allocation47_spill] sm:$0xff] %v11565_v37  ;;  %v4772_v60 = vsel %vm4749_vm6, %v4720_v3, %v11444_v26  ;;  %v11575_v58 = vadd.f32 %v2477_v55, %v1635_v52 }
 0x3a7   : > { %13975 = vst [vmem:[#allocation42_spill] sm:$0xff] %v11569_v17  ;;  %4837 = vmatpush1.bf16.msra.mxu0 %v4772_v60  ;;  %v4337_v40 = vpop.permute.xlu0 %4336 }
 0x3a8   : > { %13976 = vst [vmem:[#allocation6_spill] sm:$0xff] %v11575_v58  ;;  %8563 = vrot.lane.b32.xlu1 %v13864_v15, %s8941_s29 }
 0x3a9   : > { %v8469_v41 = vpop.permute.xlu1 %8468 }
 0x3aa   : > { %v8471_v10 = vunpack.i.h.bf16 %v8469_v41  ;;  %v8470_v63 = vunpack.i.l.bf16 %v8469_v41 }
 0x3ab   : > { %v4335_v32 = vpop.permute.xlu0 %4334 }
 0x3ac   : > { %v4372_v36 = vsel %vm4346_vm7, %v11480_v31, %v8470_v63  ;;  %v4374_v26 = vsel %vm4346_vm7, %v4331_v25, %v8471_v10  ;;  %v4375_v63 = vsel %vm4346_vm7, %v4335_v32, %v4337_v40  ;;  %8568 = vrot.lane.b32.xlu1 %v13864_v15, %s8942_s11 }
 0x3ad   : > { %v4728_v18 = vpop.permute.xlu1 %4727  ;;  %4435 = vmatprep.subr.bf16.mxu1 %v4372_v36 }
 0x3ae   : > { %4436 = vmatpush1.bf16.msra.mxu1 %v4371_v53  ;;  %v4775_v29 = vsel %vm4749_vm6, %v4728_v18, %v8475_v45 }
 0x3af   : > { %4437 = vmatprep.subr.bf16.mxu1 %v4374_v26  ;;  %4838 = vmatprep.subr.bf16.mxu0 %v4775_v29  ;;  %v4742_v8 = vpop.permute.xlu0 %4741 }
 0x3b0   : > { %8573 = vrot.lane.b32.xlu1 %v13864_v15, %s8941_s29 }
 0x3b1   : > { %v4726_v34 = vpop.permute.xlu1 %4725 }
 0x3b2   : > { %v4774_v61 = vsel %vm4749_vm6, %v4726_v34, %v4728_v18 }
 0x3b3   : > { %4839 = vmatpush1.bf16.msra.mxu0 %v4774_v61  ;;  %v4343_v10 = vpop.permute.xlu0 %4342 }
 0x3b4   : > { %4840 = vmatprep.subr.bf16.mxu0 %v4777_v50  ;;  %8578 = vrot.lane.b32.xlu1 %v13864_v15, %s8942_s11 }
 0x3b5   : > { %v4329_v31 = vpop.permute.xlu1 %4328 }
 0x3b6   : > { %v4373_v43 = vsel %vm4346_vm7, %v4329_v31, %v4331_v25 }
 0x3b7   : > { %4438 = vmatpush1.bf16.msra.mxu1 %v4373_v43  ;;  %v11587_v62 = vpop.f32.mrb[96].mxu0  ;;  %v4746_v34 = vpop.permute.xlu0 %4745 }
 0x3b8   : > { %v11589_v52 = vpop.f32.mrb[97].mxu0 }
 0x3b9   : > { %v4732_v49 = vpop.permute.xlu1 %4731  ;;  %v11591_v54 = vpop.f32.mrb[98].mxu0 }
 0x3ba   : > { %v4776_v3 = vsel %vm4749_vm6, %v4732_v49, %v4734_v22  ;;  %v11594_v55 = vpop.f32.mrb[99].mxu0  ;;  %v8845_v49 = vld [vmem:[%s13698_s3 + $0x380] ss:$8 sps:$4 sm:$0xff]   ;;  %v3656_v11 = vsel %vm11249_vm10, %v11591_v54, 0.0 }
 0x3bb   : > { %4841 = vmatpush1.bf16.msra.mxu0 %v4776_v3  ;;  %v8851_v3 = vld [vmem:[%s13698_s3 + $0x394] ss:$8 sps:$4 sm:$0xff]  }
 0x3bd   : > { %v8479_v60 = vpop.permute.xlu1 %8478 }
 0x3be   : > { %v8481_v41 = vunpack.i.h.bf16 %v8479_v60  ;;  %v8480_v45 = vunpack.i.l.bf16 %v8479_v60 }
 0x3c0   : > { %v4376_v25 = vsel %vm4346_vm7, %v4337_v40, %v8480_v45  ;;  %v4378_v18 = vsel %vm4346_vm7, %v4343_v10, %v8481_v41  ;;  %v4744_v41 = vpop.permute.xlu0 %4743 }
 0x3c1   : > { %v4740_v36 = vpop.permute.xlu1 %4739  ;;  %4439 = vmatprep.subr.bf16.mxu1 %v4376_v25  ;;  %v11598_v53 = vpop.f32.mrb[100].mxu0  ;;  %v4780_v25 = vsel %vm4749_vm6, %v4744_v41, %v4746_v34  ;;  %v8863_v41 = vld [vmem:[%s13698_s3 + $0x3b4] ss:$8 sps:$4 sm:$0xff]  }
 0x3c2   : > { %4440 = vmatpush1.bf16.msra.mxu1 %v4375_v63  ;;  %v4779_v22 = vsel %vm4749_vm6, %v4740_v36, %v4742_v8  ;;  %v11602_v26 = vpop.f32.mrb[101].mxu0  ;;  %v8848_v63 = vld [vmem:[%s13698_s3 + $0x400] ss:$8 sps:$4 sm:$0xff]  }
 0x3c3   : > { %4441 = vmatprep.subr.bf16.mxu1 %v4378_v18  ;;  %4842 = vmatprep.subr.bf16.mxu0 %v4779_v22  ;;  %v11604_v29 = vpop.f32.mrb[102].mxu0  ;;  %v8853_v18 = vld [vmem:[%s13698_s3 + $0x390] ss:$8 sps:$4 sm:$0xff]  }
 0x3c4   : > { %v11606_v56 = vpop.f32.mrb[103].mxu0 }
 0x3c6   : > { %v4738_v40 = vpop.permute.xlu1 %4737 }
 0x3c7   : > { %v4778_v61 = vsel %vm4749_vm6, %v4738_v40, %v4740_v36  ;;  %v8854_v36 = vld [vmem:[%s13698_s3 + $0x414] ss:$8 sps:$4 sm:$0xff]   ;;  %v8857_v40 = vld [vmem:[%s13698_s3 + $0x3a4] ss:$8 sps:$4 sm:$0xff]  }
 0x3c8   : > { %4843 = vmatpush1.bf16.msra.mxu0 %v4778_v61 }
 0x3c9   : > { %v11613_v50 = vpop.f32.mrb[104].mxu0 }
 0x3ca   : > { %v4341_v32 = vpop.permute.xlu1 %4340  ;;  %v11617_v31 = vpop.f32.mrb[105].mxu0 }
 0x3cb   : > { %v4377_v43 = vsel %vm4346_vm7, %v4341_v32, %v4343_v10  ;;  %v11623_v8 = vpop.f32.mrb[106].mxu0 }
 0x3cc   : > { %4442 = vmatpush1.bf16.msra.mxu1 %v4377_v43  ;;  %v11630_v60 = vpop.f32.mrb[107].mxu0  ;;  %v8856_v43 = vld [vmem:[%s13698_s3 + $0x410] ss:$8 sps:$4 sm:$0xff]  }
 0x3ce   : > { %v4748_v45 = vpop.permute.xlu1 %4747 }
 0x3cf   : > { %4444 = vmatmul.mubr.bf16.vlgmr.msra.gmra.mrb[32].mxu1 %v8845_v49  ;;  %v4781_v10 = vsel %vm4749_vm6, %v4746_v34, %v4748_v45  ;;  %v8860_v49 = vld [vmem:[%s13698_s3 + $0x424] ss:$8 sps:$4 sm:$0xff]  }
 0x3d0   : > { %4844 = vmatprep.subr.bf16.mxu0 %v4781_v10  ;;  %4453 = vmatprep.mubr.bf16.mxu1 %v8851_v3  ;;  %v8859_v3 = vld [vmem:[%s13698_s3 + $0x3a0] ss:$8 sps:$4 sm:$0xff]  }
 0x3d1   : > { %4845 = vmatpush1.bf16.msra.mxu0 %v4780_v25 }
 0x3d3   : > { %v11649_v22 = vpop.f32.mrb[108].mxu0 }
 0x3d4   : > { %4847 = vmatmul.mubr.bf16.vlgmr.msra.gmra.mrb[160].mxu0 %v8848_v63  ;;  %v11654_v34 = vpop.f32.mrb[109].mxu0 }
 0x3d5   : > { %4856 = vmatprep.mubr.bf16.mxu0 %v8854_v36  ;;  %v11656_v61 = vpop.f32.mrb[110].mxu0  ;;  %v8862_v36 = vld [vmem:[%s13698_s3 + $0x420] ss:$8 sps:$4 sm:$0xff]  }
 0x3d6   : > { %v11660_v32 = vpop.f32.mrb[111].mxu0 }
 0x3d7   : > { %4454 = vmatmul.mubr.bf16.gmra.mrb[36].mxu1 %v8853_v18 }
 0x3d8   : > { %4463 = vmatprep.mubr.bf16.mxu1 %v8857_v40 }
 0x3dc   : > { %4857 = vmatmul.mubr.bf16.gmra.mrb[164].mxu0 %v8856_v43  ;;  %v11676_v45 = vpop.f32.mrb[112].mxu0 }
 0x3dd   : > { %4866 = vmatprep.mubr.bf16.mxu0 %v8860_v49  ;;  %v11678_v10 = vpop.f32.mrb[113].mxu0  ;;  %v3654_v49 = vsel %vm11249_vm10, %v11587_v62, 0.0 }
 0x3de   : > { %v11682_v25 = vpop.f32.mrb[114].mxu0 }
 0x3df   : > { %4464 = vmatmul.mubr.bf16.gmra.mrb[40].mxu1 %v8859_v3  ;;  %v2802_v63 = vpop.f32.mrb[64].mxu1  ;;  %v11687_v18 = vpop.f32.mrb[115].mxu0  ;;  %v8866_v3 = vld [vmem:[%s13698_s3 + $0x434] ss:$8 sps:$4 sm:$0xff]  }
 0x3e0   : > { %4473 = vmatprep.mubr.bf16.mxu1 %v8863_v41  ;;  %v2881_v40 = vsel %vm11236_vm8, %v2802_v63, 0.0  ;;  %v2804_v43 = vpop.f32.mrb[65].mxu1  ;;  %v3655_v63 = vsel %vm11262_vm11, %v11589_v52, 0.0 }
 0x3e1   : > { %v7812_v58 = vadd.f32 %v11281_v39, %v2881_v40  ;;  %v2882_v41 = vsel %vm11242_vm9, %v2804_v43, 0.0  ;;  %v2806_v17 = vpop.f32.mrb[66].mxu1  ;;  %v8865_v39 = vld [vmem:[%s13698_s3 + $0x3b0] ss:$8 sps:$4 sm:$0xff]  }
 0x3e2   : > { %v7817_v37 = vadd.f32 %v11294_v4, %v2882_v41  ;;  %v2883_v62 = vsel %vm11236_vm8, %v2806_v17, 0.0  ;;  %v2808_v5 = vpop.f32.mrb[67].mxu1  ;;  %v3657_v4 = vsel %vm11262_vm11, %v11594_v55, 0.0  ;;  %v8869_v17 = vld [vmem:[%s13698_s3 + $0x3c4] ss:$8 sps:$4 sm:$0xff]  }
 0x3e3   : > { %v7822_v40 = vadd.f32 %v11298_v9, %v2883_v62  ;;  %v11715_v43 = vadd.f32 %v7812_v58, %v3654_v49  ;;  %v2884_v52 = vsel %vm11242_vm9, %v2808_v5, 0.0 }
 0x3e4   : > { %4867 = vmatmul.mubr.bf16.gmra.mrb[168].mxu0 %v8862_v36  ;;  %v11725_v54 = vpop.f32.mrb[116].mxu0  ;;  %v7827_v41 = vadd.f32 %v11302_v24, %v2884_v52  ;;  %v11728_v33 = vadd.f32 %v7817_v37, %v3655_v63  ;;  %v3658_v37 = vsel %vm11249_vm10, %v11598_v53, 0.0  ;;  %v8872_v53 = vld [vmem:[%s13698_s3 + $0x444] ss:$8 sps:$4 sm:$0xff]  }
 0x3e5   : > { %4876 = vmatprep.mubr.bf16.mxu0 %v8866_v3  ;;  %v11730_v9 = vpop.f32.mrb[117].mxu0  ;;  %v11734_v5 = vadd.f32 %v7822_v40, %v3656_v11  ;;  %v8868_v3 = vld [vmem:[%s13698_s3 + $0x430] ss:$8 sps:$4 sm:$0xff]   ;;  %v3659_v40 = vsel %vm11262_vm11, %v11602_v26, 0.0 }
 0x3e6   : > { %v11736_v58 = vpop.f32.mrb[118].mxu0  ;;  %v11738_v55 = vadd.f32 %v7827_v41, %v3657_v4 }
 0x3e7   : > { %v2812_v36 = vpop.f32.mrb[68].mxu1  ;;  %4474 = vmatmul.mubr.bf16.gmra.mrb[44].mxu1 %v8865_v39  ;;  %v11748_v11 = vpop.f32.mrb[119].mxu0 }
 0x3e8   : > { %v2885_v49 = vsel %vm11236_vm8, %v2812_v36, 0.0  ;;  %v2814_v24 = vpop.f32.mrb[69].mxu1  ;;  %4483 = vmatprep.mubr.bf16.mxu1 %v8869_v17  ;;  %v3660_v17 = vsel %vm11249_vm10, %v11604_v29, 0.0 }
 0x3e9   : > { %v7832_v63 = vadd.f32 %v11332_v59, %v2885_v49  ;;  %v2886_v62 = vsel %vm11242_vm9, %v2814_v24, 0.0  ;;  %v2816_v39 = vpop.f32.mrb[70].mxu1  ;;  %v3661_v49 = vsel %vm11262_vm11, %v11606_v56, 0.0 }
 0x3ea   : > { %v7837_v52 = vadd.f32 %v11343_v7, %v2886_v62  ;;  %v2887_v59 = vsel %vm11236_vm8, %v2816_v39, 0.0  ;;  %v2818_v4 = vpop.f32.mrb[71].mxu1  ;;  %v8871_v7 = vld [vmem:[%s13698_s3 + $0x3c0] ss:$8 sps:$4 sm:$0xff]  }
 0x3eb   : > { %v7842_v41 = vadd.f32 %v11348_v16, %v2887_v59  ;;  %v11768_v26 = vadd.f32 %v7832_v63, %v3658_v37  ;;  %v2888_v36 = vsel %vm11242_vm9, %v2818_v4, 0.0  ;;  %v8875_v16 = vld [vmem:[%s13698_s3 + $0x3d4] ss:$8 sps:$4 sm:$0xff]   ;;  %v3663_v4 = vsel %vm11262_vm11, %v11617_v31, 0.0 }
 0x3ec   : > { %v7847_v24 = vadd.f32 %v11352_v42, %v2888_v36  ;;  %v11779_v62 = vadd.f32 %v7837_v52, %v3659_v40  ;;  %4877 = vmatmul.mubr.bf16.gmra.mrb[172].mxu0 %v8868_v3  ;;  %v3662_v42 = vsel %vm11249_vm10, %v11613_v50, 0.0 }
 0x3ed   : > { %v11784_v29 = vadd.f32 %v7842_v41, %v3660_v17  ;;  %4886 = vmatprep.mubr.bf16.mxu0 %v8872_v53  ;;  %v11786_v37 = vpop.f32.mrb[120].mxu0  ;;  %v8874_v53 = vld [vmem:[%s13698_s3 + $0x440] ss:$8 sps:$4 sm:$0xff]   ;;  %v8878_v41 = vld [vmem:[%s13698_s3 + $0x454] ss:$8 sps:$4 sm:$0xff]  }
 0x3ee   : > { %v11788_v63 = vadd.f32 %v7847_v24, %v3661_v49  ;;  %v11790_v56 = vpop.f32.mrb[121].mxu0 }
 0x3ef   : > { %v2822_v39 = vpop.f32.mrb[72].mxu1  ;;  %4484 = vmatmul.mubr.bf16.gmra.mrb[48].mxu1 %v8871_v7  ;;  %v11800_v52 = vpop.f32.mrb[122].mxu0 }
 0x3f0   : > { %v2889_v3 = vsel %vm11236_vm8, %v2822_v39, 0.0  ;;  %v2824_v40 = vpop.f32.mrb[73].mxu1  ;;  %4493 = vmatprep.mubr.bf16.mxu1 %v8875_v16  ;;  %v11811_v36 = vpop.f32.mrb[123].mxu0  ;;  %v3665_v16 = vsel %vm11262_vm11, %v11630_v60, 0.0 }
 0x3f1   : > { %v7852_v59 = vadd.f32 %v11379_v44, %v2889_v3  ;;  %v2890_v50 = vsel %vm11242_vm9, %v2824_v40, 0.0  ;;  %v2826_v17 = vpop.f32.mrb[74].mxu1  ;;  %v3664_v44 = vsel %vm11249_vm10, %v11623_v8, 0.0 }
 0x3f2   : > { %v7857_v49 = vadd.f32 %v11389_v12, %v2890_v50  ;;  %v2891_v7 = vsel %vm11236_vm8, %v2826_v17, 0.0  ;;  %v2828_v31 = vpop.f32.mrb[75].mxu1  ;;  %v8877_v12 = vld [vmem:[%s13698_s3 + $0x3d0] ss:$8 sps:$4 sm:$0xff]  }
 0x3f3   : > { %v7862_v24 = vadd.f32 %v11393_v47, %v2891_v7  ;;  %v2892_v39 = vsel %vm11242_vm9, %v2828_v31, 0.0  ;;  %v11828_v3 = vadd.f32 %v7852_v59, %v3662_v42  ;;  %v8881_v47 = vld [vmem:[%s13698_s3 + $0x3e4] ss:$8 sps:$4 sm:$0xff]   ;;  %v3666_v42 = vsel %vm11249_vm10, %v11649_v22, 0.0  ;;  %v8880_v59 = vld [vmem:[%s13698_s3 + $0x450] ss:$8 sps:$4 sm:$0xff]  }
 0x3f4   : > { %v7867_v8 = vadd.f32 %v11397_v46, %v2892_v39  ;;  %4887 = vmatmul.mubr.bf16.gmra.mrb[176].mxu0 %v8874_v53  ;;  %v11834_v40 = vadd.f32 %v7857_v49, %v3663_v4  ;;  %v3667_v4 = vsel %vm11262_vm11, %v11654_v34, 0.0  ;;  %v8884_v22 = vld [vmem:[%s13698_s3 + $0x464] ss:$8 sps:$4 sm:$0xff]   ;;  %v3668_v7 = vsel %vm11249_vm10, %v11656_v61, 0.0 }
 0x3f5   : > { %4896 = vmatprep.mubr.bf16.mxu0 %v8878_v41  ;;  %v11836_v60 = vadd.f32 %v7862_v24, %v3664_v44 }
 0x3f6   : > { %v11838_v50 = vadd.f32 %v7867_v8, %v3665_v16 }
 0x3f7   : > { %v2832_v17 = vpop.f32.mrb[76].mxu1  ;;  %4494 = vmatmul.mubr.bf16.gmra.mrb[52].mxu1 %v8877_v12  ;;  %v8883_v12 = vld [vmem:[%s13698_s3 + $0x3e0] ss:$8 sps:$4 sm:$0xff]  }
 0x3f8   : > { %v2893_v46 = vsel %vm11236_vm8, %v2832_v17, 0.0  ;;  %v2834_v53 = vpop.f32.mrb[77].mxu1  ;;  %4503 = vmatprep.mubr.bf16.mxu1 %v8881_v47 }
 0x3f9   : > { %v7872_v41 = vadd.f32 %v11418_v57, %v2893_v46  ;;  %v2894_v49 = vsel %vm11242_vm9, %v2834_v53, 0.0  ;;  %v2836_v44 = vpop.f32.mrb[78].mxu1  ;;  %v3669_v57 = vsel %vm11262_vm11, %v11660_v32, 0.0 }
 0x3fa   : > { %v7877_v31 = vadd.f32 %v11426_v27, %v2894_v49  ;;  %v2895_v24 = vsel %vm11236_vm8, %v2836_v44, 0.0  ;;  %v2838_v34 = vpop.f32.mrb[79].mxu1  ;;  %v8886_v49 = vld [vmem:[%s13698_s3 + $0x460] ss:$8 sps:$4 sm:$0xff]   ;;  %v3671_v44 = vsel %vm11262_vm11, %v11678_v10, 0.0 }
 0x3fb   : > { %v7882_v16 = vadd.f32 %v11430_v51, %v2895_v24  ;;  %v2896_v39 = vsel %vm11242_vm9, %v2838_v34, 0.0  ;;  %v11872_v61 = vpop.f32.mrb[124].mxu0  ;;  %v11874_v27 = vadd.f32 %v7872_v41, %v3666_v42  ;;  %v8887_v51 = vld [vmem:[%s13698_s3 + $0x3f4] ss:$8 sps:$4 sm:$0xff]   ;;  %v3672_v24 = vsel %vm11249_vm10, %v11682_v25, 0.0 }
 0x3fc   : > { %v7887_v8 = vadd.f32 %v11436_v6, %v2896_v39  ;;  %4897 = vmatmul.mubr.bf16.gmra.mrb[180].mxu0 %v8880_v59  ;;  %v11877_v47 = vpop.f32.mrb[125].mxu0  ;;  %v11882_v32 = vadd.f32 %v7877_v31, %v3667_v4  ;;  %v3670_v6 = vsel %vm11249_vm10, %v11676_v45, 0.0  ;;  %v8890_v45 = vld [vmem:[%s13698_s3 + $0x474] ss:$8 sps:$4 sm:$0xff]  }
 0x3fd   : > { %4906 = vmatprep.mubr.bf16.mxu0 %v8884_v22  ;;  %v11884_v17 = vpop.f32.mrb[126].mxu0  ;;  %v11886_v46 = vadd.f32 %v7882_v16, %v3668_v7 }
 0x3fe   : > { %v11888_v53 = vpop.f32.mrb[127].mxu0  ;;  %v11890_v42 = vadd.f32 %v7887_v8, %v3669_v57 }
 0x3ff   : > { %v2842_v41 = vpop.f32.mrb[80].mxu1  ;;  %4504 = vmatmul.mubr.bf16.gmra.mrb[56].mxu1 %v8883_v12  ;;  %v8889_v12 = vld [vmem:[%s13698_s3 + $0x3f0] ss:$8 sps:$4 sm:$0xff]  }
 0x400   : > { %v2897_v59 = vsel %vm11236_vm8, %v2842_v41, 0.0  ;;  %v2844_v4 = vpop.f32.mrb[81].mxu1  ;;  %4513 = vmatprep.mubr.bf16.mxu1 %v8887_v51 }
 0x401   : > { %v7892_v22 = vadd.f32 %v11461_v20, %v2897_v59  ;;  %v2898_v7 = vsel %vm11242_vm9, %v2844_v4, 0.0  ;;  %v2846_v31 = vpop.f32.mrb[82].mxu1  ;;  %v3673_v20 = vsel %vm11262_vm11, %v11687_v18, 0.0  ;;  %v3676_v59 = vsel %vm11249_vm10, %v11736_v58, 0.0 }
 0x402   : > { %v7897_v34 = vadd.f32 %v11468_v35, %v2898_v7  ;;  %v2899_v57 = vsel %vm11236_vm8, %v2846_v31, 0.0  ;;  %v2848_v10 = vpop.f32.mrb[83].mxu1 }
 0x403   : > { %v7902_v16 = vadd.f32 %v11474_v30, %v2899_v57  ;;  %v2900_v39 = vsel %vm11242_vm9, %v2848_v10, 0.0  ;;  %v11924_v25 = vadd.f32 %v7892_v22, %v3670_v6  ;;  %v8892_v30 = vld [vmem:[%s13698_s3 + $0x470] ss:$8 sps:$4 sm:$0xff]   ;;  %v3674_v6 = vsel %vm11249_vm10, %v11725_v54, 0.0 }
 0x404   : > { %v7907_v35 = vadd.f32 %v11478_v23, %v2900_v39  ;;  %4907 = vmatmul.mubr.bf16.gmra.mrb[184].mxu0 %v8886_v49  ;;  %v11927_v8 = vadd.f32 %v7897_v34, %v3671_v44  ;;  %v3675_v23 = vsel %vm11262_vm11, %v11730_v9, 0.0  ;;  %v3677_v22 = vsel %vm11262_vm11, %v11748_v11, 0.0 }
 0x405   : > { %4916 = vmatprep.mubr.bf16.mxu0 %v8890_v45  ;;  %v11929_v51 = vadd.f32 %v7902_v16, %v3672_v24 }
 0x406   : > { %v4010_v18 = vpop.f32.mrb[128].mxu0  ;;  %v11934_v41 = vadd.f32 %v7907_v35, %v3673_v20 }
 0x407   : > { %v4089_v4 = vsel %vm11236_vm8, %v4010_v18, 0.0  ;;  %v2852_v49 = vpop.f32.mrb[84].mxu1  ;;  %v4012_v44 = vpop.f32.mrb[129].mxu0  ;;  %4514 = vmatmul.mubr.bf16.gmra.mrb[60].mxu1 %v8889_v12 }
 0x408   : > { %v11951_v54 = vadd.f32 %v11715_v43, %v4089_v4  ;;  %v2901_v9 = vsel %vm11236_vm8, %v2852_v49, 0.0  ;;  %v4090_v7 = vsel %vm11242_vm9, %v4012_v44, 0.0  ;;  %v2854_v58 = vpop.f32.mrb[85].mxu1  ;;  %v4014_v31 = vpop.f32.mrb[130].mxu0  ;;  %5391 = vmatprep.mubr.bf16.mxu1 %v13864_v15 }
 0x409   : > { %v7912_v45 = vadd.f32 %v11492_v48, %v2901_v9  ;;  %v11960_v24 = vadd.f32 %v11728_v33, %v4090_v7  ;;  %v2902_v11 = vsel %vm11242_vm9, %v2854_v58, 0.0  ;;  %v4091_v43 = vsel %vm11236_vm8, %v4014_v31, 0.0  ;;  %v2856_v34 = vpop.f32.mrb[86].mxu1  ;;  %v4016_v57 = vpop.f32.mrb[131].mxu0 }
 0x40a   : > { %v7917_v10 = vadd.f32 %v11500_v19, %v2902_v11  ;;  %v11968_v20 = vadd.f32 %v11734_v5, %v4091_v43  ;;  %v2903_v16 = vsel %vm11236_vm8, %v2856_v34, 0.0  ;;  %v4092_v48 = vsel %vm11242_vm9, %v4016_v57, 0.0  ;;  %v2858_v33 = vpop.f32.mrb[87].mxu1  ;;  %v13977_v57 = vld [vmem:[#allocation20_spill] sm:$0xff] }
 0x40b   : > { %v7922_v39 = vadd.f32 %v11504_v21, %v2903_v16  ;;  %v11976_v12 = vadd.f32 %v11738_v55, %v4092_v48  ;;  %v2904_v35 = vsel %vm11242_vm9, %v2858_v33, 0.0  ;;  %v11980_v18 = vadd.f32 %v7912_v45, %v3674_v6 }
 0x40c   : > { %v7927_v19 = vadd.f32 %v11508_v28, %v2904_v35  ;;  %4917 = vmatmul.mubr.bf16.gmra.mrb[188].mxu0 %v8892_v30  ;;  %v11983_v5 = vadd.f32 %v7917_v10, %v3675_v23  ;;  %v3678_v21 = vsel %vm11249_vm10, %v11786_v37, 0.0  ;;  %v3679_v55 = vsel %vm11262_vm11, %v11790_v56, 0.0 }
 0x40d   : > { %v11985_v4 = vadd.f32 %v7922_v39, %v3676_v59  ;;  %5609 = vmatprep.mubr.bf16.mxu0 %v13864_v15  ;;  %v3680_v28 = vsel %vm11249_vm10, %v11800_v52, 0.0  ;;  %v3681_v59 = vsel %vm11262_vm11, %v11811_v36, 0.0 }
 0x40e   : > { %v4020_v49 = vpop.f32.mrb[132].mxu0  ;;  %v11988_v44 = vadd.f32 %v7927_v19, %v3677_v22 }
 0x40f   : > { %v4093_v30 = vsel %vm11236_vm8, %v4020_v49, 0.0  ;;  %v2862_v6 = vpop.f32.mrb[88].mxu1  ;;  %v4022_v23 = vpop.f32.mrb[133].mxu0 }
 0x410   : > { %v12005_v22 = vadd.f32 %v11768_v26, %v4093_v30  ;;  %v2905_v37 = vsel %vm11236_vm8, %v2862_v6, 0.0  ;;  %v4094_v56 = vsel %vm11242_vm9, %v4022_v23, 0.0  ;;  %v2864_v9 = vpop.f32.mrb[89].mxu1  ;;  %v4024_v52 = vpop.f32.mrb[134].mxu0  ;;  %v3682_v30 = vsel %vm11249_vm10, %v11872_v61, 0.0 }
 0x411   : > { %v7932_v7 = vadd.f32 %v11526_v0, %v2905_v37  ;;  %v12013_v58 = vadd.f32 %v11779_v62, %v4094_v56  ;;  %v2906_v31 = vsel %vm11242_vm9, %v2864_v9, 0.0  ;;  %v4095_v26 = vsel %vm11236_vm8, %v4024_v52, 0.0  ;;  %v2866_v36 = vpop.f32.mrb[90].mxu1  ;;  %v4026_v45 = vpop.f32.mrb[135].mxu0  ;;  %v13979_v56 = vld [vmem:[#allocation53_spill] sm:$0xff] }
 0x412   : > { %v7937_v11 = vadd.f32 %v11535_v38, %v2906_v31  ;;  %v12021_v43 = vadd.f32 %v11784_v29, %v4095_v26  ;;  %v2907_v34 = vsel %vm11236_vm8, %v2866_v36, 0.0  ;;  %v4096_v0 = vsel %vm11242_vm9, %v4026_v45, 0.0  ;;  %v2868_v62 = vpop.f32.mrb[91].mxu1  ;;  %v13978_v38 = vld [vmem:[#allocation35_spill] sm:$0xff] }
 0x413   : > { %v7942_v10 = vadd.f32 %v13977_v57, %v2907_v34  ;;  %v12029_v16 = vadd.f32 %v11788_v63, %v4096_v0  ;;  %v2908_v48 = vsel %vm11242_vm9, %v2868_v62, 0.0  ;;  %v12033_v33 = vadd.f32 %v7932_v7, %v3678_v21  ;;  %v13980_v26 = vld [vmem:[#allocation47_spill] sm:$0xff]  ;;  %v13981_v0 = vld [vmem:[#allocation42_spill] sm:$0xff] }
 0x414   : > { %v7947_v29 = vadd.f32 %v13978_v38, %v2908_v48  ;;  %v12036_v39 = vadd.f32 %v7937_v11, %v3679_v55  ;;  %v3683_v63 = vsel %vm11262_vm11, %v11877_v47, 0.0  ;;  %v3684_v21 = vsel %vm11249_vm10, %v11884_v17, 0.0  ;;  %v13982_v38 = vld [vmem:[#allocation6_spill] sm:$0xff] }
 0x415   : > { %v12038_v35 = vadd.f32 %v7942_v10, %v3680_v28  ;;  %v3685_v23 = vsel %vm11262_vm11, %v11888_v53, 0.0 }
 0x416   : > { %v4030_v19 = vpop.f32.mrb[136].mxu0  ;;  %v12040_v49 = vadd.f32 %v7947_v29, %v3681_v59 }
 0x417   : > { %v4097_v55 = vsel %vm11236_vm8, %v4030_v19, 0.0  ;;  %v2872_v28 = vpop.f32.mrb[92].mxu1  ;;  %v4032_v6 = vpop.f32.mrb[137].mxu0 }
 0x418   : > { %v12057_v59 = vadd.f32 %v11828_v3, %v4097_v55  ;;  %v2909_v61 = vsel %vm11236_vm8, %v2872_v28, 0.0  ;;  %v4098_v47 = vsel %vm11242_vm9, %v4032_v6, 0.0  ;;  %v2874_v37 = vpop.f32.mrb[93].mxu1  ;;  %v4034_v17 = vpop.f32.mrb[138].mxu0 }
 0x419   : > { %v7952_v9 = vadd.f32 %v13979_v56, %v2909_v61  ;;  %v12065_v52 = vadd.f32 %v11834_v40, %v4098_v47  ;;  %v2910_v7 = vsel %vm11242_vm9, %v2874_v37, 0.0  ;;  %v4099_v3 = vsel %vm11236_vm8, %v4034_v17, 0.0  ;;  %v2876_v53 = vpop.f32.mrb[94].mxu1  ;;  %v4036_v31 = vpop.f32.mrb[139].mxu0 }
 0x41a   : > { %v7957_v36 = vadd.f32 %v13980_v26, %v2910_v7  ;;  %v12073_v45 = vadd.f32 %v11836_v60, %v4099_v3  ;;  %v2911_v11 = vsel %vm11236_vm8, %v2876_v53, 0.0  ;;  %v4100_v40 = vsel %vm11242_vm9, %v4036_v31, 0.0  ;;  %v2878_v34 = vpop.f32.mrb[95].mxu1 }
 0x41b   : > { %v7962_v62 = vadd.f32 %v13981_v0, %v2911_v11  ;;  %v12081_v57 = vadd.f32 %v11838_v50, %v4100_v40  ;;  %v2912_v10 = vsel %vm11242_vm9, %v2878_v34, 0.0  ;;  %v12085_v48 = vadd.f32 %v7952_v9, %v3682_v30 }
 0x41c   : > { %v7967_v60 = vadd.f32 %v13982_v38, %v2912_v10  ;;  %v12088_v29 = vadd.f32 %v7957_v36, %v3683_v63 }
 0x41d   : > { %v12090_v19 = vadd.f32 %v7962_v62, %v3684_v21 }
 0x41e   : > { %v4040_v55 = vpop.f32.mrb[140].mxu0  ;;  %v12092_v28 = vadd.f32 %v7967_v60, %v3685_v23 }
 0x41f   : > { %v4101_v6 = vsel %vm11236_vm8, %v4040_v55, 0.0  ;;  %v4042_v61 = vpop.f32.mrb[141].mxu0 }
 0x420   : > { %v12097_v50 = vadd.f32 %v11874_v27, %v4101_v6  ;;  %v4102_v30 = vsel %vm11242_vm9, %v4042_v61, 0.0  ;;  %v4044_v47 = vpop.f32.mrb[142].mxu0 }
 0x421   : > { %v12102_v37 = vadd.f32 %v11882_v32, %v4102_v30  ;;  %v4103_v63 = vsel %vm11236_vm8, %v4044_v47, 0.0  ;;  %v4046_v21 = vpop.f32.mrb[143].mxu0 }
 0x422   : > { %v12107_v23 = vadd.f32 %v11886_v46, %v4103_v63  ;;  %v4104_v17 = vsel %vm11242_vm9, %v4046_v21, 0.0 }
 0x423   : > { %v12112_v27 = vadd.f32 %v11890_v42, %v4104_v17 }
 0x426   : > { %v4050_v32 = vpop.f32.mrb[144].mxu0 }
 0x427   : > { %v4105_v56 = vsel %vm11236_vm8, %v4050_v32, 0.0  ;;  %v4052_v9 = vpop.f32.mrb[145].mxu0 }
 0x428   : > { %v12121_v46 = vadd.f32 %v11924_v25, %v4105_v56  ;;  %v4106_v7 = vsel %vm11242_vm9, %v4052_v9, 0.0  ;;  %v4054_v3 = vpop.f32.mrb[146].mxu0 }
 0x429   : > { %v12130_v42 = vadd.f32 %v11927_v8, %v4106_v7  ;;  %v4107_v53 = vsel %vm11236_vm8, %v4054_v3, 0.0  ;;  %v4056_v31 = vpop.f32.mrb[147].mxu0 }
 0x42a   : > { %v12135_v25 = vadd.f32 %v11929_v51, %v4107_v53  ;;  %v4108_v26 = vsel %vm11242_vm9, %v4056_v31, 0.0 }
 0x42b   : > { %v12140_v36 = vadd.f32 %v11934_v41, %v4108_v26 }
 0x42e   : > { %v4060_v8 = vpop.f32.mrb[148].mxu0 }
 0x42f   : > { %v4109_v11 = vsel %vm11236_vm8, %v4060_v8, 0.0  ;;  %v4062_v40 = vpop.f32.mrb[149].mxu0 }
 0x430   : > { %v12149_v51 = vadd.f32 %v11980_v18, %v4109_v11  ;;  %v4110_v34 = vsel %vm11242_vm9, %v4062_v40, 0.0  ;;  %v4064_v0 = vpop.f32.mrb[150].mxu0  ;;  %v5010_v11 = vpop.permute.xlu1 %5009 }
 0x431   : > { %v12158_v41 = vadd.f32 %v11983_v5, %v4110_v34  ;;  %v4111_v62 = vsel %vm11236_vm8, %v4064_v0, 0.0  ;;  %v4066_v10 = vpop.f32.mrb[151].mxu0 }
 0x432   : > { %v12163_v18 = vadd.f32 %v11985_v4, %v4111_v62  ;;  %v4112_v38 = vsel %vm11242_vm9, %v4066_v10, 0.0 }
 0x433   : > { %v12168_v60 = vadd.f32 %v11988_v44, %v4112_v38 }
 0x436   : > { %v4070_v55 = vpop.f32.mrb[152].mxu0 }
 0x437   : > { %v4113_v6 = vsel %vm11236_vm8, %v4070_v55, 0.0  ;;  %v4072_v61 = vpop.f32.mrb[153].mxu0 }
 0x438   : > { %v12173_v5 = vadd.f32 %v12033_v33, %v4113_v6  ;;  %v4114_v30 = vsel %vm11242_vm9, %v4072_v61, 0.0  ;;  %v4074_v47 = vpop.f32.mrb[154].mxu0 }
 0x439   : > { %v12178_v4 = vadd.f32 %v12036_v39, %v4114_v30  ;;  %v4115_v63 = vsel %vm11236_vm8, %v4074_v47, 0.0  ;;  %v4076_v44 = vpop.f32.mrb[155].mxu0 }
 0x43a   : > { %v12183_v21 = vadd.f32 %v12038_v35, %v4115_v63  ;;  %v4116_v17 = vsel %vm11242_vm9, %v4076_v44, 0.0 }
 0x43b   : > { %v12188_v33 = vadd.f32 %v12040_v49, %v4116_v17 }
 0x43e   : > { %v4080_v32 = vpop.f32.mrb[156].mxu0 }
 0x43f   : > { %v4117_v56 = vsel %vm11236_vm8, %v4080_v32, 0.0  ;;  %v4082_v9 = vpop.f32.mrb[157].mxu0 }
 0x440   : > { %v12193_v39 = vadd.f32 %v12085_v48, %v4117_v56  ;;  %v4118_v7 = vsel %vm11242_vm9, %v4082_v9, 0.0  ;;  %v4084_v3 = vpop.f32.mrb[158].mxu0  ;;  %v5015_v9 = vpop.permute.xlu0 %5014 }
 0x441   : > { %v12198_v35 = vadd.f32 %v12088_v29, %v4118_v7  ;;  %v4119_v53 = vsel %vm11236_vm8, %v4084_v3, 0.0  ;;  %v4086_v49 = vpop.f32.mrb[159].mxu0 }
 0x442   : > { %v12203_v31 = vadd.f32 %v12090_v19, %v4119_v53  ;;  %v4120_v26 = vsel %vm11242_vm9, %v4086_v49, 0.0 }
 0x443   : > { %v12208_v48 = vadd.f32 %v12092_v28, %v4120_v26  ;;  %v5020_v28 = vpop.permute.xlu1 %5019 }
 0x4a2   : > { %v4445_v8 = vpop.f32.mrb[32].mxu1 }
 0x4a3   : > { %v7815_v40 = vadd.f32 %v11951_v54, %v4445_v8  ;;  %v4447_v34 = vpop.f32.mrb[33].mxu1 }
 0x4a4   : > { %v7820_v29 = vadd.f32 %v11960_v24, %v4447_v34  ;;  %v4449_v0 = vpop.f32.mrb[34].mxu1 }
 0x4a5   : > { %v7825_v62 = vadd.f32 %v11968_v20, %v4449_v0  ;;  %v4451_v10 = vpop.f32.mrb[35].mxu1  ;;  %v5030_v0 = vpop.permute.xlu1 %5029 }
 0x4a6   : > { %v7830_v19 = vadd.f32 %v11976_v12, %v4451_v10 }
 0x4a7   : > { %v4848_v38 = vpop.f32.mrb[160].mxu0 }
 0x4a8   : > { %v4927_v55 = vsel %vm11249_vm10, %v4848_v38, 0.0  ;;  %v4850_v6 = vpop.f32.mrb[161].mxu0 }
 0x4a9   : > { %v4959_v61 = vadd.f32 %v7815_v40, %v4927_v55  ;;  %v4928_v30 = vsel %vm11262_vm11, %v4850_v6, 0.0  ;;  %v4852_v54 = vpop.f32.mrb[162].mxu0 }
 0x4aa   : > { %v4960_v47 = vadd.f32 %v7820_v29, %v4928_v30  ;;  %v4929_v24 = vsel %vm11249_vm10, %v4852_v54, 0.0  ;;  %v4455_v63 = vpop.f32.mrb[36].mxu1  ;;  %v4854_v20 = vpop.f32.mrb[163].mxu0 }
 0x4ab   : > { %v5087_v44 = vadd.f32 %v5010_v11, %v4959_v61  ;;  %v4961_v17 = vadd.f32 %v7825_v62, %v4929_v24  ;;  %v7835_v12 = vadd.f32 %v12005_v22, %v4455_v63  ;;  %v4930_v32 = vsel %vm11262_vm11, %v4854_v20, 0.0  ;;  %v4457_v56 = vpop.f32.mrb[37].mxu1 }
 0x4ac   : > { %v5088_v7 = vadd.f32 %v5010_v11, %v4960_v47  ;;  %v4962_v3 = vadd.f32 %v7830_v19, %v4930_v32  ;;  %v7840_v53 = vadd.f32 %v12013_v58, %v4457_v56  ;;  %v4459_v49 = vpop.f32.mrb[38].mxu1  ;;  %v5025_v32 = vpop.permute.xlu0 %5024 }
 0x4ad   : > { %v5089_v26 = vadd.f32 %v5015_v9, %v4961_v17  ;;  %v7845_v8 = vadd.f32 %v12021_v43, %v4459_v49  ;;  %v4461_v40 = vpop.f32.mrb[39].mxu1  ;;  %v5119_v62 = vmax.f32 %v5087_v44, 0.0 }
 0x4ae   : > { %v5090_v34 = vadd.f32 %v5015_v9, %v4962_v3  ;;  %v7850_v29 = vadd.f32 %v12029_v16, %v4461_v40  ;;  %v5120_v38 = vmax.f32 %v5088_v7, 0.0 }
 0x4af   : > { %v5121_v22 = vmax.f32 %v5089_v26, 0.0  ;;  %v4858_v10 = vpop.f32.mrb[164].mxu0 }
 0x4b0   : > { %v5122_v55 = vmax.f32 %v5090_v34, 0.0  ;;  %v4931_v11 = vsel %vm11249_vm10, %v4858_v10, 0.0  ;;  %v4860_v19 = vpop.f32.mrb[165].mxu0 }
 0x4b1   : > { %v12228_v6 = vpack.c.bf16 %v5121_v22, %v5119_v62  ;;  %v4963_v58 = vadd.f32 %v7835_v12, %v4931_v11  ;;  %v4932_v43 = vsel %vm11262_vm11, %v4860_v19, 0.0  ;;  %v4862_v61 = vpop.f32.mrb[166].mxu0 }
 0x4b2   : > { %v12232_v30 = vpack.c.bf16 %v5122_v55, %v5120_v38  ;;  %v4964_v16 = vadd.f32 %v7840_v53, %v4932_v43  ;;  %v4933_v54 = vsel %vm11249_vm10, %v4862_v61, 0.0  ;;  %v4465_v47 = vpop.f32.mrb[40].mxu1  ;;  %v4864_v24 = vpop.f32.mrb[167].mxu0 }
 0x4b3   : > { %13983 = vst [vmem:[#allocation39_spill] sm:$0xff] %v12228_v6  ;;  %v5091_v63 = vadd.f32 %v5020_v28, %v4963_v58  ;;  %v4965_v20 = vadd.f32 %v7845_v8, %v4933_v54  ;;  %v7855_v44 = vadd.f32 %v12057_v59, %v4465_v47  ;;  %v4934_v17 = vsel %vm11262_vm11, %v4864_v24, 0.0  ;;  %5701 = vrot.lane.b32.xlu0 %v12228_v6, %s8940_s24  ;;  %v4467_v12 = vpop.f32.mrb[41].mxu1  ;;  %v12244_v53 = vpop.permute.xlu1 %5039 }
 0x4b4   : > { %13984 = vst [vmem:[#allocation60_spill] sm:$0xff] %v12232_v30  ;;  %5281 = vrot.lane.b32.xlu1 %v12228_v6, %s8938_s16  ;;  %v5092_v56 = vadd.f32 %v5020_v28, %v4964_v16  ;;  %v4966_v9 = vadd.f32 %v7850_v29, %v4934_v17  ;;  %v7860_v7 = vadd.f32 %v12065_v52, %v4467_v12  ;;  %v4469_v3 = vpop.f32.mrb[42].mxu1 }
 0x4b5   : > { %v5093_v49 = vadd.f32 %v5025_v32, %v4965_v20  ;;  %v7865_v59 = vadd.f32 %v12073_v45, %v4469_v3  ;;  %v4471_v26 = vpop.f32.mrb[43].mxu1  ;;  %v5123_v34 = vmax.f32 %v5091_v63, 0.0 }
 0x4b6   : > { %v5094_v8 = vadd.f32 %v5025_v32, %v4966_v9  ;;  %v7870_v40 = vadd.f32 %v12081_v57, %v4471_v26  ;;  %v5124_v52 = vmax.f32 %v5092_v56, 0.0 }
 0x4b7   : > { %v5125_v62 = vmax.f32 %v5093_v49, 0.0  ;;  %v4868_v22 = vpop.f32.mrb[168].mxu0  ;;  %6305 = vrot.lane.b32.xlu0 %v12228_v6, %s8942_s11  ;;  %v12262_v16 = vpop.permute.xlu1 %5049 }
 0x4b8   : > { %5499 = vrot.lane.b32.xlu1 %v12228_v6, %s8939_s19  ;;  %v5126_v28 = vmax.f32 %v5094_v8, 0.0  ;;  %v4935_v29 = vsel %vm11249_vm10, %v4868_v22, 0.0  ;;  %v4870_v10 = vpop.f32.mrb[169].mxu0 }
 0x4b9   : > { %v12254_v45 = vpack.c.bf16 %v5125_v62, %v5123_v34  ;;  %v4967_v38 = vadd.f32 %v7855_v44, %v4935_v29  ;;  %v4936_v57 = vsel %vm11262_vm11, %v4870_v10, 0.0  ;;  %v4872_v55 = vpop.f32.mrb[170].mxu0  ;;  %v5035_v44 = vpop.permute.xlu0 %5034 }
 0x4ba   : > { %v12258_v11 = vpack.c.bf16 %v5126_v28, %v5124_v52  ;;  %v4968_v19 = vadd.f32 %v7860_v7, %v4936_v57  ;;  %v4937_v58 = vsel %vm11249_vm10, %v4872_v55, 0.0  ;;  %v4475_v43 = vpop.f32.mrb[44].mxu1  ;;  %v4874_v61 = vpop.f32.mrb[171].mxu0 }
 0x4bb   : > { %13985 = vst [vmem:[#allocation50_spill] sm:$0xff] %v12254_v45  ;;  %v5095_v54 = vadd.f32 %v5030_v0, %v4967_v38  ;;  %v4969_v47 = vadd.f32 %v7865_v59, %v4937_v58  ;;  %v7875_v24 = vadd.f32 %v12097_v50, %v4475_v43  ;;  %v4938_v63 = vsel %vm11262_vm11, %v4874_v61, 0.0  ;;  %5283 = vrot.lane.b32.xlu0 %v12232_v30, %s8938_s16  ;;  %v4477_v20 = vpop.f32.mrb[45].mxu1 }
 0x4bc   : > { %13986 = vst [vmem:[#allocation45_spill] sm:$0xff] %v12258_v11  ;;  %5919 = vrot.lane.b32.xlu1 %v12228_v6, %s8941_s29  ;;  %v5096_v17 = vadd.f32 %v5030_v0, %v4968_v19  ;;  %v4970_v12 = vadd.f32 %v7870_v40, %v4938_v63  ;;  %v7880_v32 = vadd.f32 %v12102_v37, %v4477_v20  ;;  %v4479_v56 = vpop.f32.mrb[46].mxu1 }
 0x4bd   : > { %v5097_v9 = vadd.f32 %v5035_v44, %v4969_v47  ;;  %v7885_v7 = vadd.f32 %v12107_v23, %v4479_v56  ;;  %v4481_v50 = vpop.f32.mrb[47].mxu1  ;;  %v5127_v59 = vmax.f32 %v5095_v54, 0.0  ;;  %v12280_v23 = vpop.permute.xlu1 %5059 }
 0x4be   : > { %v5098_v3 = vadd.f32 %v5035_v44, %v4970_v12  ;;  %v7890_v49 = vadd.f32 %v12112_v27, %v4481_v50  ;;  %v5128_v0 = vmax.f32 %v5096_v17, 0.0  ;;  %v5045_v54 = vpop.permute.xlu0 %5044 }
 0x4bf   : > { %v5129_v26 = vmax.f32 %v5097_v9, 0.0  ;;  %v4878_v8 = vpop.f32.mrb[172].mxu0  ;;  %5501 = vrot.lane.b32.xlu0 %v12232_v30, %s8939_s19 }
 0x4c0   : > { %6523 = vrot.lane.b32.xlu1 %v12228_v6, %s8943_s12  ;;  %v5130_v40 = vmax.f32 %v5098_v3, 0.0  ;;  %v4939_v37 = vsel %vm11249_vm10, %v4878_v8, 0.0  ;;  %v4880_v34 = vpop.f32.mrb[173].mxu0 }
 0x4c1   : > { %v12282_v62 = vpack.c.bf16 %v5129_v26, %v5127_v59  ;;  %v4971_v27 = vadd.f32 %v7875_v24, %v4939_v37  ;;  %v4940_v22 = vsel %vm11262_vm11, %v4880_v34, 0.0  ;;  %v4882_v52 = vpop.f32.mrb[174].mxu0  ;;  %v12302_v56 = vpop.permute.xlu1 %5069 }
 0x4c2   : > { %v12286_v28 = vpack.c.bf16 %v5130_v40, %v5128_v0  ;;  %v4972_v29 = vadd.f32 %v7880_v32, %v4940_v22  ;;  %v4941_v10 = vsel %vm11249_vm10, %v4882_v52, 0.0  ;;  %v4485_v38 = vpop.f32.mrb[48].mxu1  ;;  %v4884_v57 = vpop.f32.mrb[175].mxu0 }
 0x4c3   : > { %13987 = vst [vmem:[#allocation26_spill] sm:$0xff] %v12282_v62  ;;  %v5099_v55 = vadd.f32 %v12244_v53, %v4971_v27  ;;  %v4973_v19 = vadd.f32 %v7885_v7, %v4941_v10  ;;  %v7895_v58 = vadd.f32 %v12121_v46, %v4485_v38  ;;  %v4942_v43 = vsel %vm11262_vm11, %v4884_v57, 0.0  ;;  %5921 = vrot.lane.b32.xlu0 %v12232_v30, %s8941_s29  ;;  %v4487_v61 = vpop.f32.mrb[49].mxu1  ;;  %v5055_v38 = vpop.permute.xlu0 %5054 }
 0x4c4   : > { %13988 = vst [vmem:[#allocation44_spill] sm:$0xff] %v12286_v28  ;;  %5703 = vrot.lane.b32.xlu1 %v12232_v30, %s8940_s24  ;;  %v5100_v47 = vadd.f32 %v12244_v53, %v4972_v29  ;;  %v4974_v24 = vadd.f32 %v7890_v49, %v4942_v43  ;;  %v7900_v63 = vadd.f32 %v12130_v42, %v4487_v61  ;;  %v4489_v20 = vpop.f32.mrb[50].mxu1 }
 0x4c5   : > { %v5101_v44 = vadd.f32 %v5045_v54, %v4973_v19  ;;  %v7905_v46 = vadd.f32 %v12135_v25, %v4489_v20  ;;  %v4491_v17 = vpop.f32.mrb[51].mxu1  ;;  %v5131_v9 = vmax.f32 %v5099_v55, 0.0  ;;  %v12328_v43 = vpop.permute.xlu1 %5079 }
 0x4c6   : > { %v5102_v12 = vadd.f32 %v5045_v54, %v4974_v24  ;;  %v7910_v32 = vadd.f32 %v12140_v36, %v4491_v17  ;;  %v5132_v42 = vmax.f32 %v5100_v47, 0.0 }
 0x4c7   : > { %v5133_v7 = vmax.f32 %v5101_v44, 0.0  ;;  %v4888_v50 = vpop.f32.mrb[176].mxu0  ;;  %6307 = vrot.lane.b32.xlu0 %v12232_v30, %s8942_s11 }
 0x4c8   : > { %6525 = vrot.lane.b32.xlu1 %v12232_v30, %s8943_s12  ;;  %v5134_v53 = vmax.f32 %v5102_v12, 0.0  ;;  %v4943_v25 = vsel %vm11249_vm10, %v4888_v50, 0.0  ;;  %v4890_v3 = vpop.f32.mrb[177].mxu0 }
 0x4c9   : > { %v12310_v49 = vpack.c.bf16 %v5133_v7, %v5131_v9  ;;  %v4975_v36 = vadd.f32 %v7895_v58, %v4943_v25  ;;  %v4944_v59 = vsel %vm11262_vm11, %v4890_v3, 0.0  ;;  %v4892_v26 = vpop.f32.mrb[178].mxu0  ;;  %v12342_v9 = vpop.permute.xlu1 %8483 }
 0x4ca   : > { %v12314_v8 = vpack.c.bf16 %v5134_v53, %v5132_v42  ;;  %v4976_v0 = vadd.f32 %v7900_v63, %v4944_v59  ;;  %v4945_v40 = vsel %vm11249_vm10, %v4892_v26, 0.0  ;;  %v4495_v37 = vpop.f32.mrb[52].mxu1  ;;  %v4894_v34 = vpop.f32.mrb[179].mxu0 }
 0x4cb   : > { %13989 = vst [vmem:[#allocation66_spill] sm:$0xff] %v12310_v49  ;;  %v5103_v27 = vadd.f32 %v12262_v16, %v4975_v36  ;;  %v4977_v22 = vadd.f32 %v7905_v46, %v4945_v40  ;;  %v7915_v52 = vadd.f32 %v12149_v51, %v4495_v37  ;;  %v4946_v29 = vsel %vm11262_vm11, %v4894_v34, 0.0  ;;  %5287 = vrot.lane.b32.xlu0 %v12254_v45, %s8938_s16  ;;  %v4497_v10 = vpop.f32.mrb[53].mxu1  ;;  %v5065_v40 = vpop.permute.xlu0 %5064 }
 0x4cc   : > { %13990 = vst [vmem:[#allocation57_spill] sm:$0xff] %v12314_v8  ;;  %5505 = vrot.lane.b32.xlu1 %v12254_v45, %s8939_s19  ;;  %v5104_v57 = vadd.f32 %v12262_v16, %v4976_v0  ;;  %v4978_v55 = vadd.f32 %v7910_v32, %v4946_v29  ;;  %v7920_v19 = vadd.f32 %v12158_v41, %v4497_v10  ;;  %v4499_v58 = vpop.f32.mrb[54].mxu1 }
 0x4cd   : > { %v5105_v51 = vadd.f32 %v5055_v38, %v4977_v22  ;;  %v7925_v61 = vadd.f32 %v12163_v18, %v4499_v58  ;;  %v4501_v54 = vpop.f32.mrb[55].mxu1  ;;  %v5135_v63 = vmax.f32 %v5103_v27, 0.0 }
 0x4ce   : > { %v5106_v47 = vadd.f32 %v5055_v38, %v4978_v55  ;;  %v7930_v24 = vadd.f32 %v12168_v60, %v4501_v54  ;;  %v5136_v41 = vmax.f32 %v5104_v57, 0.0 }
 0x4cf   : > { %v5137_v20 = vmax.f32 %v5105_v51, 0.0  ;;  %v4898_v44 = vpop.f32.mrb[180].mxu0  ;;  %6311 = vrot.lane.b32.xlu0 %v12254_v45, %s8942_s11 }
 0x4d0   : > { %5707 = vrot.lane.b32.xlu1 %v12254_v45, %s8940_s24  ;;  %v5138_v16 = vmax.f32 %v5106_v47, 0.0  ;;  %v4947_v46 = vsel %vm11249_vm10, %v4898_v44, 0.0  ;;  %v4900_v17 = vpop.f32.mrb[181].mxu0 }
 0x4d1   : > { %v12338_v18 = vpack.c.bf16 %v5137_v20, %v5135_v63  ;;  %v4979_v12 = vadd.f32 %v7915_v52, %v4947_v46  ;;  %v4948_v60 = vsel %vm11262_vm11, %v4900_v17, 0.0  ;;  %v4902_v32 = vpop.f32.mrb[182].mxu0 }
 0x4d2   : > { %v12344_v7 = vpack.c.bf16 %v5138_v16, %v5136_v41  ;;  %v4980_v50 = vadd.f32 %v7920_v19, %v4948_v60  ;;  %v4949_v42 = vsel %vm11249_vm10, %v4902_v32, 0.0  ;;  %v4505_v53 = vpop.f32.mrb[56].mxu1  ;;  %v4904_v25 = vpop.f32.mrb[183].mxu0 }
 0x4d3   : > { %13991 = vst [vmem:[#allocation56_spill] sm:$0xff] %v12338_v18  ;;  %v5107_v3 = vadd.f32 %v12280_v23, %v4979_v12  ;;  %v4981_v36 = vadd.f32 %v7925_v61, %v4949_v42  ;;  %v7935_v59 = vadd.f32 %v12173_v5, %v4505_v53  ;;  %v4950_v26 = vsel %vm11262_vm11, %v4904_v25, 0.0  ;;  %5507 = vrot.lane.b32.xlu0 %v12258_v11, %s8939_s19  ;;  %v4507_v0 = vpop.f32.mrb[57].mxu1  ;;  %v5075_v32 = vpop.permute.xlu0 %5074 }
 0x4d4   : > { %13992 = vst [vmem:[#allocation7_spill] sm:$0xff] %v12344_v7  ;;  %5925 = vrot.lane.b32.xlu1 %v12254_v45, %s8941_s29  ;;  %v5108_v37 = vadd.f32 %v12280_v23, %v4980_v50  ;;  %v4982_v34 = vadd.f32 %v7930_v24, %v4950_v26  ;;  %v7940_v27 = vadd.f32 %v12178_v4, %v4507_v0  ;;  %v4509_v22 = vpop.f32.mrb[58].mxu1  ;;  %v12364_v23 = vpop.permute.xlu1 %8493 }
 0x4d5   : > { %v5109_v52 = vadd.f32 %v5065_v40, %v4981_v36  ;;  %v7945_v5 = vadd.f32 %v12183_v21, %v4509_v22  ;;  %v4511_v29 = vpop.f32.mrb[59].mxu1  ;;  %v5139_v57 = vmax.f32 %v5107_v3, 0.0 }
 0x4d6   : > { %v5110_v10 = vadd.f32 %v5065_v40, %v4982_v34  ;;  %v7950_v38 = vadd.f32 %v12188_v33, %v4511_v29  ;;  %v5140_v4 = vmax.f32 %v5108_v37, 0.0 }
 0x4d7   : > { %v5141_v55 = vmax.f32 %v5109_v52, 0.0  ;;  %v4908_v19 = vpop.f32.mrb[184].mxu0  ;;  %5709 = vrot.lane.b32.xlu0 %v12258_v11, %s8940_s24 }
 0x4d8   : > { %5289 = vrot.lane.b32.xlu1 %v12258_v11, %s8938_s16  ;;  %v5142_v58 = vmax.f32 %v5110_v10, 0.0  ;;  %v4951_v21 = vsel %vm11249_vm10, %v4908_v19, 0.0  ;;  %v4910_v51 = vpop.f32.mrb[185].mxu0 }
 0x4d9   : > { %v12368_v61 = vpack.c.bf16 %v5141_v55, %v5139_v57  ;;  %v4983_v33 = vadd.f32 %v7935_v59, %v4951_v21  ;;  %v4952_v54 = vsel %vm11262_vm11, %v4910_v51, 0.0  ;;  %v4912_v47 = vpop.f32.mrb[186].mxu0  ;;  %v12387_v59 = vpop.permute.xlu1 %8503 }
 0x4da   : > { %v12372_v24 = vpack.c.bf16 %v5142_v58, %v5140_v4  ;;  %v4984_v63 = vadd.f32 %v7940_v27, %v4952_v54  ;;  %v4953_v20 = vsel %vm11249_vm10, %v4912_v47, 0.0  ;;  %v4515_v44 = vpop.f32.mrb[60].mxu1  ;;  %v4914_v41 = vpop.f32.mrb[187].mxu0 }
 0x4db   : > { %13993 = vst [vmem:[#allocation51_spill] sm:$0xff] %v12368_v61  ;;  %v5111_v16 = vadd.f32 %v12302_v56, %v4983_v33  ;;  %v4985_v46 = vadd.f32 %v7945_v5, %v4953_v20  ;;  %v7955_v17 = vadd.f32 %v12193_v39, %v4515_v44  ;;  %v4954_v12 = vsel %vm11262_vm11, %v4914_v41, 0.0  ;;  %5927 = vrot.lane.b32.xlu0 %v12258_v11, %s8941_s29  ;;  %v4517_v60 = vpop.f32.mrb[61].mxu1  ;;  %v5085_v21 = vpop.permute.xlu0 %5084 }
 0x4dc   : > { %13994 = vst [vmem:[#allocation62_spill] sm:$0xff] %v12372_v24  ;;  %6313 = vrot.lane.b32.xlu1 %v12258_v11, %s8942_s11  ;;  %v5112_v50 = vadd.f32 %v12302_v56, %v4984_v63  ;;  %v4986_v42 = vadd.f32 %v7950_v38, %v4954_v12  ;;  %v7960_v53 = vadd.f32 %v12198_v35, %v4517_v60  ;;  %v4519_v25 = vpop.f32.mrb[62].mxu1 }
 0x4dd   : > { %v5113_v3 = vadd.f32 %v5075_v32, %v4985_v46  ;;  %v7965_v39 = vadd.f32 %v12203_v31, %v4519_v25  ;;  %v4521_v36 = vpop.f32.mrb[63].mxu1  ;;  %v5143_v40 = vmax.f32 %v5111_v16, 0.0  ;;  %v12411_v58 = vpop.permute.xlu1 %8513 }
 0x4de   : > { %v5114_v26 = vadd.f32 %v5075_v32, %v4986_v42  ;;  %v7970_v0 = vadd.f32 %v12208_v48, %v4521_v36  ;;  %v5144_v35 = vmax.f32 %v5112_v50, 0.0 }
 0x4df   : > { %v5145_v37 = vmax.f32 %v5113_v3, 0.0  ;;  %v4918_v34 = vpop.f32.mrb[188].mxu0  ;;  %5293 = vrot.lane.b32.xlu0 %v12282_v62, %s8938_s16  ;;  %v12450_v32 = vpop.permute.xlu0 %8488 }
 0x4e0   : > { %5511 = vrot.lane.b32.xlu1 %v12282_v62, %s8939_s19  ;;  %v5146_v56 = vmax.f32 %v5114_v26, 0.0  ;;  %v4955_v31 = vsel %vm11249_vm10, %v4918_v34, 0.0  ;;  %v4920_v27 = vpop.f32.mrb[189].mxu0 }
 0x4e1   : > { %v12396_v22 = vpack.c.bf16 %v5145_v37, %v5143_v40  ;;  %v4987_v52 = vadd.f32 %v7955_v17, %v4955_v31  ;;  %v4956_v48 = vsel %vm11262_vm11, %v4920_v27, 0.0  ;;  %v4922_v5 = vpop.f32.mrb[190].mxu0  ;;  %v12420_v46 = vpop.permute.xlu1 %8523 }
 0x4e2   : > { %v12400_v29 = vpack.c.bf16 %v5146_v56, %v5144_v35  ;;  %v4988_v10 = vadd.f32 %v7960_v53, %v4956_v48  ;;  %v4957_v38 = vsel %vm11249_vm10, %v4922_v5, 0.0  ;;  %v4924_v57 = vpop.f32.mrb[191].mxu0 }
 0x4e3   : > { %v5115_v55 = vadd.f32 %v12328_v43, %v4987_v52  ;;  %v4989_v19 = vadd.f32 %v7965_v39, %v4957_v38  ;;  %v4958_v4 = vsel %vm11262_vm11, %v4924_v57, 0.0  ;;  %5713 = vrot.lane.b32.xlu0 %v12282_v62, %s8940_s24  ;;  %v12458_v42 = vpop.permute.xlu0 %8498  ;;  %v8485_v52 = vunpack.i.l.bf16 %v12342_v9 }
 0x4e4   : > { %5931 = vrot.lane.b32.xlu1 %v12282_v62, %s8941_s29  ;;  %v5116_v51 = vadd.f32 %v12328_v43, %v4988_v10  ;;  %v4990_v33 = vadd.f32 %v7970_v0, %v4958_v4  ;;  %v8505_v57 = vunpack.i.l.bf16 %v12387_v59 }
 0x4e5   : > { %v5117_v54 = vadd.f32 %v5085_v21, %v4989_v19  ;;  %v5147_v63 = vmax.f32 %v5115_v55, 0.0  ;;  %v12432_v43 = vpop.permute.xlu1 %8533 }
 0x4e6   : > { %v5118_v47 = vadd.f32 %v5085_v21, %v4990_v33  ;;  %v5148_v44 = vmax.f32 %v5116_v51, 0.0 }
 0x4e7   : > { %v5149_v20 = vmax.f32 %v5117_v54, 0.0  ;;  %6317 = vrot.lane.b32.xlu0 %v12282_v62, %s8942_s11  ;;  %v12470_v25 = vpop.permute.xlu0 %8508 }
 0x4e8   : > { %5295 = vrot.lane.b32.xlu1 %v12286_v28, %s8938_s16  ;;  %v5150_v41 = vmax.f32 %v5118_v47, 0.0 }
 0x4e9   : > { %v12418_v16 = vpack.c.bf16 %v5149_v20, %v5147_v63  ;;  %v12438_v12 = vpop.permute.xlu1 %8543 }
 0x4ea   : > { %v12422_v17 = vpack.c.bf16 %v5150_v41, %v5148_v44 }
 0x4eb   : > { %5513 = vrot.lane.b32.xlu0 %v12286_v28, %s8939_s19  ;;  %v12478_v39 = vpop.permute.xlu0 %8518 }
 0x4ec   : > { %13995 = vst [vmem:[#allocation55_spill] sm:$0xff] %v12422_v17  ;;  %5715 = vrot.lane.b32.xlu1 %v12286_v28, %s8940_s24 }
 0x4ed   : > { %v12448_v60 = vpop.permute.xlu1 %8548 }
 0x4ef   : > { %5933 = vrot.lane.b32.xlu0 %v12286_v28, %s8941_s29  ;;  %v12490_v26 = vpop.permute.xlu0 %8528 }
 0x4f0   : > { %5299 = vrot.lane.b32.xlu1 %v12310_v49, %s8938_s16 }
 0x4f1   : > { %v12456_v50 = vpop.permute.xlu1 %8553 }
 0x4f3   : > { %6319 = vrot.lane.b32.xlu0 %v12286_v28, %s8942_s11  ;;  %v12498_v40 = vpop.permute.xlu0 %8538 }
 0x4f4   : > { %5517 = vrot.lane.b32.xlu1 %v12310_v49, %s8939_s19 }
 0x4f5   : > { %v12468_v53 = vpop.permute.xlu1 %8558 }
 0x4f7   : > { %6323 = vrot.lane.b32.xlu0 %v12310_v49, %s8942_s11  ;;  %v12510_v34 = vpop.permute.xlu0 %8583 }
 0x4f8   : > { %5719 = vrot.lane.b32.xlu1 %v12310_v49, %s8940_s24  ;;  %14000 = vst [vmem:[#allocation69_spill] sm:$0xff] %v12510_v34 }
 0x4f9   : > { %v12476_v3 = vpop.permute.xlu1 %8563 }
 0x4fa   : > { %13996 = vst [vmem:[#allocation29_spill] sm:$0xff] %v12476_v3 }
 0x4fb   : > { %5301 = vrot.lane.b32.xlu0 %v12314_v8, %s8938_s16 }
 0x4fc   : > { %5937 = vrot.lane.b32.xlu1 %v12310_v49, %s8941_s29 }
 0x4fd   : > { %v12488_v36 = vpop.permute.xlu1 %8568 }
 0x4fe   : > { %13997 = vst [vmem:[#allocation59_spill] sm:$0xff] %v12488_v36 }
 0x4ff   : > { %5519 = vrot.lane.b32.xlu0 %v12314_v8, %s8939_s19 }
 0x500   : > { %6325 = vrot.lane.b32.xlu1 %v12314_v8, %s8942_s11 }
 0x501   : > { %v12496_v0 = vpop.permute.xlu1 %8573 }
 0x502   : > { %13998 = vst [vmem:[#allocation74_spill] sm:$0xff] %v12496_v0 }
 0x503   : > { %5721 = vrot.lane.b32.xlu0 %v12314_v8, %s8940_s24 }
 0x504   : > { %5305 = vrot.lane.b32.xlu1 %v12338_v18, %s8938_s16 }
 0x505   : > { %v12508_v37 = vpop.permute.xlu1 %8578 }
 0x506   : > { %13999 = vst [vmem:[#allocation68_spill] sm:$0xff] %v12508_v37 }
 0x507   : > { %5939 = vrot.lane.b32.xlu0 %v12314_v8, %s8941_s29 }
 0x508   : > { %5523 = vrot.lane.b32.xlu1 %v12338_v18, %s8939_s19 }
 0x50b   : > { %5725 = vrot.lane.b32.xlu0 %v12338_v18, %s8940_s24 }
 0x50c   : > { %5943 = vrot.lane.b32.xlu1 %v12338_v18, %s8941_s29 }
 0x50f   : > { %6329 = vrot.lane.b32.xlu0 %v12338_v18, %s8942_s11 }
 0x510   : > { %5727 = vrot.lane.b32.xlu1 %v12344_v7, %s8940_s24 }
 0x513   : > { %5307 = vrot.lane.b32.xlu0 %v12344_v7, %s8938_s16 }
 0x514   : > { %5529 = vrot.lane.b32.xlu1 %v12368_v61, %s8939_s19 }
 0x517   : > { %5525 = vrot.lane.b32.xlu0 %v12344_v7, %s8939_s19 }
 0x518   : > { %5731 = vrot.lane.b32.xlu1 %v12368_v61, %s8940_s24 }
 0x51b   : > { %5945 = vrot.lane.b32.xlu0 %v12344_v7, %s8941_s29 }
 0x51c   : > { %5949 = vrot.lane.b32.xlu1 %v12368_v61, %s8941_s29 }
 0x51f   : > { %6331 = vrot.lane.b32.xlu0 %v12344_v7, %s8942_s11 }
 0x520   : > { %5313 = vrot.lane.b32.xlu1 %v12372_v24, %s8938_s16 }
 0x523   : > { %5311 = vrot.lane.b32.xlu0 %v12368_v61, %s8938_s16 }
 0x524   : > { %6337 = vrot.lane.b32.xlu1 %v12372_v24, %s8942_s11 }
 0x525   : > { %v12516_v35 = vpop.permute.xlu0 %5701 }
 0x526   : > { %v5282_v56 = vpop.permute.xlu1 %5281 }
 0x527   : > { %6335 = vrot.lane.b32.xlu0 %v12368_v61, %s8942_s11  ;;  %v5327_v38 = vsel %vm1422_vm0, %v8485_v52, %v5282_v56 }
 0x528   : > { %5535 = vrot.lane.b32.xlu1 %v12396_v22, %s8939_s19 }
 0x529   : > { %v12522_v31 = vpop.permute.xlu0 %6305 }
 0x52a   : > { %v5500_v27 = vpop.permute.xlu1 %5499 }
 0x52b   : > { %5531 = vrot.lane.b32.xlu0 %v12372_v24, %s8939_s19  ;;  %v5545_v21 = vsel %vm1861_vm2, %v8505_v57, %v5500_v27 }
 0x52c   : > { %5955 = vrot.lane.b32.xlu1 %v12396_v22, %s8941_s29 }
 0x52d   : > { %v5284_v5 = vpop.permute.xlu0 %5283 }
 0x52e   : > { %v12529_v48 = vpop.permute.xlu1 %5919  ;;  %v5328_v10 = vsel %vm1422_vm0, %v5282_v56, %v5284_v5  ;;  %v8506_v56 = vunpack.i.h.bf16 %v12387_v59 }
 0x52f   : > { %5359 = vmatprep.subr.bf16.mxu1 %v5328_v10  ;;  %5733 = vrot.lane.b32.xlu0 %v12372_v24, %s8940_s24 }
 0x530   : > { %5319 = vrot.lane.b32.xlu1 %v12400_v29, %s8938_s16  ;;  %5360 = vmatpush1.bf16.msra.mxu1 %v5327_v38  ;;  %v8486_v38 = vunpack.i.h.bf16 %v12342_v9 }
 0x531   : > { %v5502_v19 = vpop.permute.xlu0 %5501 }
 0x532   : > { %v12538_v55 = vpop.permute.xlu1 %6523  ;;  %v5546_v4 = vsel %vm1861_vm2, %v5500_v27, %v5502_v19 }
 0x533   : > { %14001 = vst [vmem:[#allocation9_spill] sm:$0xff] %v12538_v55  ;;  %5577 = vmatprep.subr.bf16.mxu0 %v5546_v4  ;;  %5951 = vrot.lane.b32.xlu0 %v12372_v24, %s8941_s29 }
 0x534   : > { %5739 = vrot.lane.b32.xlu1 %v12400_v29, %s8940_s24  ;;  %5578 = vmatpush1.bf16.msra.mxu0 %v5545_v21 }
 0x535   : > { %v12548_v33 = vpop.permute.xlu0 %5921 }
 0x536   : > { %v12546_v51 = vpop.permute.xlu1 %5703 }
 0x537   : > { %5317 = vrot.lane.b32.xlu0 %v12396_v22, %s8938_s16 }
 0x538   : > { %5323 = vrot.lane.b32.xlu1 %v12418_v16, %s8938_s16 }
 0x539   : > { %v12556_v47 = vpop.permute.xlu0 %6307 }
 0x53a   : > { %v12554_v54 = vpop.permute.xlu1 %6525 }
 0x53b   : > { %14002 = vst [vmem:[#allocation64_spill] sm:$0xff] %v12554_v54  ;;  %5737 = vrot.lane.b32.xlu0 %v12396_v22, %s8940_s24  ;;  %v8516_v54 = vunpack.i.h.bf16 %v12411_v58 }
 0x53c   : > { %5541 = vrot.lane.b32.xlu1 %v12418_v16, %s8939_s19 }
 0x53d   : > { %v5288_v20 = vpop.permute.xlu0 %5287 }
 0x53e   : > { %v5506_v63 = vpop.permute.xlu1 %5505  ;;  %v5329_v4 = vsel %vm1422_vm0, %v8486_v38, %v5288_v20 }
 0x53f   : > { %6341 = vrot.lane.b32.xlu0 %v12396_v22, %s8942_s11  ;;  %v5547_v10 = vsel %vm1861_vm2, %v8506_v56, %v5506_v63 }
 0x540   : > { %5743 = vrot.lane.b32.xlu1 %v12418_v16, %s8940_s24 }
 0x541   : > { %v12568_v41 = vpop.permute.xlu0 %6311 }
 0x542   : > { %v12566_v44 = vpop.permute.xlu1 %5707 }
 0x543   : > { %5537 = vrot.lane.b32.xlu0 %v12400_v29, %s8939_s19 }
 0x544   : > { %5961 = vrot.lane.b32.xlu1 %v12418_v16, %s8941_s29 }
 0x545   : > { %v5508_v52 = vpop.permute.xlu0 %5507 }
 0x546   : > { %v12575_v27 = vpop.permute.xlu1 %5925  ;;  %v5548_v5 = vsel %vm1861_vm2, %v5506_v63, %v5508_v52 }
 0x547   : > { %5579 = vmatprep.subr.bf16.mxu0 %v5548_v5  ;;  %5957 = vrot.lane.b32.xlu0 %v12400_v29, %s8941_s29  ;;  %v8490_v5 = vunpack.i.l.bf16 %v12450_v32 }
 0x548   : > { %6529 = vrot.lane.b32.xlu1 %v12254_v45, %s8943_s12  ;;  %5580 = vmatpush1.bf16.msra.mxu0 %v5547_v10 }
 0x549   : > { %v12584_v57 = vpop.permute.xlu0 %5709 }
 0x54a   : > { %v5290_v59 = vpop.permute.xlu1 %5289 }
 0x54b   : > { %v5330_v19 = vsel %vm1422_vm0, %v5288_v20, %v5290_v59  ;;  %6343 = vrot.lane.b32.xlu0 %v12400_v29, %s8942_s11 }
 0x54c   : > { %5361 = vmatprep.subr.bf16.mxu1 %v5330_v19  ;;  %8588 = vrot.lane.b32.xlu1 %v13864_v15, %s8943_s12 }
 0x54d   : > { %5362 = vmatpush1.bf16.msra.mxu1 %v5329_v4  ;;  %v12592_v21 = vpop.permute.xlu0 %5927  ;;  %v8515_v4 = vunpack.i.l.bf16 %v12411_v58 }
 0x54e   : > { %v12594_v63 = vpop.permute.xlu1 %6313 }
 0x54f   : > { %6347 = vrot.lane.b32.xlu0 %v12418_v16, %s8942_s11 }
 0x550   : > { %6543 = vrot.lane.b32.xlu1 %v12314_v8, %s8943_s12 }
 0x551   : > { %v5294_v56 = vpop.permute.xlu0 %5293 }
 0x552   : > { %v5512_v9 = vpop.permute.xlu1 %5511  ;;  %v5331_v19 = vsel %vm1422_vm0, %v8490_v5, %v5294_v56 }
 0x553   : > { %5325 = vrot.lane.b32.xlu0 %v12422_v17, %s8938_s16 }
 0x554   : > { %6549 = vrot.lane.b32.xlu1 %v12344_v7, %s8943_s12 }
 0x555   : > { %v12606_v52 = vpop.permute.xlu0 %5713 }
 0x556   : > { %v12604_v20 = vpop.permute.xlu1 %5931 }
 0x557   : > { %6531 = vrot.lane.b32.xlu0 %v12258_v11, %s8943_s12 }
 0x558   : > { %6547 = vrot.lane.b32.xlu1 %v12338_v18, %s8943_s12 }
 0x559   : > { %v12613_v10 = vpop.permute.xlu0 %6317 }
 0x55a   : > { %v5296_v38 = vpop.permute.xlu1 %5295 }
 0x55b   : > { %v5332_v59 = vsel %vm1422_vm0, %v5294_v56, %v5296_v38  ;;  %6537 = vrot.lane.b32.xlu0 %v12286_v28, %s8943_s12  ;;  %v5549_v38 = vsel %vm1861_vm2, %v8515_v4, %v5512_v9 }
 0x55c   : > { %5363 = vmatprep.subr.bf16.mxu1 %v5332_v59  ;;  %6553 = vrot.lane.b32.xlu1 %v12368_v61, %s8943_s12 }
 0x55d   : > { %5364 = vmatpush1.bf16.msra.mxu1 %v5331_v19  ;;  %v5514_v2 = vpop.permute.xlu0 %5513  ;;  %v8491_v19 = vunpack.i.h.bf16 %v12450_v32 }
 0x55e   : > { %v12622_v1 = vpop.permute.xlu1 %5715  ;;  %v5550_v13 = vsel %vm1861_vm2, %v5512_v9, %v5514_v2 }
 0x55f   : > { %5581 = vmatprep.subr.bf16.mxu0 %v5550_v13  ;;  %6535 = vrot.lane.b32.xlu0 %v12282_v62, %s8943_s12 }
 0x560   : > { %8598 = vrot.lane.b32.xlu1 %v13864_v15, %s8943_s12  ;;  %5582 = vmatpush1.bf16.msra.mxu0 %v5549_v38 }
 0x561   : > { %v12630_v56 = vpop.permute.xlu0 %5933 }
 0x562   : > { %v5300_v5 = vpop.permute.xlu1 %5299 }
 0x563   : > { %6541 = vrot.lane.b32.xlu0 %v12310_v49, %s8943_s12  ;;  %v5333_v55 = vsel %vm1422_vm0, %v8491_v19, %v5300_v5 }
 0x564   : > { %6743 = vrot.lane.b32.xlu1 %v12232_v30, %s8944_s22 }
 0x565   : > { %v12636_v2 = vpop.permute.xlu0 %6319 }
 0x566   : > { %v5518_v13 = vpop.permute.xlu1 %5517 }
 0x567   : > { %8593 = vrot.lane.b32.xlu0 %v13864_v15, %s8943_s12 }
 0x568   : > { %6741 = vrot.lane.b32.xlu1 %v12228_v6, %s8944_s22 }
 0x569   : > { %v12642_v9 = vpop.permute.xlu0 %6323 }
 0x56a   : > { %14003 = vst [vmem:[#allocation76_spill] sm:$0xff] %v12642_v9  ;;  %v12644_v59 = vpop.permute.xlu1 %5719  ;;  %v8525_v9 = vunpack.i.l.bf16 %v12420_v46 }
 0x56b   : > { %6555 = vrot.lane.b32.xlu0 %v12372_v24, %s8943_s12 }
 0x56c   : > { %8608 = vrot.lane.b32.xlu1 %v13864_v15, %s8945_s17 }
 0x56d   : > { %v5302_v38 = vpop.permute.xlu0 %5301 }
 0x56e   : > { %v12651_v4 = vpop.permute.xlu1 %5937  ;;  %v5334_v14 = vsel %vm1422_vm0, %v5300_v5, %v5302_v38 }
 0x56f   : > { %5365 = vmatprep.subr.bf16.mxu1 %v5334_v14  ;;  %5543 = vrot.lane.b32.xlu0 %v12422_v17, %s8939_s19  ;;  %v5551_v14 = vsel %vm1861_vm2, %v8516_v54, %v5518_v13 }
 0x570   : > { %6749 = vrot.lane.b32.xlu1 %v12258_v11, %s8944_s22  ;;  %5366 = vmatpush1.bf16.msra.mxu1 %v5333_v55 }
 0x571   : > { %v5520_v32 = vpop.permute.xlu0 %5519 }
 0x572   : > { %v12660_v34 = vpop.permute.xlu1 %6325  ;;  %v5552_v37 = vsel %vm1861_vm2, %v5518_v13, %v5520_v32  ;;  %v8495_v32 = vunpack.i.l.bf16 %v12364_v23 }
 0x573   : > { %5583 = vmatprep.subr.bf16.mxu0 %v5552_v37  ;;  %5745 = vrot.lane.b32.xlu0 %v12422_v17, %s8940_s24 }
 0x574   : > { %6951 = vrot.lane.b32.xlu1 %v12258_v11, %s8945_s17  ;;  %5584 = vmatpush1.bf16.msra.mxu0 %v5551_v14 }
 0x575   : > { %v12668_v5 = vpop.permute.xlu0 %5721 }
 0x576   : > { %v5306_v55 = vpop.permute.xlu1 %5305 }
 0x577   : > { %6561 = vrot.lane.b32.xlu0 %v12400_v29, %s8943_s12 }
 0x578   : > { %6349 = vrot.lane.b32.xlu1 %v12422_v17, %s8942_s11  ;;  %s332_s11 = scalar_lea.vmem %s13704_s9, %s7786_s15 }
 0x579   : > { %v12674_v58 = vpop.permute.xlu0 %5939 }
 0x57a   : > { %v5524_v37 = vpop.permute.xlu1 %5523 }
 0x57b   : > { %6559 = vrot.lane.b32.xlu0 %v12396_v22, %s8943_s12 }
 0x57c   : > { %6755 = vrot.lane.b32.xlu1 %v12286_v28, %s8944_s22 }
 0x57d   : > { %v12680_v54 = vpop.permute.xlu0 %5725 }
 0x57e   : > { %v12682_v13 = vpop.permute.xlu1 %5943 }
 0x57f   : > { %14004 = vst [vmem:[#allocation71_spill] sm:$0xff] %v12682_v13  ;;  %6565 = vrot.lane.b32.xlu0 %v12418_v16, %s8943_s12 }
 0x580   : > { %6753 = vrot.lane.b32.xlu1 %v12282_v62, %s8944_s22 }
 0x581   : > { %v12688_v19 = vpop.permute.xlu0 %6329 }
 0x582   : > { %14005 = vst [vmem:[#allocation65_spill] sm:$0xff] %v12688_v19  ;;  %v12690_v38 = vpop.permute.xlu1 %5727  ;;  %v5335_v19 = vsel %vm1422_vm0, %v8495_v32, %v5306_v55 }
 0x583   : > { %8603 = vrot.lane.b32.xlu0 %v13864_v15, %s8944_s22 }
 0x584   : > { %8618 = vrot.lane.b32.xlu1 %v13864_v15, %s8945_s17 }
 0x585   : > { %v5308_v14 = vpop.permute.xlu0 %5307 }
 0x586   : > { %v5530_v11 = vpop.permute.xlu1 %5529  ;;  %v5336_v0 = vsel %vm1422_vm0, %v5306_v55, %v5308_v14 }
 0x587   : > { %5367 = vmatprep.subr.bf16.mxu1 %v5336_v0  ;;  %6945 = vrot.lane.b32.xlu0 %v12232_v30, %s8945_s17  ;;  %v5553_v0 = vsel %vm1861_vm2, %v8525_v9, %v5524_v37  ;;  %v8496_v9 = vunpack.i.h.bf16 %v12364_v23 }
 0x588   : > { %6761 = vrot.lane.b32.xlu1 %v12314_v8, %s8944_s22  ;;  %5368 = vmatpush1.bf16.msra.mxu1 %v5335_v19 }
 0x589   : > { %v5526_v36 = vpop.permute.xlu0 %5525 }
 0x58a   : > { %v12704_v3 = vpop.permute.xlu1 %5731  ;;  %v5554_v13 = vsel %vm1861_vm2, %v5524_v37, %v5526_v36 }
 0x58b   : > { %5585 = vmatprep.subr.bf16.mxu0 %v5554_v13  ;;  %6943 = vrot.lane.b32.xlu0 %v12228_v6, %s8945_s17 }
 0x58c   : > { %6963 = vrot.lane.b32.xlu1 %v12314_v8, %s8945_s17  ;;  %5586 = vmatpush1.bf16.msra.mxu0 %v5553_v0 }
 0x58d   : > { %v12712_v55 = vpop.permute.xlu0 %5945 }
 0x58e   : > { %v12714_v19 = vpop.permute.xlu1 %5949 }
 0x58f   : > { %5963 = vrot.lane.b32.xlu0 %v12422_v17, %s8941_s29 }
 0x590   : > { %6767 = vrot.lane.b32.xlu1 %v12344_v7, %s8944_s22 }
 0x591   : > { %v12720_v36 = vpop.permute.xlu0 %6331 }
 0x592   : > { %v5314_v13 = vpop.permute.xlu1 %5313 }
 0x593   : > { %6747 = vrot.lane.b32.xlu0 %v12254_v45, %s8944_s22 }
 0x594   : > { %6765 = vrot.lane.b32.xlu1 %v12338_v18, %s8944_s22 }
 0x595   : > { %v5312_v37 = vpop.permute.xlu0 %5311 }
 0x596   : > { %v12727_v32 = vpop.permute.xlu1 %6337  ;;  %v5338_v14 = vsel %vm1422_vm0, %v5312_v37, %v5314_v13  ;;  %v5337_v0 = vsel %vm1422_vm0, %v8496_v9, %v5312_v37  ;;  %v8526_v13 = vunpack.i.h.bf16 %v12420_v46 }
 0x597   : > { %14006 = vst [vmem:[#allocation70_spill] sm:$0xff] %v12727_v32  ;;  %5369 = vmatprep.subr.bf16.mxu1 %v5338_v14  ;;  %6949 = vrot.lane.b32.xlu0 %v12254_v45, %s8945_s17 }
 0x598   : > { %6567 = vrot.lane.b32.xlu1 %v12422_v17, %s8943_s12  ;;  %5370 = vmatpush1.bf16.msra.mxu1 %v5337_v0  ;;  %v5555_v0 = vsel %vm1861_vm2, %v8526_v13, %v5530_v11  ;;  %v8500_v13 = vunpack.i.l.bf16 %v12458_v42 }
 0x599   : > { %v6336_v8 = vpop.permute.xlu0 %6335 }
 0x59a   : > { %v5536_v23 = vpop.permute.xlu1 %5535  ;;  %v12737_v6 = vsel %vm3476_vm3, %v6336_v8, %v12727_v32 }
 0x59b   : > { %14007 = vst [vmem:[#allocation72_spill] sm:$0xff] %v12737_v6  ;;  %8613 = vrot.lane.b32.xlu0 %v13864_v15, %s8944_s22 }
 0x59c   : > { %8628 = vrot.lane.b32.xlu1 %v13864_v15, %s8945_s17 }
 0x59d   : > { %v5532_v9 = vpop.permute.xlu0 %5531 }
 0x59e   : > { %v12744_v37 = vpop.permute.xlu1 %5955  ;;  %v5556_v14 = vsel %vm1861_vm2, %v5530_v11, %v5532_v9 }
 0x59f   : > { %5587 = vmatprep.subr.bf16.mxu0 %v5556_v14  ;;  %6957 = vrot.lane.b32.xlu0 %v12286_v28, %s8945_s17 }
 0x5a0   : > { %6773 = vrot.lane.b32.xlu1 %v12372_v24, %s8944_s22  ;;  %5588 = vmatpush1.bf16.msra.mxu0 %v5555_v0 }
 0x5a1   : > { %v12752_v8 = vpop.permute.xlu0 %5733 }
 0x5a2   : > { %v5320_v45 = vpop.permute.xlu1 %5319 }
 0x5a3   : > { %6955 = vrot.lane.b32.xlu0 %v12282_v62, %s8945_s17 }
 0x5a4   : > { %6975 = vrot.lane.b32.xlu1 %v12372_v24, %s8945_s17 }
 0x5a5   : > { %v5952_v46 = vpop.permute.xlu0 %5951 }
 0x5a6   : > { %v12758_v9 = vpop.permute.xlu1 %5739  ;;  %v12762_v11 = vsel %vm2703_vm4, %v12714_v19, %v5952_v46 }
 0x5a7   : > { %6759 = vrot.lane.b32.xlu0 %v12310_v49, %s8944_s22 }
 0x5a8   : > { %6779 = vrot.lane.b32.xlu1 %v12400_v29, %s8944_s22 }
 0x5a9   : > { %v5318_v14 = vpop.permute.xlu0 %5317 }
 0x5aa   : > { %v5339_v0 = vsel %vm1422_vm0, %v8500_v13, %v5318_v14  ;;  %v5324_v62 = vpop.permute.xlu1 %5323  ;;  %v5340_v24 = vsel %vm1422_vm0, %v5318_v14, %v5320_v45 }
 0x5ab   : > { %5371 = vmatprep.subr.bf16.mxu1 %v5340_v24  ;;  %6961 = vrot.lane.b32.xlu0 %v12310_v49, %s8945_s17  ;;  %v8535_v24 = vunpack.i.l.bf16 %v12432_v43 }
 0x5ac   : > { %6777 = vrot.lane.b32.xlu1 %v12396_v22, %s8944_s22  ;;  %5372 = vmatpush1.bf16.msra.mxu1 %v5339_v0 }
 0x5ad   : > { %v12775_v46 = vpop.permute.xlu0 %5737  ;;  %v5557_v30 = vsel %vm1861_vm2, %v8535_v24, %v5536_v23 }
 0x5ae   : > { %v12777_v28 = vpop.permute.xlu1 %5541 }
 0x5af   : > { %8623 = vrot.lane.b32.xlu0 %v13864_v15, %s8944_s22 }
 0x5b0   : > { %6983 = vrot.lane.b32.xlu1 %v13864_v15, %s8945_s17 }
 0x5b1   : > { %v6342_v13 = vpop.permute.xlu0 %6341 }
 0x5b2   : > { %v12783_v45 = vpop.permute.xlu1 %5743 }
 0x5b3   : > { %6969 = vrot.lane.b32.xlu0 %v12344_v7, %s8945_s17 }
 0x5b4   : > { %6785 = vrot.lane.b32.xlu1 %v12422_v17, %s8944_s22 }
 0x5b5   : > { %v5538_v14 = vpop.permute.xlu0 %5537 }
 0x5b6   : > { %v12790_v0 = vpop.permute.xlu1 %5961  ;;  %v5558_v49 = vsel %vm1861_vm2, %v5536_v23, %v5538_v14  ;;  %v7129_v23 = vld [vmem:[%s13701_s6 + $0x8] sm:$0xff]  ;;  %v7131_v14 = vld [vmem:[%s13701_s6 + $0x18] sm:$0xff] }
 0x5b7   : > { %5589 = vmatprep.subr.bf16.mxu0 %v5558_v49  ;;  %6967 = vrot.lane.b32.xlu0 %v12338_v18, %s8945_s17 }
 0x5b8   : > { %6987 = vrot.lane.b32.xlu1 %v12422_v17, %s8945_s17  ;;  %5590 = vmatpush1.bf16.msra.mxu0 %v5557_v30 }
 0x5b9   : > { %v5958_v7 = vpop.permute.xlu0 %5957 }
 0x5ba   : > { %v12798_v6 = vpop.permute.xlu1 %6529  ;;  %v12802_v32 = vsel %vm2703_vm4, %v12744_v37, %v5958_v7 }
 0x5bb   : > { %14008 = vst [vmem:[#allocation10_spill] sm:$0xff] %v12798_v6  ;;  %6771 = vrot.lane.b32.xlu0 %v12368_v61, %s8944_s22 }
 0x5bc   : > { %6985 = vrot.lane.b32.xlu1 %v12418_v16, %s8945_s17 }
 0x5bd   : > { %v12808_v49 = vpop.permute.xlu0 %6343 }
 0x5be   : > { %v12815_v30 = vsel %vm3476_vm3, %v6342_v13, %v12808_v49  ;;  %v12817_v24 = vpop.permute.xlu1 %8588  ;;  %v8501_v13 = vunpack.i.h.bf16 %v12458_v42  ;;  %v5748_v42 = vsel %vm2264_vm1, %v12516_v35, %v12546_v51  ;;  %v5750_v51 = vsel %vm2264_vm1, %v12566_v44, %v12584_v57 }
 0x5bf   : > { %14009 = vst [vmem:[#allocation75_spill] sm:$0xff] %v12817_v24  ;;  %6973 = vrot.lane.b32.xlu0 %v12368_v61, %s8945_s17  ;;  %v7133_v61 = vld [vmem:[%s13701_s6 + $0x28] sm:$0xff]  ;;  %v8520_v57 = vunpack.i.l.bf16 %v12478_v39 }
 0x5c0   : > { %7143 = vperm.xlu1 %8166, %v7129_v23   ;;  %v5341_v24 = vsel %vm1422_vm0, %v8501_v13, %v5324_v62 }
 0x5c1   : > { %v12821_v7 = vpop.permute.xlu0 %6347 }
 0x5c2   : > { %v12826_v17 = vpop.permute.xlu1 %6543 }
 0x5c3   : > { %8633 = vrot.lane.b32.xlu0 %v13864_v15, %s8944_s22 }
 0x5c4   : > { %7153 = vperm.xlu1 %8166, %v7131_v14   ;;  %v8893_v14 = vld [vmem:[%s13700_s5] sm:$0xff]  }
 0x5c5   : > { %v5326_v18 = vpop.permute.xlu0 %5325 }
 0x5c6   : > { %v12834_v23 = vpop.permute.xlu1 %6549  ;;  %v5342_v6 = vsel %vm1422_vm0, %v5324_v62, %v5326_v18  ;;  %v7135_v62 = vld [vmem:[%s13701_s6 + $0x38] sm:$0xff] }
 0x5c7   : > { %14010 = vst [vmem:[#allocation77_spill] sm:$0xff] %v12834_v23  ;;  %6981 = vrot.lane.b32.xlu0 %v12400_v29, %s8945_s17  ;;  %5373 = vmatprep.subr.bf16.mxu1 %v5342_v6  ;;  %v8510_v23 = vunpack.i.l.bf16 %v12470_v25 }
 0x5c8   : > { %7163 = vperm.xlu1 %8166, %v7133_v61   ;;  %5374 = vmatpush1.bf16.msra.mxu1 %v5341_v24  ;;  %v8511_v24 = vunpack.i.h.bf16 %v12470_v25  ;;  %v5752_v25 = vsel %vm2264_vm1, %v12606_v52, %v12622_v1  ;;  %v5754_v1 = vsel %vm2264_vm1, %v12644_v59, %v12668_v5  ;;  %v8895_v5 = vld [vmem:[%s13700_s5 + $0x10] sm:$0xff]  }
 0x5c9   : > { %5779 = vmatprep.subr.bf16.mxu1 %v5748_v42  ;;  %v12847_v18 = vpop.permute.xlu0 %6531  ;;  %v5747_v61 = vsel %vm2264_vm1, %v8510_v23, %v12516_v35  ;;  %v8894_v23 = vld [vmem:[%s13700_s5 + $0x8] sm:$0xff]  }
 0x5ca   : > { %v12852_v6 = vpop.permute.xlu1 %6547  ;;  %v5749_v35 = vsel %vm2264_vm1, %v8511_v24, %v12566_v44  ;;  %v5751_v44 = vsel %vm2264_vm1, %v8520_v57, %v12606_v52  ;;  %v8521_v24 = vunpack.i.h.bf16 %v12478_v39  ;;  %v7130_v39 = vld [vmem:[%s13701_s6 + $0x10] sm:$0xff]  ;;  %v8530_v57 = vunpack.i.l.bf16 %v12490_v26 }
 0x5cb   : > { %6979 = vrot.lane.b32.xlu0 %v12396_v22, %s8945_s17  ;;  %5392 = vmatmul.mubr.bf16.vlgmr.msra.gmra.mrb[96].mxu1 %v8893_v14 }
 0x5cc   : > { %7173 = vperm.xlu1 %8166, %v7135_v62   ;;  %5780 = vmatpush1.bf16.msra.mxu1 %v5747_v61  ;;  %v5753_v52 = vsel %vm2264_vm1, %v8521_v24, %v12644_v59  ;;  %v5755_v59 = vsel %vm2264_vm1, %v8530_v57, %v12680_v54 }
 0x5cd   : > { %5781 = vmatprep.subr.bf16.mxu1 %v5750_v51  ;;  %v12862_v13 = vpop.permute.xlu0 %6537  ;;  %5401 = vmatprep.mubr.bf16.mxu1 %v13864_v15  ;;  %v7128_v51 = vld [vmem:[%s13701_s6] sm:$0xff] }
 0x5ce   : > { %v12865_v42 = vpop.permute.xlu1 %6553 }
 0x5cf   : > { %6783 = vrot.lane.b32.xlu0 %v12418_v16, %s8944_s22 }
 0x5d0   : > { %5782 = vmatpush1.bf16.msra.mxu1 %v5749_v35 }
 0x5d1   : > { %5783 = vmatprep.subr.bf16.mxu1 %v5752_v25  ;;  %v6536_v14 = vpop.permute.xlu0 %6535  ;;  %v5756_v25 = vsel %vm2264_vm1, %v12680_v54, %v12690_v38  ;;  %v5758_v38 = vsel %vm2264_vm1, %v12704_v3, %v12752_v8  ;;  %v8896_v8 = vld [vmem:[%s13700_s5 + $0x18] sm:$0xff]  }
 0x5d2   : > { %v12878_v62 = vpop.permute.xlu1 %8598  ;;  %v12882_v61 = vsel %vm3911_vm5, %v6536_v14, %v12862_v13 }
 0x5d3   : > { %6989 = vrot.lane.b32.xlu0 %v13864_v15, %s8945_s17  ;;  %5402 = vmatmul.mubr.bf16.gmra.mrb[100].mxu1 %v8894_v23 }
 0x5d4   : > { %5784 = vmatpush1.bf16.msra.mxu1 %v5751_v44  ;;  %5411 = vmatprep.mubr.bf16.mxu1 %v13864_v15 }
 0x5d5   : > { %5785 = vmatprep.subr.bf16.mxu1 %v5754_v1  ;;  %v12896_v35 = vpop.permute.xlu0 %6541  ;;  %v7132_v1 = vld [vmem:[%s13701_s6 + $0x20] sm:$0xff] }
 0x5d6   : > { %v12898_v23 = vpop.permute.xlu1 %6743 }
 0x5d7   : > { %7138 = vperm.xlu0 %8165, %v7128_v51   ;;  %v8531_v51 = vunpack.i.h.bf16 %v12490_v26  ;;  %v7134_v26 = vld [vmem:[%s13701_s6 + $0x30] sm:$0xff] }
 0x5d8   : > { %5786 = vmatpush1.bf16.msra.mxu1 %v5753_v52 }
 0x5d9   : > { %5787 = vmatprep.subr.bf16.mxu1 %v5756_v25  ;;  %v12912_v14 = vpop.permute.xlu0 %8593  ;;  %v5757_v54 = vsel %vm2264_vm1, %v8531_v51, %v12704_v3  ;;  %v8540_v25 = vunpack.i.l.bf16 %v12498_v40  ;;  %v8536_v3 = vunpack.i.h.bf16 %v12432_v43  ;;  %v8541_v43 = vunpack.i.h.bf16 %v12498_v40 }
 0x5da   : > { %v12914_v44 = vpop.permute.xlu1 %6741  ;;  %v5966_v51 = vsel %vm2703_vm4, %v12529_v48, %v12548_v33  ;;  %v8898_v33 = vld [vmem:[%s13700_s5 + $0x40] sm:$0xff]  }
 0x5db   : > { %7148 = vperm.xlu0 %8165, %v7130_v39   ;;  %5412 = vmatmul.mubr.bf16.gmra.mrb[104].mxu1 %v8895_v5  ;;  %v5760_v5 = vsel %vm2264_vm1, %v12775_v46, %v12758_v9  ;;  %v5559_v9 = vsel %vm1861_vm2, %v8536_v3, %v12777_v28  ;;  %v5761_v40 = vsel %vm2264_vm1, %v8541_v43, %v12783_v45  ;;  %v8546_v3 = vunpack.i.h.bf16 %v12438_v12 }
 0x5dc   : > { %5788 = vmatpush1.bf16.msra.mxu1 %v5755_v59  ;;  %5421 = vmatprep.mubr.bf16.mxu1 %v13864_v15  ;;  %v6355_v43 = vsel %vm3476_vm3, %v12568_v41, %v12594_v63  ;;  %v8556_v41 = vunpack.i.h.bf16 %v12456_v50 }
 0x5dd   : > { %5789 = vmatprep.subr.bf16.mxu1 %v5758_v38  ;;  %v12926_v24 = vpop.permute.xlu0 %6555  ;;  %v5759_v38 = vsel %vm2264_vm1, %v8540_v25, %v12775_v46  ;;  %v8545_v46 = vunpack.i.l.bf16 %v12438_v12  ;;  %v8899_v12 = vld [vmem:[%s13700_s5 + $0x28] sm:$0xff]  }
 0x5de   : > { %v12928_v52 = vpop.permute.xlu1 %8608 }
 0x5df   : > { %7158 = vperm.xlu0 %8165, %v7132_v1   ;;  %v8897_v1 = vld [vmem:[%s13700_s5 + $0x20] sm:$0xff]  }
 0x5e0   : > { %5790 = vmatpush1.bf16.msra.mxu1 %v5757_v54 }
 0x5e1   : > { %5791 = vmatprep.subr.bf16.mxu1 %v5760_v5  ;;  %v5544_v39 = vpop.permute.xlu0 %5543 }
 0x5e2   : > { %v12943_v57 = vpop.permute.xlu1 %6749  ;;  %v5560_v59 = vsel %vm1861_vm2, %v12777_v28, %v5544_v39  ;;  %v8550_v28 = vunpack.i.l.bf16 %v12448_v60  ;;  %v5968_v39 = vsel %vm2703_vm4, %v12575_v27, %v12592_v21  ;;  %v5967_v21 = vsel %vm2703_vm4, %v8546_v3, %v12575_v27  ;;  %v14014_v3 = vld [vmem:[#allocation76_spill] sm:$0xff] }
 0x5e3   : > { %7168 = vperm.xlu0 %8165, %v7134_v26   ;;  %5422 = vmatmul.mubr.bf16.gmra.mrb[108].mxu1 %v8896_v8  ;;  %v5965_v26 = vsel %vm2703_vm4, %v8545_v46, %v12529_v48  ;;  %v6353_v48 = vsel %vm3476_vm3, %v12522_v31, %v12556_v47  ;;  %v8560_v27 = vunpack.i.l.bf16 %v12468_v53  ;;  %v5972_v46 = vsel %vm2703_vm4, %v12651_v4, %v12674_v58 }
 0x5e4   : > { %5591 = vmatprep.subr.bf16.mxu0 %v5560_v59  ;;  %5792 = vmatpush1.bf16.msra.mxu1 %v5759_v38  ;;  %v6354_v25 = vsel %vm3476_vm3, %v12556_v47, %v8550_v28  ;;  %v8551_v59 = vunpack.i.h.bf16 %v12448_v60  ;;  %v5970_v60 = vsel %vm2703_vm4, %v12604_v20, %v12630_v56  ;;  %v8555_v47 = vunpack.i.l.bf16 %v12456_v50  ;;  %v8901_v50 = vld [vmem:[%s13700_s5 + $0x30] sm:$0xff]  }
 0x5e5   : > { %5592 = vmatpush1.bf16.msra.mxu0 %v5559_v9  ;;  %v5746_v54 = vpop.permute.xlu0 %5745  ;;  %5811 = vmatprep.mubr.bf16.mxu1 %v13864_v15  ;;  %v5971_v58 = vsel %vm2703_vm4, %v8556_v41, %v12651_v4 }
 0x5e6   : > { %v12961_v8 = vpop.permute.xlu1 %6951  ;;  %5997 = vmatprep.subr.bf16.mxu0 %v5966_v51  ;;  %v5762_v5 = vsel %vm2264_vm1, %v12783_v45, %v5746_v54  ;;  %v6356_v9 = vsel %vm3476_vm3, %v12594_v63, %v8551_v59  ;;  %v8900_v51 = vld [vmem:[%s13700_s5 + $0x48] sm:$0xff]   ;;  %v5969_v56 = vsel %vm2703_vm4, %v8555_v47, %v12604_v20  ;;  %v6358_v54 = vsel %vm3476_vm3, %v12636_v2, %v8560_v27 }
 0x5e7   : > { %5793 = vmatprep.subr.bf16.mxu1 %v5762_v5  ;;  %v8561_v63 = vunpack.i.h.bf16 %v12468_v53  ;;  %v6357_v20 = vsel %vm3476_vm3, %v12613_v10, %v12636_v2  ;;  %v14011_v53 = vld [vmem:[#allocation71_spill] sm:$0xff]  ;;  %v14012_v2 = vld [vmem:[#allocation29_spill] sm:$0xff]  ;;  %v6359_v59 = vsel %vm3476_vm3, %v14014_v3, %v12660_v34 }
 0x5e8   : > { %5610 = vmatmul.mubr.bf16.vlgmr.msra.gmra.mrb[192].mxu0 %v8897_v1  ;;  %5794 = vmatpush1.bf16.msra.mxu1 %v5761_v40  ;;  %v8565_v4 = vunpack.i.l.bf16 %v14012_v2  ;;  %v14015_v47 = vld [vmem:[#allocation65_spill] sm:$0xff] }
 0x5e9   : > { %5998 = vmatpush1.bf16.msra.mxu0 %v5965_v26  ;;  %6385 = vmatprep.subr.bf16.mxu1 %v6354_v25  ;;  %v12977_v45 = vpop.permute.xlu0 %6561  ;;  %v6360_v40 = vsel %vm3476_vm3, %v12660_v34, %v8561_v63  ;;  %v14013_v26 = vld [vmem:[#allocation59_spill] sm:$0xff]  ;;  %v6361_v27 = vsel %vm3476_vm3, %v14015_v47, %v12720_v36  ;;  %v14020_v3 = vld [vmem:[#allocation69_spill] sm:$0xff] }
 0x5ea   : > { %v12981_v38 = vpop.permute.xlu1 %6349  ;;  %5999 = vmatprep.subr.bf16.mxu0 %v5968_v39  ;;  %5619 = vmatprep.mubr.bf16.mxu0 %v13864_v15  ;;  %v8570_v25 = vunpack.i.l.bf16 %v14013_v26  ;;  %v8571_v34 = vunpack.i.h.bf16 %v14013_v26  ;;  %v8905_v26 = vld [vmem:[%s13700_s5 + $0x60] sm:$0xff]  }
 0x5eb   : > { %5812 = vmatmul.mubr.bf16.vlgmr.msra.gmra.mrb[112].mxu1 %v8898_v33  ;;  %v5974_v33 = vsel %vm2703_vm4, %v14011_v53, %v12712_v55  ;;  %v5973_v55 = vsel %vm2703_vm4, %v8565_v4, %v14011_v53 }
 0x5ec   : > { %6386 = vmatpush1.bf16.msra.mxu1 %v6353_v48  ;;  %5821 = vmatprep.mubr.bf16.mxu1 %v13864_v15  ;;  %v8902_v48 = vld [vmem:[%s13700_s5 + $0x50] sm:$0xff]  }
 0x5ed   : > { %6000 = vmatpush1.bf16.msra.mxu0 %v5967_v21  ;;  %6387 = vmatprep.subr.bf16.mxu1 %v6356_v9  ;;  %v12998_v31 = vpop.permute.xlu0 %6559  ;;  %v6362_v21 = vsel %vm3476_vm3, %v12720_v36, %v8570_v25  ;;  %v14018_v36 = vld [vmem:[#allocation68_spill] sm:$0xff] }
 0x5ee   : > { %v13002_v1 = vpop.permute.xlu1 %6755  ;;  %6001 = vmatprep.subr.bf16.mxu0 %v5970_v60  ;;  %v8580_v63 = vunpack.i.l.bf16 %v14018_v36 }
 0x5f0   : > { %5620 = vmatmul.mubr.bf16.gmra.mrb[196].mxu0 %v8899_v12  ;;  %6388 = vmatpush1.bf16.msra.mxu1 %v6355_v43  ;;  %v8566_v12 = vunpack.i.h.bf16 %v14012_v2 }
 0x5f1   : > { %6002 = vmatpush1.bf16.msra.mxu0 %v5969_v56  ;;  %6389 = vmatprep.subr.bf16.mxu1 %v6358_v54  ;;  %v13017_v28 = vpop.permute.xlu0 %6565  ;;  %v8903_v54 = vld [vmem:[%s13700_s5 + $0x38] sm:$0xff]  }
 0x5f2   : > { %v13021_v5 = vpop.permute.xlu1 %6753  ;;  %6003 = vmatprep.subr.bf16.mxu0 %v5972_v46  ;;  %5629 = vmatprep.mubr.bf16.mxu0 %v13864_v15  ;;  %v5975_v43 = vsel %vm2703_vm4, %v8566_v12, %v12714_v19  ;;  %v14017_v46 = vld [vmem:[#allocation74_spill] sm:$0xff]  ;;  %v8904_v19 = vld [vmem:[%s13700_s5 + $0x58] sm:$0xff]  }
 0x5f3   : > { %5822 = vmatmul.mubr.bf16.gmra.mrb[116].mxu1 %v8900_v51  ;;  %v14016_v51 = vld [vmem:[#allocation70_spill] sm:$0xff]  ;;  %v8575_v41 = vunpack.i.l.bf16 %v14017_v46 }
 0x5f4   : > { %6390 = vmatpush1.bf16.msra.mxu1 %v6357_v20  ;;  %5831 = vmatprep.mubr.bf16.mxu1 %v13864_v15  ;;  %v6364_v56 = vsel %vm3476_vm3, %v14016_v51, %v8571_v34  ;;  %v14023_v34 = vld [vmem:[#allocation39_spill] sm:$0xff] }
 0x5f5   : > { %6004 = vmatpush1.bf16.msra.mxu0 %v5971_v58  ;;  %6391 = vmatprep.subr.bf16.mxu1 %v6360_v40  ;;  %v13038_v10 = vpop.permute.xlu0 %8603  ;;  %v5977_v58 = vsel %vm2703_vm4, %v8575_v41, %v12744_v37  ;;  %v14019_v40 = vld [vmem:[#allocation72_spill] sm:$0xff]  ;;  %v14026_v51 = vld [vmem:[#allocation75_spill] sm:$0xff]  ;;  %v14027_v41 = vld [vmem:[#allocation50_spill] sm:$0xff] }
 0x5f6   : > { %v13042_v39 = vpop.permute.xlu1 %8618  ;;  %6005 = vmatprep.subr.bf16.mxu0 %v5974_v33  ;;  %v8576_v33 = vunpack.i.h.bf16 %v14017_v46  ;;  %v8907_v46 = vld [vmem:[%s13700_s5 + $0x68] sm:$0xff]  }
 0x5f8   : > { %5630 = vmatmul.mubr.bf16.gmra.mrb[200].mxu0 %v8901_v50  ;;  %6392 = vmatpush1.bf16.msra.mxu1 %v6359_v59  ;;  %v6366_v50 = vsel %vm3476_vm3, %v12808_v49, %v8580_v63  ;;  %v5979_v37 = vsel %vm2703_vm4, %v8576_v33, %v12790_v0  ;;  %v8585_v59 = vunpack.i.l.bf16 %v14020_v3 }
 0x5f9   : > { %6006 = vmatpush1.bf16.msra.mxu0 %v5973_v55  ;;  %6393 = vmatprep.subr.bf16.mxu1 %v6362_v21  ;;  %v13054_v9 = vpop.permute.xlu0 %6945  ;;  %v14022_v21 = vld [vmem:[#allocation64_spill] sm:$0xff] }
 0x5fa   : > { %v13058_v60 = vpop.permute.xlu1 %6761  ;;  %6007 = vmatprep.subr.bf16.mxu0 %v12762_v11  ;;  %5639 = vmatprep.mubr.bf16.mxu0 %v13864_v15  ;;  %v6572_v12 = vsel %vm3911_vm5, %v14022_v21, %v8585_v59 }
 0x5fb   : > { %5832 = vmatmul.mubr.bf16.gmra.mrb[120].mxu1 %v8902_v48  ;;  %v14021_v48 = vld [vmem:[#allocation60_spill] sm:$0xff] }
 0x5fc   : > { %6394 = vmatpush1.bf16.msra.mxu1 %v6361_v27  ;;  %5841 = vmatprep.mubr.bf16.mxu1 %v13864_v15  ;;  %v8586_v27 = vunpack.i.h.bf16 %v14020_v3  ;;  %v14032_v3 = vld [vmem:[#allocation66_spill] sm:$0xff] }
 0x5fd   : > { %6008 = vmatpush1.bf16.msra.mxu0 %v5975_v43  ;;  %6395 = vmatprep.subr.bf16.mxu1 %v6364_v56  ;;  %v13073_v11 = vpop.permute.xlu0 %6943  ;;  %v14024_v43 = vld [vmem:[#allocation45_spill] sm:$0xff]  ;;  %v8590_v56 = vunpack.i.l.bf16 %v14026_v51 }
 0x5fe   : > { %v13077_v20 = vpop.permute.xlu1 %6963  ;;  %6009 = vmatprep.subr.bf16.mxu0 %v12802_v32  ;;  %v8581_v32 = vunpack.i.h.bf16 %v14018_v36 }
 0x5ff   : > { %v6576_v33 = vsel %vm3911_vm5, %v12862_v13, %v8590_v56  ;;  %v8909_v13 = vld [vmem:[%s13700_s5 + $0x70] sm:$0xff]  }
 0x600   : > { %5640 = vmatmul.mubr.bf16.gmra.mrb[204].mxu0 %v8903_v54  ;;  %6396 = vmatpush1.bf16.msra.mxu1 %v14019_v40  ;;  %v6368_v49 = vsel %vm3476_vm3, %v12981_v38, %v8581_v32  ;;  %v6574_v54 = vsel %vm3911_vm5, %v12847_v18, %v8586_v27  ;;  %v14030_v32 = vld [vmem:[#allocation26_spill] sm:$0xff]  ;;  %v8596_v27 = vunpack.i.h.bf16 %v12912_v14 }
 0x601   : > { %6010 = vmatpush1.bf16.msra.mxu0 %v5977_v58  ;;  %6397 = vmatprep.subr.bf16.mxu1 %v6366_v50  ;;  %v5964_v53 = vpop.permute.xlu0 %5963  ;;  %v14029_v58 = vld [vmem:[#allocation10_spill] sm:$0xff]  ;;  %v8908_v50 = vld [vmem:[%s13700_s5 + $0xa8] sm:$0xff]  }
 0x602   : > { %v13090_v2 = vpop.permute.xlu1 %6767  ;;  %v5980_v4 = vsel %vm2703_vm4, %v12790_v0, %v5964_v53  ;;  %6029 = vmatprep.mubr.bf16.mxu0 %v13864_v15  ;;  %v6367_v0 = vsel %vm3476_vm3, %v12821_v7, %v12981_v38  ;;  %v14025_v7 = vld [vmem:[#allocation9_spill] sm:$0xff]  ;;  %v6573_v40 = vsel %vm3911_vm5, %v14029_v58, %v12847_v18  ;;  %v8591_v53 = vunpack.i.h.bf16 %v14026_v51  ;;  %v14037_v51 = vld [vmem:[#allocation51_spill] sm:$0xff] }
 0x603   : > { %5842 = vmatmul.mubr.bf16.gmra.mrb[124].mxu1 %v8904_v19  ;;  %6011 = vmatprep.subr.bf16.mxu0 %v5980_v4  ;;  %v6571_v38 = vsel %vm3911_vm5, %v14025_v7, %v14022_v21  ;;  %v14028_v19 = vld [vmem:[#allocation44_spill] sm:$0xff]  ;;  %v8595_v18 = vunpack.i.l.bf16 %v12912_v14  ;;  %v14036_v7 = vld [vmem:[#allocation62_spill] sm:$0xff]  ;;  %v8911_v14 = vld [vmem:[%s13700_s5 + $0x78] sm:$0xff]   ;;  %v6583_v58 = vsel %vm3911_vm5, %v12998_v31, %v12977_v45 }
 0x604   : > { %6398 = vmatpush1.bf16.msra.mxu1 %v12815_v30  ;;  %6417 = vmatprep.mubr.bf16.mxu1 %v13864_v15  ;;  %v8906_v30 = vld [vmem:[%s13700_s5 + $0xa0] sm:$0xff]  }
 0x605   : > { %6012 = vmatpush1.bf16.msra.mxu0 %v5979_v37  ;;  %6399 = vmatprep.subr.bf16.mxu1 %v6368_v49  ;;  %v13104_v25 = vpop.permute.xlu0 %6747  ;;  %v14031_v37 = vld [vmem:[#allocation57_spill] sm:$0xff] }
 0x606   : > { %6135 = vmatprep.subr.bf16.mxu0 %v14021_v48  ;;  %v13114_v55 = vpop.permute.xlu1 %6765  ;;  %v14033_v48 = vld [vmem:[#allocation7_spill] sm:$0xff] }
 0x608   : > { %6030 = vmatmul.mubr.bf16.vlgmr.msra.gmra.mrb[208].mxu0 %v8905_v26  ;;  %6400 = vmatpush1.bf16.msra.mxu1 %v6367_v0  ;;  %v6578_v26 = vsel %vm3911_vm5, %v12826_v17, %v8591_v53  ;;  %v8910_v0 = vld [vmem:[%s13700_s5 + $0xb0] sm:$0xff]  }
 0x609   : > { %6136 = vmatpush1.bf16.msra.mxu0 %v14023_v34  ;;  %6603 = vmatprep.subr.bf16.mxu1 %v6572_v12  ;;  %v13119_v47 = vpop.permute.xlu0 %6949  ;;  %v14035_v12 = vld [vmem:[#allocation56_spill] sm:$0xff] }
 0x60a   : > { %6137 = vmatprep.subr.bf16.mxu0 %v14024_v43  ;;  %6039 = vmatprep.mubr.bf16.mxu0 %v13864_v15  ;;  %v13137_v63 = vpop.permute.xlu1 %6567 }
 0x60b   : > { %6418 = vmatmul.mubr.bf16.vlgmr.msra.gmra.mrb[128].mxu1 %v8906_v30  ;;  %v14034_v30 = vld [vmem:[#allocation77_spill] sm:$0xff] }
 0x60c   : > { %6604 = vmatpush1.bf16.msra.mxu1 %v6571_v38  ;;  %6427 = vmatprep.mubr.bf16.mxu1 %v13864_v15  ;;  %v6580_v21 = vsel %vm3911_vm5, %v14034_v30, %v8595_v18  ;;  %v6582_v38 = vsel %vm3911_vm5, %v12926_v24, %v8596_v27  ;;  %v8917_v27 = vld [vmem:[%s13700_s5 + $0x90] sm:$0xff]  }
 0x60d   : > { %6138 = vmatpush1.bf16.msra.mxu0 %v14027_v41  ;;  %6605 = vmatprep.subr.bf16.mxu1 %v6574_v54  ;;  %v13135_v36 = vpop.permute.xlu0 %8613  ;;  %v8912_v54 = vld [vmem:[%s13700_s5 + $0xb8] sm:$0xff]  }
 0x60e   : > { %6139 = vmatprep.subr.bf16.mxu0 %v14028_v19  ;;  %v13155_v49 = vpop.permute.xlu1 %8628  ;;  %v8605_v19 = vunpack.i.l.bf16 %v13038_v10  ;;  %v8615_v18 = vunpack.i.l.bf16 %v13135_v36 }
 0x610   : > { %6040 = vmatmul.mubr.bf16.gmra.mrb[212].mxu0 %v8907_v46  ;;  %6606 = vmatpush1.bf16.msra.mxu1 %v6573_v40  ;;  %v8610_v40 = vunpack.i.l.bf16 %v12928_v52 }
 0x611   : > { %6140 = vmatpush1.bf16.msra.mxu0 %v14030_v32  ;;  %6607 = vmatprep.subr.bf16.mxu1 %v6576_v33  ;;  %v13150_v4 = vpop.permute.xlu0 %6957  ;;  %v6585_v33 = vsel %vm3911_vm5, %v13017_v28, %v13137_v63  ;;  %v8914_v32 = vld [vmem:[%s13700_s5 + $0xc0] sm:$0xff]  }
 0x612   : > { %6141 = vmatprep.subr.bf16.mxu0 %v14031_v37  ;;  %6049 = vmatprep.mubr.bf16.mxu0 %v13864_v15  ;;  %v13180_v43 = vpop.permute.xlu1 %6773  ;;  %v6992_v37 = vsel %vm4749_vm6, %v13054_v9, %v8610_v40 }
 0x613   : > { %6428 = vmatmul.mubr.bf16.gmra.mrb[132].mxu1 %v8908_v50  ;;  %v8913_v50 = vld [vmem:[%s13700_s5 + $0x80] sm:$0xff]  }
 0x614   : > { %6608 = vmatpush1.bf16.msra.mxu1 %v12882_v61  ;;  %6437 = vmatprep.mubr.bf16.mxu1 %v13864_v15  ;;  %v6577_v61 = vsel %vm3911_vm5, %v12896_v35, %v12826_v17  ;;  %v6579_v17 = vsel %vm3911_vm5, %v12852_v6, %v14034_v30  ;;  %v8600_v35 = vunpack.i.l.bf16 %v12878_v62  ;;  %v6581_v6 = vsel %vm3911_vm5, %v12865_v42, %v12926_v24  ;;  %v14038_v24 = vld [vmem:[#allocation55_spill] sm:$0xff] }
 0x615   : > { %6142 = vmatpush1.bf16.msra.mxu0 %v14032_v3  ;;  %6609 = vmatprep.subr.bf16.mxu1 %v6578_v26  ;;  %v13165_v59 = vpop.permute.xlu0 %6955  ;;  %v8601_v42 = vunpack.i.h.bf16 %v12878_v62  ;;  %v8606_v62 = vunpack.i.h.bf16 %v13038_v10  ;;  %v8611_v10 = vunpack.i.h.bf16 %v12928_v52  ;;  %v6791_v52 = vsel %vm4346_vm7, %v13104_v25, %v12943_v57  ;;  %v8915_v3 = vld [vmem:[%s13700_s5 + $0x88] sm:$0xff]  }
 0x616   : > { %6143 = vmatprep.subr.bf16.mxu0 %v14033_v48  ;;  %v13204_v46 = vpop.permute.xlu1 %6975  ;;  %v6584_v41 = vsel %vm3911_vm5, %v12977_v45, %v8600_v35  ;;  %v6790_v45 = vsel %vm4346_vm7, %v12898_v23, %v8605_v19  ;;  %v6794_v48 = vsel %vm4346_vm7, %v13002_v1, %v8615_v18  ;;  %v8916_v25 = vld [vmem:[%s13700_s5 + $0xc8] sm:$0xff]   ;;  %v8631_v35 = vunpack.i.h.bf16 %v13155_v49  ;;  %v8926_v18 = vld [vmem:[%s13700_s5 + $0x110] sm:$0xff]  }
 0x617   : > { %v6792_v28 = vsel %vm4346_vm7, %v12943_v57, %v8606_v62  ;;  %v6993_v57 = vsel %vm4749_vm6, %v13119_v47, %v12961_v8 }
 0x618   : > { %6050 = vmatmul.mubr.bf16.gmra.mrb[216].mxu0 %v8909_v13  ;;  %6610 = vmatpush1.bf16.msra.mxu1 %v6577_v61  ;;  %v6994_v13 = vsel %vm4749_vm6, %v12961_v8, %v8611_v10  ;;  %v6793_v61 = vsel %vm4346_vm7, %v13021_v5, %v13002_v1  ;;  %v6995_v1 = vsel %vm4749_vm6, %v13165_v59, %v13150_v4  ;;  %v8630_v5 = vunpack.i.l.bf16 %v13155_v49  ;;  %v8924_v10 = vld [vmem:[%s13700_s5 + $0x108] sm:$0xff]  }
 0x619   : > { %6144 = vmatpush1.bf16.msra.mxu0 %v14035_v12  ;;  %v13177_v34 = vpop.permute.xlu0 %6759  ;;  %6611 = vmatprep.subr.bf16.mxu1 %v6580_v21  ;;  %v7002_v49 = vsel %vm4749_vm6, %v13204_v46, %v8631_v35 }
 0x61a   : > { %6145 = vmatprep.subr.bf16.mxu0 %v14036_v7  ;;  %6059 = vmatprep.mubr.bf16.mxu0 %v13864_v15  ;;  %v13231_v31 = vpop.permute.xlu1 %6779 }
 0x61b   : > { %6438 = vmatmul.mubr.bf16.gmra.mrb[136].mxu1 %v8910_v0 }
 0x61c   : > { %6612 = vmatpush1.bf16.msra.mxu1 %v6579_v17  ;;  %6447 = vmatprep.mubr.bf16.mxu1 %v13864_v15  ;;  %v6797_v17 = vsel %vm4346_vm7, %v13114_v55, %v13090_v2 }
 0x61d   : > { %6146 = vmatpush1.bf16.msra.mxu0 %v14037_v51  ;;  %v13195_v56 = vpop.permute.xlu0 %6961  ;;  %6613 = vmatprep.subr.bf16.mxu1 %v6582_v38 }
 0x61e   : > { %6147 = vmatprep.subr.bf16.mxu0 %v12400_v29 }
 0x620   : > { %6060 = vmatmul.mubr.bf16.gmra.mrb[220].mxu0 %v8911_v14  ;;  %6614 = vmatpush1.bf16.msra.mxu1 %v6581_v6 }
 0x621   : > { %6148 = vmatpush1.bf16.msra.mxu0 %v12396_v22  ;;  %v13210_v29 = vpop.permute.xlu0 %8623  ;;  %6615 = vmatprep.subr.bf16.mxu1 %v6584_v41  ;;  %v6586_v22 = vsel %vm3911_vm5, %v13137_v63, %v8601_v42  ;;  %v13258_v63 = vpop.permute.xlu1 %6777  ;;  %v8920_v42 = vld [vmem:[%s13700_s5 + $0xd8] sm:$0xff]  }
 0x622   : > { %6149 = vmatprep.subr.bf16.mxu0 %v14038_v24  ;;  %6167 = vmatprep.mubr.bf16.mxu0 %v13864_v15  ;;  %v8625_v30 = vunpack.i.l.bf16 %v13210_v29  ;;  %v8626_v7 = vunpack.i.h.bf16 %v13210_v29  ;;  %v6801_v24 = vsel %vm4346_vm7, %v13258_v63, %v13231_v31 }
 0x623   : > { %6448 = vmatmul.mubr.bf16.gmra.mrb[140].mxu1 %v8912_v54 }
 0x624   : > { %6616 = vmatpush1.bf16.msra.mxu1 %v6583_v58  ;;  %6635 = vmatprep.mubr.bf16.mxu1 %v13864_v15  ;;  %v6798_v59 = vsel %vm4346_vm7, %v13090_v2, %v8625_v30 }
 0x625   : > { %6150 = vmatpush1.bf16.msra.mxu0 %v12418_v16  ;;  %v13227_v53 = vpop.permute.xlu0 %6969  ;;  %6617 = vmatprep.subr.bf16.mxu1 %v6586_v22  ;;  %v6789_v16 = vsel %vm4346_vm7, %v12914_v44, %v12898_v23  ;;  %v6991_v23 = vsel %vm4749_vm6, %v13073_v11, %v13054_v9  ;;  %v8620_v44 = vunpack.i.l.bf16 %v13042_v39  ;;  %v8616_v9 = vunpack.i.h.bf16 %v13135_v36  ;;  %v6984_v47 = vpop.permute.xlu1 %6983 }
 0x626   : > { %6821 = vmatprep.subr.bf16.mxu0 %v6790_v45  ;;  %v8621_v36 = vunpack.i.h.bf16 %v13042_v39  ;;  %v6795_v39 = vsel %vm4346_vm7, %v13177_v34, %v13058_v60  ;;  %v8918_v34 = vld [vmem:[%s13700_s5 + $0xd0] sm:$0xff]   ;;  %v7000_v14 = vsel %vm4749_vm6, %v13227_v53, %v8630_v5 }
 0x627   : > { %v6996_v0 = vsel %vm4749_vm6, %v13150_v4, %v8620_v44  ;;  %v6796_v8 = vsel %vm4346_vm7, %v13058_v60, %v8616_v9  ;;  %v6997_v60 = vsel %vm4749_vm6, %v13195_v56, %v13077_v20  ;;  %v8919_v56 = vld [vmem:[%s13700_s5 + $0x98] sm:$0xff]  }
 0x628   : > { %6168 = vmatmul.mubr.bf16.vlgmr.msra.gmra.mrb[192].mxu0 %v8913_v50  ;;  %6618 = vmatpush1.bf16.msra.mxu1 %v6585_v33  ;;  %v6998_v12 = vsel %vm4749_vm6, %v13077_v20, %v8621_v36  ;;  %v6800_v20 = vsel %vm4346_vm7, %v13180_v43, %v8626_v7 }
 0x629   : > { %6822 = vmatpush1.bf16.msra.mxu0 %v6789_v16  ;;  %v13246_v26 = vpop.permute.xlu0 %6967  ;;  %7023 = vmatprep.subr.bf16.mxu1 %v6992_v37  ;;  %v6786_v38 = vpop.permute.xlu1 %6785  ;;  %v8923_v16 = vld [vmem:[%s13700_s5 + $0xe8] sm:$0xff]   ;;  %v8925_v37 = vld [vmem:[%s13700_s5 + $0xf0] sm:$0xff]  }
 0x62a   : > { %6823 = vmatprep.subr.bf16.mxu0 %v6792_v28  ;;  %6177 = vmatprep.mubr.bf16.mxu0 %v13864_v15  ;;  %v6999_v2 = vsel %vm4749_vm6, %v13246_v26, %v13227_v53  ;;  %v8921_v53 = vld [vmem:[%s13700_s5 + $0xe0] sm:$0xff]   ;;  %v8927_v26 = vld [vmem:[%s13700_s5 + $0xf8] sm:$0xff]  }
 0x62b   : > { %6636 = vmatmul.mubr.bf16.vlgmr.msra.gmra.mrb[144].mxu1 %v8914_v32  ;;  %v8922_v32 = vld [vmem:[%s13700_s5 + $0x100] sm:$0xff]   ;;  %v8928_v28 = vld [vmem:[%s13700_s5 + $0x118] sm:$0xff]  }
 0x62c   : > { %7024 = vmatpush1.bf16.msra.mxu1 %v6991_v23  ;;  %6645 = vmatprep.mubr.bf16.mxu1 %v13864_v15 }
 0x62d   : > { %6824 = vmatpush1.bf16.msra.mxu0 %v6791_v52  ;;  %v6772_v11 = vpop.permute.xlu0 %6771  ;;  %7025 = vmatprep.subr.bf16.mxu1 %v6994_v13  ;;  %v6988_v29 = vpop.permute.xlu1 %6987 }
 0x62e   : > { %6825 = vmatprep.subr.bf16.mxu0 %v6794_v48  ;;  %v6799_v55 = vsel %vm4346_vm7, %v6772_v11, %v13180_v43 }
 0x630   : > { %6178 = vmatmul.mubr.bf16.gmra.mrb[196].mxu0 %v8915_v3  ;;  %7026 = vmatpush1.bf16.msra.mxu1 %v6993_v57 }
 0x631   : > { %6826 = vmatpush1.bf16.msra.mxu0 %v6793_v61  ;;  %v6974_v21 = vpop.permute.xlu0 %6973  ;;  %7027 = vmatprep.subr.bf16.mxu1 %v6996_v0  ;;  %v6986_v62 = vpop.permute.xlu1 %6985 }
 0x632   : > { %6827 = vmatprep.subr.bf16.mxu0 %v6796_v8  ;;  %6187 = vmatprep.mubr.bf16.mxu0 %v13864_v15  ;;  %v7001_v43 = vsel %vm4749_vm6, %v6974_v21, %v13204_v46  ;;  %v7005_v33 = vsel %vm4749_vm6, %v6986_v62, %v6988_v29 }
 0x633   : > { %6646 = vmatmul.mubr.bf16.gmra.mrb[148].mxu1 %v8916_v25 }
 0x634   : > { %7028 = vmatpush1.bf16.msra.mxu1 %v6995_v1  ;;  %6655 = vmatprep.mubr.bf16.mxu1 %v13864_v15 }
 0x635   : > { %6828 = vmatpush1.bf16.msra.mxu0 %v6795_v39  ;;  %v8634_v4 = vpop.permute.xlu0 %8633  ;;  %7029 = vmatprep.subr.bf16.mxu1 %v6998_v12 }
 0x636   : > { %6829 = vmatprep.subr.bf16.mxu0 %v6798_v59  ;;  %v8635_v51 = vunpack.i.l.bf16 %v8634_v4  ;;  %v8636_v54 = vunpack.i.h.bf16 %v8634_v4  ;;  %v7209_v4 = vld [vmem:[%s13702_s7 + $0x8] sm:$0x3] }
 0x638   : > { %6188 = vmatmul.mubr.bf16.gmra.mrb[200].mxu0 %v8917_v27  ;;  %7030 = vmatpush1.bf16.msra.mxu1 %v6997_v60  ;;  %v6802_v19 = vsel %vm4346_vm7, %v13231_v31, %v8635_v51  ;;  %v6804_v22 = vsel %vm4346_vm7, %v6786_v38, %v8636_v54 }
 0x639   : > { %6830 = vmatpush1.bf16.msra.mxu0 %v6797_v17  ;;  %v6982_v6 = vpop.permute.xlu0 %6981  ;;  %7031 = vmatprep.subr.bf16.mxu1 %v7000_v14 }
 0x63a   : > { %6831 = vmatprep.subr.bf16.mxu0 %v6800_v20  ;;  %6197 = vmatprep.mubr.bf16.mxu0 %v13864_v15  ;;  %v7004_v58 = vsel %vm4749_vm6, %v6982_v6, %v6984_v47 }
 0x63b   : > { %6656 = vmatmul.mubr.bf16.gmra.mrb[152].mxu1 %v8918_v34 }
 0x63c   : > { %7032 = vmatpush1.bf16.msra.mxu1 %v6999_v2  ;;  %6665 = vmatprep.mubr.bf16.mxu1 %v13864_v15  ;;  %v8946_v2 = vmov 0.0  }
 0x63d   : > { %6832 = vmatpush1.bf16.msra.mxu0 %v6799_v55  ;;  %v6980_v41 = vpop.permute.xlu0 %6979  ;;  %7033 = vmatprep.subr.bf16.mxu1 %v7002_v49 }
 0x63e   : > { %6833 = vmatprep.subr.bf16.mxu0 %v6802_v19  ;;  %v7003_v46 = vsel %vm4749_vm6, %v6980_v41, %v6982_v6 }
 0x640   : > { %6198 = vmatmul.mubr.bf16.gmra.mrb[204].mxu0 %v8919_v56  ;;  %7034 = vmatpush1.bf16.msra.mxu1 %v7001_v43 }
 0x641   : > { %6834 = vmatpush1.bf16.msra.mxu0 %v6801_v24  ;;  %v6784_v40 = vpop.permute.xlu0 %6783  ;;  %7035 = vmatprep.subr.bf16.mxu1 %v7004_v58 }
 0x642   : > { %v6803_v50 = vsel %vm4346_vm7, %v6784_v40, %v6786_v38  ;;  %6835 = vmatprep.subr.bf16.mxu0 %v6804_v22  ;;  %6853 = vmatprep.mubr.bf16.mxu0 %v13864_v15 }
 0x643   : > { %6666 = vmatmul.mubr.bf16.gmra.mrb[156].mxu1 %v8920_v42 }
 0x644   : > { %7036 = vmatpush1.bf16.msra.mxu1 %v7003_v46  ;;  %7055 = vmatprep.mubr.bf16.mxu1 %v13864_v15 }
 0x645   : > { %6836 = vmatpush1.bf16.msra.mxu0 %v6803_v50  ;;  %v6990_v45 = vpop.permute.xlu0 %6989 }
 0x646   : > { %v7006_v31 = vsel %vm4749_vm6, %v6988_v29, %v6990_v45 }
 0x647   : > { %7037 = vmatprep.subr.bf16.mxu1 %v7006_v31 }
 0x648   : > { %6854 = vmatmul.mubr.bf16.vlgmr.msra.gmra.mrb[192].mxu0 %v8921_v53  ;;  %7038 = vmatpush1.bf16.msra.mxu1 %v7005_v33 }
 0x649   : > { %6863 = vmatprep.mubr.bf16.mxu0 %v13864_v15 }
 0x64b   : > { %7056 = vmatmul.mubr.bf16.vlgmr.msra.gmra.mrb[160].mxu1 %v8922_v32 }
 0x64c   : > { %7065 = vmatprep.mubr.bf16.mxu1 %v13864_v15 }
 0x650   : > { %6864 = vmatmul.mubr.bf16.gmra.mrb[196].mxu0 %v8923_v16 }
 0x651   : > { %6873 = vmatprep.mubr.bf16.mxu0 %v13864_v15 }
 0x653   : > { %7066 = vmatmul.mubr.bf16.gmra.mrb[164].mxu1 %v8924_v10 }
 0x654   : > { %7075 = vmatprep.mubr.bf16.mxu1 %v13864_v15 }
 0x658   : > { %6874 = vmatmul.mubr.bf16.gmra.mrb[200].mxu0 %v8925_v37 }
 0x659   : > { %6883 = vmatprep.mubr.bf16.mxu0 %v13864_v15 }
 0x65b   : > { %7076 = vmatmul.mubr.bf16.gmra.mrb[168].mxu1 %v8926_v18 }
 0x65c   : > { %7085 = vmatprep.mubr.bf16.mxu1 %v13864_v15 }
 0x660   : > { %6884 = vmatmul.mubr.bf16.gmra.mrb[204].mxu0 %v8927_v26 }
 0x661   : > { %7281 = vmatprep.mubr.f32.mxu0 %v8946_v2 }
 0x663   : > { %7086 = vmatmul.mubr.bf16.gmra.mrb[172].mxu1 %v8928_v28 }
 0x664   : > { %7287 = vmatprep.mubr.f32.mxu1 %v8946_v2 }
 0x69e   : > { %v5393_v23 = vpop.f32.mrb[96].mxu1 }
 0x69f   : > { %v5395_v44 = vpop.f32.mrb[97].mxu1  ;;  %v5432_v47 = vsel %vm11236_vm8, %v5393_v23, 0.0 }
 0x6a0   : > { %v5397_v52 = vpop.f32.mrb[98].mxu1  ;;  %v5433_v27 = vsel %vm11242_vm9, %v5395_v44, 0.0 }
 0x6a1   : > { %v5399_v63 = vpop.f32.mrb[99].mxu1  ;;  %v5434_v34 = vsel %vm11236_vm8, %v5397_v52, 0.0 }
 0x6a2   : > { %v5435_v14 = vsel %vm11242_vm9, %v5399_v63, 0.0 }
 0x6a6   : > { %v5403_v13 = vpop.f32.mrb[100].mxu1 }
 0x6a7   : > { %v5405_v3 = vpop.f32.mrb[101].mxu1  ;;  %v5436_v49 = vsel %vm11236_vm8, %v5403_v13, 0.0 }
 0x6a8   : > { %v5407_v9 = vpop.f32.mrb[102].mxu1  ;;  %v5437_v41 = vsel %vm11242_vm9, %v5405_v3, 0.0 }
 0x6a9   : > { %v5409_v11 = vpop.f32.mrb[103].mxu1  ;;  %v5438_v42 = vsel %vm11236_vm8, %v5407_v9, 0.0 }
 0x6aa   : > { %v5439_v22 = vsel %vm11242_vm9, %v5409_v11, 0.0 }
 0x6ae   : > { %v5413_v48 = vpop.f32.mrb[104].mxu1 }
 0x6af   : > { %v5415_v57 = vpop.f32.mrb[105].mxu1  ;;  %v5440_v45 = vsel %vm11236_vm8, %v5413_v48, 0.0 }
 0x6b0   : > { %v5417_v25 = vpop.f32.mrb[106].mxu1  ;;  %v5441_v32 = vsel %vm11242_vm9, %v5415_v57, 0.0 }
 0x6b1   : > { %v5419_v61 = vpop.f32.mrb[107].mxu1  ;;  %v5442_v18 = vsel %vm11236_vm8, %v5417_v25, 0.0 }
 0x6b2   : > { %v5443_v44 = vsel %vm11242_vm9, %v5419_v61, 0.0 }
 0x6b6   : > { %v5423_v36 = vpop.f32.mrb[108].mxu1 }
 0x6b7   : > { %v13375_v15 = vpop.f32.mrb[109].mxu1  ;;  %v5444_v9 = vsel %vm11236_vm8, %v5423_v36, 0.0 }
 0x6b8   : > { %v13377_v0 = vpop.f32.mrb[110].mxu1  ;;  %v5445_v57 = vsel %vm11242_vm9, %v13375_v15, 0.0 }
 0x6b9   : > { %v13379_v30 = vpop.f32.mrb[111].mxu1 }
 0x6ba   : > { %v5447_v15 = vsel %vm11242_vm9, %v13379_v30, 0.0 }
 0x6be   : > { %v5813_v21 = vpop.f32.mrb[112].mxu1 }
 0x6bf   : > { %v5852_v5 = vsel %vm11249_vm10, %v5813_v21, 0.0  ;;  %v5815_v39 = vpop.f32.mrb[113].mxu1 }
 0x6c0   : > { %v13387_v7 = vadd.f32 %v5852_v5, %v5432_v47  ;;  %v5853_v59 = vsel %vm11262_vm11, %v5815_v39, 0.0  ;;  %v5817_v60 = vpop.f32.mrb[114].mxu1  ;;  %v5446_v47 = vsel %vm11236_vm8, %v13377_v0, 0.0 }
 0x6c1   : > { %v13393_v17 = vadd.f32 %v5853_v59, %v5433_v27  ;;  %v5854_v35 = vsel %vm11249_vm10, %v5817_v60, 0.0  ;;  %v5819_v38 = vpop.f32.mrb[115].mxu1 }
 0x6c2   : > { %v13399_v51 = vadd.f32 %v5854_v35, %v5434_v34  ;;  %v5855_v6 = vsel %vm11262_vm11, %v5819_v38, 0.0 }
 0x6c3   : > { %v13403_v20 = vadd.f32 %v5855_v6, %v5435_v14 }
 0x6c6   : > { %v5823_v55 = vpop.f32.mrb[116].mxu1 }
 0x6c7   : > { %v5856_v56 = vsel %vm11249_vm10, %v5823_v55, 0.0  ;;  %v5825_v54 = vpop.f32.mrb[117].mxu1 }
 0x6c8   : > { %v13411_v19 = vadd.f32 %v5856_v56, %v5436_v49  ;;  %v5857_v29 = vsel %vm11262_vm11, %v5825_v54, 0.0  ;;  %v5827_v43 = vpop.f32.mrb[118].mxu1 }
 0x6c9   : > { %v13417_v24 = vadd.f32 %v5857_v29, %v5437_v41  ;;  %v5858_v58 = vsel %vm11249_vm10, %v5827_v43, 0.0  ;;  %v5829_v40 = vpop.f32.mrb[119].mxu1 }
 0x6ca   : > { %v13423_v50 = vadd.f32 %v5858_v58, %v5438_v42  ;;  %v5859_v46 = vsel %vm11262_vm11, %v5829_v40, 0.0 }
 0x6cb   : > { %v13427_v62 = vadd.f32 %v5859_v46, %v5439_v22 }
 0x6ce   : > { %v5833_v53 = vpop.f32.mrb[120].mxu1 }
 0x6cf   : > { %v5860_v31 = vsel %vm11249_vm10, %v5833_v53, 0.0  ;;  %v5835_v33 = vpop.f32.mrb[121].mxu1 }
 0x6d0   : > { %v13435_v16 = vadd.f32 %v5860_v31, %v5440_v45  ;;  %v5861_v10 = vsel %vm11262_vm11, %v5835_v33, 0.0  ;;  %v5837_v37 = vpop.f32.mrb[122].mxu1 }
 0x6d1   : > { %v13441_v26 = vadd.f32 %v5861_v10, %v5441_v32  ;;  %v5862_v28 = vsel %vm11249_vm10, %v5837_v37, 0.0  ;;  %v5839_v23 = vpop.f32.mrb[123].mxu1 }
 0x6d2   : > { %v13447_v52 = vadd.f32 %v5862_v28, %v5442_v18  ;;  %v5863_v63 = vsel %vm11262_vm11, %v5839_v23, 0.0 }
 0x6d3   : > { %v13451_v13 = vadd.f32 %v5863_v63, %v5443_v44 }
 0x6d6   : > { %v5843_v3 = vpop.f32.mrb[124].mxu1 }
 0x6d7   : > { %v5864_v11 = vsel %vm11249_vm10, %v5843_v3, 0.0  ;;  %v5845_v48 = vpop.f32.mrb[125].mxu1 }
 0x6d8   : > { %v13460_v25 = vadd.f32 %v5864_v11, %v5444_v9  ;;  %v5865_v61 = vsel %vm11262_vm11, %v5845_v48, 0.0  ;;  %v5847_v21 = vpop.f32.mrb[126].mxu1 }
 0x6d9   : > { %v13467_v5 = vadd.f32 %v5865_v61, %v5445_v57  ;;  %v5866_v36 = vsel %vm11249_vm10, %v5847_v21, 0.0  ;;  %v5849_v39 = vpop.f32.mrb[127].mxu1 }
 0x6da   : > { %v13474_v27 = vadd.f32 %v5866_v36, %v5446_v47  ;;  %v5867_v59 = vsel %vm11262_vm11, %v5849_v39, 0.0 }
 0x6db   : > { %v13478_v60 = vadd.f32 %v5867_v59, %v5447_v15  ;;  %v6031_v34 = vpop.f32.mrb[208].mxu0 }
 0x6dc   : > { %v6070_v0 = vsel %vm11236_vm8, %v6031_v34, 0.0  ;;  %v6033_v35 = vpop.f32.mrb[209].mxu0 }
 0x6dd   : > { %v7972_v38 = vadd.f32 %v13387_v7, %v6070_v0  ;;  %v6071_v14 = vsel %vm11242_vm9, %v6033_v35, 0.0  ;;  %v6035_v6 = vpop.f32.mrb[210].mxu0 }
 0x6de   : > { %v7977_v30 = vadd.f32 %v13393_v17, %v6071_v14  ;;  %v6072_v2 = vsel %vm11236_vm8, %v6035_v6, 0.0  ;;  %v6037_v55 = vpop.f32.mrb[211].mxu0  ;;  %v6419_v49 = vpop.f32.mrb[128].mxu1 }
 0x6df   : > { %v7982_v56 = vadd.f32 %v13399_v51, %v6072_v2  ;;  %v6073_v54 = vsel %vm11242_vm9, %v6037_v55, 0.0  ;;  %v6458_v41 = vsel %vm11249_vm10, %v6419_v49, 0.0  ;;  %v6421_v7 = vpop.f32.mrb[129].mxu1 }
 0x6e0   : > { %v7987_v29 = vadd.f32 %v13403_v20, %v6073_v54  ;;  %v13494_v43 = vadd.f32 %v7972_v38, %v6458_v41  ;;  %v6459_v17 = vsel %vm11262_vm11, %v6421_v7, 0.0  ;;  %v6423_v42 = vpop.f32.mrb[130].mxu1 }
 0x6e1   : > { %v13498_v58 = vadd.f32 %v7977_v30, %v6459_v17  ;;  %v6460_v51 = vsel %vm11249_vm10, %v6423_v42, 0.0  ;;  %v6425_v40 = vpop.f32.mrb[131].mxu1 }
 0x6e2   : > { %v13502_v22 = vadd.f32 %v7982_v56, %v6460_v51  ;;  %v6461_v46 = vsel %vm11262_vm11, %v6425_v40, 0.0 }
 0x6e3   : > { %v13506_v53 = vadd.f32 %v7987_v29, %v6461_v46  ;;  %v6041_v20 = vpop.f32.mrb[212].mxu0 }
 0x6e4   : > { %v6074_v45 = vsel %vm11236_vm8, %v6041_v20, 0.0  ;;  %v6043_v31 = vpop.f32.mrb[213].mxu0 }
 0x6e5   : > { %v7992_v33 = vadd.f32 %v13411_v19, %v6074_v45  ;;  %v6075_v32 = vsel %vm11242_vm9, %v6043_v31, 0.0  ;;  %v6045_v10 = vpop.f32.mrb[214].mxu0 }
 0x6e6   : > { %v7997_v37 = vadd.f32 %v13417_v24, %v6075_v32  ;;  %v6076_v18 = vsel %vm11236_vm8, %v6045_v10, 0.0  ;;  %v6047_v28 = vpop.f32.mrb[215].mxu0  ;;  %v6429_v23 = vpop.f32.mrb[132].mxu1 }
 0x6e7   : > { %v8002_v44 = vadd.f32 %v13423_v50, %v6076_v18  ;;  %v6077_v63 = vsel %vm11242_vm9, %v6047_v28, 0.0  ;;  %v6462_v3 = vsel %vm11249_vm10, %v6429_v23, 0.0  ;;  %v6431_v19 = vpop.f32.mrb[133].mxu1 }
 0x6e8   : > { %v8007_v9 = vadd.f32 %v13427_v62, %v6077_v63  ;;  %v13522_v11 = vadd.f32 %v7992_v33, %v6462_v3  ;;  %v6463_v24 = vsel %vm11262_vm11, %v6431_v19, 0.0  ;;  %v6433_v48 = vpop.f32.mrb[134].mxu1 }
 0x6e9   : > { %v13526_v57 = vadd.f32 %v7997_v37, %v6463_v24  ;;  %v6464_v50 = vsel %vm11249_vm10, %v6433_v48, 0.0  ;;  %v6435_v61 = vpop.f32.mrb[135].mxu1 }
 0x6ea   : > { %v13530_v21 = vadd.f32 %v8002_v44, %v6464_v50  ;;  %v6465_v47 = vsel %vm11262_vm11, %v6435_v61, 0.0 }
 0x6eb   : > { %v13534_v36 = vadd.f32 %v8007_v9, %v6465_v47  ;;  %v6051_v62 = vpop.f32.mrb[216].mxu0 }
 0x6ec   : > { %v6078_v39 = vsel %vm11236_vm8, %v6051_v62, 0.0  ;;  %v6053_v15 = vpop.f32.mrb[217].mxu0 }
 0x6ed   : > { %v8012_v59 = vadd.f32 %v13435_v16, %v6078_v39  ;;  %v6079_v34 = vsel %vm11242_vm9, %v6053_v15, 0.0  ;;  %v6055_v0 = vpop.f32.mrb[218].mxu0 }
 0x6ee   : > { %v8017_v35 = vadd.f32 %v13441_v26, %v6079_v34  ;;  %v6080_v38 = vsel %vm11236_vm8, %v6055_v0, 0.0  ;;  %v6057_v14 = vpop.f32.mrb[219].mxu0  ;;  %v6439_v6 = vpop.f32.mrb[136].mxu1 }
 0x6ef   : > { %v8022_v30 = vadd.f32 %v13447_v52, %v6080_v38  ;;  %v6081_v2 = vsel %vm11242_vm9, %v6057_v14, 0.0  ;;  %v6466_v55 = vsel %vm11249_vm10, %v6439_v6, 0.0  ;;  %v6441_v16 = vpop.f32.mrb[137].mxu1 }
 0x6f0   : > { %v8027_v49 = vadd.f32 %v13451_v13, %v6081_v2  ;;  %v8013_v56 = vadd.f32 %v8012_v59, %v6466_v55  ;;  %v6467_v26 = vsel %vm11262_vm11, %v6441_v16, 0.0  ;;  %v6443_v54 = vpop.f32.mrb[138].mxu1 }
 0x6f1   : > { %v8018_v41 = vadd.f32 %v8017_v35, %v6467_v26  ;;  %v6468_v7 = vsel %vm11249_vm10, %v6443_v54, 0.0  ;;  %v6445_v29 = vpop.f32.mrb[139].mxu1 }
 0x6f2   : > { %v8023_v52 = vadd.f32 %v8022_v30, %v6468_v7  ;;  %v6469_v17 = vsel %vm11262_vm11, %v6445_v29, 0.0 }
 0x6f3   : > { %v8028_v42 = vadd.f32 %v8027_v49, %v6469_v17  ;;  %v6061_v51 = vpop.f32.mrb[220].mxu0 }
 0x6f4   : > { %v6082_v40 = vsel %vm11236_vm8, %v6061_v51, 0.0  ;;  %v6063_v13 = vpop.f32.mrb[221].mxu0 }
 0x6f5   : > { %v8032_v46 = vadd.f32 %v13460_v25, %v6082_v40  ;;  %v6083_v20 = vsel %vm11242_vm9, %v6063_v13, 0.0  ;;  %v6065_v45 = vpop.f32.mrb[222].mxu0 }
 0x6f6   : > { %v8037_v31 = vadd.f32 %v13467_v5, %v6083_v20  ;;  %v6084_v33 = vsel %vm11236_vm8, %v6065_v45, 0.0  ;;  %v6067_v32 = vpop.f32.mrb[223].mxu0  ;;  %v6449_v10 = vpop.f32.mrb[140].mxu1 }
 0x6f7   : > { %v8042_v37 = vadd.f32 %v13474_v27, %v6084_v33  ;;  %v6085_v18 = vsel %vm11242_vm9, %v6067_v32, 0.0  ;;  %v6470_v28 = vsel %vm11249_vm10, %v6449_v10, 0.0  ;;  %v6451_v25 = vpop.f32.mrb[141].mxu1 }
 0x6f8   : > { %v8047_v23 = vadd.f32 %v13478_v60, %v6085_v18  ;;  %v8033_v44 = vadd.f32 %v8032_v46, %v6470_v28  ;;  %v6471_v5 = vsel %vm11262_vm11, %v6451_v25, 0.0  ;;  %v6453_v63 = vpop.f32.mrb[142].mxu1 }
 0x6f9   : > { %v8038_v3 = vadd.f32 %v8037_v31, %v6471_v5  ;;  %v6472_v19 = vsel %vm11249_vm10, %v6453_v63, 0.0  ;;  %v6455_v9 = vpop.f32.mrb[143].mxu1 }
 0x6fa   : > { %v8043_v27 = vadd.f32 %v8042_v37, %v6472_v19  ;;  %v6473_v24 = vsel %vm11262_vm11, %v6455_v9, 0.0 }
 0x6fb   : > { %v8048_v48 = vadd.f32 %v8047_v23, %v6473_v24 }
 0x6fe   : > { %v6637_v50 = vpop.f32.mrb[144].mxu1 }
 0x6ff   : > { %v6676_v61 = vsel %vm11236_vm8, %v6637_v50, 0.0  ;;  %v6639_v60 = vpop.f32.mrb[145].mxu1 }
 0x700   : > { %v7974_v47 = vadd.f32 %v13494_v43, %v6676_v61  ;;  %v6677_v62 = vsel %vm11242_vm9, %v6639_v60, 0.0  ;;  %v6641_v39 = vpop.f32.mrb[146].mxu1 }
 0x701   : > { %v7979_v15 = vadd.f32 %v13498_v58, %v6677_v62  ;;  %v6678_v59 = vsel %vm11236_vm8, %v6641_v39, 0.0  ;;  %v6643_v34 = vpop.f32.mrb[147].mxu1 }
 0x702   : > { %v7984_v0 = vadd.f32 %v13502_v22, %v6678_v59  ;;  %v6679_v35 = vsel %vm11242_vm9, %v6643_v34, 0.0  ;;  %v7144_v59 = vpop.permute.xlu1 %7143 }
 0x703   : > { %v7989_v38 = vadd.f32 %v13506_v53, %v6679_v35 }
 0x706   : > { %v6647_v14 = vpop.f32.mrb[148].mxu1 }
 0x707   : > { %v6680_v43 = vsel %vm11236_vm8, %v6647_v14, 0.0  ;;  %v6649_v6 = vpop.f32.mrb[149].mxu1 }
 0x708   : > { %v7994_v30 = vadd.f32 %v13522_v11, %v6680_v43  ;;  %v6681_v58 = vsel %vm11242_vm9, %v6649_v6, 0.0  ;;  %v6651_v2 = vpop.f32.mrb[150].mxu1 }
 0x709   : > { %v7999_v55 = vadd.f32 %v13526_v57, %v6681_v58  ;;  %v6682_v22 = vsel %vm11236_vm8, %v6651_v2, 0.0  ;;  %v6653_v16 = vpop.f32.mrb[151].mxu1 }
 0x70a   : > { %v8004_v49 = vadd.f32 %v13530_v21, %v6682_v22  ;;  %v6683_v53 = vsel %vm11242_vm9, %v6653_v16, 0.0 }
 0x70b   : > { %v13600_v26 = vadd.f32 %v13534_v36, %v6683_v53 }
 0x70e   : > { %v6657_v54 = vpop.f32.mrb[152].mxu1 }
 0x70f   : > { %v6684_v11 = vsel %vm11236_vm8, %v6657_v54, 0.0  ;;  %v6659_v7 = vpop.f32.mrb[153].mxu1 }
 0x710   : > { %v13604_v29 = vadd.f32 %v8013_v56, %v6684_v11  ;;  %v6685_v57 = vsel %vm11242_vm9, %v6659_v7, 0.0  ;;  %v6661_v17 = vpop.f32.mrb[154].mxu1 }
 0x711   : > { %v13608_v51 = vadd.f32 %v8018_v41, %v6685_v57  ;;  %v6686_v21 = vsel %vm11236_vm8, %v6661_v17, 0.0  ;;  %v6663_v40 = vpop.f32.mrb[155].mxu1 }
 0x712   : > { %v13612_v13 = vadd.f32 %v8023_v52, %v6686_v21  ;;  %v6687_v36 = vsel %vm11242_vm9, %v6663_v40, 0.0 }
 0x713   : > { %v13616_v46 = vadd.f32 %v8028_v42, %v6687_v36 }
 0x716   : > { %v6667_v20 = vpop.f32.mrb[156].mxu1 }
 0x717   : > { %v6688_v56 = vsel %vm11236_vm8, %v6667_v20, 0.0  ;;  %v6669_v45 = vpop.f32.mrb[157].mxu1 }
 0x718   : > { %v13620_v31 = vadd.f32 %v8033_v44, %v6688_v56  ;;  %v6689_v41 = vsel %vm11242_vm9, %v6669_v45, 0.0  ;;  %v6671_v33 = vpop.f32.mrb[158].mxu1 }
 0x719   : > { %v13624_v32 = vadd.f32 %v8038_v3, %v6689_v41  ;;  %v6690_v52 = vsel %vm11236_vm8, %v6671_v33, 0.0  ;;  %v6673_v10 = vpop.f32.mrb[159].mxu1 }
 0x71a   : > { %v13628_v37 = vadd.f32 %v8043_v27, %v6690_v52  ;;  %v6691_v42 = vsel %vm11242_vm9, %v6673_v10, 0.0 }
 0x71b   : > { %v13632_v18 = vadd.f32 %v8048_v48, %v6691_v42  ;;  %v6855_v28 = vpop.f32.mrb[192].mxu0  ;;  %v7139_v48 = vpop.permute.xlu0 %7138 }
 0x71c   : > { %v7975_v25 = vadd.f32 %v7974_v47, %v6855_v28  ;;  %v6857_v23 = vpop.f32.mrb[193].mxu0  ;;  %v7154_v42 = vpop.permute.xlu1 %7153 }
 0x71d   : > { %v7980_v44 = vadd.f32 %v7979_v15, %v6857_v23  ;;  %v6859_v5 = vpop.f32.mrb[194].mxu0 }
 0x71e   : > { %v7985_v63 = vadd.f32 %v7984_v0, %v6859_v5  ;;  %v6861_v19 = vpop.f32.mrb[195].mxu0  ;;  %v7057_v3 = vpop.f32.mrb[160].mxu1 }
 0x71f   : > { %v7990_v9 = vadd.f32 %v7989_v38, %v6861_v19  ;;  %v7096_v8 = vsel %vm11249_vm10, %v7057_v3, 0.0  ;;  %v7059_v24 = vpop.f32.mrb[161].mxu1  ;;  %v7149_v56 = vpop.permute.xlu0 %7148 }
 0x720   : > { %v7112_v27 = vadd.f32 %v7975_v25, %v7096_v8  ;;  %v7097_v12 = vsel %vm11262_vm11, %v7059_v24, 0.0  ;;  %v7061_v50 = vpop.f32.mrb[162].mxu1 }
 0x721   : > { %v7113_v61 = vadd.f32 %v7980_v44, %v7097_v12  ;;  %v7098_v60 = vsel %vm11249_vm10, %v7061_v50, 0.0  ;;  %v7063_v47 = vpop.f32.mrb[163].mxu1 }
 0x722   : > { %v7176_v62 = vadd.f32 %v7139_v48, %v7112_v27  ;;  %v7114_v39 = vadd.f32 %v7985_v63, %v7098_v60  ;;  %v7099_v15 = vsel %vm11262_vm11, %v7063_v47, 0.0 }
 0x723   : > { %v7177_v34 = vadd.f32 %v7139_v48, %v7113_v61  ;;  %v7115_v0 = vadd.f32 %v7990_v9, %v7099_v15  ;;  %v6865_v35 = vpop.f32.mrb[196].mxu0 }
 0x724   : > { %v7178_v38 = vadd.f32 %v7144_v59, %v7114_v39  ;;  %v7995_v14 = vadd.f32 %v7994_v30, %v6865_v35  ;;  %v6867_v43 = vpop.f32.mrb[197].mxu0  ;;  %v7192_v22 = vmax.f32 %v7176_v62, 0.0 }
 0x725   : > { %v7179_v6 = vadd.f32 %v7144_v59, %v7115_v0  ;;  %v8000_v58 = vadd.f32 %v7999_v55, %v6867_v43  ;;  %v6869_v2 = vpop.f32.mrb[198].mxu0  ;;  %v7193_v7 = vmax.f32 %v7177_v34, 0.0  ;;  %v7159_v59 = vpop.permute.xlu0 %7158 }
 0x726   : > { %v7194_v16 = vmax.f32 %v7178_v38, 0.0  ;;  %v8005_v53 = vadd.f32 %v8004_v49, %v6869_v2  ;;  %v6871_v54 = vpop.f32.mrb[199].mxu0  ;;  %v7067_v11 = vpop.f32.mrb[164].mxu1 }
 0x727   : > { %v7195_v57 = vmax.f32 %v7179_v6, 0.0  ;;  %v8010_v17 = vadd.f32 %v13600_v26, %v6871_v54  ;;  %v7100_v21 = vsel %vm11249_vm10, %v7067_v11, 0.0  ;;  %v7069_v40 = vpop.f32.mrb[165].mxu1  ;;  %v7164_v43 = vpop.permute.xlu1 %7163 }
 0x728   : > { %v7789_v36 = vpack.c.bf16 %v7194_v16, %v7192_v22  ;;  %v7116_v20 = vadd.f32 %v7995_v14, %v7100_v21  ;;  %v7101_v30 = vsel %vm11262_vm11, %v7069_v40, 0.0  ;;  %v7071_v55 = vpop.f32.mrb[166].mxu1 }
 0x729   : > { %v7117_v45 = vadd.f32 %v8000_v58, %v7101_v30  ;;  %v7102_v49 = vsel %vm11249_vm10, %v7071_v55, 0.0  ;;  %v7073_v41 = vpop.f32.mrb[167].mxu1  ;;  %v7787_v33 = vpack.c.bf16 %v7195_v57, %v7193_v7 }
 0x72a   : > { %v7180_v52 = vadd.f32 %v7149_v56, %v7116_v20  ;;  %v7118_v10 = vadd.f32 %v8005_v53, %v7102_v49  ;;  %v7103_v26 = vsel %vm11262_vm11, %v7073_v41, 0.0 }
 0x72b   : > { %v7181_v28 = vadd.f32 %v7149_v56, %v7117_v45  ;;  %v7119_v25 = vadd.f32 %v8010_v17, %v7103_v26  ;;  %v6875_v23 = vpop.f32.mrb[200].mxu0  ;;  %7788 = vmatprep.subr.bf16.mxu0 %v7787_v33  ;;  %7803 = vmatprep.subr.bf16.mxu1 %v7787_v33  ;;  %v7169_v33 = vpop.permute.xlu0 %7168 }
 0x72c   : > { %v7182_v44 = vadd.f32 %v7154_v42, %v7118_v10  ;;  %v8015_v5 = vadd.f32 %v13604_v29, %v6875_v23  ;;  %v6877_v63 = vpop.f32.mrb[201].mxu0  ;;  %7790 = vmatpush1.bf16.msra.mxu0 %v7789_v36  ;;  %7807 = vmatpush1.bf16.msra.mxu1 %v7789_v36  ;;  %v7196_v8 = vmax.f32 %v7180_v52, 0.0 }
 0x72d   : > { %v7183_v19 = vadd.f32 %v7154_v42, %v7119_v25  ;;  %v8020_v3 = vadd.f32 %v13608_v51, %v6877_v63  ;;  %v6879_v9 = vpop.f32.mrb[202].mxu0  ;;  %v7197_v48 = vmax.f32 %v7181_v28, 0.0  ;;  %v7174_v25 = vpop.permute.xlu1 %7173 }
 0x72e   : > { %v7198_v24 = vmax.f32 %v7182_v44, 0.0  ;;  %v8025_v27 = vadd.f32 %v13612_v13, %v6879_v9  ;;  %v6881_v12 = vpop.f32.mrb[203].mxu0  ;;  %v7077_v50 = vpop.f32.mrb[168].mxu1 }
 0x72f   : > { %v7199_v61 = vmax.f32 %v7183_v19, 0.0  ;;  %v8030_v60 = vadd.f32 %v13616_v46, %v6881_v12  ;;  %v7104_v29 = vsel %vm11249_vm10, %v7077_v50, 0.0  ;;  %v7079_v47 = vpop.f32.mrb[169].mxu1 }
 0x730   : > { %v7793_v62 = vpack.c.bf16 %v7198_v24, %v7196_v8  ;;  %v7120_v39 = vadd.f32 %v8015_v5, %v7104_v29  ;;  %v7105_v51 = vsel %vm11262_vm11, %v7079_v47, 0.0  ;;  %v7081_v15 = vpop.f32.mrb[170].mxu1 }
 0x731   : > { %v7121_v34 = vadd.f32 %v8020_v3, %v7105_v51  ;;  %v7106_v13 = vsel %vm11249_vm10, %v7081_v15, 0.0  ;;  %v7083_v0 = vpop.f32.mrb[171].mxu1  ;;  %v7791_v35 = vpack.c.bf16 %v7199_v61, %v7197_v48  ;;  %v7306_v15 = vld [vmem:[%s13703_s8 + $0x8] sm:$0x3] }
 0x732   : > { %v7184_v38 = vadd.f32 %v7159_v59, %v7120_v39  ;;  %v7122_v14 = vadd.f32 %v8025_v27, %v7106_v13  ;;  %v7107_v46 = vsel %vm11262_vm11, %v7083_v0, 0.0  ;;  %v7208_v27 = vld [vmem:[%s13702_s7] sm:$0xff] }
 0x733   : > { %v7185_v6 = vadd.f32 %v7159_v59, %v7121_v34  ;;  %v7123_v58 = vadd.f32 %v8030_v60, %v7107_v46  ;;  %v6885_v2 = vpop.f32.mrb[204].mxu0  ;;  %7792 = vmatprep.subr.bf16.mxu0 %v7791_v35  ;;  %7804 = vmatprep.subr.bf16.mxu1 %v7791_v35  ;;  %v7305_v39 = vld [vmem:[%s13703_s8] sm:$0xff] }
 0x734   : > { %v7186_v22 = vadd.f32 %v7164_v43, %v7122_v14  ;;  %v8035_v16 = vadd.f32 %v13620_v31, %v6885_v2  ;;  %v6887_v53 = vpop.f32.mrb[205].mxu0  ;;  %7794 = vmatpush1.bf16.msra.mxu0 %v7793_v62  ;;  %7808 = vmatpush1.bf16.msra.mxu1 %v7793_v62  ;;  %v7200_v57 = vmax.f32 %v7184_v38, 0.0 }
 0x735   : > { %v7187_v54 = vadd.f32 %v7164_v43, %v7123_v58  ;;  %v8040_v11 = vadd.f32 %v13624_v32, %v6887_v53  ;;  %v6889_v7 = vpop.f32.mrb[206].mxu0  ;;  %v7201_v20 = vmax.f32 %v7185_v6, 0.0 }
 0x736   : > { %v7202_v17 = vmax.f32 %v7186_v22, 0.0  ;;  %v8045_v21 = vadd.f32 %v13628_v37, %v6889_v7  ;;  %v6891_v40 = vpop.f32.mrb[207].mxu0  ;;  %v7087_v36 = vpop.f32.mrb[172].mxu1 }
 0x737   : > { %v7203_v30 = vmax.f32 %v7187_v54, 0.0  ;;  %v8050_v55 = vadd.f32 %v13632_v18, %v6891_v40  ;;  %v7108_v31 = vsel %vm11249_vm10, %v7087_v36, 0.0  ;;  %v7089_v56 = vpop.f32.mrb[173].mxu1 }
 0x738   : > { %v7797_v45 = vpack.c.bf16 %v7202_v17, %v7200_v57  ;;  %v7124_v49 = vadd.f32 %v8035_v16, %v7108_v31  ;;  %v7109_v32 = vsel %vm11262_vm11, %v7089_v56, 0.0  ;;  %v7091_v41 = vpop.f32.mrb[174].mxu1 }
 0x739   : > { %v7125_v52 = vadd.f32 %v8040_v11, %v7109_v32  ;;  %v7110_v37 = vsel %vm11249_vm10, %v7091_v41, 0.0  ;;  %v7093_v10 = vpop.f32.mrb[175].mxu1  ;;  %v7795_v26 = vpack.c.bf16 %v7203_v30, %v7201_v20 }
 0x73a   : > { %v7188_v42 = vadd.f32 %v7169_v33, %v7124_v49  ;;  %v7126_v28 = vadd.f32 %v8045_v21, %v7110_v37  ;;  %v7111_v18 = vsel %vm11262_vm11, %v7093_v10, 0.0 }
 0x73b   : > { %v7189_v23 = vadd.f32 %v7169_v33, %v7125_v52  ;;  %v7127_v44 = vadd.f32 %v8050_v55, %v7111_v18  ;;  %7796 = vmatprep.subr.bf16.mxu0 %v7795_v26  ;;  %7805 = vmatprep.subr.bf16.mxu1 %v7795_v26 }
 0x73c   : > { %v7190_v5 = vadd.f32 %v7174_v25, %v7126_v28  ;;  %7798 = vmatpush1.bf16.msra.mxu0 %v7797_v45  ;;  %7809 = vmatpush1.bf16.msra.mxu1 %v7797_v45  ;;  %v7204_v19 = vmax.f32 %v7188_v42, 0.0 }
 0x73d   : > { %v7191_v63 = vadd.f32 %v7174_v25, %v7127_v44  ;;  %v7205_v1 = vmax.f32 %v7189_v23, 0.0 }
 0x73e   : > { %v7206_v3 = vmax.f32 %v7190_v5, 0.0 }
 0x73f   : > { %v7207_v9 = vmax.f32 %v7191_v63, 0.0 }
 0x740   : > { %v7801_v8 = vpack.c.bf16 %v7206_v3, %v7204_v19 }
 0x741   : > { %v7799_v24 = vpack.c.bf16 %v7207_v9, %v7205_v1 }
 0x743   : > { %7800 = vmatprep.subr.bf16.mxu0 %v7799_v24  ;;  %7806 = vmatprep.subr.bf16.mxu1 %v7799_v24 }
 0x744   : > { %7802 = vmatpush1.bf16.msra.mxu0 %v7801_v8  ;;  %7810 = vmatpush1.bf16.msra.mxu1 %v7801_v8 }
 0x747   : > { %7782 = vmatmul.mubr.msk.f32.vlgmr.msra.gmra.mrb[176].mxu1 %vm7210_vm12, %v7209_v4  ;;  %7781 = vmatmul.mubr.msk.f32.vlgmr.msra.gmra.mrb[224].mxu0 %vm7210_vm12, %v7208_v27 }
 0x81a   : > { %v7289_v12 = vpop.f32.mrb[176].mxu1  ;;  %v7283_v50 = vpop.f32.mrb[224].mxu0 }
 0x81b   : > { %v7298_v48 = vsel %vm7297_vm13, %v7289_v12, 0.0  ;;  %v7291_v61 = vpop.f32.mrb[177].mxu1  ;;  %v7285_v60 = vpop.f32.mrb[225].mxu0 }
 0x81c   : > { %v7299_v29 = vsel %vm7297_vm13, %v7291_v61, 0.0  ;;  %v7294_v47 = vadd.f32 %v7285_v60, %v7283_v50 }
 0x81d   : > { %v7300_v62 = vadd.f32 %v7299_v29, %v7298_v48 }
 0x81e   : > { %7295 = vadd.xlane.f32.xlu0 %v7294_v47 }
 0x81f   : > { %7301 = vadd.xlane.f32.xlu1 %v7300_v62 }
 0x8ab   : > { %v7296_v51 = vpop.xlane.xlu0 %7295 }
 0x8ac   : > { %v7302_v59 = vpop.xlane.xlu1 %7301  ;;  %v7303_v34 = vmul.f32 0.00390625, %v7296_v51 }
 0x8ad   : > { %v7304_v13 = vmul.f32 0.00390625, %v7302_v59 }
 0x8ae   : > { %v7307_v0 = vadd.f32 %v7305_v39, %v7303_v34 }
 0x8af   : > { %v7308_v35 = vadd.f32 %v7306_v15, %v7304_v13 }
 0x8b0   : > { %7310 = vst.msk [vmem:[%s332_s11] sm:$0xff] %vm2703_vm4, %v7307_v0 }
 0x8b1   : > { %7312 = vst.msk [vmem:[%s332_s11 + $0x8] sm:$0x3] %vm7311_vm14, %v7308_v35 }
 0x8b2 PF: > { %s19_s30 = sadd.s32 1, %s8935_s30  }
 0x8b3   : > { %p16_p4 = scmp.ge.s32.totalorder %s19_s30, 4  }
 0x8b5   :  { %18 = sbr.rel (!%p16_p4) target bundleno = 1 (0x1), region = 102 }

</bundles_post_ra>
